<compile_context>
chip_gen: v6e
topology: v6e:2x2x1
jax: 0.10.0
libtpu: 0.0.40
codegen_flags: <defaults>
</compile_context>

<pallas_src>
from functools import partial

import jax
import jax.numpy as jnp
from jax.experimental import pallas as pl
from jax.experimental.pallas import tpu as pltpu

MXU_DTYPE = jnp.bfloat16          # MXU input dtype; accumulation is always f32
_CIN_ALIGN = 16                   # input-channel padding (bf16 sublane tile)
_COUT_ALIGN = 8                   # output-channel padding (f32 sublane tile)
_K_ALIGN = 16                     # reduction-axis padding for the im2col path
_TM_S1 = 2048                     # lane tile over M for the fused stride-1 path
_TM_S2 = 1024                     # lane tile over M for the im2col (stride-2) path
_VMEM_LIMIT = 32 * 1024 * 1024    # scoped-VMEM budget (fits v5e/v6e/v7x)

PAD1 = (1, 1, 1, 1)               # (top, bottom, left, right)


def _round_up(x, m):
    return (x + m - 1) // m * m


# ---------------------------------------------------------------------------
# Fused stride-1 conv kernel: in-kernel im2col + GEMM + bias (+ReLU).
#   xs_ref : (1, C_in_pad, TIN)  bf16   flat padded activation slab (with halo)
#   w_ref  : (C_out_pad, K_pad)  bf16   K ordered (tap, c_in_pad)
#   b_ref  : (C_out_pad, 1)      f32
#   o_ref  : (C_out_pad, TM)     f32    lane-dense store
#   pat_ref: (K_pad, TM)         bf16   VMEM scratch (on-chip patch matrix)
# Tap (ki, kj) of output column m reads slab column m + ki*Wp + kj.
# ---------------------------------------------------------------------------
def _conv_s1_kernel(xs_ref, w_ref, b_ref, o_ref, pat_ref, *, wp, relu):
    cp = xs_ref.shape[1]
    tm = o_ref.shape[1]
    t = 0
    for ki in range(3):
        for kj in range(3):
            off = ki * wp + kj
            # Lane-shifted slice of the slab -> tap t rows of the patch matrix.
            pat_ref[t * cp:(t + 1) * cp, :] = xs_ref[0, :, off:off + tm]
            t += 1
    y = jnp.dot(w_ref[...], pat_ref[...], preferred_element_type=jnp.float32)
    y = y + b_ref[...]
    if relu:
        y = jnp.maximum(y, 0.0)
    o_ref[...] = y


def _conv_s1(x, w_flat, b_col, *, c_out, pads, relu):
    """3x3 stride-1 conv.  x: (C_in, N, H, W) f32 -> (c_out, N, Ho, Wo) f32."""
    c_in, n, h, w = x.shape
    pt, pb, pleft, pr = pads
    hp, wp = h + pt + pb, w + pleft + pr
    ho, wo = hp - 2, wp - 2
    c_out_pad, k_pad = w_flat.shape
    c_in_pad = k_pad // 9

    p = n * hp * wp                                   # flat padded footprint
    tm = min(_TM_S1, max(128, _round_up(p, 128)))
    n_tiles = -(-p // tm)
    halo = 2 * wp + 2                                 # max tap offset
    tin = _round_up(tm + halo, 128)
    total = n_tiles * tm + (tin - tm)

    # Channel-pad + spatial-pad + flatten (C on sublanes, flat spatial on lanes).
    xp = jnp.pad(x.astype(MXU_DTYPE),
                 ((0, c_in_pad - c_in), (0, 0), (pt, pb), (pleft, pr)))
    xf = jnp.pad(xp.reshape(c_in_pad, p), ((0, 0), (0, total - p)))
    # Per-tile slabs with duplicated halo columns -> plain Blocked pipelining.
    slabs = jnp.stack([xf[:, t * tm: t * tm + tin] for t in range(n_tiles)], axis=0)

    out = pl.pallas_call(
        partial(_conv_s1_kernel, wp=wp, relu=relu),
        out_shape=jax.ShapeDtypeStruct((c_out_pad, n_tiles * tm), jnp.float32),
        grid=(n_tiles,),
        in_specs=[
            pl.BlockSpec((1, c_in_pad, tin), lambda i: (i, 0, 0)),   # slab tile i
            pl.BlockSpec((c_out_pad, k_pad), lambda i: (0, 0)),      # weights
            pl.BlockSpec((c_out_pad, 1), lambda i: (0, 0)),          # bias
        ],
        out_specs=pl.BlockSpec((c_out_pad, tm), lambda i: (0, i)),
        scratch_shapes=[pltpu.VMEM((k_pad, tm), MXU_DTYPE)],
        compiler_params=pltpu.CompilerParams(
            dimension_semantics=("parallel",),
            vmem_limit_bytes=_VMEM_LIMIT,
        ),
    )(slabs, w_flat, b_col)

    # Outputs were computed on the padded footprint; drop junk rows/cols.
    return out[:c_out, :p].reshape(c_out, n, hp, wp)[:, :, :ho, :wo]


def _conv_transpose(x, w_flat, b_col, *, c_out):
    """ConvTranspose2d(k=3, stride=2, padding=1, output_padding=1), no activation."""
    c, n, h, w = x.shape
    # TODO(synk): 4-phase decomposition to avoid materializing the dilated zeros.
    z = jnp.zeros((c, n, 2 * h - 1, 2 * w - 1), x.dtype).at[:, :, ::2, ::2].set(x)
    return _conv_s1(z, w_flat, b_col, c_out=c_out, pads=(1, 2, 1, 2), relu=False)


# ---------------------------------------------------------------------------
# Stride-2 convs: host im2col feeding the fused GEMM+bias(+ReLU) kernel.
#   w_ref: (C_pad, K_pad) bf16, p_ref: (K_pad, TM) bf16, b_ref: (C_pad, 1) f32.
# ---------------------------------------------------------------------------
def _gemm_bias_act_kernel(w_ref, p_ref, b_ref, o_ref, *, relu):
    y = jnp.dot(w_ref[...], p_ref[...], preferred_element_type=jnp.float32)
    y = y + b_ref[...]
    if relu:
        y = jnp.maximum(y, 0.0)
    o_ref[...] = y


def _gemm_bias_act(w_flat, b_col, patches, *, relu):
    c_pad, k_pad = w_flat.shape
    m = patches.shape[1]
    tm = min(_TM_S2, max(128, _round_up(m, 128)))
    m_pad = _round_up(m, tm)
    if m_pad != m:
        patches = jnp.pad(patches, ((0, 0), (0, m_pad - m)))
    out = pl.pallas_call(
        partial(_gemm_bias_act_kernel, relu=relu),
        out_shape=jax.ShapeDtypeStruct((c_pad, m_pad), jnp.float32),
        grid=(m_pad // tm,),
        in_specs=[
            pl.BlockSpec((c_pad, k_pad), lambda i: (0, 0)),
            pl.BlockSpec((k_pad, tm), lambda i: (0, i)),
            pl.BlockSpec((c_pad, 1), lambda i: (0, 0)),
        ],
        out_specs=pl.BlockSpec((c_pad, tm), lambda i: (0, i)),
        compiler_params=pltpu.CompilerParams(
            dimension_semantics=("parallel",),
            vmem_limit_bytes=_VMEM_LIMIT,
        ),
    )(w_flat, patches, b_col)
    return out[:, :m]


def _im2col_cnhw(x, kh, kw, stride, pads):
    """x: (C, N, H, W) -> patches (C*kh*kw, N*Ho*Wo); K ordered (c, ki, kj)."""
    pt, pb, pleft, pr = pads
    c, n, h, w = x.shape
    ho = (h + pt + pb - kh) // stride + 1
    wo = (w + pleft + pr - kw) // stride + 1
    xp = jnp.pad(x, ((0, 0), (0, 0), (pt, pb), (pleft, pr)))
    taps = []
    for ki in range(kh):
        for kj in range(kw):
            taps.append(xp[:, :, ki:ki + stride * ho:stride, kj:kj + stride * wo:stride])
    patches = jnp.stack(taps, axis=1).reshape(c * kh * kw, n * ho * wo)
    return patches, ho, wo


def _conv_s2(x, w_flat, b_col, *, c_out, relu):
    """3x3 stride-2 conv, padding 1.  x: (C_in, N, H, W) -> (c_out, N, H/2, W/2)."""
    n = x.shape[1]
    patches, ho, wo = _im2col_cnhw(x, 3, 3, 2, PAD1)
    k_pad = w_flat.shape[1]
    patches = patches.astype(MXU_DTYPE)
    if patches.shape[0] < k_pad:
        patches = jnp.pad(patches, ((0, k_pad - patches.shape[0]), (0, 0)))
    out = _gemm_bias_act(w_flat, b_col, patches, relu=relu)
    return out[:c_out].reshape(c_out, n, ho, wo)


# ---------------------------------------------------------------------------
# Parameter prep: flatten / pad / cast once at init.
# ---------------------------------------------------------------------------
def _prep_conv_fused(w, b):
    """Conv2d weight (C_out, C_in, 3, 3) -> (C_out_pad, 9*C_in_pad) bf16, K=(tap, c)."""
    c_out, c_in, kh, kw = w.shape
    c_in_pad = _round_up(c_in, _CIN_ALIGN)
    c_out_pad = _round_up(c_out, _COUT_ALIGN)
    wt = jnp.transpose(w, (0, 2, 3, 1))                      # (C_out, kh, kw, C_in)
    wt = jnp.pad(wt, ((0, c_out_pad - c_out), (0, 0), (0, 0), (0, c_in_pad - c_in)))
    w_flat = wt.reshape(c_out_pad, kh * kw * c_in_pad)
    b_col = jnp.pad(b, (0, c_out_pad - c_out)).reshape(c_out_pad, 1)
    return w_flat.astype(MXU_DTYPE), b_col.astype(jnp.float32)


def _prep_convtranspose_fused(w_t, b):
    """ConvTranspose2d weight (C_in, C_out, 3, 3) -> equivalent direct-conv weight."""
    w_eq = jnp.flip(w_t, axis=(-2, -1)).transpose(1, 0, 2, 3)  # (C_out, C_in, 3, 3)
    return _prep_conv_fused(w_eq, b)


def _prep_conv_im2col(w, b):
    """Conv2d weight -> (C_out_pad, K_pad) bf16 with K ordered (c, ki, kj)."""
    c_out, c_in, kh, kw = w.shape
    k = c_in * kh * kw
    k_pad = _round_up(k, _K_ALIGN)
    c_pad = _round_up(c_out, _COUT_ALIGN)
    w_flat = jnp.pad(w.reshape(c_out, k), ((0, c_pad - c_out), (0, k_pad - k)))
    b_col = jnp.pad(b, (0, c_pad - c_out)).reshape(c_pad, 1)
    return w_flat.astype(MXU_DTYPE), b_col.astype(jnp.float32)


def init_params(key, g):
    def rnd(k, shape, scale):
        return scale * jax.random.normal(k, shape, jnp.float32)

    ks = jax.random.split(key, 12)
    return {
        "C_0": _prep_conv_fused(rnd(ks[0], (8, g, 3, 3), 0.1), rnd(ks[1], (8,), 0.01)),
        "C_1": _prep_conv_im2col(rnd(ks[2], (16, 8, 3, 3), 0.1), rnd(ks[3], (16,), 0.01)),
        "C_2": _prep_conv_im2col(rnd(ks[4], (32, 16, 3, 3), 0.1), rnd(ks[5], (32,), 0.01)),
        "C_3": _prep_convtranspose_fused(rnd(ks[6], (32, 16, 3, 3), 0.1), rnd(ks[7], (16,), 0.01)),
        "C_4": _prep_convtranspose_fused(rnd(ks[8], (32, 8, 3, 3), 0.1), rnd(ks[9], (8,), 0.01)),
        "S_":  _prep_conv_fused(rnd(ks[10], (1, 16, 3, 3), 0.1), rnd(ks[11], (1,), 0.01)),
    }


# ---------------------------------------------------------------------------
# Forward (matches the PyTorch SimlarityRegNet.forward semantics).
# ---------------------------------------------------------------------------
def similarity_reg_net_forward(params, x):
    """x: (B, G, D, H, W) float32 -> (B, D, H, W) float32."""
    b, g, d, h, w = x.shape
    # view(B, G, D*H, W), then go channel-major (G, B, D*H, W) once.
    x2 = x.reshape(b, g, d * h, w).transpose(1, 0, 2, 3)

    c0 = _conv_s1(x2, *params["C_0"], c_out=8, pads=PAD1, relu=True)      # (8,  B, DH,   W)
    c1 = _conv_s2(c0, *params["C_1"], c_out=16, relu=True)                # (16, B, DH/2, W/2)
    c2 = _conv_s2(c1, *params["C_2"], c_out=32, relu=True)                # (32, B, DH/4, W/4)

    c3 = _conv_transpose(c2, *params["C_3"], c_out=16)                    # (16, B, DH/2, W/2)
    c4 = _conv_transpose(jnp.concatenate([c3, c1], axis=0),
                         *params["C_4"], c_out=8)                         # (8,  B, DH,   W)
    s = _conv_s1(jnp.concatenate([c4, c0], axis=0), *params["S_"],
                 c_out=1, pads=PAD1, relu=False)                          # (1,  B, DH,   W)

    return s.transpose(1, 0, 2, 3).reshape(b, d, h, w)


if __name__ == "__main__":
    key = jax.random.PRNGKey(0)
    kx, kp = jax.random.split(key)
    # Small shapes consistent with the module: x is (B, G, D, H, W); D*H and W are
    # divisible by 4 so the stride-2 / transposed-conv stages line up for the concats.
    B, G, D, H, W = 2, 4, 8, 16, 16
    x = jax.random.normal(kx, (B, G, D, H, W), jnp.float32)
    params = init_params(kp, G)

    out = jax.jit(similarity_reg_net_forward)(params, x)
    out = jax.block_until_ready(out)

    assert out.shape == (B, D, H, W), out.shape
    assert bool(jnp.all(jnp.isfinite(out)))
    print("KERNEL_OK")
</pallas_src>

<mosaic_0001>
module attributes {stable_mosaic.version = 11 : i64} {
  func.func @_conv_s1_kernel(%arg0: i32, %arg1: memref<1x16x2176xbf16, #tpu.memory_space<vmem>>, %arg2: memref<8x144xbf16, #tpu.memory_space<vmem>>, %arg3: memref<8x1xf32, #tpu.memory_space<vmem>>, %arg4: memref<8x2048xf32, #tpu.memory_space<vmem>>, %arg5: memref<144x2048xbf16, #tpu.memory_space<vmem>>) attributes {dimension_semantics = [#tpu.dimension_semantics<parallel>], iteration_bounds = array<i64: 3>, scalar_prefetch = 0 : i64, scratch_operands = 1 : i64, tpu.core_type = #tpu.core_type<tc>, window_params = [{transform_indices = @transform_0, window_bounds = array<i64: 1, 16, 2176>}, {pipeline_mode = #tpu.pipeline_mode<synchronous>, transform_indices = @transform_1, window_bounds = array<i64: 8, 144>}, {pipeline_mode = #tpu.pipeline_mode<synchronous>, transform_indices = @transform_2, window_bounds = array<i64: 8, 1>}, {transform_indices = @transform_3, window_bounds = array<i64: 8, 2048>}]} {
    %c0 = arith.constant 0 : index
    %c0_0 = arith.constant 0 : index
    %c0_1 = arith.constant 0 : index
    %0 = vector.load %arg1[%c0, %c0_0, %c0_1] : memref<1x16x2176xbf16, #tpu.memory_space<vmem>>, vector<1x16x2048xbf16>
    %1 = vector.shape_cast %0 : vector<1x16x2048xbf16> to vector<16x2048xbf16>
    %c0_2 = arith.constant 0 : index
    %c0_3 = arith.constant 0 : index
    %2 = vector.load %arg5[%c0_2, %c0_3] : memref<144x2048xbf16, #tpu.memory_space<vmem>>, vector<16x2048xbf16>
    tpu.vector_store %arg5[%c0_2, %c0_3], %1 {strides = array<i32>} : memref<144x2048xbf16, #tpu.memory_space<vmem>>, vector<16x2048xbf16>,
    %c0_4 = arith.constant 0 : index
    %c0_5 = arith.constant 0 : index
    %c1 = arith.constant 1 : index
    %3 = vector.load %arg1[%c0_4, %c0_5, %c1] : memref<1x16x2176xbf16, #tpu.memory_space<vmem>>, vector<1x16x2048xbf16>
    %4 = vector.shape_cast %3 : vector<1x16x2048xbf16> to vector<16x2048xbf16>
    %c16 = arith.constant 16 : index
    %c0_6 = arith.constant 0 : index
    %5 = vector.load %arg5[%c16, %c0_6] : memref<144x2048xbf16, #tpu.memory_space<vmem>>, vector<16x2048xbf16>
    tpu.vector_store %arg5[%c16, %c0_6], %4 {strides = array<i32>} : memref<144x2048xbf16, #tpu.memory_space<vmem>>, vector<16x2048xbf16>,
    %c0_7 = arith.constant 0 : index
    %c0_8 = arith.constant 0 : index
    %c2 = arith.constant 2 : index
    %6 = vector.load %arg1[%c0_7, %c0_8, %c2] : memref<1x16x2176xbf16, #tpu.memory_space<vmem>>, vector<1x16x2048xbf16>
    %7 = vector.shape_cast %6 : vector<1x16x2048xbf16> to vector<16x2048xbf16>
    %c32 = arith.constant 32 : index
    %c0_9 = arith.constant 0 : index
    %8 = vector.load %arg5[%c32, %c0_9] : memref<144x2048xbf16, #tpu.memory_space<vmem>>, vector<16x2048xbf16>
    tpu.vector_store %arg5[%c32, %c0_9], %7 {strides = array<i32>} : memref<144x2048xbf16, #tpu.memory_space<vmem>>, vector<16x2048xbf16>,
    %c0_10 = arith.constant 0 : index
    %c0_11 = arith.constant 0 : index
    %c18 = arith.constant 18 : index
    %9 = vector.load %arg1[%c0_10, %c0_11, %c18] : memref<1x16x2176xbf16, #tpu.memory_space<vmem>>, vector<1x16x2048xbf16>
    %10 = vector.shape_cast %9 : vector<1x16x2048xbf16> to vector<16x2048xbf16>
    %c48 = arith.constant 48 : index
    %c0_12 = arith.constant 0 : index
    %11 = vector.load %arg5[%c48, %c0_12] : memref<144x2048xbf16, #tpu.memory_space<vmem>>, vector<16x2048xbf16>
    tpu.vector_store %arg5[%c48, %c0_12], %10 {strides = array<i32>} : memref<144x2048xbf16, #tpu.memory_space<vmem>>, vector<16x2048xbf16>,
    %c0_13 = arith.constant 0 : index
    %c0_14 = arith.constant 0 : index
    %c19 = arith.constant 19 : index
    %12 = vector.load %arg1[%c0_13, %c0_14, %c19] : memref<1x16x2176xbf16, #tpu.memory_space<vmem>>, vector<1x16x2048xbf16>
    %13 = vector.shape_cast %12 : vector<1x16x2048xbf16> to vector<16x2048xbf16>
    %c64 = arith.constant 64 : index
    %c0_15 = arith.constant 0 : index
    %14 = vector.load %arg5[%c64, %c0_15] : memref<144x2048xbf16, #tpu.memory_space<vmem>>, vector<16x2048xbf16>
    tpu.vector_store %arg5[%c64, %c0_15], %13 {strides = array<i32>} : memref<144x2048xbf16, #tpu.memory_space<vmem>>, vector<16x2048xbf16>,
    %c0_16 = arith.constant 0 : index
    %c0_17 = arith.constant 0 : index
    %c20 = arith.constant 20 : index
    %15 = vector.load %arg1[%c0_16, %c0_17, %c20] : memref<1x16x2176xbf16, #tpu.memory_space<vmem>>, vector<1x16x2048xbf16>
    %16 = vector.shape_cast %15 : vector<1x16x2048xbf16> to vector<16x2048xbf16>
    %c80 = arith.constant 80 : index
    %c0_18 = arith.constant 0 : index
    %17 = vector.load %arg5[%c80, %c0_18] : memref<144x2048xbf16, #tpu.memory_space<vmem>>, vector<16x2048xbf16>
    tpu.vector_store %arg5[%c80, %c0_18], %16 {strides = array<i32>} : memref<144x2048xbf16, #tpu.memory_space<vmem>>, vector<16x2048xbf16>,
    %c0_19 = arith.constant 0 : index
    %c0_20 = arith.constant 0 : index
    %c36 = arith.constant 36 : index
    %18 = vector.load %arg1[%c0_19, %c0_20, %c36] : memref<1x16x2176xbf16, #tpu.memory_space<vmem>>, vector<1x16x2048xbf16>
    %19 = vector.shape_cast %18 : vector<1x16x2048xbf16> to vector<16x2048xbf16>
    %c96 = arith.constant 96 : index
    %c0_21 = arith.constant 0 : index
    %20 = vector.load %arg5[%c96, %c0_21] : memref<144x2048xbf16, #tpu.memory_space<vmem>>, vector<16x2048xbf16>
    tpu.vector_store %arg5[%c96, %c0_21], %19 {strides = array<i32>} : memref<144x2048xbf16, #tpu.memory_space<vmem>>, vector<16x2048xbf16>,
    %c0_22 = arith.constant 0 : index
    %c0_23 = arith.constant 0 : index
    %c37 = arith.constant 37 : index
    %21 = vector.load %arg1[%c0_22, %c0_23, %c37] : memref<1x16x2176xbf16, #tpu.memory_space<vmem>>, vector<1x16x2048xbf16>
    %22 = vector.shape_cast %21 : vector<1x16x2048xbf16> to vector<16x2048xbf16>
    %c112 = arith.constant 112 : index
    %c0_24 = arith.constant 0 : index
    %23 = vector.load %arg5[%c112, %c0_24] : memref<144x2048xbf16, #tpu.memory_space<vmem>>, vector<16x2048xbf16>
    tpu.vector_store %arg5[%c112, %c0_24], %22 {strides = array<i32>} : memref<144x2048xbf16, #tpu.memory_space<vmem>>, vector<16x2048xbf16>,
    %c0_25 = arith.constant 0 : index
    %c0_26 = arith.constant 0 : index
    %c38 = arith.constant 38 : index
    %24 = vector.load %arg1[%c0_25, %c0_26, %c38] : memref<1x16x2176xbf16, #tpu.memory_space<vmem>>, vector<1x16x2048xbf16>
    %25 = vector.shape_cast %24 : vector<1x16x2048xbf16> to vector<16x2048xbf16>
    %c128 = arith.constant 128 : index
    %c0_27 = arith.constant 0 : index
    %26 = vector.load %arg5[%c128, %c0_27] : memref<144x2048xbf16, #tpu.memory_space<vmem>>, vector<16x2048xbf16>
    tpu.vector_store %arg5[%c128, %c0_27], %25 {strides = array<i32>} : memref<144x2048xbf16, #tpu.memory_space<vmem>>, vector<16x2048xbf16>,
    %c0_28 = arith.constant 0 : index
    %c0_29 = arith.constant 0 : index
    %27 = vector.load %arg2[%c0_28, %c0_29] : memref<8x144xbf16, #tpu.memory_space<vmem>>, vector<8x144xbf16>
    %c0_30 = arith.constant 0 : index
    %c0_31 = arith.constant 0 : index
    %28 = vector.load %arg5[%c0_30, %c0_31] : memref<144x2048xbf16, #tpu.memory_space<vmem>>, vector<144x2048xbf16>
    %cst = arith.constant dense<0.000000e+00> : vector<8x2048xf32>
    %29 = tpu.matmul %27, %28, %cst {dimension_numbers = #tpu.dot_dimension_numbers<[1], [0], [0], [1], [0, 0, 1, 1], [], []>} : vector<8x144xbf16>, vector<144x2048xbf16>, vector<8x2048xf32> -> vector<8x2048xf32>
    %c0_32 = arith.constant 0 : index
    %c0_33 = arith.constant 0 : index
    %30 = vector.load %arg3[%c0_32, %c0_33] : memref<8x1xf32, #tpu.memory_space<vmem>>, vector<8x1xf32>
    %31 = vector.broadcast %30 : vector<8x1xf32> to vector<8x2048xf32>
    %32 = arith.addf %29, %31 : vector<8x2048xf32>
    %cst_34 = arith.constant 0.000000e+00 : f32
    %33 = vector.broadcast %cst_34 : f32 to vector<8x2048xf32>
    %34 = arith.maximumf %32, %33 : vector<8x2048xf32>
    %c0_35 = arith.constant 0 : index
    %c0_36 = arith.constant 0 : index
    %35 = vector.load %arg4[%c0_35, %c0_36] : memref<8x2048xf32, #tpu.memory_space<vmem>>, vector<8x2048xf32>
    tpu.vector_store %arg4[%c0_35, %c0_36], %34 {strides = array<i32>} : memref<8x2048xf32, #tpu.memory_space<vmem>>, vector<8x2048xf32>,
    return
  }
  func.func @transform_0(%arg0: i32) -> (i32, i32, i32) {
    %c0_i32 = arith.constant 0 : i32
    %c0_i32_0 = arith.constant 0 : i32
    %c0_i32_1 = arith.constant 0 : i32
    return %arg0, %c0_i32, %c0_i32_0 : i32, i32, i32
  }
  func.func @transform_1(%arg0: i32) -> (i32, i32) {
    %c0_i32 = arith.constant 0 : i32
    %c0_i32_0 = arith.constant 0 : i32
    %c0_i32_1 = arith.constant 0 : i32
    return %c0_i32, %c0_i32_0 : i32, i32
  }
  func.func @transform_2(%arg0: i32) -> (i32, i32) {
    %c0_i32 = arith.constant 0 : i32
    %c0_i32_0 = arith.constant 0 : i32
    %c0_i32_1 = arith.constant 0 : i32
    return %c0_i32, %c0_i32_0 : i32, i32
  }
  func.func @transform_3(%arg0: i32) -> (i32, i32) {
    %c0_i32 = arith.constant 0 : i32
    %c0_i32_0 = arith.constant 0 : i32
    return %c0_i32, %arg0 : i32, i32
  }
}

module attributes {stable_mosaic.version = 11 : i64} {
  func.func @_gemm_bias_act_kernel(%arg0: i32, %arg1: memref<16x80xbf16, #tpu.memory_space<vmem>>, %arg2: memref<80x1024xbf16, #tpu.memory_space<vmem>>, %arg3: memref<16x1xf32, #tpu.memory_space<vmem>>, %arg4: memref<16x1024xf32, #tpu.memory_space<vmem>>) attributes {dimension_semantics = [#tpu.dimension_semantics<parallel>], iteration_bounds = array<i64: 1>, scalar_prefetch = 0 : i64, scratch_operands = 0 : i64, tpu.core_type = #tpu.core_type<tc>, window_params = [{pipeline_mode = #tpu.pipeline_mode<synchronous>, transform_indices = @transform_0, window_bounds = array<i64: 16, 80>}, {transform_indices = @transform_1, window_bounds = array<i64: 80, 1024>}, {pipeline_mode = #tpu.pipeline_mode<synchronous>, transform_indices = @transform_2, window_bounds = array<i64: 16, 1>}, {transform_indices = @transform_3, window_bounds = array<i64: 16, 1024>}]} {
    %c0 = arith.constant 0 : index
    %c0_0 = arith.constant 0 : index
    %0 = vector.load %arg1[%c0, %c0_0] : memref<16x80xbf16, #tpu.memory_space<vmem>>, vector<16x80xbf16>
    %c0_1 = arith.constant 0 : index
    %c0_2 = arith.constant 0 : index
    %1 = vector.load %arg2[%c0_1, %c0_2] : memref<80x1024xbf16, #tpu.memory_space<vmem>>, vector<80x1024xbf16>
    %cst = arith.constant dense<0.000000e+00> : vector<16x1024xf32>
    %2 = tpu.matmul %0, %1, %cst {dimension_numbers = #tpu.dot_dimension_numbers<[1], [0], [0], [1], [0, 0, 1, 1], [], []>} : vector<16x80xbf16>, vector<80x1024xbf16>, vector<16x1024xf32> -> vector<16x1024xf32>
    %c0_3 = arith.constant 0 : index
    %c0_4 = arith.constant 0 : index
    %3 = vector.load %arg3[%c0_3, %c0_4] : memref<16x1xf32, #tpu.memory_space<vmem>>, vector<16x1xf32>
    %4 = vector.broadcast %3 : vector<16x1xf32> to vector<16x1024xf32>
    %5 = arith.addf %2, %4 : vector<16x1024xf32>
    %cst_5 = arith.constant 0.000000e+00 : f32
    %6 = vector.broadcast %cst_5 : f32 to vector<16x1024xf32>
    %7 = arith.maximumf %5, %6 : vector<16x1024xf32>
    %c0_6 = arith.constant 0 : index
    %c0_7 = arith.constant 0 : index
    %8 = vector.load %arg4[%c0_6, %c0_7] : memref<16x1024xf32, #tpu.memory_space<vmem>>, vector<16x1024xf32>
    tpu.vector_store %arg4[%c0_6, %c0_7], %7 {strides = array<i32>} : memref<16x1024xf32, #tpu.memory_space<vmem>>, vector<16x1024xf32>,
    return
  }
  func.func @transform_0(%arg0: i32) -> (i32, i32) {
    %c0_i32 = arith.constant 0 : i32
    %c0_i32_0 = arith.constant 0 : i32
    %c0_i32_1 = arith.constant 0 : i32
    return %c0_i32, %c0_i32_0 : i32, i32
  }
  func.func @transform_1(%arg0: i32) -> (i32, i32) {
    %c0_i32 = arith.constant 0 : i32
    %c0_i32_0 = arith.constant 0 : i32
    return %c0_i32, %arg0 : i32, i32
  }
  func.func @transform_2(%arg0: i32) -> (i32, i32) {
    %c0_i32 = arith.constant 0 : i32
    %c0_i32_0 = arith.constant 0 : i32
    %c0_i32_1 = arith.constant 0 : i32
    return %c0_i32, %c0_i32_0 : i32, i32
  }
  func.func @transform_3(%arg0: i32) -> (i32, i32) {
    %c0_i32 = arith.constant 0 : i32
    %c0_i32_0 = arith.constant 0 : i32
    return %c0_i32, %arg0 : i32, i32
  }
}

module attributes {stable_mosaic.version = 11 : i64} {
  func.func @_gemm_bias_act_kernel(%arg0: i32, %arg1: memref<32x144xbf16, #tpu.memory_space<vmem>>, %arg2: memref<144x256xbf16, #tpu.memory_space<vmem>>, %arg3: memref<32x1xf32, #tpu.memory_space<vmem>>, %arg4: memref<32x256xf32, #tpu.memory_space<vmem>>) attributes {dimension_semantics = [#tpu.dimension_semantics<parallel>], iteration_bounds = array<i64: 1>, scalar_prefetch = 0 : i64, scratch_operands = 0 : i64, tpu.core_type = #tpu.core_type<tc>, window_params = [{pipeline_mode = #tpu.pipeline_mode<synchronous>, transform_indices = @transform_0, window_bounds = array<i64: 32, 144>}, {transform_indices = @transform_1, window_bounds = array<i64: 144, 256>}, {pipeline_mode = #tpu.pipeline_mode<synchronous>, transform_indices = @transform_2, window_bounds = array<i64: 32, 1>}, {transform_indices = @transform_3, window_bounds = array<i64: 32, 256>}]} {
    %c0 = arith.constant 0 : index
    %c0_0 = arith.constant 0 : index
    %0 = vector.load %arg1[%c0, %c0_0] : memref<32x144xbf16, #tpu.memory_space<vmem>>, vector<32x144xbf16>
    %c0_1 = arith.constant 0 : index
    %c0_2 = arith.constant 0 : index
    %1 = vector.load %arg2[%c0_1, %c0_2] : memref<144x256xbf16, #tpu.memory_space<vmem>>, vector<144x256xbf16>
    %cst = arith.constant dense<0.000000e+00> : vector<32x256xf32>
    %2 = tpu.matmul %0, %1, %cst {dimension_numbers = #tpu.dot_dimension_numbers<[1], [0], [0], [1], [0, 0, 1, 1], [], []>} : vector<32x144xbf16>, vector<144x256xbf16>, vector<32x256xf32> -> vector<32x256xf32>
    %c0_3 = arith.constant 0 : index
    %c0_4 = arith.constant 0 : index
    %3 = vector.load %arg3[%c0_3, %c0_4] : memref<32x1xf32, #tpu.memory_space<vmem>>, vector<32x1xf32>
    %4 = vector.broadcast %3 : vector<32x1xf32> to vector<32x256xf32>
    %5 = arith.addf %2, %4 : vector<32x256xf32>
    %cst_5 = arith.constant 0.000000e+00 : f32
    %6 = vector.broadcast %cst_5 : f32 to vector<32x256xf32>
    %7 = arith.maximumf %5, %6 : vector<32x256xf32>
    %c0_6 = arith.constant 0 : index
    %c0_7 = arith.constant 0 : index
    %8 = vector.load %arg4[%c0_6, %c0_7] : memref<32x256xf32, #tpu.memory_space<vmem>>, vector<32x256xf32>
    tpu.vector_store %arg4[%c0_6, %c0_7], %7 {strides = array<i32>} : memref<32x256xf32, #tpu.memory_space<vmem>>, vector<32x256xf32>,
    return
  }
  func.func @transform_0(%arg0: i32) -> (i32, i32) {
    %c0_i32 = arith.constant 0 : i32
    %c0_i32_0 = arith.constant 0 : i32
    %c0_i32_1 = arith.constant 0 : i32
    return %c0_i32, %c0_i32_0 : i32, i32
  }
  func.func @transform_1(%arg0: i32) -> (i32, i32) {
    %c0_i32 = arith.constant 0 : i32
    %c0_i32_0 = arith.constant 0 : i32
    return %c0_i32, %arg0 : i32, i32
  }
  func.func @transform_2(%arg0: i32) -> (i32, i32) {
    %c0_i32 = arith.constant 0 : i32
    %c0_i32_0 = arith.constant 0 : i32
    %c0_i32_1 = arith.constant 0 : i32
    return %c0_i32, %c0_i32_0 : i32, i32
  }
  func.func @transform_3(%arg0: i32) -> (i32, i32) {
    %c0_i32 = arith.constant 0 : i32
    %c0_i32_0 = arith.constant 0 : i32
    return %c0_i32, %arg0 : i32, i32
  }
}

module attributes {stable_mosaic.version = 11 : i64} {
  func.func @_conv_s1_kernel(%arg0: i32, %arg1: memref<1x32x1536xbf16, #tpu.memory_space<vmem>>, %arg2: memref<16x288xbf16, #tpu.memory_space<vmem>>, %arg3: memref<16x1xf32, #tpu.memory_space<vmem>>, %arg4: memref<16x1408xf32, #tpu.memory_space<vmem>>, %arg5: memref<288x1408xbf16, #tpu.memory_space<vmem>>) attributes {dimension_semantics = [#tpu.dimension_semantics<parallel>], iteration_bounds = array<i64: 1>, scalar_prefetch = 0 : i64, scratch_operands = 1 : i64, tpu.core_type = #tpu.core_type<tc>, window_params = [{transform_indices = @transform_0, window_bounds = array<i64: 1, 32, 1536>}, {pipeline_mode = #tpu.pipeline_mode<synchronous>, transform_indices = @transform_1, window_bounds = array<i64: 16, 288>}, {pipeline_mode = #tpu.pipeline_mode<synchronous>, transform_indices = @transform_2, window_bounds = array<i64: 16, 1>}, {transform_indices = @transform_3, window_bounds = array<i64: 16, 1408>}]} {
    %c0 = arith.constant 0 : index
    %c0_0 = arith.constant 0 : index
    %c0_1 = arith.constant 0 : index
    %0 = vector.load %arg1[%c0, %c0_0, %c0_1] : memref<1x32x1536xbf16, #tpu.memory_space<vmem>>, vector<1x32x1408xbf16>
    %1 = vector.shape_cast %0 : vector<1x32x1408xbf16> to vector<32x1408xbf16>
    %c0_2 = arith.constant 0 : index
    %c0_3 = arith.constant 0 : index
    %2 = vector.load %arg5[%c0_2, %c0_3] : memref<288x1408xbf16, #tpu.memory_space<vmem>>, vector<32x1408xbf16>
    tpu.vector_store %arg5[%c0_2, %c0_3], %1 {strides = array<i32>} : memref<288x1408xbf16, #tpu.memory_space<vmem>>, vector<32x1408xbf16>,
    %c0_4 = arith.constant 0 : index
    %c0_5 = arith.constant 0 : index
    %c1 = arith.constant 1 : index
    %3 = vector.load %arg1[%c0_4, %c0_5, %c1] : memref<1x32x1536xbf16, #tpu.memory_space<vmem>>, vector<1x32x1408xbf16>
    %4 = vector.shape_cast %3 : vector<1x32x1408xbf16> to vector<32x1408xbf16>
    %c32 = arith.constant 32 : index
    %c0_6 = arith.constant 0 : index
    %5 = vector.load %arg5[%c32, %c0_6] : memref<288x1408xbf16, #tpu.memory_space<vmem>>, vector<32x1408xbf16>
    tpu.vector_store %arg5[%c32, %c0_6], %4 {strides = array<i32>} : memref<288x1408xbf16, #tpu.memory_space<vmem>>, vector<32x1408xbf16>,
    %c0_7 = arith.constant 0 : index
    %c0_8 = arith.constant 0 : index
    %c2 = arith.constant 2 : index
    %6 = vector.load %arg1[%c0_7, %c0_8, %c2] : memref<1x32x1536xbf16, #tpu.memory_space<vmem>>, vector<1x32x1408xbf16>
    %7 = vector.shape_cast %6 : vector<1x32x1408xbf16> to vector<32x1408xbf16>
    %c64 = arith.constant 64 : index
    %c0_9 = arith.constant 0 : index
    %8 = vector.load %arg5[%c64, %c0_9] : memref<288x1408xbf16, #tpu.memory_space<vmem>>, vector<32x1408xbf16>
    tpu.vector_store %arg5[%c64, %c0_9], %7 {strides = array<i32>} : memref<288x1408xbf16, #tpu.memory_space<vmem>>, vector<32x1408xbf16>,
    %c0_10 = arith.constant 0 : index
    %c0_11 = arith.constant 0 : index
    %c10 = arith.constant 10 : index
    %9 = vector.load %arg1[%c0_10, %c0_11, %c10] : memref<1x32x1536xbf16, #tpu.memory_space<vmem>>, vector<1x32x1408xbf16>
    %10 = vector.shape_cast %9 : vector<1x32x1408xbf16> to vector<32x1408xbf16>
    %c96 = arith.constant 96 : index
    %c0_12 = arith.constant 0 : index
    %11 = vector.load %arg5[%c96, %c0_12] : memref<288x1408xbf16, #tpu.memory_space<vmem>>, vector<32x1408xbf16>
    tpu.vector_store %arg5[%c96, %c0_12], %10 {strides = array<i32>} : memref<288x1408xbf16, #tpu.memory_space<vmem>>, vector<32x1408xbf16>,
    %c0_13 = arith.constant 0 : index
    %c0_14 = arith.constant 0 : index
    %c11 = arith.constant 11 : index
    %12 = vector.load %arg1[%c0_13, %c0_14, %c11] : memref<1x32x1536xbf16, #tpu.memory_space<vmem>>, vector<1x32x1408xbf16>
    %13 = vector.shape_cast %12 : vector<1x32x1408xbf16> to vector<32x1408xbf16>
    %c128 = arith.constant 128 : index
    %c0_15 = arith.constant 0 : index
    %14 = vector.load %arg5[%c128, %c0_15] : memref<288x1408xbf16, #tpu.memory_space<vmem>>, vector<32x1408xbf16>
    tpu.vector_store %arg5[%c128, %c0_15], %13 {strides = array<i32>} : memref<288x1408xbf16, #tpu.memory_space<vmem>>, vector<32x1408xbf16>,
    %c0_16 = arith.constant 0 : index
    %c0_17 = arith.constant 0 : index
    %c12 = arith.constant 12 : index
    %15 = vector.load %arg1[%c0_16, %c0_17, %c12] : memref<1x32x1536xbf16, #tpu.memory_space<vmem>>, vector<1x32x1408xbf16>
    %16 = vector.shape_cast %15 : vector<1x32x1408xbf16> to vector<32x1408xbf16>
    %c160 = arith.constant 160 : index
    %c0_18 = arith.constant 0 : index
    %17 = vector.load %arg5[%c160, %c0_18] : memref<288x1408xbf16, #tpu.memory_space<vmem>>, vector<32x1408xbf16>
    tpu.vector_store %arg5[%c160, %c0_18], %16 {strides = array<i32>} : memref<288x1408xbf16, #tpu.memory_space<vmem>>, vector<32x1408xbf16>,
    %c0_19 = arith.constant 0 : index
    %c0_20 = arith.constant 0 : index
    %c20 = arith.constant 20 : index
    %18 = vector.load %arg1[%c0_19, %c0_20, %c20] : memref<1x32x1536xbf16, #tpu.memory_space<vmem>>, vector<1x32x1408xbf16>
    %19 = vector.shape_cast %18 : vector<1x32x1408xbf16> to vector<32x1408xbf16>
    %c192 = arith.constant 192 : index
    %c0_21 = arith.constant 0 : index
    %20 = vector.load %arg5[%c192, %c0_21] : memref<288x1408xbf16, #tpu.memory_space<vmem>>, vector<32x1408xbf16>
    tpu.vector_store %arg5[%c192, %c0_21], %19 {strides = array<i32>} : memref<288x1408xbf16, #tpu.memory_space<vmem>>, vector<32x1408xbf16>,
    %c0_22 = arith.constant 0 : index
    %c0_23 = arith.constant 0 : index
    %c21 = arith.constant 21 : index
    %21 = vector.load %arg1[%c0_22, %c0_23, %c21] : memref<1x32x1536xbf16, #tpu.memory_space<vmem>>, vector<1x32x1408xbf16>
    %22 = vector.shape_cast %21 : vector<1x32x1408xbf16> to vector<32x1408xbf16>
    %c224 = arith.constant 224 : index
    %c0_24 = arith.constant 0 : index
    %23 = vector.load %arg5[%c224, %c0_24] : memref<288x1408xbf16, #tpu.memory_space<vmem>>, vector<32x1408xbf16>
    tpu.vector_store %arg5[%c224, %c0_24], %22 {strides = array<i32>} : memref<288x1408xbf16, #tpu.memory_space<vmem>>, vector<32x1408xbf16>,
    %c0_25 = arith.constant 0 : index
    %c0_26 = arith.constant 0 : index
    %c22 = arith.constant 22 : index
    %24 = vector.load %arg1[%c0_25, %c0_26, %c22] : memref<1x32x1536xbf16, #tpu.memory_space<vmem>>, vector<1x32x1408xbf16>
    %25 = vector.shape_cast %24 : vector<1x32x1408xbf16> to vector<32x1408xbf16>
    %c256 = arith.constant 256 : index
    %c0_27 = arith.constant 0 : index
    %26 = vector.load %arg5[%c256, %c0_27] : memref<288x1408xbf16, #tpu.memory_space<vmem>>, vector<32x1408xbf16>
    tpu.vector_store %arg5[%c256, %c0_27], %25 {strides = array<i32>} : memref<288x1408xbf16, #tpu.memory_space<vmem>>, vector<32x1408xbf16>,
    %c0_28 = arith.constant 0 : index
    %c0_29 = arith.constant 0 : index
    %27 = vector.load %arg2[%c0_28, %c0_29] : memref<16x288xbf16, #tpu.memory_space<vmem>>, vector<16x288xbf16>
    %c0_30 = arith.constant 0 : index
    %c0_31 = arith.constant 0 : index
    %28 = vector.load %arg5[%c0_30, %c0_31] : memref<288x1408xbf16, #tpu.memory_space<vmem>>, vector<288x1408xbf16>
    %cst = arith.constant dense<0.000000e+00> : vector<16x1408xf32>
    %29 = tpu.matmul %27, %28, %cst {dimension_numbers = #tpu.dot_dimension_numbers<[1], [0], [0], [1], [0, 0, 1, 1], [], []>} : vector<16x288xbf16>, vector<288x1408xbf16>, vector<16x1408xf32> -> vector<16x1408xf32>
    %c0_32 = arith.constant 0 : index
    %c0_33 = arith.constant 0 : index
    %30 = vector.load %arg3[%c0_32, %c0_33] : memref<16x1xf32, #tpu.memory_space<vmem>>, vector<16x1xf32>
    %31 = vector.broadcast %30 : vector<16x1xf32> to vector<16x1408xf32>
    %32 = arith.addf %29, %31 : vector<16x1408xf32>
    %c0_34 = arith.constant 0 : index
    %c0_35 = arith.constant 0 : index
    %33 = vector.load %arg4[%c0_34, %c0_35] : memref<16x1408xf32, #tpu.memory_space<vmem>>, vector<16x1408xf32>
    tpu.vector_store %arg4[%c0_34, %c0_35], %32 {strides = array<i32>} : memref<16x1408xf32, #tpu.memory_space<vmem>>, vector<16x1408xf32>,
    return
  }
  func.func @transform_0(%arg0: i32) -> (i32, i32, i32) {
    %c0_i32 = arith.constant 0 : i32
    %c0_i32_0 = arith.constant 0 : i32
    %c0_i32_1 = arith.constant 0 : i32
    return %arg0, %c0_i32, %c0_i32_0 : i32, i32, i32
  }
  func.func @transform_1(%arg0: i32) -> (i32, i32) {
    %c0_i32 = arith.constant 0 : i32
    %c0_i32_0 = arith.constant 0 : i32
    %c0_i32_1 = arith.constant 0 : i32
    return %c0_i32, %c0_i32_0 : i32, i32
  }
  func.func @transform_2(%arg0: i32) -> (i32, i32) {
    %c0_i32 = arith.constant 0 : i32
    %c0_i32_0 = arith.constant 0 : i32
    %c0_i32_1 = arith.constant 0 : i32
    return %c0_i32, %c0_i32_0 : i32, i32
  }
  func.func @transform_3(%arg0: i32) -> (i32, i32) {
    %c0_i32 = arith.constant 0 : i32
    %c0_i32_0 = arith.constant 0 : i32
    return %c0_i32, %arg0 : i32, i32
  }
}

module attributes {stable_mosaic.version = 11 : i64} {
  func.func @_conv_s1_kernel(%arg0: i32, %arg1: memref<1x32x2176xbf16, #tpu.memory_space<vmem>>, %arg2: memref<8x288xbf16, #tpu.memory_space<vmem>>, %arg3: memref<8x1xf32, #tpu.memory_space<vmem>>, %arg4: memref<8x2048xf32, #tpu.memory_space<vmem>>, %arg5: memref<288x2048xbf16, #tpu.memory_space<vmem>>) attributes {dimension_semantics = [#tpu.dimension_semantics<parallel>], iteration_bounds = array<i64: 3>, scalar_prefetch = 0 : i64, scratch_operands = 1 : i64, tpu.core_type = #tpu.core_type<tc>, window_params = [{transform_indices = @transform_0, window_bounds = array<i64: 1, 32, 2176>}, {pipeline_mode = #tpu.pipeline_mode<synchronous>, transform_indices = @transform_1, window_bounds = array<i64: 8, 288>}, {pipeline_mode = #tpu.pipeline_mode<synchronous>, transform_indices = @transform_2, window_bounds = array<i64: 8, 1>}, {transform_indices = @transform_3, window_bounds = array<i64: 8, 2048>}]} {
    %c0 = arith.constant 0 : index
    %c0_0 = arith.constant 0 : index
    %c0_1 = arith.constant 0 : index
    %0 = vector.load %arg1[%c0, %c0_0, %c0_1] : memref<1x32x2176xbf16, #tpu.memory_space<vmem>>, vector<1x32x2048xbf16>
    %1 = vector.shape_cast %0 : vector<1x32x2048xbf16> to vector<32x2048xbf16>
    %c0_2 = arith.constant 0 : index
    %c0_3 = arith.constant 0 : index
    %2 = vector.load %arg5[%c0_2, %c0_3] : memref<288x2048xbf16, #tpu.memory_space<vmem>>, vector<32x2048xbf16>
    tpu.vector_store %arg5[%c0_2, %c0_3], %1 {strides = array<i32>} : memref<288x2048xbf16, #tpu.memory_space<vmem>>, vector<32x2048xbf16>,
    %c0_4 = arith.constant 0 : index
    %c0_5 = arith.constant 0 : index
    %c1 = arith.constant 1 : index
    %3 = vector.load %arg1[%c0_4, %c0_5, %c1] : memref<1x32x2176xbf16, #tpu.memory_space<vmem>>, vector<1x32x2048xbf16>
    %4 = vector.shape_cast %3 : vector<1x32x2048xbf16> to vector<32x2048xbf16>
    %c32 = arith.constant 32 : index
    %c0_6 = arith.constant 0 : index
    %5 = vector.load %arg5[%c32, %c0_6] : memref<288x2048xbf16, #tpu.memory_space<vmem>>, vector<32x2048xbf16>
    tpu.vector_store %arg5[%c32, %c0_6], %4 {strides = array<i32>} : memref<288x2048xbf16, #tpu.memory_space<vmem>>, vector<32x2048xbf16>,
    %c0_7 = arith.constant 0 : index
    %c0_8 = arith.constant 0 : index
    %c2 = arith.constant 2 : index
    %6 = vector.load %arg1[%c0_7, %c0_8, %c2] : memref<1x32x2176xbf16, #tpu.memory_space<vmem>>, vector<1x32x2048xbf16>
    %7 = vector.shape_cast %6 : vector<1x32x2048xbf16> to vector<32x2048xbf16>
    %c64 = arith.constant 64 : index
    %c0_9 = arith.constant 0 : index
    %8 = vector.load %arg5[%c64, %c0_9] : memref<288x2048xbf16, #tpu.memory_space<vmem>>, vector<32x2048xbf16>
    tpu.vector_store %arg5[%c64, %c0_9], %7 {strides = array<i32>} : memref<288x2048xbf16, #tpu.memory_space<vmem>>, vector<32x2048xbf16>,
    %c0_10 = arith.constant 0 : index
    %c0_11 = arith.constant 0 : index
    %c18 = arith.constant 18 : index
    %9 = vector.load %arg1[%c0_10, %c0_11, %c18] : memref<1x32x2176xbf16, #tpu.memory_space<vmem>>, vector<1x32x2048xbf16>
    %10 = vector.shape_cast %9 : vector<1x32x2048xbf16> to vector<32x2048xbf16>
    %c96 = arith.constant 96 : index
    %c0_12 = arith.constant 0 : index
    %11 = vector.load %arg5[%c96, %c0_12] : memref<288x2048xbf16, #tpu.memory_space<vmem>>, vector<32x2048xbf16>
    tpu.vector_store %arg5[%c96, %c0_12], %10 {strides = array<i32>} : memref<288x2048xbf16, #tpu.memory_space<vmem>>, vector<32x2048xbf16>,
    %c0_13 = arith.constant 0 : index
    %c0_14 = arith.constant 0 : index
    %c19 = arith.constant 19 : index
    %12 = vector.load %arg1[%c0_13, %c0_14, %c19] : memref<1x32x2176xbf16, #tpu.memory_space<vmem>>, vector<1x32x2048xbf16>
    %13 = vector.shape_cast %12 : vector<1x32x2048xbf16> to vector<32x2048xbf16>
    %c128 = arith.constant 128 : index
    %c0_15 = arith.constant 0 : index
    %14 = vector.load %arg5[%c128, %c0_15] : memref<288x2048xbf16, #tpu.memory_space<vmem>>, vector<32x2048xbf16>
    tpu.vector_store %arg5[%c128, %c0_15], %13 {strides = array<i32>} : memref<288x2048xbf16, #tpu.memory_space<vmem>>, vector<32x2048xbf16>,
    %c0_16 = arith.constant 0 : index
    %c0_17 = arith.constant 0 : index
    %c20 = arith.constant 20 : index
    %15 = vector.load %arg1[%c0_16, %c0_17, %c20] : memref<1x32x2176xbf16, #tpu.memory_space<vmem>>, vector<1x32x2048xbf16>
    %16 = vector.shape_cast %15 : vector<1x32x2048xbf16> to vector<32x2048xbf16>
    %c160 = arith.constant 160 : index
    %c0_18 = arith.constant 0 : index
    %17 = vector.load %arg5[%c160, %c0_18] : memref<288x2048xbf16, #tpu.memory_space<vmem>>, vector<32x2048xbf16>
    tpu.vector_store %arg5[%c160, %c0_18], %16 {strides = array<i32>} : memref<288x2048xbf16, #tpu.memory_space<vmem>>, vector<32x2048xbf16>,
    %c0_19 = arith.constant 0 : index
    %c0_20 = arith.constant 0 : index
    %c36 = arith.constant 36 : index
    %18 = vector.load %arg1[%c0_19, %c0_20, %c36] : memref<1x32x2176xbf16, #tpu.memory_space<vmem>>, vector<1x32x2048xbf16>
    %19 = vector.shape_cast %18 : vector<1x32x2048xbf16> to vector<32x2048xbf16>
    %c192 = arith.constant 192 : index
    %c0_21 = arith.constant 0 : index
    %20 = vector.load %arg5[%c192, %c0_21] : memref<288x2048xbf16, #tpu.memory_space<vmem>>, vector<32x2048xbf16>
    tpu.vector_store %arg5[%c192, %c0_21], %19 {strides = array<i32>} : memref<288x2048xbf16, #tpu.memory_space<vmem>>, vector<32x2048xbf16>,
    %c0_22 = arith.constant 0 : index
    %c0_23 = arith.constant 0 : index
    %c37 = arith.constant 37 : index
    %21 = vector.load %arg1[%c0_22, %c0_23, %c37] : memref<1x32x2176xbf16, #tpu.memory_space<vmem>>, vector<1x32x2048xbf16>
    %22 = vector.shape_cast %21 : vector<1x32x2048xbf16> to vector<32x2048xbf16>
    %c224 = arith.constant 224 : index
    %c0_24 = arith.constant 0 : index
    %23 = vector.load %arg5[%c224, %c0_24] : memref<288x2048xbf16, #tpu.memory_space<vmem>>, vector<32x2048xbf16>
    tpu.vector_store %arg5[%c224, %c0_24], %22 {strides = array<i32>} : memref<288x2048xbf16, #tpu.memory_space<vmem>>, vector<32x2048xbf16>,
    %c0_25 = arith.constant 0 : index
    %c0_26 = arith.constant 0 : index
    %c38 = arith.constant 38 : index
    %24 = vector.load %arg1[%c0_25, %c0_26, %c38] : memref<1x32x2176xbf16, #tpu.memory_space<vmem>>, vector<1x32x2048xbf16>
    %25 = vector.shape_cast %24 : vector<1x32x2048xbf16> to vector<32x2048xbf16>
    %c256 = arith.constant 256 : index
    %c0_27 = arith.constant 0 : index
    %26 = vector.load %arg5[%c256, %c0_27] : memref<288x2048xbf16, #tpu.memory_space<vmem>>, vector<32x2048xbf16>
    tpu.vector_store %arg5[%c256, %c0_27], %25 {strides = array<i32>} : memref<288x2048xbf16, #tpu.memory_space<vmem>>, vector<32x2048xbf16>,
    %c0_28 = arith.constant 0 : index
    %c0_29 = arith.constant 0 : index
    %27 = vector.load %arg2[%c0_28, %c0_29] : memref<8x288xbf16, #tpu.memory_space<vmem>>, vector<8x288xbf16>
    %c0_30 = arith.constant 0 : index
    %c0_31 = arith.constant 0 : index
    %28 = vector.load %arg5[%c0_30, %c0_31] : memref<288x2048xbf16, #tpu.memory_space<vmem>>, vector<288x2048xbf16>
    %cst = arith.constant dense<0.000000e+00> : vector<8x2048xf32>
    %29 = tpu.matmul %27, %28, %cst {dimension_numbers = #tpu.dot_dimension_numbers<[1], [0], [0], [1], [0, 0, 1, 1], [], []>} : vector<8x288xbf16>, vector<288x2048xbf16>, vector<8x2048xf32> -> vector<8x2048xf32>
    %c0_32 = arith.constant 0 : index
    %c0_33 = arith.constant 0 : index
    %30 = vector.load %arg3[%c0_32, %c0_33] : memref<8x1xf32, #tpu.memory_space<vmem>>, vector<8x1xf32>
    %31 = vector.broadcast %30 : vector<8x1xf32> to vector<8x2048xf32>
    %32 = arith.addf %29, %31 : vector<8x2048xf32>
    %c0_34 = arith.constant 0 : index
    %c0_35 = arith.constant 0 : index
    %33 = vector.load %arg4[%c0_34, %c0_35] : memref<8x2048xf32, #tpu.memory_space<vmem>>, vector<8x2048xf32>
    tpu.vector_store %arg4[%c0_34, %c0_35], %32 {strides = array<i32>} : memref<8x2048xf32, #tpu.memory_space<vmem>>, vector<8x2048xf32>,
    return
  }
  func.func @transform_0(%arg0: i32) -> (i32, i32, i32) {
    %c0_i32 = arith.constant 0 : i32
    %c0_i32_0 = arith.constant 0 : i32
    %c0_i32_1 = arith.constant 0 : i32
    return %arg0, %c0_i32, %c0_i32_0 : i32, i32, i32
  }
  func.func @transform_1(%arg0: i32) -> (i32, i32) {
    %c0_i32 = arith.constant 0 : i32
    %c0_i32_0 = arith.constant 0 : i32
    %c0_i32_1 = arith.constant 0 : i32
    return %c0_i32, %c0_i32_0 : i32, i32
  }
  func.func @transform_2(%arg0: i32) -> (i32, i32) {
    %c0_i32 = arith.constant 0 : i32
    %c0_i32_0 = arith.constant 0 : i32
    %c0_i32_1 = arith.constant 0 : i32
    return %c0_i32, %c0_i32_0 : i32, i32
  }
  func.func @transform_3(%arg0: i32) -> (i32, i32) {
    %c0_i32 = arith.constant 0 : i32
    %c0_i32_0 = arith.constant 0 : i32
    return %c0_i32, %arg0 : i32, i32
  }
}

module attributes {stable_mosaic.version = 11 : i64} {
  func.func @_conv_s1_kernel(%arg0: i32, %arg1: memref<1x16x2176xbf16, #tpu.memory_space<vmem>>, %arg2: memref<8x144xbf16, #tpu.memory_space<vmem>>, %arg3: memref<8x1xf32, #tpu.memory_space<vmem>>, %arg4: memref<8x2048xf32, #tpu.memory_space<vmem>>, %arg5: memref<144x2048xbf16, #tpu.memory_space<vmem>>) attributes {dimension_semantics = [#tpu.dimension_semantics<parallel>], iteration_bounds = array<i64: 3>, scalar_prefetch = 0 : i64, scratch_operands = 1 : i64, tpu.core_type = #tpu.core_type<tc>, window_params = [{transform_indices = @transform_0, window_bounds = array<i64: 1, 16, 2176>}, {pipeline_mode = #tpu.pipeline_mode<synchronous>, transform_indices = @transform_1, window_bounds = array<i64: 8, 144>}, {pipeline_mode = #tpu.pipeline_mode<synchronous>, transform_indices = @transform_2, window_bounds = array<i64: 8, 1>}, {transform_indices = @transform_3, window_bounds = array<i64: 8, 2048>}]} {
    %c0 = arith.constant 0 : index
    %c0_0 = arith.constant 0 : index
    %c0_1 = arith.constant 0 : index
    %0 = vector.load %arg1[%c0, %c0_0, %c0_1] : memref<1x16x2176xbf16, #tpu.memory_space<vmem>>, vector<1x16x2048xbf16>
    %1 = vector.shape_cast %0 : vector<1x16x2048xbf16> to vector<16x2048xbf16>
    %c0_2 = arith.constant 0 : index
    %c0_3 = arith.constant 0 : index
    %2 = vector.load %arg5[%c0_2, %c0_3] : memref<144x2048xbf16, #tpu.memory_space<vmem>>, vector<16x2048xbf16>
    tpu.vector_store %arg5[%c0_2, %c0_3], %1 {strides = array<i32>} : memref<144x2048xbf16, #tpu.memory_space<vmem>>, vector<16x2048xbf16>,
    %c0_4 = arith.constant 0 : index
    %c0_5 = arith.constant 0 : index
    %c1 = arith.constant 1 : index
    %3 = vector.load %arg1[%c0_4, %c0_5, %c1] : memref<1x16x2176xbf16, #tpu.memory_space<vmem>>, vector<1x16x2048xbf16>
    %4 = vector.shape_cast %3 : vector<1x16x2048xbf16> to vector<16x2048xbf16>
    %c16 = arith.constant 16 : index
    %c0_6 = arith.constant 0 : index
    %5 = vector.load %arg5[%c16, %c0_6] : memref<144x2048xbf16, #tpu.memory_space<vmem>>, vector<16x2048xbf16>
    tpu.vector_store %arg5[%c16, %c0_6], %4 {strides = array<i32>} : memref<144x2048xbf16, #tpu.memory_space<vmem>>, vector<16x2048xbf16>,
    %c0_7 = arith.constant 0 : index
    %c0_8 = arith.constant 0 : index
    %c2 = arith.constant 2 : index
    %6 = vector.load %arg1[%c0_7, %c0_8, %c2] : memref<1x16x2176xbf16, #tpu.memory_space<vmem>>, vector<1x16x2048xbf16>
    %7 = vector.shape_cast %6 : vector<1x16x2048xbf16> to vector<16x2048xbf16>
    %c32 = arith.constant 32 : index
    %c0_9 = arith.constant 0 : index
    %8 = vector.load %arg5[%c32, %c0_9] : memref<144x2048xbf16, #tpu.memory_space<vmem>>, vector<16x2048xbf16>
    tpu.vector_store %arg5[%c32, %c0_9], %7 {strides = array<i32>} : memref<144x2048xbf16, #tpu.memory_space<vmem>>, vector<16x2048xbf16>,
    %c0_10 = arith.constant 0 : index
    %c0_11 = arith.constant 0 : index
    %c18 = arith.constant 18 : index
    %9 = vector.load %arg1[%c0_10, %c0_11, %c18] : memref<1x16x2176xbf16, #tpu.memory_space<vmem>>, vector<1x16x2048xbf16>
    %10 = vector.shape_cast %9 : vector<1x16x2048xbf16> to vector<16x2048xbf16>
    %c48 = arith.constant 48 : index
    %c0_12 = arith.constant 0 : index
    %11 = vector.load %arg5[%c48, %c0_12] : memref<144x2048xbf16, #tpu.memory_space<vmem>>, vector<16x2048xbf16>
    tpu.vector_store %arg5[%c48, %c0_12], %10 {strides = array<i32>} : memref<144x2048xbf16, #tpu.memory_space<vmem>>, vector<16x2048xbf16>,
    %c0_13 = arith.constant 0 : index
    %c0_14 = arith.constant 0 : index
    %c19 = arith.constant 19 : index
    %12 = vector.load %arg1[%c0_13, %c0_14, %c19] : memref<1x16x2176xbf16, #tpu.memory_space<vmem>>, vector<1x16x2048xbf16>
    %13 = vector.shape_cast %12 : vector<1x16x2048xbf16> to vector<16x2048xbf16>
    %c64 = arith.constant 64 : index
    %c0_15 = arith.constant 0 : index
    %14 = vector.load %arg5[%c64, %c0_15] : memref<144x2048xbf16, #tpu.memory_space<vmem>>, vector<16x2048xbf16>
    tpu.vector_store %arg5[%c64, %c0_15], %13 {strides = array<i32>} : memref<144x2048xbf16, #tpu.memory_space<vmem>>, vector<16x2048xbf16>,
    %c0_16 = arith.constant 0 : index
    %c0_17 = arith.constant 0 : index
    %c20 = arith.constant 20 : index
    %15 = vector.load %arg1[%c0_16, %c0_17, %c20] : memref<1x16x2176xbf16, #tpu.memory_space<vmem>>, vector<1x16x2048xbf16>
    %16 = vector.shape_cast %15 : vector<1x16x2048xbf16> to vector<16x2048xbf16>
    %c80 = arith.constant 80 : index
    %c0_18 = arith.constant 0 : index
    %17 = vector.load %arg5[%c80, %c0_18] : memref<144x2048xbf16, #tpu.memory_space<vmem>>, vector<16x2048xbf16>
    tpu.vector_store %arg5[%c80, %c0_18], %16 {strides = array<i32>} : memref<144x2048xbf16, #tpu.memory_space<vmem>>, vector<16x2048xbf16>,
    %c0_19 = arith.constant 0 : index
    %c0_20 = arith.constant 0 : index
    %c36 = arith.constant 36 : index
    %18 = vector.load %arg1[%c0_19, %c0_20, %c36] : memref<1x16x2176xbf16, #tpu.memory_space<vmem>>, vector<1x16x2048xbf16>
    %19 = vector.shape_cast %18 : vector<1x16x2048xbf16> to vector<16x2048xbf16>
    %c96 = arith.constant 96 : index
    %c0_21 = arith.constant 0 : index
    %20 = vector.load %arg5[%c96, %c0_21] : memref<144x2048xbf16, #tpu.memory_space<vmem>>, vector<16x2048xbf16>
    tpu.vector_store %arg5[%c96, %c0_21], %19 {strides = array<i32>} : memref<144x2048xbf16, #tpu.memory_space<vmem>>, vector<16x2048xbf16>,
    %c0_22 = arith.constant 0 : index
    %c0_23 = arith.constant 0 : index
    %c37 = arith.constant 37 : index
    %21 = vector.load %arg1[%c0_22, %c0_23, %c37] : memref<1x16x2176xbf16, #tpu.memory_space<vmem>>, vector<1x16x2048xbf16>
    %22 = vector.shape_cast %21 : vector<1x16x2048xbf16> to vector<16x2048xbf16>
    %c112 = arith.constant 112 : index
    %c0_24 = arith.constant 0 : index
    %23 = vector.load %arg5[%c112, %c0_24] : memref<144x2048xbf16, #tpu.memory_space<vmem>>, vector<16x2048xbf16>
    tpu.vector_store %arg5[%c112, %c0_24], %22 {strides = array<i32>} : memref<144x2048xbf16, #tpu.memory_space<vmem>>, vector<16x2048xbf16>,
    %c0_25 = arith.constant 0 : index
    %c0_26 = arith.constant 0 : index
    %c38 = arith.constant 38 : index
    %24 = vector.load %arg1[%c0_25, %c0_26, %c38] : memref<1x16x2176xbf16, #tpu.memory_space<vmem>>, vector<1x16x2048xbf16>
    %25 = vector.shape_cast %24 : vector<1x16x2048xbf16> to vector<16x2048xbf16>
    %c128 = arith.constant 128 : index
    %c0_27 = arith.constant 0 : index
    %26 = vector.load %arg5[%c128, %c0_27] : memref<144x2048xbf16, #tpu.memory_space<vmem>>, vector<16x2048xbf16>
    tpu.vector_store %arg5[%c128, %c0_27], %25 {strides = array<i32>} : memref<144x2048xbf16, #tpu.memory_space<vmem>>, vector<16x2048xbf16>,
    %c0_28 = arith.constant 0 : index
    %c0_29 = arith.constant 0 : index
    %27 = vector.load %arg2[%c0_28, %c0_29] : memref<8x144xbf16, #tpu.memory_space<vmem>>, vector<8x144xbf16>
    %c0_30 = arith.constant 0 : index
    %c0_31 = arith.constant 0 : index
    %28 = vector.load %arg5[%c0_30, %c0_31] : memref<144x2048xbf16, #tpu.memory_space<vmem>>, vector<144x2048xbf16>
    %cst = arith.constant dense<0.000000e+00> : vector<8x2048xf32>
    %29 = tpu.matmul %27, %28, %cst {dimension_numbers = #tpu.dot_dimension_numbers<[1], [0], [0], [1], [0, 0, 1, 1], [], []>} : vector<8x144xbf16>, vector<144x2048xbf16>, vector<8x2048xf32> -> vector<8x2048xf32>
    %c0_32 = arith.constant 0 : index
    %c0_33 = arith.constant 0 : index
    %30 = vector.load %arg3[%c0_32, %c0_33] : memref<8x1xf32, #tpu.memory_space<vmem>>, vector<8x1xf32>
    %31 = vector.broadcast %30 : vector<8x1xf32> to vector<8x2048xf32>
    %32 = arith.addf %29, %31 : vector<8x2048xf32>
    %c0_34 = arith.constant 0 : index
    %c0_35 = arith.constant 0 : index
    %33 = vector.load %arg4[%c0_34, %c0_35] : memref<8x2048xf32, #tpu.memory_space<vmem>>, vector<8x2048xf32>
    tpu.vector_store %arg4[%c0_34, %c0_35], %32 {strides = array<i32>} : memref<8x2048xf32, #tpu.memory_space<vmem>>, vector<8x2048xf32>,
    return
  }
  func.func @transform_0(%arg0: i32) -> (i32, i32, i32) {
    %c0_i32 = arith.constant 0 : i32
    %c0_i32_0 = arith.constant 0 : i32
    %c0_i32_1 = arith.constant 0 : i32
    return %arg0, %c0_i32, %c0_i32_0 : i32, i32, i32
  }
  func.func @transform_1(%arg0: i32) -> (i32, i32) {
    %c0_i32 = arith.constant 0 : i32
    %c0_i32_0 = arith.constant 0 : i32
    %c0_i32_1 = arith.constant 0 : i32
    return %c0_i32, %c0_i32_0 : i32, i32
  }
  func.func @transform_2(%arg0: i32) -> (i32, i32) {
    %c0_i32 = arith.constant 0 : i32
    %c0_i32_0 = arith.constant 0 : i32
    %c0_i32_1 = arith.constant 0 : i32
    return %c0_i32, %c0_i32_0 : i32, i32
  }
  func.func @transform_3(%arg0: i32) -> (i32, i32) {
    %c0_i32 = arith.constant 0 : i32
    %c0_i32_0 = arith.constant 0 : i32
    return %c0_i32, %arg0 : i32, i32
  }
}

</mosaic_0001>

<bundles_post_ra>
// kernel: similarity_reg_net_forward.6
= control target key start
LH: loop header
LB: loop body
LE: loop exit
PB: predicated region body
PF: predicated region fallthrough
CT: control target
= control target key end

     0   :  { %s2987_s12 = smov 0   ;;  %s4063_s0 = inlined_call_operand.vmem [shape: bf16[3,16,2176], index: 0, kind: input, shape index: {}]   ;;  %s4064_s1 = inlined_call_operand.vmem [shape: bf16[8,144], index: 1, kind: input, shape index: {}]   ;;  %s4065_s2 = inlined_call_operand.vmem [shape: f32[8,1], index: 2, kind: input, shape index: {}]   ;;  %s4066_s3 = inlined_call_operand.vmem [shape: f32[8,6144], index: 3, kind: output, shape index: {}]  }
   0x1 LB: > { %s2993_s13 = sadd.s32 4294967295, %s2956_s12   ;;  %p2747_p0 = scmp.ge.s32.totalorder %s2956_s12, 1  ;;  %s2956_s12 = sphi %s2987_s12, %s13_s12  }
   0x2   : > { %p137_p1 = scmp.lt.s32.totalorder %s2956_s12, 4 }
   0x4   : > { %p138_p2 = pnand %p2747_p0, %p137_p1 }
   0x5   : > { %p161_p3 = scmp.lt.s32.totalorder (!%p138_p2), %s2993_s13, 2  ;;  %s2958_s19 = smov (!%p138_p2), 91  }
   0x6   : > { %141 = sbr.rel (%p138_p2) target bundleno = 627 (0x273), region = 32  ;;  %s2959_s20 = smov (!%p138_p2), 92  }
   0x7   : > { %s2960_s21 = smov (!%p138_p2), 108   ;;  %s2961_s22 = smov (!%p138_p2), 109  }
   0x8   : > { %s2962_s23 = smov (!%p138_p2), 110   ;;  %s2963_s24 = smov (!%p138_p2), 126  }
   0x9   : > { %s2964_s25 = smov (!%p138_p2), 127   ;;  %s2965_s26 = smov (!%p138_p2), 90  }
   0xa   : > { %s2749_s4 = sshll.u32 (!%p138_p2), %s2993_s13, 4 }
   0xb   : > { %s162_s14 = scalar_select %p161_p3, %s2993_s13, 2  ;;  %v3098_v6 = vld [vmem:[%s4064_s1] sm:$0xff]  ;;  %vm2323_vm0 = vcmask 130048   ;;  %vm295_vm1 = vcmask 1043456   ;;  %vm1227_vm2 = vcmask 744448   ;;  %vm1072_vm3 = vcmask 752640  }
   0xc   : > { %v3105_v7 = vcombine.high %v3098_v6, %v3098_v6  ;;  %vm917_vm4 = vcmask 883712   ;;  %vm762_vm5 = vcmask 891904   ;;  %vm607_vm6 = vcmask 900096   ;;  %p167_p4 = scmp.lt.s32.totalorder %s2749_s4, 47 }
   0xd   : > { %s2907_s15 = smul.u32 136, %s162_s14  ;;  %vm452_vm7 = vcmask 1031168   ;;  %vm297_vm8 = vcmask 1039360   ;;  %vm1382_vm9 = vcmask 736256  }
   0xe   : > { %2897 = vmatprep.mubr.msk.bf16.mxu0 %vm2323_vm0, %v3105_v7  ;;  %2898 = vmatprep.mubr.msk.bf16.mxu1 %vm2323_vm0, %v3105_v7  ;;  %s4068_s4 = smov (!%p167_p4, %s2749_s4), 47 }
   0xf   : > { %s3002_s18 = scalar_lea.vmem %s4063_s0, %s2907_s15  ;;  %s2750_s5 = sshll.u32 %s4068_s4, 3 }
  0x10   : > { %v1138_v0 = vld [vmem:[%s3002_s18 + $0x10] sm:$0xff]  ;;  %v3006_v1 = vld [vmem:[%s3002_s18] sm:$0xff]  ;;  %v3015_v3 = vld [vmem:[%s3002_s18 + $0x8] sm:$0xff]  ;;  %s4030_s8 = scalar_lea.vmem %s4066_s3, %s2750_s5 }
  0x11   : > { %1176 = vrot.lane.b32.xlu1 %v1138_v0, %s2958_s19  ;;  %1172 = vrot.lane.b32.xlu0 %v3006_v1, %s2958_s19  ;;  %v3012_v2 = vld [vmem:[%s3002_s18 + $0x44] sm:$0xff]  ;;  %v1147_v4 = vld [vmem:[%s3002_s18 + $0x54] sm:$0xff] }
  0x12   : > { %v3019_v5 = vld [vmem:[%s3002_s18 + $0x4c] sm:$0xff]  ;;  %v3108_v8 = vld [vmem:[%s3002_s18 + $0x20] sm:$0xff]  ;;  %v3111_v9 = vld [vmem:[%s3002_s18 + $0x18] sm:$0xff] }
  0x13   : > { %v3122_v10 = vld [vmem:[%s3002_s18 + $0x64] sm:$0xff]  ;;  %v3125_v11 = vld [vmem:[%s3002_s18 + $0x5c] sm:$0xff] }
  0x15   : > { %1190 = vrot.lane.b32.xlu1 %v3012_v2, %s2958_s19  ;;  %1174 = vrot.lane.b32.xlu0 %v3015_v3, %s2958_s19 }
  0x19   : > { %1194 = vrot.lane.b32.xlu1 %v1147_v4, %s2958_s19  ;;  %1192 = vrot.lane.b32.xlu0 %v3019_v5, %s2958_s19 }
  0x1d   : > { %1019 = vrot.lane.b32.xlu1 %v3015_v3, %s2959_s20  ;;  %1017 = vrot.lane.b32.xlu0 %v3006_v1, %s2959_s20 }
  0x21   : > { %1035 = vrot.lane.b32.xlu1 %v3012_v2, %s2959_s20  ;;  %1021 = vrot.lane.b32.xlu0 %v1138_v0, %s2959_s20 }
  0x25   : > { %1039 = vrot.lane.b32.xlu1 %v1147_v4, %s2959_s20  ;;  %1037 = vrot.lane.b32.xlu0 %v3019_v5, %s2959_s20 }
  0x29   : > { %864 = vrot.lane.b32.xlu1 %v3015_v3, %s2960_s21  ;;  %862 = vrot.lane.b32.xlu0 %v3006_v1, %s2960_s21 }
  0x2d   : > { %880 = vrot.lane.b32.xlu1 %v3012_v2, %s2960_s21  ;;  %866 = vrot.lane.b32.xlu0 %v1138_v0, %s2960_s21 }
  0x31   : > { %884 = vrot.lane.b32.xlu1 %v1147_v4, %s2960_s21  ;;  %882 = vrot.lane.b32.xlu0 %v3019_v5, %s2960_s21 }
  0x35   : > { %709 = vrot.lane.b32.xlu1 %v3015_v3, %s2961_s22  ;;  %707 = vrot.lane.b32.xlu0 %v3006_v1, %s2961_s22 }
  0x39   : > { %725 = vrot.lane.b32.xlu1 %v3012_v2, %s2961_s22  ;;  %711 = vrot.lane.b32.xlu0 %v1138_v0, %s2961_s22 }
  0x3d   : > { %729 = vrot.lane.b32.xlu1 %v1147_v4, %s2961_s22  ;;  %727 = vrot.lane.b32.xlu0 %v3019_v5, %s2961_s22 }
  0x41   : > { %554 = vrot.lane.b32.xlu1 %v3015_v3, %s2962_s23  ;;  %552 = vrot.lane.b32.xlu0 %v3006_v1, %s2962_s23 }
  0x45   : > { %570 = vrot.lane.b32.xlu1 %v3012_v2, %s2962_s23  ;;  %556 = vrot.lane.b32.xlu0 %v1138_v0, %s2962_s23 }
  0x49   : > { %574 = vrot.lane.b32.xlu1 %v1147_v4, %s2962_s23  ;;  %572 = vrot.lane.b32.xlu0 %v3019_v5, %s2962_s23 }
  0x4d   : > { %399 = vrot.lane.b32.xlu1 %v3015_v3, %s2963_s24  ;;  %397 = vrot.lane.b32.xlu0 %v3006_v1, %s2963_s24 }
  0x51   : > { %415 = vrot.lane.b32.xlu1 %v3012_v2, %s2963_s24  ;;  %401 = vrot.lane.b32.xlu0 %v1138_v0, %s2963_s24 }
  0x55   : > { %419 = vrot.lane.b32.xlu1 %v1147_v4, %s2963_s24  ;;  %417 = vrot.lane.b32.xlu0 %v3019_v5, %s2963_s24 }
  0x59   : > { %243 = vrot.lane.b32.xlu1 %v3015_v3, %s2964_s25  ;;  %241 = vrot.lane.b32.xlu0 %v3006_v1, %s2964_s25 }
  0x5d   : > { %259 = vrot.lane.b32.xlu1 %v3012_v2, %s2964_s25  ;;  %245 = vrot.lane.b32.xlu0 %v1138_v0, %s2964_s25 }
  0x61   : > { %263 = vrot.lane.b32.xlu1 %v1147_v4, %s2964_s25  ;;  %261 = vrot.lane.b32.xlu0 %v3019_v5, %s2964_s25 }
  0x65   : > { %1329 = vrot.lane.b32.xlu1 %v3015_v3, %s2965_s26  ;;  %1327 = vrot.lane.b32.xlu0 %v3006_v1, %s2965_s26 }
  0x69   : > { %1345 = vrot.lane.b32.xlu1 %v3012_v2, %s2965_s26  ;;  %1331 = vrot.lane.b32.xlu0 %v1138_v0, %s2965_s26 }
  0x6d   : > { %1349 = vrot.lane.b32.xlu1 %v1147_v4, %s2965_s26  ;;  %1347 = vrot.lane.b32.xlu0 %v3019_v5, %s2965_s26 }
  0x71   : > { %1180 = vrot.lane.b32.xlu1 %v3108_v8, %s2958_s19  ;;  %1178 = vrot.lane.b32.xlu0 %v3111_v9, %s2958_s19 }
  0x75   : > { %1198 = vrot.lane.b32.xlu1 %v3122_v10, %s2958_s19  ;;  %1196 = vrot.lane.b32.xlu0 %v3125_v11, %s2958_s19 }
  0x79   : > { %1025 = vrot.lane.b32.xlu1 %v3108_v8, %s2959_s20  ;;  %1023 = vrot.lane.b32.xlu0 %v3111_v9, %s2959_s20 }
  0x7d   : > { %1043 = vrot.lane.b32.xlu1 %v3122_v10, %s2959_s20  ;;  %1041 = vrot.lane.b32.xlu0 %v3125_v11, %s2959_s20 }
  0x81   : > { %870 = vrot.lane.b32.xlu1 %v3108_v8, %s2960_s21  ;;  %868 = vrot.lane.b32.xlu0 %v3111_v9, %s2960_s21 }
  0x83   : > { %v3143_v12 = vpop.permute.xlu1 %1176  ;;  %v1173_v13 = vpop.permute.xlu0 %1172 }
  0x84   : > { %v1210_v17 = vrot.slane %v3143_v12, 4  ;;  %v1208_v18 = vrot.slane %v1173_v13, 4 }
  0x85   : > { %888 = vrot.lane.b32.xlu1 %v3122_v10, %s2960_s21  ;;  %886 = vrot.lane.b32.xlu0 %v3125_v11, %s2960_s21 }
  0x87   : > { %v1191_v14 = vpop.permute.xlu1 %1190  ;;  %v1175_v15 = vpop.permute.xlu0 %1174 }
  0x88   : > { %v1209_v16 = vrot.slane %v1175_v15, 4  ;;  %v1217_v19 = vrot.slane %v1191_v14, 4 }
  0x89   : > { %715 = vrot.lane.b32.xlu1 %v3108_v8, %s2961_s22  ;;  %713 = vrot.lane.b32.xlu0 %v3111_v9, %s2961_s22 }
  0x8a   : > { %v1226_v24 = vsel %vm295_vm1, %v1208_v18, %v1209_v16  ;;  %v1229_v25 = vsel %vm295_vm1, %v1209_v16, %v1210_v17 }
  0x8b   : > { %v3154_v20 = vpop.permute.xlu1 %1194  ;;  %v1193_v21 = vpop.permute.xlu0 %1192  ;;  %v1228_v30 = vsel %vm1227_vm2, %v1173_v13, %v1226_v24  ;;  %v1230_v32 = vsel %vm1227_vm2, %v1175_v15, %v1229_v25 }
  0x8c   : > { %v1219_v22 = vrot.slane %v3154_v20, 4  ;;  %v1218_v23 = vrot.slane %v1193_v21, 4 }
  0x8d   : > { %733 = vrot.lane.b32.xlu1 %v3122_v10, %s2961_s22  ;;  %731 = vrot.lane.b32.xlu0 %v3125_v11, %s2961_s22 }
  0x8e   : > { %v1243_v26 = vsel %vm295_vm1, %v1217_v19, %v1218_v23  ;;  %v1245_v27 = vsel %vm295_vm1, %v1218_v23, %v1219_v22 }
  0x8f   : > { %v1020_v28 = vpop.permute.xlu1 %1019  ;;  %v1018_v29 = vpop.permute.xlu0 %1017  ;;  %v1244_v31 = vsel %vm1227_vm2, %v1191_v14, %v1243_v26  ;;  %v1246_v33 = vsel %vm1227_vm2, %v1193_v21, %v1245_v27 }
  0x90   : > { %v2866_v34 = vcombine.high %v1228_v30, %v1244_v31  ;;  %v2868_v35 = vcombine.high %v1230_v32, %v1246_v33  ;;  %v2865_v36 = vcombine.low %v1228_v30, %v1244_v31  ;;  %v2867_v37 = vcombine.low %v1230_v32, %v1246_v33 }
  0x91   : > { %560 = vrot.lane.b32.xlu1 %v3108_v8, %s2962_s23  ;;  %558 = vrot.lane.b32.xlu0 %v3111_v9, %s2962_s23  ;;  %v1054_v38 = vrot.slane %v1020_v28, 4  ;;  %v1053_v39 = vrot.slane %v1018_v29, 4 }
  0x92   : > { %2327 = vmatprep.subr.bf16.mxu0 %v2866_v34  ;;  %2368 = vmatprep.subr.bf16.mxu1 %v2868_v35 }
  0x93   : > { %2328 = vmatpush1.bf16.msra.mxu0 %v2865_v36  ;;  %2369 = vmatpush1.bf16.msra.mxu1 %v2867_v37  ;;  %v1036_v40 = vpop.permute.xlu1 %1035  ;;  %v3177_v41 = vpop.permute.xlu0 %1021  ;;  %v1071_v43 = vsel %vm295_vm1, %v1053_v39, %v1054_v38 }
  0x94   : > { %v1055_v42 = vrot.slane %v3177_v41, 4  ;;  %v1062_v46 = vrot.slane %v1036_v40, 4  ;;  %v1073_v52 = vsel %vm1072_vm3, %v1018_v29, %v1071_v43 }
  0x95   : > { %578 = vrot.lane.b32.xlu1 %v3122_v10, %s2962_s23  ;;  %576 = vrot.lane.b32.xlu0 %v3125_v11, %s2962_s23 }
  0x96   : > { %v1074_v49 = vsel %vm295_vm1, %v1054_v38, %v1055_v42 }
  0x97   : > { %v3185_v44 = vpop.permute.xlu1 %1039  ;;  %v1038_v45 = vpop.permute.xlu0 %1037  ;;  %v1075_v57 = vsel %vm1072_vm3, %v1020_v28, %v1074_v49 }
  0x98   : > { %v1064_v47 = vrot.slane %v3185_v44, 4  ;;  %v1063_v48 = vrot.slane %v1038_v45, 4 }
  0x99   : > { %405 = vrot.lane.b32.xlu1 %v3108_v8, %s2963_s24  ;;  %403 = vrot.lane.b32.xlu0 %v3111_v9, %s2963_s24 }
  0x9a   : > { %v1090_v50 = vsel %vm295_vm1, %v1063_v48, %v1064_v47  ;;  %v1088_v51 = vsel %vm295_vm1, %v1062_v46, %v1063_v48 }
  0x9b   : > { %v1091_v53 = vsel %vm1072_vm3, %v1038_v45, %v1090_v50  ;;  %v865_v54 = vpop.permute.xlu1 %864  ;;  %v863_v55 = vpop.permute.xlu0 %862  ;;  %v1089_v56 = vsel %vm1072_vm3, %v1036_v40, %v1088_v51  ;;  %v3265_v51 = vld [vmem:[%s3002_s18 + $0x74] sm:$0xff] }
  0x9c   : > { %v2850_v58 = vcombine.high %v1073_v52, %v1089_v56  ;;  %v2852_v59 = vcombine.high %v1075_v57, %v1091_v53  ;;  %v2849_v60 = vcombine.low %v1073_v52, %v1089_v56  ;;  %v2851_v61 = vcombine.low %v1075_v57, %v1091_v53  ;;  %v3268_v52 = vld [vmem:[%s3002_s18 + $0x6c] sm:$0xff] }
  0x9d   : > { %423 = vrot.lane.b32.xlu1 %v3122_v10, %s2963_s24  ;;  %421 = vrot.lane.b32.xlu0 %v3125_v11, %s2963_s24  ;;  %v899_v62 = vrot.slane %v865_v54, 4  ;;  %v898_v63 = vrot.slane %v863_v55, 4 }
  0x9e   : > { %2329 = vmatprep.subr.bf16.mxu0 %v2850_v58  ;;  %2370 = vmatprep.subr.bf16.mxu1 %v2852_v59 }
  0x9f   : > { %2330 = vmatpush1.bf16.msra.mxu0 %v2849_v60  ;;  %2371 = vmatpush1.bf16.msra.mxu1 %v2851_v61  ;;  %v881_v0 = vpop.permute.xlu1 %880  ;;  %v3207_v4 = vpop.permute.xlu0 %866  ;;  %v916_v14 = vsel %vm295_vm1, %v898_v63, %v899_v62 }
  0xa0   : > { %v900_v13 = vrot.slane %v3207_v4, 4  ;;  %v907_v18 = vrot.slane %v881_v0, 4  ;;  %v918_v26 = vsel %vm917_vm4, %v863_v55, %v916_v14 }
  0xa1   : > { %249 = vrot.lane.b32.xlu1 %v3108_v8, %s2964_s25  ;;  %247 = vrot.lane.b32.xlu0 %v3111_v9, %s2964_s25 }
  0xa2   : > { %v919_v23 = vsel %vm295_vm1, %v899_v62, %v900_v13 }
  0xa3   : > { %v3215_v15 = vpop.permute.xlu1 %884  ;;  %v883_v16 = vpop.permute.xlu0 %882  ;;  %v920_v31 = vsel %vm917_vm4, %v865_v54, %v919_v23 }
  0xa4   : > { %v909_v19 = vrot.slane %v3215_v15, 4  ;;  %v908_v21 = vrot.slane %v883_v16, 4 }
  0xa5   : > { %267 = vrot.lane.b32.xlu1 %v3122_v10, %s2964_s25  ;;  %265 = vrot.lane.b32.xlu0 %v3125_v11, %s2964_s25 }
  0xa6   : > { %v935_v24 = vsel %vm295_vm1, %v908_v21, %v909_v19  ;;  %v933_v25 = vsel %vm295_vm1, %v907_v18, %v908_v21 }
  0xa7   : > { %v936_v27 = vsel %vm917_vm4, %v883_v16, %v935_v24  ;;  %v710_v28 = vpop.permute.xlu1 %709  ;;  %v708_v29 = vpop.permute.xlu0 %707  ;;  %v934_v30 = vsel %vm917_vm4, %v881_v0, %v933_v25 }
  0xa8   : > { %v2834_v32 = vcombine.high %v918_v26, %v934_v30  ;;  %v2836_v33 = vcombine.high %v920_v31, %v936_v27  ;;  %v2833_v34 = vcombine.low %v918_v26, %v934_v30  ;;  %v2835_v35 = vcombine.low %v920_v31, %v936_v27 }
  0xa9   : > { %1335 = vrot.lane.b32.xlu1 %v3108_v8, %s2965_s26  ;;  %1333 = vrot.lane.b32.xlu0 %v3111_v9, %s2965_s26  ;;  %v744_v36 = vrot.slane %v710_v28, 4  ;;  %v743_v37 = vrot.slane %v708_v29, 4  ;;  %v3245_v8 = vld [vmem:[%s3002_s18 + $0x30] sm:$0xff]  ;;  %v3248_v9 = vld [vmem:[%s3002_s18 + $0x28] sm:$0xff] }
  0xaa   : > { %2331 = vmatprep.subr.bf16.mxu0 %v2834_v32  ;;  %2372 = vmatprep.subr.bf16.mxu1 %v2836_v33 }
  0xab   : > { %2332 = vmatpush1.bf16.msra.mxu0 %v2833_v34  ;;  %2373 = vmatpush1.bf16.msra.mxu1 %v2835_v35  ;;  %v726_v38 = vpop.permute.xlu1 %725  ;;  %v3237_v39 = vpop.permute.xlu0 %711  ;;  %v761_v43 = vsel %vm295_vm1, %v743_v37, %v744_v36 }
  0xac   : > { %v745_v40 = vrot.slane %v3237_v39, 4  ;;  %v752_v48 = vrot.slane %v726_v38, 4  ;;  %v763_v54 = vsel %vm762_vm5, %v708_v29, %v761_v43 }
  0xad   : > { %1353 = vrot.lane.b32.xlu1 %v3122_v10, %s2965_s26  ;;  %1351 = vrot.lane.b32.xlu0 %v3125_v11, %s2965_s26 }
  0xae   : > { %v764_v10 = vsel %vm295_vm1, %v744_v36, %v745_v40 }
  0xaf   : > { %v3251_v45 = vpop.permute.xlu1 %729  ;;  %v728_v46 = vpop.permute.xlu0 %727  ;;  %v765_v59 = vsel %vm762_vm5, %v710_v28, %v764_v10 }
  0xb0   : > { %v754_v49 = vrot.slane %v3251_v45, 4  ;;  %v753_v50 = vrot.slane %v728_v46, 4 }
  0xb1   : > { %1184 = vrot.lane.b32.xlu1 %v3245_v8, %s2958_s19  ;;  %1182 = vrot.lane.b32.xlu0 %v3248_v9, %s2958_s19 }
  0xb2   : > { %v780_v11 = vsel %vm295_vm1, %v753_v50, %v754_v49  ;;  %v778_v53 = vsel %vm295_vm1, %v752_v48, %v753_v50 }
  0xb3   : > { %v781_v55 = vsel %vm762_vm5, %v728_v46, %v780_v11  ;;  %v555_v56 = vpop.permute.xlu1 %554  ;;  %v553_v57 = vpop.permute.xlu0 %552  ;;  %v779_v58 = vsel %vm762_vm5, %v726_v38, %v778_v53 }
  0xb4   : > { %v2818_v60 = vcombine.high %v763_v54, %v779_v58  ;;  %v2820_v61 = vcombine.high %v765_v59, %v781_v55  ;;  %v2817_v62 = vcombine.low %v763_v54, %v779_v58  ;;  %v2819_v63 = vcombine.low %v765_v59, %v781_v55 }
  0xb5   : > { %1202 = vrot.lane.b32.xlu1 %v3265_v51, %s2958_s19  ;;  %1200 = vrot.lane.b32.xlu0 %v3268_v52, %s2958_s19  ;;  %v589_v0 = vrot.slane %v555_v56, 4  ;;  %v588_v14 = vrot.slane %v553_v57, 4 }
  0xb6   : > { %2333 = vmatprep.subr.bf16.mxu0 %v2818_v60  ;;  %2374 = vmatprep.subr.bf16.mxu1 %v2820_v61 }
  0xb7   : > { %2334 = vmatpush1.bf16.msra.mxu0 %v2817_v62  ;;  %2375 = vmatpush1.bf16.msra.mxu1 %v2819_v63  ;;  %v571_v16 = vpop.permute.xlu1 %570  ;;  %v3279_v18 = vpop.permute.xlu0 %556  ;;  %v606_v23 = vsel %vm295_vm1, %v588_v14, %v589_v0 }
  0xb8   : > { %v590_v21 = vrot.slane %v3279_v18, 4  ;;  %v597_v26 = vrot.slane %v571_v16, 4  ;;  %v608_v32 = vsel %vm607_vm6, %v553_v57, %v606_v23 }
  0xb9   : > { %1029 = vrot.lane.b32.xlu1 %v3245_v8, %s2959_s20  ;;  %1027 = vrot.lane.b32.xlu0 %v3248_v9, %s2959_s20 }
  0xba   : > { %v609_v29 = vsel %vm295_vm1, %v589_v0, %v590_v21 }
  0xbb   : > { %v3287_v24 = vpop.permute.xlu1 %574  ;;  %v573_v25 = vpop.permute.xlu0 %572  ;;  %v610_v37 = vsel %vm607_vm6, %v555_v56, %v609_v29 }
  0xbc   : > { %v599_v27 = vrot.slane %v3287_v24, 4  ;;  %v598_v28 = vrot.slane %v573_v25, 4 }
  0xbd   : > { %1047 = vrot.lane.b32.xlu1 %v3265_v51, %s2959_s20  ;;  %1045 = vrot.lane.b32.xlu0 %v3268_v52, %s2959_s20 }
  0xbe   : > { %v625_v30 = vsel %vm295_vm1, %v598_v28, %v599_v27  ;;  %v623_v31 = vsel %vm295_vm1, %v597_v26, %v598_v28 }
  0xbf   : > { %v626_v33 = vsel %vm607_vm6, %v573_v25, %v625_v30  ;;  %v400_v34 = vpop.permute.xlu1 %399  ;;  %v398_v35 = vpop.permute.xlu0 %397  ;;  %v624_v36 = vsel %vm607_vm6, %v571_v16, %v623_v31 }
  0xc0   : > { %v2802_v38 = vcombine.high %v608_v32, %v624_v36  ;;  %v2804_v43 = vcombine.high %v610_v37, %v626_v33  ;;  %v2801_v46 = vcombine.low %v608_v32, %v624_v36  ;;  %v2803_v48 = vcombine.low %v610_v37, %v626_v33 }
  0xc1   : > { %874 = vrot.lane.b32.xlu1 %v3245_v8, %s2960_s21  ;;  %872 = vrot.lane.b32.xlu0 %v3248_v9, %s2960_s21  ;;  %v434_v50 = vrot.slane %v400_v34, 4  ;;  %v433_v10 = vrot.slane %v398_v35, 4 }
  0xc2   : > { %2335 = vmatprep.subr.bf16.mxu0 %v2802_v38  ;;  %2376 = vmatprep.subr.bf16.mxu1 %v2804_v43 }
  0xc3   : > { %2336 = vmatpush1.bf16.msra.mxu0 %v2801_v46  ;;  %2377 = vmatpush1.bf16.msra.mxu1 %v2803_v48  ;;  %v416_v11 = vpop.permute.xlu1 %415  ;;  %v3309_v53 = vpop.permute.xlu0 %401  ;;  %v451_v55 = vsel %vm295_vm1, %v433_v10, %v434_v50 }
  0xc4   : > { %v435_v54 = vrot.slane %v3309_v53, 4  ;;  %v442_v58 = vrot.slane %v416_v11, 4  ;;  %v453_v0 = vsel %vm452_vm7, %v398_v35, %v451_v55 }
  0xc5   : > { %892 = vrot.lane.b32.xlu1 %v3265_v51, %s2960_s21  ;;  %890 = vrot.lane.b32.xlu0 %v3268_v52, %s2960_s21 }
  0xc6   : > { %v454_v61 = vsel %vm295_vm1, %v434_v50, %v435_v54 }
  0xc7   : > { %v3317_v56 = vpop.permute.xlu1 %419  ;;  %v418_v57 = vpop.permute.xlu0 %417  ;;  %v455_v26 = vsel %vm452_vm7, %v400_v34, %v454_v61 }
  0xc8   : > { %v444_v59 = vrot.slane %v3317_v56, 4  ;;  %v443_v60 = vrot.slane %v418_v57, 4 }
  0xc9   : > { %719 = vrot.lane.b32.xlu1 %v3245_v8, %s2961_s22  ;;  %717 = vrot.lane.b32.xlu0 %v3248_v9, %s2961_s22 }
  0xca   : > { %v470_v62 = vsel %vm295_vm1, %v443_v60, %v444_v59  ;;  %v468_v63 = vsel %vm295_vm1, %v442_v58, %v443_v60 }
  0xcb   : > { %v471_v14 = vsel %vm452_vm7, %v418_v57, %v470_v62  ;;  %v244_v16 = vpop.permute.xlu1 %243  ;;  %v242_v23 = vpop.permute.xlu0 %241  ;;  %v469_v25 = vsel %vm452_vm7, %v416_v11, %v468_v63 }
  0xcc   : > { %v2786_v28 = vcombine.high %v453_v0, %v469_v25  ;;  %v2788_v29 = vcombine.high %v455_v26, %v471_v14  ;;  %v2785_v30 = vcombine.low %v453_v0, %v469_v25  ;;  %v2787_v31 = vcombine.low %v455_v26, %v471_v14 }
  0xcd   : > { %737 = vrot.lane.b32.xlu1 %v3265_v51, %s2961_s22  ;;  %735 = vrot.lane.b32.xlu0 %v3268_v52, %s2961_s22  ;;  %v278_v32 = vrot.slane %v244_v16, 4  ;;  %v277_v33 = vrot.slane %v242_v23, 4  ;;  %v2754_v25 = vcombine.high %v3006_v1, %v3012_v2  ;;  %v2756_v26 = vcombine.high %v3015_v3, %v3019_v5 }
  0xce   : > { %2337 = vmatprep.subr.bf16.mxu0 %v2786_v28  ;;  %2378 = vmatprep.subr.bf16.mxu1 %v2788_v29 }
  0xcf   : > { %2338 = vmatpush1.bf16.msra.mxu0 %v2785_v30  ;;  %2379 = vmatpush1.bf16.msra.mxu1 %v2787_v31  ;;  %v260_v35 = vpop.permute.xlu1 %259  ;;  %v3339_v36 = vpop.permute.xlu0 %245  ;;  %v296_v37 = vsel %vm295_vm1, %v277_v33, %v278_v32  ;;  %v2755_v33 = vcombine.low %v3015_v3, %v3019_v5 }
  0xd0   : > { %v279_v34 = vrot.slane %v3339_v36, 4  ;;  %v286_v46 = vrot.slane %v260_v35, 4  ;;  %v298_v57 = vsel %vm297_vm8, %v242_v23, %v296_v37 }
  0xd1   : > { %564 = vrot.lane.b32.xlu1 %v3245_v8, %s2962_s23  ;;  %562 = vrot.lane.b32.xlu0 %v3248_v9, %s2962_s23 }
  0xd2   : > { %v299_v10 = vsel %vm295_vm1, %v278_v32, %v279_v34  ;;  %v2753_v32 = vcombine.low %v3006_v1, %v3012_v2 }
  0xd3   : > { %v3347_v38 = vpop.permute.xlu1 %263  ;;  %v262_v43 = vpop.permute.xlu0 %261  ;;  %v300_v63 = vsel %vm297_vm8, %v244_v16, %v299_v10 }
  0xd4   : > { %v288_v48 = vrot.slane %v3347_v38, 4  ;;  %v287_v50 = vrot.slane %v262_v43, 4 }
  0xd5   : > { %582 = vrot.lane.b32.xlu1 %v3265_v51, %s2962_s23  ;;  %580 = vrot.lane.b32.xlu0 %v3268_v52, %s2962_s23 }
  0xd6   : > { %v315_v11 = vsel %vm295_vm1, %v287_v50, %v288_v48  ;;  %v313_v55 = vsel %vm295_vm1, %v286_v46, %v287_v50 }
  0xd7   : > { %v316_v58 = vsel %vm297_vm8, %v262_v43, %v315_v11  ;;  %v1330_v60 = vpop.permute.xlu1 %1329  ;;  %v1328_v61 = vpop.permute.xlu0 %1327  ;;  %v314_v62 = vsel %vm297_vm8, %v260_v35, %v313_v55 }
  0xd8   : > { %v2770_v0 = vcombine.high %v298_v57, %v314_v62  ;;  %v2772_v14 = vcombine.high %v300_v63, %v316_v58  ;;  %v2769_v23 = vcombine.low %v298_v57, %v314_v62  ;;  %v2771_v28 = vcombine.low %v300_v63, %v316_v58 }
  0xd9   : > { %409 = vrot.lane.b32.xlu1 %v3245_v8, %s2963_s24  ;;  %407 = vrot.lane.b32.xlu0 %v3248_v9, %s2963_s24  ;;  %v1364_v29 = vrot.slane %v1330_v60, 4  ;;  %v1363_v16 = vrot.slane %v1328_v61, 4 }
  0xda   : > { %2339 = vmatprep.subr.bf16.mxu0 %v2770_v0  ;;  %2380 = vmatprep.subr.bf16.mxu1 %v2772_v14 }
  0xdb   : > { %v1346_v30 = vpop.permute.xlu1 %1345  ;;  %2340 = vmatpush1.bf16.msra.mxu0 %v2769_v23  ;;  %2381 = vmatpush1.bf16.msra.mxu1 %v2771_v28  ;;  %v3373_v31 = vpop.permute.xlu0 %1331  ;;  %v1381_v37 = vsel %vm295_vm1, %v1363_v16, %v1364_v29  ;;  %v3412_v28 = vcombine.low %v3098_v6, %v3098_v6 }
  0xdc   : > { %v1365_v35 = vrot.slane %v3373_v31, 4  ;;  %2341 = vmatprep.subr.bf16.mxu0 %v2754_v25  ;;  %2382 = vmatprep.subr.bf16.mxu1 %v2756_v26  ;;  %v1372_v1 = vrot.slane %v1346_v30, 4  ;;  %v1383_v11 = vsel %vm1382_vm9, %v1328_v61, %v1381_v37 }
  0xdd   : > { %427 = vrot.lane.b32.xlu1 %v3265_v51, %s2963_s24  ;;  %425 = vrot.lane.b32.xlu0 %v3268_v52, %s2963_s24 }
  0xde   : > { %v1384_v5 = vsel %vm295_vm1, %v1364_v29, %v1365_v35 }
  0xdf   : > { %v3385_v43 = vpop.permute.xlu1 %1349  ;;  %v1348_v46 = vpop.permute.xlu0 %1347  ;;  %2342 = vmatpush1.bf16.msra.mxu0 %v2753_v32  ;;  %2383 = vmatpush1.bf16.msra.mxu1 %v2755_v33  ;;  %v1385_v63 = vsel %vm1382_vm9, %v1330_v60, %v1384_v5 }
  0xe0   : > { %v1374_v2 = vrot.slane %v3385_v43, 4  ;;  %v1373_v3 = vrot.slane %v1348_v46, 4 }
  0xe1   : > { %253 = vrot.lane.b32.xlu1 %v3245_v8, %s2964_s25  ;;  %251 = vrot.lane.b32.xlu0 %v3248_v9, %s2964_s25 }
  0xe2   : > { %v1400_v50 = vsel %vm295_vm1, %v1373_v3, %v1374_v2  ;;  %v1398_v10 = vsel %vm295_vm1, %v1372_v1, %v1373_v3 }
  0xe3   : > { %v1401_v55 = vsel %vm1382_vm9, %v1348_v46, %v1400_v50  ;;  %v3401_v57 = vpop.permute.xlu1 %1180  ;;  %v1179_v58 = vpop.permute.xlu0 %1178  ;;  %v1399_v62 = vsel %vm1382_vm9, %v1346_v30, %v1398_v10 }
  0xe4   : > { %v1212_v0 = vrot.slane %v3401_v57, 4  ;;  %v1211_v14 = vrot.slane %v1179_v58, 4  ;;  %v2882_v25 = vcombine.high %v1383_v11, %v1399_v62  ;;  %v2884_v26 = vcombine.high %v1385_v63, %v1401_v55 }
  0xe5   : > { %271 = vrot.lane.b32.xlu1 %v3265_v51, %s2964_s25  ;;  %269 = vrot.lane.b32.xlu0 %v3268_v52, %s2964_s25  ;;  %v2881_v61 = vcombine.low %v1383_v11, %v1399_v62  ;;  %v2883_v23 = vcombine.low %v1385_v63, %v1401_v55  ;;  %v3454_v55 = vld [vmem:[%s3002_s18 + $0x38] sm:$0xff] }
  0xe6   : > { %2357 = vmatprep.subr.bf16.mxu0 %v2882_v25  ;;  %2398 = vmatprep.subr.bf16.mxu1 %v2884_v26  ;;  %v1233_v60 = vsel %vm295_vm1, %v1211_v14, %v1212_v0  ;;  %v1231_v30 = vsel %vm295_vm1, %v1210_v17, %v1211_v14  ;;  %v1153_v26 = vld [vmem:[%s3002_s18 + $0x84] sm:$0xf] }
  0xe7   : > { %v3417_v29 = vpop.permute.xlu1 %1198  ;;  %v1197_v16 = vpop.permute.xlu0 %1196  ;;  %2358 = vmatpush2.bf16.msra.mxu0 %v2881_v61  ;;  %2399 = vmatpush2.bf16.msra.mxu1 %v2883_v23  ;;  %v1234_v6 = vsel %vm1227_vm2, %v1179_v58, %v1233_v60  ;;  %v1232_v1 = vsel %vm1227_vm2, %v3143_v12, %v1231_v30  ;;  %v3476_v61 = vld [vmem:[%s3002_s18 + $0x7c] sm:$0xff] }
  0xe8   : > { %v1221_v32 = vrot.slane %v3417_v29, 4  ;;  %v1220_v33 = vrot.slane %v1197_v16, 4 }
  0xe9   : > { %1339 = vrot.lane.b32.xlu1 %v3245_v8, %s2965_s26  ;;  %1337 = vrot.lane.b32.xlu0 %v3248_v9, %s2965_s26 }
  0xea   : > { %v1247_v37 = vsel %vm295_vm1, %v1219_v22, %v1220_v33  ;;  %v1249_v46 = vsel %vm295_vm1, %v1220_v33, %v1221_v32  ;;  %2360 = vmatmul.mubr.bf16.vlgmr.msra.gmra.mxu0 %v3412_v28  ;;  %2401 = vmatmul.mubr.bf16.vlgmr.msra.gmra.mxu1 %v3412_v28 }
  0xeb   : > { %v1250_v17 = vsel %vm1227_vm2, %v1197_v16, %v1249_v46  ;;  %v3437_v8 = vpop.permute.xlu1 %1025  ;;  %v1024_v9 = vpop.permute.xlu0 %1023  ;;  %v1248_v22 = vsel %vm1227_vm2, %v3154_v20, %v1247_v37  ;;  %2899 = vmatprep.mubr.msk.bf16.mxu0 %vm2323_vm0, %v3105_v7  ;;  %2900 = vmatprep.mubr.msk.bf16.mxu1 %vm2323_vm0, %v3105_v7  ;;  %v1144_v20 = vld [vmem:[%s3002_s18 + $0x40] sm:$0xf] }
  0xec   : > { %v2871_v3 = vcombine.low %v1234_v6, %v1250_v17  ;;  %v2872_v5 = vcombine.high %v1234_v6, %v1250_v17  ;;  %v1057_v50 = vrot.slane %v3437_v8, 4  ;;  %v1056_v10 = vrot.slane %v1024_v9, 4 }
  0xed   : > { %1357 = vrot.lane.b32.xlu1 %v3265_v51, %s2965_s26  ;;  %1355 = vrot.lane.b32.xlu0 %v3268_v52, %s2965_s26  ;;  %v2869_v12 = vcombine.low %v1232_v1, %v1248_v22  ;;  %v2870_v11 = vcombine.high %v1232_v1, %v1248_v22  ;;  %v989_v22 = vld [vmem:[%s3002_s18 + $0x40] sm:$0xf] }
  0xee   : > { %2450 = vmatprep.subr.bf16.mxu1 %v2872_v5  ;;  %v1076_v51 = vsel %vm295_vm1, %v1055_v42, %v1056_v10  ;;  %v1078_v52 = vsel %vm295_vm1, %v1056_v10, %v1057_v50 }
  0xef   : > { %2409 = vmatprep.subr.bf16.mxu0 %v2870_v11  ;;  %v3456_v58 = vpop.permute.xlu1 %1043  ;;  %v1042_v62 = vpop.permute.xlu0 %1041  ;;  %2451 = vmatpush1.bf16.msra.mxu1 %v2871_v3  ;;  %v1079_v23 = vsel %vm1072_vm3, %v1024_v9, %v1078_v52  ;;  %v1077_v33 = vsel %vm1072_vm3, %v3177_v41, %v1076_v51 }
  0xf0   : > { %v1066_v63 = vrot.slane %v3456_v58, 4  ;;  %v1065_v14 = vrot.slane %v1042_v62, 4  ;;  %2410 = vmatpush1.bf16.msra.mxu0 %v2869_v12 }
  0xf1   : > { %1188 = vrot.lane.b32.xlu1 %v1144_v20, %s2958_s19  ;;  %1186 = vrot.lane.b32.xlu0 %v3454_v55, %s2958_s19  ;;  %v998_v20 = vld [vmem:[%s3002_s18 + $0x84] sm:$0xf] }
  0xf2   : > { %v1092_v25 = vsel %vm295_vm1, %v1064_v47, %v1065_v14  ;;  %v1094_v42 = vsel %vm295_vm1, %v1065_v14, %v1066_v63 }
  0xf3   : > { %v1095_v60 = vsel %vm1072_vm3, %v1042_v62, %v1094_v42  ;;  %v3480_v16 = vpop.permute.xlu1 %870  ;;  %v869_v30 = vpop.permute.xlu0 %868  ;;  %v1093_v47 = vsel %vm1072_vm3, %v3185_v44, %v1092_v25 }
  0xf4   : > { %v2855_v6 = vcombine.low %v1079_v23, %v1095_v60  ;;  %v2856_v37 = vcombine.high %v1079_v23, %v1095_v60  ;;  %v902_v46 = vrot.slane %v3480_v16, 4  ;;  %v901_v17 = vrot.slane %v869_v30, 4 }
  0xf5   : > { %1206 = vrot.lane.b32.xlu1 %v1153_v26, %s2958_s19  ;;  %1204 = vrot.lane.b32.xlu0 %v3476_v61, %s2958_s19  ;;  %v2853_v9 = vcombine.low %v1077_v33, %v1093_v47  ;;  %v2854_v1 = vcombine.high %v1077_v33, %v1093_v47  ;;  %v834_v47 = vld [vmem:[%s3002_s18 + $0x40] sm:$0xf] }
  0xf6   : > { %2452 = vmatprep.subr.bf16.mxu1 %v2856_v37  ;;  %v921_v44 = vsel %vm295_vm1, %v900_v13, %v901_v17  ;;  %v923_v5 = vsel %vm295_vm1, %v901_v17, %v902_v46 }
  0xf7   : > { %2411 = vmatprep.subr.bf16.mxu0 %v2854_v1  ;;  %v3491_v41 = vpop.permute.xlu1 %888  ;;  %v887_v3 = vpop.permute.xlu0 %886  ;;  %2453 = vmatpush1.bf16.msra.mxu1 %v2855_v6  ;;  %v924_v62 = vsel %vm917_vm4, %v869_v30, %v923_v5  ;;  %v922_v25 = vsel %vm917_vm4, %v3207_v4, %v921_v44 }
  0xf8   : > { %v911_v10 = vrot.slane %v3491_v41, 4  ;;  %v910_v12 = vrot.slane %v887_v3, 4  ;;  %2412 = vmatpush1.bf16.msra.mxu0 %v2853_v9 }
  0xf9   : > { %1033 = vrot.lane.b32.xlu1 %v989_v22, %s2959_s20  ;;  %1031 = vrot.lane.b32.xlu0 %v3454_v55, %s2959_s20 }
  0xfa   : > { %v937_v11 = vsel %vm295_vm1, %v909_v19, %v910_v12  ;;  %v939_v13 = vsel %vm295_vm1, %v910_v12, %v911_v10 }
  0xfb   : > { %v940_v51 = vsel %vm917_vm4, %v887_v3, %v939_v13  ;;  %v3512_v52 = vpop.permute.xlu1 %715  ;;  %v714_v14 = vpop.permute.xlu0 %713  ;;  %v938_v42 = vsel %vm917_vm4, %v3215_v15, %v937_v11 }
  0xfc   : > { %v2839_v19 = vcombine.low %v924_v62, %v940_v51  ;;  %v2840_v26 = vcombine.high %v924_v62, %v940_v51  ;;  %v747_v23 = vrot.slane %v3512_v52, 4  ;;  %v746_v60 = vrot.slane %v714_v14, 4 }
  0xfd   : > { %1051 = vrot.lane.b32.xlu1 %v998_v20, %s2959_s20  ;;  %1049 = vrot.lane.b32.xlu0 %v3476_v61, %s2959_s20  ;;  %v2837_v30 = vcombine.low %v922_v25, %v938_v42  ;;  %v2838_v33 = vcombine.high %v922_v25, %v938_v42 }
  0xfe   : > { %2454 = vmatprep.subr.bf16.mxu1 %v2840_v26  ;;  %v768_v4 = vsel %vm295_vm1, %v746_v60, %v747_v23  ;;  %v766_v37 = vsel %vm295_vm1, %v745_v40, %v746_v60  ;;  %v843_v40 = vld [vmem:[%s3002_s18 + $0x84] sm:$0xf] }
  0xff   : > { %2413 = vmatprep.subr.bf16.mxu0 %v2838_v33  ;;  %v3526_v15 = vpop.permute.xlu1 %733  ;;  %v732_v6 = vpop.permute.xlu0 %731  ;;  %2455 = vmatpush1.bf16.msra.mxu1 %v2839_v19  ;;  %v769_v1 = vsel %vm762_vm5, %v714_v14, %v768_v4  ;;  %v767_v11 = vsel %vm762_vm5, %v3237_v39, %v766_v37  ;;  %v2966_v14 = vmov 0   ;;  %v679_v39 = vld [vmem:[%s3002_s18 + $0x40] sm:$0xf]  ;;  %v688_v4 = vld [vmem:[%s3002_s18 + $0x84] sm:$0xf] }
 0x100   : > { %v756_v17 = vrot.slane %v3526_v15, 4  ;;  %v755_v9 = vrot.slane %v732_v6, 4  ;;  %2414 = vmatpush1.bf16.msra.mxu0 %v2837_v30  ;;  %2925 = vset.pattern.permute.xlu0 %v2966_v14 }
 0x101   : > { %878 = vrot.lane.b32.xlu1 %v834_v47, %s2960_s21  ;;  %876 = vrot.lane.b32.xlu0 %v3454_v55, %s2960_s21 }
 0x102   : > { %v782_v22 = vsel %vm295_vm1, %v754_v49, %v755_v9  ;;  %v784_v3 = vsel %vm295_vm1, %v755_v9, %v756_v17 }
 0x103   : > { %v785_v44 = vsel %vm762_vm5, %v732_v6, %v784_v3  ;;  %v3544_v5 = vpop.permute.xlu1 %560  ;;  %v559_v12 = vpop.permute.xlu0 %558  ;;  %v783_v13 = vsel %vm762_vm5, %v3251_v45, %v782_v22 }
 0x104   : > { %v2823_v20 = vcombine.low %v769_v1, %v785_v44  ;;  %v2824_v62 = vcombine.high %v769_v1, %v785_v44  ;;  %v592_v49 = vrot.slane %v3544_v5, 4  ;;  %v591_v51 = vrot.slane %v559_v12, 4 }
 0x105   : > { %896 = vrot.lane.b32.xlu1 %v843_v40, %s2960_s21  ;;  %894 = vrot.lane.b32.xlu0 %v3476_v61, %s2960_s21  ;;  %v2821_v25 = vcombine.low %v767_v11, %v783_v13  ;;  %v2822_v42 = vcombine.high %v767_v11, %v783_v13 }
 0x106   : > { %2456 = vmatprep.subr.bf16.mxu1 %v2824_v62  ;;  %v611_v26 = vsel %vm295_vm1, %v590_v21, %v591_v51  ;;  %v613_v60 = vsel %vm295_vm1, %v591_v51, %v592_v49 }
 0x107   : > { %2415 = vmatprep.subr.bf16.mxu0 %v2822_v42  ;;  %v3555_v19 = vpop.permute.xlu1 %578  ;;  %v577_v45 = vpop.permute.xlu0 %576  ;;  %2457 = vmatpush1.bf16.msra.mxu1 %v2823_v20  ;;  %v614_v6 = vsel %vm607_vm6, %v559_v12, %v613_v60  ;;  %v612_v22 = vsel %vm607_vm6, %v3279_v18, %v611_v26  ;;  %v524_v20 = vld [vmem:[%s3002_s18 + $0x40] sm:$0xf] }
 0x108   : > { %v601_v30 = vrot.slane %v3555_v19, 4  ;;  %v600_v33 = vrot.slane %v577_v45, 4  ;;  %2416 = vmatpush1.bf16.msra.mxu0 %v2821_v25 }
 0x109   : > { %723 = vrot.lane.b32.xlu1 %v679_v39, %s2961_s22  ;;  %721 = vrot.lane.b32.xlu0 %v3454_v55, %s2961_s22  ;;  %v533_v39 = vld [vmem:[%s3002_s18 + $0x84] sm:$0xf] }
 0x10a   : > { %v627_v47 = vsel %vm295_vm1, %v599_v27, %v600_v33  ;;  %v629_v21 = vsel %vm295_vm1, %v600_v33, %v601_v30 }
 0x10b   : > { %v630_v37 = vsel %vm607_vm6, %v577_v45, %v629_v21  ;;  %v3576_v9 = vpop.permute.xlu1 %405  ;;  %v404_v1 = vpop.permute.xlu0 %403  ;;  %v628_v3 = vsel %vm607_vm6, %v3287_v24, %v627_v47 }
 0x10c   : > { %v2807_v27 = vcombine.low %v614_v6, %v630_v37  ;;  %v2808_v40 = vcombine.high %v614_v6, %v630_v37  ;;  %v437_v44 = vrot.slane %v3576_v9, 4  ;;  %v436_v11 = vrot.slane %v404_v1, 4 }
 0x10d   : > { %741 = vrot.lane.b32.xlu1 %v688_v4, %s2961_s22  ;;  %739 = vrot.lane.b32.xlu0 %v3476_v61, %s2961_s22  ;;  %v2805_v12 = vcombine.low %v612_v22, %v628_v3  ;;  %v2806_v13 = vcombine.high %v612_v22, %v628_v3  ;;  %v369_v3 = vld [vmem:[%s3002_s18 + $0x40] sm:$0xf] }
 0x10e   : > { %2458 = vmatprep.subr.bf16.mxu1 %v2808_v40  ;;  %v456_v24 = vsel %vm295_vm1, %v435_v54, %v436_v11  ;;  %v458_v51 = vsel %vm295_vm1, %v436_v11, %v437_v44 }
 0x10f   : > { %2417 = vmatprep.subr.bf16.mxu0 %v2806_v13  ;;  %v3587_v18 = vpop.permute.xlu1 %423  ;;  %v422_v62 = vpop.permute.xlu0 %421  ;;  %2459 = vmatpush1.bf16.msra.mxu1 %v2807_v27  ;;  %v459_v45 = vsel %vm452_vm7, %v404_v1, %v458_v51  ;;  %v457_v47 = vsel %vm452_vm7, %v3309_v53, %v456_v24 }
 0x110   : > { %v446_v14 = vrot.slane %v3587_v18, 4  ;;  %v445_v25 = vrot.slane %v422_v62, 4  ;;  %2418 = vmatpush1.bf16.msra.mxu0 %v2805_v12 }
 0x111   : > { %568 = vrot.lane.b32.xlu1 %v524_v20, %s2962_s23  ;;  %566 = vrot.lane.b32.xlu0 %v3454_v55, %s2962_s23  ;;  %v378_v20 = vld [vmem:[%s3002_s18 + $0x84] sm:$0xf] }
 0x112   : > { %v472_v42 = vsel %vm295_vm1, %v444_v59, %v445_v25  ;;  %v474_v54 = vsel %vm295_vm1, %v445_v25, %v446_v14 }
 0x113   : > { %v475_v26 = vsel %vm452_vm7, %v422_v62, %v474_v54  ;;  %v3608_v60 = vpop.permute.xlu1 %249  ;;  %v248_v33 = vpop.permute.xlu0 %247  ;;  %v473_v21 = vsel %vm452_vm7, %v3317_v56, %v472_v42 }
 0x114   : > { %v2791_v59 = vcombine.low %v459_v45, %v475_v26  ;;  %v2792_v4 = vcombine.high %v459_v45, %v475_v26  ;;  %v281_v6 = vrot.slane %v3608_v60, 4  ;;  %v280_v37 = vrot.slane %v248_v33, 4 }
 0x115   : > { %586 = vrot.lane.b32.xlu1 %v533_v39, %s2962_s23  ;;  %584 = vrot.lane.b32.xlu0 %v3476_v61, %s2962_s23  ;;  %v2789_v1 = vcombine.low %v457_v47, %v473_v21  ;;  %v2790_v22 = vcombine.high %v457_v47, %v473_v21 }
 0x116   : > { %2460 = vmatprep.subr.bf16.mxu1 %v2792_v4  ;;  %v301_v56 = vsel %vm295_vm1, %v279_v34, %v280_v37  ;;  %v303_v40 = vsel %vm295_vm1, %v280_v37, %v281_v6  ;;  %v2935_v37 = vld [vmem:[%s3002_s18 + $0x18] ss:$68 sps:$4 sm:$0xff]  }
 0x117   : > { %2419 = vmatprep.subr.bf16.mxu0 %v2790_v22  ;;  %v3619_v53 = vpop.permute.xlu1 %267  ;;  %v266_v27 = vpop.permute.xlu0 %265  ;;  %2461 = vmatpush1.bf16.msra.mxu1 %v2791_v59  ;;  %v304_v62 = vsel %vm297_vm8, %v248_v33, %v303_v40  ;;  %v302_v42 = vsel %vm297_vm8, %v3339_v36, %v301_v56  ;;  %v2937_v33 = vld [vmem:[%s3002_s18 + $0x1c] ss:$68 sps:$4 sm:$0xff]   ;;  %v2934_v59 = vld [vmem:[%s3002_s18 + $0x14] ss:$68 sps:$4 sm:$0xff]  }
 0x118   : > { %v290_v11 = vrot.slane %v3619_v53, 4  ;;  %v289_v12 = vrot.slane %v266_v27, 4  ;;  %2420 = vmatpush1.bf16.msra.mxu0 %v2789_v1  ;;  %v213_v36 = vld [vmem:[%s3002_s18 + $0x40] sm:$0xf]  ;;  %v2932_v56 = vld [vmem:[%s3002_s18 + $0x10] ss:$68 sps:$4 sm:$0xff]  }
 0x119   : > { %413 = vrot.lane.b32.xlu1 %v369_v3, %s2963_s24  ;;  %411 = vrot.lane.b32.xlu0 %v3454_v55, %s2963_s24 }
 0x11a   : > { %v317_v13 = vsel %vm295_vm1, %v288_v48, %v289_v12  ;;  %v319_v34 = vsel %vm295_vm1, %v289_v12, %v290_v11  ;;  %v222_v12 = vld [vmem:[%s3002_s18 + $0x84] sm:$0xf] }
 0x11b   : > { %v320_v24 = vsel %vm297_vm8, %v266_v27, %v319_v34  ;;  %v3640_v51 = vpop.permute.xlu1 %1335  ;;  %v1334_v25 = vpop.permute.xlu0 %1333  ;;  %v318_v48 = vsel %vm297_vm8, %v3347_v38, %v317_v13 }
 0x11c   : > { %v2775_v54 = vcombine.low %v304_v62, %v320_v24  ;;  %v2776_v39 = vcombine.high %v304_v62, %v320_v24  ;;  %v1367_v45 = vrot.slane %v3640_v51, 4  ;;  %v1366_v26 = vrot.slane %v1334_v25, 4 }
 0x11d   : > { %431 = vrot.lane.b32.xlu1 %v378_v20, %s2963_s24  ;;  %429 = vrot.lane.b32.xlu0 %v3476_v61, %s2963_s24  ;;  %v2773_v47 = vcombine.low %v302_v42, %v318_v48  ;;  %v2774_v21 = vcombine.high %v302_v42, %v318_v48 }
 0x11e   : > { %2462 = vmatprep.subr.bf16.mxu1 %v2776_v39  ;;  %v1386_v1 = vsel %vm295_vm1, %v1365_v35, %v1366_v26  ;;  %v1388_v22 = vsel %vm295_vm1, %v1366_v26, %v1367_v45 }
 0x11f   : > { %2421 = vmatprep.subr.bf16.mxu0 %v2774_v21  ;;  %v3653_v38 = vpop.permute.xlu1 %1353  ;;  %v1352_v4 = vpop.permute.xlu0 %1351  ;;  %2463 = vmatpush1.bf16.msra.mxu1 %v2775_v54  ;;  %v1389_v13 = vsel %vm1382_vm9, %v1334_v25, %v1388_v22  ;;  %v1387_v24 = vsel %vm1382_vm9, %v3373_v31, %v1386_v1 }
 0x120   : > { %v1376_v3 = vrot.slane %v3653_v38, 4  ;;  %v1375_v27 = vrot.slane %v1352_v4, 4  ;;  %2422 = vmatpush1.bf16.msra.mxu0 %v2773_v47  ;;  %2464 = vmatprep.subr.bf16.mxu1 %v2937_v33  ;;  %v1299_v33 = vld [vmem:[%s3002_s18 + $0x40] sm:$0xf] }
 0x121   : > { %257 = vrot.lane.b32.xlu1 %v213_v36, %s2964_s25  ;;  %255 = vrot.lane.b32.xlu0 %v3454_v55, %s2964_s25 }
 0x122   : > { %v1402_v40 = vsel %vm295_vm1, %v1374_v2, %v1375_v27  ;;  %v1404_v35 = vsel %vm295_vm1, %v1375_v27, %v1376_v3  ;;  %2423 = vmatprep.subr.bf16.mxu0 %v2934_v59 }
 0x123   : > { %v1405_v34 = vsel %vm1382_vm9, %v1352_v4, %v1404_v35  ;;  %v3676_v20 = vpop.permute.xlu1 %1184  ;;  %v1183_v62 = vpop.permute.xlu0 %1182  ;;  %2465 = vmatpush1.bf16.msra.mxu1 %v2935_v37  ;;  %v1403_v2 = vsel %vm1382_vm9, %v3385_v43, %v1402_v40 }
 0x124   : > { %v2887_v42 = vcombine.low %v1389_v13, %v1405_v34  ;;  %v2888_v48 = vcombine.high %v1389_v13, %v1405_v34  ;;  %v1214_v54 = vrot.slane %v3676_v20, 4  ;;  %v1213_v39 = vrot.slane %v1183_v62, 4  ;;  %2424 = vmatpush1.bf16.msra.mxu0 %v2932_v56  ;;  %v1591_v34 = vld [vmem:[%s4065_s2] sm:$0xff] }
 0x125   : > { %275 = vrot.lane.b32.xlu1 %v222_v12, %s2964_s25  ;;  %273 = vrot.lane.b32.xlu0 %v3476_v61, %s2964_s25  ;;  %v2885_v25 = vcombine.low %v1387_v24, %v1403_v2  ;;  %v2886_v26 = vcombine.high %v1387_v24, %v1403_v2 }
 0x126   : > { %2480 = vmatprep.subr.bf16.mxu1 %v2888_v48  ;;  %v1237_v31 = vsel %vm295_vm1, %v1213_v39, %v1214_v54  ;;  %v1235_v21 = vsel %vm295_vm1, %v1212_v0, %v1213_v39  ;;  %v1308_v0 = vld [vmem:[%s3002_s18 + $0x84] sm:$0xf] }
 0x127   : > { %2439 = vmatprep.subr.bf16.mxu0 %v2886_v26  ;;  %v3690_v43 = vpop.permute.xlu1 %1202  ;;  %v1201_v47 = vpop.permute.xlu0 %1200  ;;  %2481 = vmatpush2.bf16.msra.mxu1 %v2887_v42  ;;  %v1238_v4 = vsel %vm1227_vm2, %v1183_v62, %v1237_v31 }
 0x128   : > { %v1223_v36 = vrot.slane %v3690_v43, 4  ;;  %v1222_v59 = vrot.slane %v1201_v47, 4  ;;  %2440 = vmatpush2.bf16.msra.mxu0 %v2885_v25 }
 0x129   : > { %1343 = vrot.lane.b32.xlu1 %v1299_v33, %s2965_s26  ;;  %1341 = vrot.lane.b32.xlu0 %v3454_v55, %s2965_s26  ;;  %v1236_v55 = vsel %vm1227_vm2, %v3401_v57, %v1235_v21 }
 0x12a   : > { %v1251_v37 = vsel %vm295_vm1, %v1221_v32, %v1222_v59  ;;  %v1253_v1 = vsel %vm295_vm1, %v1222_v59, %v1223_v36  ;;  %2483 = vmatmul.mubr.bf16.vlgmr.msra.gmra.mxu1 %v3412_v28 }
 0x12b   : > { %v1254_v22 = vsel %vm1227_vm2, %v1201_v47, %v1253_v1  ;;  %v3709_v27 = vpop.permute.xlu1 %1029  ;;  %v1028_v56 = vpop.permute.xlu0 %1027  ;;  %v1252_v40 = vsel %vm1227_vm2, %v3417_v29, %v1251_v37  ;;  %2442 = vmatmul.mubr.bf16.vlgmr.msra.gmra.mxu0 %v3412_v28  ;;  %2902 = vmatprep.mubr.msk.bf16.mxu1 %vm2323_vm0, %v3105_v7 }
 0x12c   : > { %v2875_v32 = vcombine.low %v1238_v4, %v1254_v22  ;;  %v2876_v35 = vcombine.high %v1238_v4, %v1254_v22  ;;  %v1059_v12 = vrot.slane %v3709_v27, 4  ;;  %v1058_v13 = vrot.slane %v1028_v56, 4  ;;  %2901 = vmatprep.mubr.msk.bf16.mxu0 %vm2323_vm0, %v3105_v7 }
 0x12d   : > { %1361 = vrot.lane.b32.xlu1 %v1308_v0, %s2965_s26  ;;  %1359 = vrot.lane.b32.xlu0 %v3476_v61, %s2965_s26  ;;  %v2873_v57 = vcombine.low %v1236_v55, %v1252_v40  ;;  %v2874_v29 = vcombine.high %v1236_v55, %v1252_v40 }
 0x12e   : > { %2532 = vmatprep.subr.bf16.mxu1 %v2876_v35  ;;  %v1080_v2 = vsel %vm295_vm1, %v1057_v50, %v1058_v13  ;;  %v1082_v61 = vsel %vm295_vm1, %v1058_v13, %v1059_v12 }
 0x12f   : > { %2491 = vmatprep.subr.bf16.mxu0 %v2874_v29  ;;  %v3727_v62 = vpop.permute.xlu1 %1047  ;;  %v1046_v24 = vpop.permute.xlu0 %1045  ;;  %2533 = vmatpush1.bf16.msra.mxu1 %v2875_v32  ;;  %v1083_v26 = vsel %vm1072_vm3, %v1028_v56, %v1082_v61  ;;  %v1081_v47 = vsel %vm1072_vm3, %v3437_v8, %v1080_v2 }
 0x130   : > { %v1068_v42 = vrot.slane %v3727_v62, 4  ;;  %v1067_v48 = vrot.slane %v1046_v24, 4  ;;  %2492 = vmatpush1.bf16.msra.mxu0 %v2873_v57 }
 0x131   : > { %1594 = vperm.xlu0 %2925, %v1591_v34  }
 0x132   : > { %v1096_v39 = vsel %vm295_vm1, %v1066_v63, %v1067_v48  ;;  %v1098_v25 = vsel %vm295_vm1, %v1067_v48, %v1068_v42 }
 0x133   : > { %v1099_v50 = vsel %vm1072_vm3, %v1046_v24, %v1098_v25  ;;  %v3744_v33 = vpop.permute.xlu1 %874  ;;  %v873_v31 = vpop.permute.xlu0 %872  ;;  %v1097_v21 = vsel %vm1072_vm3, %v3456_v58, %v1096_v39 }
 0x134   : > { %v2859_v59 = vcombine.low %v1083_v26, %v1099_v50  ;;  %v2860_v4 = vcombine.high %v1083_v26, %v1099_v50  ;;  %v904_v63 = vrot.slane %v3744_v33, 4  ;;  %v903_v37 = vrot.slane %v873_v31, 4 }
 0x135   : > { %v2857_v1 = vcombine.low %v1081_v47, %v1097_v21  ;;  %v2858_v0 = vcombine.high %v1081_v47, %v1097_v21 }
 0x136   : > { %2534 = vmatprep.subr.bf16.mxu1 %v2860_v4  ;;  %v925_v8 = vsel %vm295_vm1, %v902_v46, %v903_v37  ;;  %v927_v58 = vsel %vm295_vm1, %v903_v37, %v904_v63 }
 0x137   : > { %2493 = vmatprep.subr.bf16.mxu0 %v2858_v0  ;;  %v3751_v22 = vpop.permute.xlu1 %892  ;;  %v891_v56 = vpop.permute.xlu0 %890  ;;  %2535 = vmatpush1.bf16.msra.mxu1 %v2859_v59  ;;  %v928_v13 = vsel %vm917_vm4, %v873_v31, %v927_v58  ;;  %v926_v34 = vsel %vm917_vm4, %v3480_v16, %v925_v8 }
 0x138   : > { %v913_v55 = vrot.slane %v3751_v22, 4  ;;  %v912_v40 = vrot.slane %v891_v56, 4  ;;  %2494 = vmatpush1.bf16.msra.mxu0 %v2857_v1 }
 0x13a   : > { %v941_v32 = vsel %vm295_vm1, %v911_v10, %v912_v40  ;;  %v943_v35 = vsel %vm295_vm1, %v912_v40, %v913_v55 }
 0x13b   : > { %v944_v46 = vsel %vm917_vm4, %v891_v56, %v943_v35  ;;  %v3768_v57 = vpop.permute.xlu1 %719  ;;  %v718_v29 = vpop.permute.xlu0 %717  ;;  %v942_v24 = vsel %vm917_vm4, %v3491_v41, %v941_v32 }
 0x13c   : > { %v2843_v2 = vcombine.low %v928_v13, %v944_v46  ;;  %v2844_v61 = vcombine.high %v928_v13, %v944_v46  ;;  %v749_v10 = vrot.slane %v3768_v57, 4  ;;  %v748_v48 = vrot.slane %v718_v29, 4 }
 0x13d   : > { %v2841_v39 = vcombine.low %v926_v34, %v942_v24  ;;  %v2842_v25 = vcombine.high %v926_v34, %v942_v24 }
 0x13e   : > { %2536 = vmatprep.subr.bf16.mxu1 %v2844_v61  ;;  %v770_v16 = vsel %vm295_vm1, %v747_v23, %v748_v48  ;;  %v772_v41 = vsel %vm295_vm1, %v748_v48, %v749_v10 }
 0x13f   : > { %2495 = vmatprep.subr.bf16.mxu0 %v2842_v25  ;;  %v3775_v26 = vpop.permute.xlu1 %737  ;;  %v736_v50 = vpop.permute.xlu0 %735  ;;  %2537 = vmatpush1.bf16.msra.mxu1 %v2843_v2  ;;  %v773_v4 = vsel %vm762_vm5, %v718_v29, %v772_v41  ;;  %v771_v0 = vsel %vm762_vm5, %v3512_v52, %v770_v16 }
 0x140   : > { %v758_v31 = vrot.slane %v3775_v26, 4  ;;  %v757_v47 = vrot.slane %v736_v50, 4  ;;  %2496 = vmatpush1.bf16.msra.mxu0 %v2841_v39 }
 0x142   : > { %v786_v21 = vsel %vm295_vm1, %v756_v17, %v757_v47  ;;  %v788_v59 = vsel %vm295_vm1, %v757_v47, %v758_v31 }
 0x143   : > { %v789_v23 = vsel %vm762_vm5, %v736_v50, %v788_v59  ;;  %v3792_v37 = vpop.permute.xlu1 %564  ;;  %v563_v1 = vpop.permute.xlu0 %562  ;;  %v787_v56 = vsel %vm762_vm5, %v3526_v15, %v786_v21 }
 0x144   : > { %v2827_v8 = vcombine.low %v773_v4, %v789_v23  ;;  %v2828_v58 = vcombine.high %v773_v4, %v789_v23  ;;  %v594_v17 = vrot.slane %v3792_v37, 4  ;;  %v593_v40 = vrot.slane %v563_v1, 4 }
 0x145   : > { %v2825_v32 = vcombine.low %v771_v0, %v787_v56  ;;  %v2826_v35 = vcombine.high %v771_v0, %v787_v56 }
 0x146   : > { %2538 = vmatprep.subr.bf16.mxu1 %v2828_v58  ;;  %v615_v52 = vsel %vm295_vm1, %v592_v49, %v593_v40  ;;  %v617_v15 = vsel %vm295_vm1, %v593_v40, %v594_v17 }
 0x147   : > { %2497 = vmatprep.subr.bf16.mxu0 %v2826_v35  ;;  %v3799_v13 = vpop.permute.xlu1 %582  ;;  %v581_v46 = vpop.permute.xlu0 %580  ;;  %2539 = vmatpush1.bf16.msra.mxu1 %v2827_v8  ;;  %v618_v61 = vsel %vm607_vm6, %v563_v1, %v617_v15  ;;  %v616_v25 = vsel %vm607_vm6, %v3544_v5, %v615_v52 }
 0x148   : > { %v603_v29 = vrot.slane %v3799_v13, 4  ;;  %v602_v34 = vrot.slane %v581_v46, 4  ;;  %2498 = vmatpush1.bf16.msra.mxu0 %v2825_v32 }
 0x14a   : > { %v631_v24 = vsel %vm295_vm1, %v601_v30, %v602_v34  ;;  %v633_v2 = vsel %vm295_vm1, %v602_v34, %v603_v29 }
 0x14b   : > { %v634_v49 = vsel %vm607_vm6, %v581_v46, %v633_v2  ;;  %v3816_v48 = vpop.permute.xlu1 %409  ;;  %v408_v39 = vpop.permute.xlu0 %407  ;;  %v632_v50 = vsel %vm607_vm6, %v3555_v19, %v631_v24 }
 0x14c   : > { %v2811_v16 = vcombine.low %v618_v61, %v634_v49  ;;  %v2812_v41 = vcombine.high %v618_v61, %v634_v49  ;;  %v439_v30 = vrot.slane %v3816_v48, 4  ;;  %v438_v47 = vrot.slane %v408_v39, 4 }
 0x14d   : > { %v2809_v21 = vcombine.low %v616_v25, %v632_v50  ;;  %v2810_v59 = vcombine.high %v616_v25, %v632_v50 }
 0x14e   : > { %2540 = vmatprep.subr.bf16.mxu1 %v2812_v41  ;;  %v460_v5 = vsel %vm295_vm1, %v437_v44, %v438_v47  ;;  %v462_v19 = vsel %vm295_vm1, %v438_v47, %v439_v30 }
 0x14f   : > { %2499 = vmatprep.subr.bf16.mxu0 %v2810_v59  ;;  %v3823_v4 = vpop.permute.xlu1 %427  ;;  %v426_v23 = vpop.permute.xlu0 %425  ;;  %2541 = vmatpush1.bf16.msra.mxu1 %v2811_v16  ;;  %v463_v58 = vsel %vm452_vm7, %v408_v39, %v462_v19  ;;  %v461_v35 = vsel %vm452_vm7, %v3576_v9, %v460_v5 }
 0x150   : > { %v448_v1 = vrot.slane %v3823_v4, 4  ;;  %v447_v0 = vrot.slane %v426_v23, 4  ;;  %2500 = vmatpush1.bf16.msra.mxu0 %v2809_v21 }
 0x152   : > { %v476_v56 = vsel %vm295_vm1, %v446_v14, %v447_v0  ;;  %v478_v8 = vsel %vm295_vm1, %v447_v0, %v448_v1 }
 0x153   : > { %v479_v44 = vsel %vm452_vm7, %v426_v23, %v478_v8  ;;  %v3840_v40 = vpop.permute.xlu1 %253  ;;  %v252_v32 = vpop.permute.xlu0 %251  ;;  %v477_v46 = vsel %vm452_vm7, %v3587_v18, %v476_v56  ;;  %v2943_v56 = vld [vmem:[%s3002_s18 + $0x2c] ss:$68 sps:$4 sm:$0xff]  }
 0x154   : > { %v2795_v52 = vcombine.low %v463_v58, %v479_v44  ;;  %v2796_v15 = vcombine.high %v463_v58, %v479_v44  ;;  %v283_v14 = vrot.slane %v3840_v40, 4  ;;  %v282_v34 = vrot.slane %v252_v32, 4  ;;  %v2940_v44 = vld [vmem:[%s3002_s18 + $0x24] ss:$68 sps:$4 sm:$0xff]  }
 0x155   : > { %v2793_v24 = vcombine.low %v461_v35, %v477_v46  ;;  %v2794_v2 = vcombine.high %v461_v35, %v477_v46 }
 0x156   : > { %2542 = vmatprep.subr.bf16.mxu1 %v2796_v15  ;;  %v305_v9 = vsel %vm295_vm1, %v281_v6, %v282_v34  ;;  %v307_v18 = vsel %vm295_vm1, %v282_v34, %v283_v14  ;;  %v2938_v34 = vld [vmem:[%s3002_s18 + $0x20] ss:$68 sps:$4 sm:$0xff]  }
 0x157   : > { %2501 = vmatprep.subr.bf16.mxu0 %v2794_v2  ;;  %v3847_v61 = vpop.permute.xlu1 %271  ;;  %v270_v49 = vpop.permute.xlu0 %269  ;;  %2543 = vmatpush1.bf16.msra.mxu1 %v2795_v52  ;;  %v308_v6 = vsel %vm297_vm8, %v252_v32, %v307_v18  ;;  %v306_v59 = vsel %vm297_vm8, %v3608_v60, %v305_v9  ;;  %v2941_v60 = vld [vmem:[%s3002_s18 + $0x28] ss:$68 sps:$4 sm:$0xff]  }
 0x158   : > { %v292_v39 = vrot.slane %v3847_v61, 4  ;;  %v291_v25 = vrot.slane %v270_v49, 4  ;;  %2502 = vmatpush1.bf16.msra.mxu0 %v2793_v24 }
 0x15a   : > { %v321_v50 = vsel %vm295_vm1, %v290_v11, %v291_v25  ;;  %v323_v16 = vsel %vm295_vm1, %v291_v25, %v292_v39 }
 0x15b   : > { %v324_v41 = vsel %vm297_vm8, %v270_v49, %v323_v16  ;;  %v3864_v47 = vpop.permute.xlu1 %1339  ;;  %v1338_v21 = vpop.permute.xlu0 %1337  ;;  %v322_v23 = vsel %vm297_vm8, %v3619_v53, %v321_v50 }
 0x15c   : > { %v2779_v5 = vcombine.low %v308_v6, %v324_v41  ;;  %v2780_v11 = vcombine.high %v308_v6, %v324_v41  ;;  %v1369_v19 = vrot.slane %v3864_v47, 4  ;;  %v1368_v0 = vrot.slane %v1338_v21, 4 }
 0x15d   : > { %v2777_v8 = vcombine.low %v306_v59, %v322_v23  ;;  %v2778_v58 = vcombine.high %v306_v59, %v322_v23 }
 0x15e   : > { %2544 = vmatprep.subr.bf16.mxu1 %v2780_v11  ;;  %v1390_v53 = vsel %vm295_vm1, %v1367_v45, %v1368_v0  ;;  %v1392_v46 = vsel %vm295_vm1, %v1368_v0, %v1369_v19 }
 0x15f   : > { %2503 = vmatprep.subr.bf16.mxu0 %v2778_v58  ;;  %v3873_v32 = vpop.permute.xlu1 %1357  ;;  %v1356_v35 = vpop.permute.xlu0 %1355  ;;  %2545 = vmatpush1.bf16.msra.mxu1 %v2779_v5  ;;  %v1393_v45 = vsel %vm1382_vm9, %v1338_v21, %v1392_v46  ;;  %v1391_v25 = vsel %vm1382_vm9, %v3640_v51, %v1390_v53 }
 0x160   : > { %v1378_v52 = vrot.slane %v3873_v32, 4  ;;  %v1377_v15 = vrot.slane %v1356_v35, 4  ;;  %2504 = vmatpush1.bf16.msra.mxu0 %v2777_v8  ;;  %2546 = vmatprep.subr.bf16.mxu1 %v2943_v56 }
 0x161   : > { %2505 = vmatprep.subr.bf16.mxu0 %v2940_v44 }
 0x162   : > { %v1406_v24 = vsel %vm295_vm1, %v1376_v3, %v1377_v15  ;;  %v1408_v2 = vsel %vm295_vm1, %v1377_v15, %v1378_v52 }
 0x163   : > { %v1409_v49 = vsel %vm1382_vm9, %v1356_v35, %v1408_v2  ;;  %v1189_v9 = vpop.permute.xlu1 %1188  ;;  %v1187_v18 = vpop.permute.xlu0 %1186  ;;  %2547 = vmatpush1.bf16.msra.mxu1 %v2941_v60  ;;  %v1407_v50 = vsel %vm1382_vm9, %v3653_v38, %v1406_v24 }
 0x164   : > { %v2891_v16 = vcombine.low %v1393_v45, %v1409_v49  ;;  %v2892_v6 = vcombine.high %v1393_v45, %v1409_v49  ;;  %v1216_v3 = vrot.slane %v1189_v9, 4  ;;  %v1215_v41 = vrot.slane %v1187_v18, 4  ;;  %2506 = vmatpush1.bf16.msra.mxu0 %v2938_v34 }
 0x165   : > { %v2889_v59 = vcombine.low %v1391_v25, %v1407_v50  ;;  %v2890_v23 = vcombine.high %v1391_v25, %v1407_v50 }
 0x166   : > { %2562 = vmatprep.subr.bf16.mxu1 %v2892_v6  ;;  %v1241_v21 = vsel %vm295_vm1, %v1215_v41, %v1216_v3  ;;  %v1239_v51 = vsel %vm295_vm1, %v1214_v54, %v1215_v41 }
 0x167   : > { %2521 = vmatprep.subr.bf16.mxu0 %v2890_v23  ;;  %v1207_v5 = vpop.permute.xlu1 %1206  ;;  %v1205_v11 = vpop.permute.xlu0 %1204  ;;  %2563 = vmatpush2.bf16.msra.mxu1 %v2891_v16  ;;  %v1242_v56 = vsel %vm1227_vm2, %v1187_v18, %v1241_v21  ;;  %v1240_v54 = vsel %vm1227_vm2, %v3676_v20, %v1239_v51 }
 0x168   : > { %v1225_v0 = vrot.slane %v1207_v5, 4  ;;  %v1224_v38 = vrot.slane %v1205_v11, 4  ;;  %2522 = vmatpush2.bf16.msra.mxu0 %v2889_v59 }
 0x16a   : > { %v1255_v8 = vsel %vm295_vm1, %v1223_v36, %v1224_v38  ;;  %v1257_v58 = vsel %vm295_vm1, %v1224_v38, %v1225_v0  ;;  %2565 = vmatmul.mubr.bf16.vlgmr.msra.gmra.mxu1 %v3412_v28 }
 0x16b   : > { %v1258_v44 = vsel %vm1227_vm2, %v1205_v11, %v1257_v58  ;;  %v1034_v35 = vpop.permute.xlu1 %1033  ;;  %v1032_v60 = vpop.permute.xlu0 %1031  ;;  %v1256_v53 = vsel %vm1227_vm2, %v3690_v43, %v1255_v8  ;;  %2524 = vmatmul.mubr.bf16.vlgmr.msra.gmra.mxu0 %v3412_v28  ;;  %2904 = vmatprep.mubr.msk.bf16.mxu1 %vm2323_vm0, %v3105_v7 }
 0x16c   : > { %v2879_v36 = vcombine.low %v1242_v56, %v1258_v44  ;;  %v2880_v46 = vcombine.high %v1242_v56, %v1258_v44  ;;  %v1061_v15 = vrot.slane %v1034_v35, 4  ;;  %v1060_v34 = vrot.slane %v1032_v60, 4  ;;  %2903 = vmatprep.mubr.msk.bf16.mxu0 %vm2323_vm0, %v3105_v7 }
 0x16d   : > { %v2877_v24 = vcombine.low %v1240_v54, %v1256_v53  ;;  %v2878_v2 = vcombine.high %v1240_v54, %v1256_v53 }
 0x16e   : > { %2614 = vmatprep.subr.bf16.mxu1 %v2880_v46  ;;  %v1084_v43 = vsel %vm295_vm1, %v1059_v12, %v1060_v34  ;;  %v1086_v49 = vsel %vm295_vm1, %v1060_v34, %v1061_v15 }
 0x16f   : > { %2573 = vmatprep.subr.bf16.mxu0 %v2878_v2  ;;  %v1052_v20 = vpop.permute.xlu1 %1051  ;;  %v1050_v45 = vpop.permute.xlu0 %1049  ;;  %2615 = vmatpush1.bf16.msra.mxu1 %v2879_v36  ;;  %v1087_v50 = vsel %vm1072_vm3, %v1032_v60, %v1086_v49  ;;  %v1085_v12 = vsel %vm1072_vm3, %v3709_v27, %v1084_v43 }
 0x170   : > { %v1070_v9 = vrot.slane %v1052_v20, 4  ;;  %v1069_v18 = vrot.slane %v1050_v45, 4  ;;  %2574 = vmatpush1.bf16.msra.mxu0 %v2877_v24 }
 0x172   : > { %v1100_v7 = vsel %vm295_vm1, %v1068_v42, %v1069_v18  ;;  %v1102_v25 = vsel %vm295_vm1, %v1069_v18, %v1070_v9 }
 0x173   : > { %v1103_v16 = vsel %vm1072_vm3, %v1050_v45, %v1102_v25  ;;  %v879_v6 = vpop.permute.xlu1 %878  ;;  %v877_v3 = vpop.permute.xlu0 %876  ;;  %v1101_v41 = vsel %vm1072_vm3, %v3727_v62, %v1100_v7 }
 0x174   : > { %v2863_v59 = vcombine.low %v1087_v50, %v1103_v16  ;;  %v2864_v23 = vcombine.high %v1087_v50, %v1103_v16  ;;  %v906_v21 = vrot.slane %v879_v6, 4  ;;  %v905_v5 = vrot.slane %v877_v3, 4 }
 0x175   : > { %v2861_v11 = vcombine.low %v1085_v12, %v1101_v41  ;;  %v2862_v42 = vcombine.high %v1085_v12, %v1101_v41 }
 0x176   : > { %2616 = vmatprep.subr.bf16.mxu1 %v2864_v23  ;;  %v929_v38 = vsel %vm295_vm1, %v904_v63, %v905_v5  ;;  %v931_v27 = vsel %vm295_vm1, %v905_v5, %v906_v21 }
 0x177   : > { %2575 = vmatprep.subr.bf16.mxu0 %v2862_v42  ;;  %v897_v51 = vpop.permute.xlu1 %896  ;;  %v895_v0 = vpop.permute.xlu0 %894  ;;  %2617 = vmatpush1.bf16.msra.mxu1 %v2863_v59  ;;  %v932_v44 = vsel %vm917_vm4, %v877_v3, %v931_v27  ;;  %v930_v63 = vsel %vm917_vm4, %v3744_v33, %v929_v38 }
 0x178   : > { %v915_v56 = vrot.slane %v897_v51, 4  ;;  %v914_v8 = vrot.slane %v895_v0, 4  ;;  %2576 = vmatpush1.bf16.msra.mxu0 %v2861_v11 }
 0x17a   : > { %v945_v62 = vsel %vm295_vm1, %v913_v55, %v914_v8  ;;  %v947_v58 = vsel %vm295_vm1, %v914_v8, %v915_v56 }
 0x17b   : > { %v948_v35 = vsel %vm917_vm4, %v895_v0, %v947_v58  ;;  %v724_v60 = vpop.permute.xlu1 %723  ;;  %v722_v54 = vpop.permute.xlu0 %721  ;;  %v946_v53 = vsel %vm917_vm4, %v3751_v22, %v945_v62 }
 0x17c   : > { %v2847_v36 = vcombine.low %v932_v44, %v948_v35  ;;  %v2848_v46 = vcombine.high %v932_v44, %v948_v35  ;;  %v751_v15 = vrot.slane %v724_v60, 4  ;;  %v750_v34 = vrot.slane %v722_v54, 4 }
 0x17d   : > { %v2845_v24 = vcombine.low %v930_v63, %v946_v53  ;;  %v2846_v55 = vcombine.high %v930_v63, %v946_v53 }
 0x17e   : > { %2618 = vmatprep.subr.bf16.mxu1 %v2848_v46  ;;  %v774_v45 = vsel %vm295_vm1, %v749_v10, %v750_v34  ;;  %v776_v33 = vsel %vm295_vm1, %v750_v34, %v751_v15 }
 0x17f   : > { %2577 = vmatprep.subr.bf16.mxu0 %v2846_v55  ;;  %v742_v2 = vpop.permute.xlu1 %741  ;;  %v740_v20 = vpop.permute.xlu0 %739  ;;  %2619 = vmatpush1.bf16.msra.mxu1 %v2847_v36  ;;  %v777_v18 = vsel %vm762_vm5, %v722_v54, %v776_v33  ;;  %v775_v10 = vsel %vm762_vm5, %v3768_v57, %v774_v45 }
 0x180   : > { %v760_v43 = vrot.slane %v742_v2, 4  ;;  %v759_v49 = vrot.slane %v740_v20, 4  ;;  %2578 = vmatpush1.bf16.msra.mxu0 %v2845_v24 }
 0x182   : > { %v790_v22 = vsel %vm295_vm1, %v758_v31, %v759_v49  ;;  %v792_v9 = vsel %vm295_vm1, %v759_v49, %v760_v43 }
 0x183   : > { %v793_v7 = vsel %vm762_vm5, %v740_v20, %v792_v9  ;;  %v569_v25 = vpop.permute.xlu1 %568  ;;  %v567_v50 = vpop.permute.xlu0 %566  ;;  %v791_v16 = vsel %vm762_vm5, %v3775_v26, %v790_v22 }
 0x184   : > { %v2831_v6 = vcombine.low %v777_v18, %v793_v7  ;;  %v2832_v3 = vcombine.high %v777_v18, %v793_v7  ;;  %v596_v12 = vrot.slane %v569_v25, 4  ;;  %v595_v41 = vrot.slane %v567_v50, 4 }
 0x185   : > { %v2829_v59 = vcombine.low %v775_v10, %v791_v16  ;;  %v2830_v31 = vcombine.high %v775_v10, %v791_v16 }
 0x186   : > { %2620 = vmatprep.subr.bf16.mxu1 %v2832_v3  ;;  %v619_v5 = vsel %vm295_vm1, %v594_v17, %v595_v41  ;;  %v621_v57 = vsel %vm295_vm1, %v595_v41, %v596_v12 }
 0x187   : > { %2579 = vmatprep.subr.bf16.mxu0 %v2830_v31  ;;  %v587_v23 = vpop.permute.xlu1 %586  ;;  %v585_v21 = vpop.permute.xlu0 %584  ;;  %2621 = vmatpush1.bf16.msra.mxu1 %v2831_v6  ;;  %v622_v0 = vsel %vm607_vm6, %v567_v50, %v621_v57  ;;  %v620_v17 = vsel %vm607_vm6, %v3792_v37, %v619_v5 }
 0x188   : > { %v605_v11 = vrot.slane %v587_v23, 4  ;;  %v604_v42 = vrot.slane %v585_v21, 4  ;;  %2580 = vmatpush1.bf16.msra.mxu0 %v2829_v59 }
 0x18a   : > { %v635_v26 = vsel %vm295_vm1, %v603_v29, %v604_v42  ;;  %v637_v51 = vsel %vm295_vm1, %v604_v42, %v605_v11  ;;  %v2946_v11 = vld [vmem:[%s3002_s18 + $0x34] ss:$68 sps:$4 sm:$0xff]  }
 0x18b   : > { %v638_v38 = vsel %vm607_vm6, %v585_v21, %v637_v51  ;;  %v414_v27 = vpop.permute.xlu1 %413  ;;  %v412_v56 = vpop.permute.xlu0 %411  ;;  %v636_v8 = vsel %vm607_vm6, %v3799_v13, %v635_v26  ;;  %v2947_v51 = vld [vmem:[%s3002_s18 + $0x38] ss:$68 sps:$4 sm:$0xff]  }
 0x18c   : > { %v2815_v62 = vcombine.low %v622_v0, %v638_v38  ;;  %v2816_v58 = vcombine.high %v622_v0, %v638_v38  ;;  %v441_v44 = vrot.slane %v414_v27, 4  ;;  %v440_v35 = vrot.slane %v412_v56, 4  ;;  %v2944_v27 = vld [vmem:[%s3002_s18 + $0x30] ss:$68 sps:$4 sm:$0xff]  }
 0x18d   : > { %v2813_v60 = vcombine.low %v620_v17, %v636_v8  ;;  %v2814_v29 = vcombine.high %v620_v17, %v636_v8 }
 0x18e   : > { %2622 = vmatprep.subr.bf16.mxu1 %v2816_v58  ;;  %v464_v53 = vsel %vm295_vm1, %v439_v30, %v440_v35  ;;  %v466_v37 = vsel %vm295_vm1, %v440_v35, %v441_v44 }
 0x18f   : > { %2581 = vmatprep.subr.bf16.mxu0 %v2814_v29  ;;  %v432_v54 = vpop.permute.xlu1 %431  ;;  %v430_v63 = vpop.permute.xlu0 %429  ;;  %2623 = vmatpush1.bf16.msra.mxu1 %v2815_v62  ;;  %v467_v34 = vsel %vm452_vm7, %v412_v56, %v466_v37  ;;  %v465_v30 = vsel %vm452_vm7, %v3816_v48, %v464_v53 }
 0x190   : > { %v450_v36 = vrot.slane %v432_v54, 4  ;;  %v449_v46 = vrot.slane %v430_v63, 4  ;;  %2582 = vmatpush1.bf16.msra.mxu0 %v2813_v60 }
 0x192   : > { %v480_v13 = vsel %vm295_vm1, %v448_v1, %v449_v46  ;;  %v482_v15 = vsel %vm295_vm1, %v449_v46, %v450_v36 }
 0x193   : > { %v483_v24 = vsel %vm452_vm7, %v430_v63, %v482_v15  ;;  %v258_v55 = vpop.permute.xlu1 %257  ;;  %v256_v2 = vpop.permute.xlu0 %255  ;;  %v481_v20 = vsel %vm452_vm7, %v3823_v4, %v480_v13 }
 0x194   : > { %v2799_v45 = vcombine.low %v467_v34, %v483_v24  ;;  %v2800_v33 = vcombine.high %v467_v34, %v483_v24  ;;  %v285_v43 = vrot.slane %v258_v55, 4  ;;  %v284_v49 = vrot.slane %v256_v2, 4 }
 0x195   : > { %v2797_v22 = vcombine.low %v465_v30, %v481_v20  ;;  %v2798_v1 = vcombine.high %v465_v30, %v481_v20 }
 0x196   : > { %2624 = vmatprep.subr.bf16.mxu1 %v2800_v33  ;;  %v309_v7 = vsel %vm295_vm1, %v283_v14, %v284_v49  ;;  %v311_v48 = vsel %vm295_vm1, %v284_v49, %v285_v43 }
 0x197   : > { %2583 = vmatprep.subr.bf16.mxu0 %v2798_v1  ;;  %v276_v9 = vpop.permute.xlu1 %275  ;;  %v274_v18 = vpop.permute.xlu0 %273  ;;  %2625 = vmatpush1.bf16.msra.mxu1 %v2799_v45  ;;  %v312_v16 = vsel %vm297_vm8, %v256_v2, %v311_v48  ;;  %v310_v14 = vsel %vm297_vm8, %v3840_v40, %v309_v7 }
 0x198   : > { %v294_v25 = vrot.slane %v276_v9, 4  ;;  %v293_v4 = vrot.slane %v274_v18, 4  ;;  %2584 = vmatpush1.bf16.msra.mxu0 %v2797_v22 }
 0x19a   : > { %v325_v50 = vsel %vm295_vm1, %v292_v39, %v293_v4  ;;  %v327_v10 = vsel %vm295_vm1, %v293_v4, %v294_v25  ;;  %v2949_v39 = vld [vmem:[%s3002_s18 + $0x3c] ss:$68 sps:$4 sm:$0xff]  }
 0x19b   : > { %v328_v6 = vsel %vm297_vm8, %v274_v18, %v327_v10  ;;  %v1344_v3 = vpop.permute.xlu1 %1343  ;;  %v1342_v12 = vpop.permute.xlu0 %1341  ;;  %v326_v41 = vsel %vm297_vm8, %v3847_v61, %v325_v50 }
 0x19c   : > { %v2783_v59 = vcombine.low %v312_v16, %v328_v6  ;;  %v2784_v31 = vcombine.high %v312_v16, %v328_v6  ;;  %v1371_v23 = vrot.slane %v1344_v3, 4  ;;  %v1370_v21 = vrot.slane %v1342_v12, 4 }
 0x19d   : > { %v2781_v5 = vcombine.low %v310_v14, %v326_v41  ;;  %v2782_v57 = vcombine.high %v310_v14, %v326_v41 }
 0x19e   : > { %2626 = vmatprep.subr.bf16.mxu1 %v2784_v31  ;;  %v1394_v40 = vsel %vm295_vm1, %v1369_v19, %v1370_v21  ;;  %v1396_v61 = vsel %vm295_vm1, %v1370_v21, %v1371_v23 }
 0x19f   : > { %2585 = vmatprep.subr.bf16.mxu0 %v2782_v57  ;;  %v1362_v42 = vpop.permute.xlu1 %1361  ;;  %v1360_v26 = vpop.permute.xlu0 %1359  ;;  %2627 = vmatpush1.bf16.msra.mxu1 %v2783_v59  ;;  %v1397_v8 = vsel %vm1382_vm9, %v1342_v12, %v1396_v61  ;;  %v1395_v19 = vsel %vm1382_vm9, %v3864_v47, %v1394_v40 }
 0x1a0   : > { %v1380_v0 = vrot.slane %v1362_v42, 4  ;;  %v1379_v38 = vrot.slane %v1360_v26, 4  ;;  %2586 = vmatpush1.bf16.msra.mxu0 %v2781_v5  ;;  %2628 = vmatprep.subr.bf16.mxu1 %v2949_v39 }
 0x1a1   : > { %2587 = vmatprep.subr.bf16.mxu0 %v2946_v11 }
 0x1a2   : > { %v1410_v56 = vsel %vm295_vm1, %v1378_v52, %v1379_v38  ;;  %v1412_v17 = vsel %vm295_vm1, %v1379_v38, %v1380_v0 }
 0x1a3   : > { %v1413_v62 = vsel %vm1382_vm9, %v1360_v26, %v1412_v17  ;;  %2629 = vmatpush1.bf16.msra.mxu1 %v2947_v51  ;;  %v1411_v58 = vsel %vm1382_vm9, %v3873_v32, %v1410_v56 }
 0x1a4   : > { %v2895_v44 = vcombine.low %v1397_v8, %v1413_v62  ;;  %v2896_v35 = vcombine.high %v1397_v8, %v1413_v62  ;;  %2588 = vmatpush1.bf16.msra.mxu0 %v2944_v27  ;;  %v2893_v60 = vcombine.low %v1395_v19, %v1411_v58  ;;  %v2894_v29 = vcombine.high %v1395_v19, %v1411_v58 }
 0x1a6   : > { %2603 = vmatprep.subr.bf16.mxu0 %v2894_v29  ;;  %2644 = vmatprep.subr.bf16.mxu1 %v2896_v35 }
 0x1a7   : > { %2645 = vmatpush2.bf16.msra.mxu1 %v2895_v44 }
 0x1a8   : > { %2604 = vmatpush2.bf16.msra.mxu0 %v2893_v60 }
 0x1aa   : > { %2647 = vmatmul.mubr.bf16.vlgmr.msra.gmra.mxu1 %v3412_v28  ;;  %v2361_v52 = vpop.f32.mrf.mxu0  ;;  %v2402_v54 = vpop.f32.mrf.mxu1 }
 0x1ab   : > { %2606 = vmatmul.mubr.bf16.vlgmr.msra.gmra.mxu0 %v3412_v28 }
 0x1ac   : > { %v2363_v47 = vpop.f32.mrf.mxu0  ;;  %v2404_v63 = vpop.f32.mrf.mxu1 }
 0x1ad   : > { %v4021_v32 = vpop.permute.xlu0 %1594 }
 0x1ae   : > { %v2365_v53 = vpop.f32.mrf.mxu0  ;;  %v2406_v37 = vpop.f32.mrf.mxu1  ;;  %v2362_v36 = vadd.f32 %v2361_v52, %v4021_v32  ;;  %v2364_v46 = vadd.f32 %v2363_v47, %v4021_v32  ;;  %v2403_v13 = vadd.f32 %v2402_v54, %v4021_v32  ;;  %v2405_v15 = vadd.f32 %v2404_v63, %v4021_v32 }
 0x1b0   : > { %v2655_v28 = vmax.f32 %v2362_v36, 0.0  ;;  %v2656_v34 = vmax.f32 %v2364_v46, 0.0  ;;  %v2657_v24 = vmax.f32 %v2403_v13, 0.0  ;;  %v2658_v55 = vmax.f32 %v2405_v15, 0.0  ;;  %v2366_v2 = vpop.f32.mrf.mxu0  ;;  %v2407_v30 = vpop.f32.mrf.mxu1 }
 0x1b2   : > { %2671 = vst [vmem:[%s4030_s8] sm:$0xff] %v2655_v28  ;;  %2672 = vst [vmem:[%s4030_s8 + $0x8] sm:$0xff] %v2656_v34 }
 0x1b3   : > { %2673 = vst [vmem:[%s4030_s8 + $0x10] sm:$0xff] %v2657_v24  ;;  %2674 = vst [vmem:[%s4030_s8 + $0x18] sm:$0xff] %v2658_v55 }
 0x1ea   : > { %v2484_v20 = vpop.f32.mrf.mxu1 }
 0x1eb   : > { %v2443_v45 = vpop.f32.mrf.mxu0  ;;  %v2485_v33 = vadd.f32 %v2484_v20, %v4021_v32 }
 0x1ec   : > { %v2444_v43 = vadd.f32 %v2443_v45, %v4021_v32  ;;  %v2486_v49 = vpop.f32.mrf.mxu1 }
 0x1ed   : > { %v2661_v22 = vmax.f32 %v2485_v33, 0.0  ;;  %v2445_v1 = vpop.f32.mrf.mxu0  ;;  %v2487_v9 = vadd.f32 %v2486_v49, %v4021_v32 }
 0x1ee   : > { %v2659_v18 = vmax.f32 %v2444_v43, 0.0  ;;  %v2446_v7 = vadd.f32 %v2445_v1, %v4021_v32  ;;  %v2488_v48 = vpop.f32.mrf.mxu1 }
 0x1ef   : > { %2677 = vst [vmem:[%s4030_s8 + $0x30] sm:$0xff] %v2661_v22  ;;  %v2662_v25 = vmax.f32 %v2487_v9, 0.0  ;;  %v2447_v4 = vpop.f32.mrf.mxu0 }
 0x1f0   : > { %2675 = vst [vmem:[%s4030_s8 + $0x20] sm:$0xff] %v2659_v18  ;;  %v2660_v50 = vmax.f32 %v2446_v7, 0.0  ;;  %v2489_v10 = vpop.f32.mrf.mxu1 }
 0x1f1   : > { %2678 = vst [vmem:[%s4030_s8 + $0x38] sm:$0xff] %v2662_v25  ;;  %v2448_v16 = vpop.f32.mrf.mxu0 }
 0x1f2   : > { %2676 = vst [vmem:[%s4030_s8 + $0x28] sm:$0xff] %v2660_v50 }
 0x22a   : > { %v2566_v6 = vpop.f32.mrf.mxu1 }
 0x22b   : > { %v2525_v3 = vpop.f32.mrf.mxu0  ;;  %v2567_v12 = vadd.f32 %v2566_v6, %v4021_v32 }
 0x22c   : > { %v2526_v14 = vadd.f32 %v2525_v3, %v4021_v32  ;;  %v2568_v41 = vpop.f32.mrf.mxu1 }
 0x22d   : > { %v2665_v59 = vmax.f32 %v2567_v12, 0.0  ;;  %v2527_v31 = vpop.f32.mrf.mxu0  ;;  %v2569_v23 = vadd.f32 %v2568_v41, %v4021_v32 }
 0x22e   : > { %v2663_v21 = vmax.f32 %v2526_v14, 0.0  ;;  %v2528_v39 = vadd.f32 %v2527_v31, %v4021_v32  ;;  %v2570_v5 = vpop.f32.mrf.mxu1 }
 0x22f   : > { %2681 = vst [vmem:[%s4030_s8 + $0x50] sm:$0xff] %v2665_v59  ;;  %v2666_v57 = vmax.f32 %v2569_v23, 0.0  ;;  %v2529_v11 = vpop.f32.mrf.mxu0 }
 0x230   : > { %2679 = vst [vmem:[%s4030_s8 + $0x40] sm:$0xff] %v2663_v21  ;;  %v2664_v42 = vmax.f32 %v2528_v39, 0.0  ;;  %v2571_v26 = vpop.f32.mrf.mxu1 }
 0x231   : > { %2682 = vst [vmem:[%s4030_s8 + $0x58] sm:$0xff] %v2666_v57  ;;  %v2530_v51 = vpop.f32.mrf.mxu0 }
 0x232   : > { %2680 = vst [vmem:[%s4030_s8 + $0x48] sm:$0xff] %v2664_v42 }
 0x26a   : > { %v2648_v40 = vpop.f32.mrf.mxu1 }
 0x26b   : > { %v2607_v61 = vpop.f32.mrf.mxu0  ;;  %v2649_v0 = vadd.f32 %v2648_v40, %v4021_v32 }
 0x26c   : > { %v2608_v38 = vadd.f32 %v2607_v61, %v4021_v32  ;;  %v2650_v27 = vpop.f32.mrf.mxu1 }
 0x26d   : > { %v2669_v56 = vmax.f32 %v2649_v0, 0.0  ;;  %v2609_v17 = vpop.f32.mrf.mxu0  ;;  %v2651_v8 = vadd.f32 %v2650_v27, %v4021_v32 }
 0x26e   : > { %v2667_v62 = vmax.f32 %v2608_v38, 0.0  ;;  %v2610_v19 = vadd.f32 %v2609_v17, %v4021_v32  ;;  %v2652_v58 = vpop.f32.mrf.mxu1 }
 0x26f   : > { %2685 = vst [vmem:[%s4030_s8 + $0x70] sm:$0xff] %v2669_v56  ;;  %v2670_v44 = vmax.f32 %v2651_v8, 0.0  ;;  %v2611_v35 = vpop.f32.mrf.mxu0 }
 0x270   : > { %2683 = vst [vmem:[%s4030_s8 + $0x60] sm:$0xff] %v2667_v62  ;;  %v2668_v60 = vmax.f32 %v2610_v19, 0.0  ;;  %v2653_v29 = vpop.f32.mrf.mxu1 }
 0x271   : > { %2686 = vst [vmem:[%s4030_s8 + $0x78] sm:$0xff] %v2670_v44  ;;  %v2612_v52 = vpop.f32.mrf.mxu0 }
 0x272   : > { %2684 = vst [vmem:[%s4030_s8 + $0x68] sm:$0xff] %v2668_v60 }
 0x273 PF: > { %s13_s12 = sadd.s32 1, %s2956_s12  }
 0x274   : > { %p10_p5 = scmp.ge.s32.totalorder %s13_s12, 5  }
 0x276   :  { %12 = sbr.rel (!%p10_p5) target bundleno = 1 (0x1), region = 62 }

// kernel: similarity_reg_net_forward.7
= control target key start
LH: loop header
LB: loop body
LE: loop exit
PB: predicated region body
PF: predicated region fallthrough
CT: control target
= control target key end

     0   :  { %v534_v3 = vmov 0   ;;  %vm274_vm0 = vcmask 654336   ;;  %s741_s1 = inlined_call_operand.vmem [shape: bf16[80,1024], index: 1, kind: input, shape index: {}]   ;;  %s742_s0 = inlined_call_operand.vmem [shape: bf16[16,80], index: 0, kind: input, shape index: {}]   ;;  %s743_s2 = inlined_call_operand.vmem [shape: f32[16,1], index: 2, kind: input, shape index: {}]   ;;  %s744_s3 = inlined_call_operand.vmem [shape: f32[16,1024], index: 3, kind: output, shape index: {}]  }
   0x1   :  { %v49_v0 = vld [vmem:[%s741_s1 + $0x100] sm:$0xff]  ;;  %v50_v2 = vld [vmem:[%s741_s1 + $0x108] sm:$0xff]  ;;  %310 = vmatprep.mubr.bf16.mxu0 %v534_v3  ;;  %353 = vmatprep.mubr.bf16.mxu1 %v534_v3  ;;  %v51_v39 = vld [vmem:[%s741_s1 + $0x110] sm:$0xff] }
   0x2   :  { %v53_v1 = vld [vmem:[%s741_s1 + $0x120] sm:$0xff]  ;;  %v54_v5 = vld [vmem:[%s741_s1 + $0x128] sm:$0xff]  ;;  %532 = vset.pattern.permute.xlu0 %v534_v3  ;;  %v55_v40 = vld [vmem:[%s741_s1 + $0x130] sm:$0xff] }
   0x3   :  { %v520_v4 = vcombine.high %v49_v0, %v53_v1  ;;  %v519_v6 = vcombine.low %v49_v0, %v53_v1  ;;  %v41_v7 = vld [vmem:[%s741_s1 + $0xc0] sm:$0xff]  ;;  %v522_v9 = vcombine.high %v50_v2, %v54_v5  ;;  %v521_v10 = vcombine.low %v50_v2, %v54_v5  ;;  %v42_v12 = vld [vmem:[%s741_s1 + $0xc8] sm:$0xff]  ;;  %v52_v42 = vld [vmem:[%s741_s1 + $0x118] sm:$0xff] }
   0x4   :  { %v45_v8 = vld [vmem:[%s741_s1 + $0xe0] sm:$0xff]  ;;  %v46_v13 = vld [vmem:[%s741_s1 + $0xe8] sm:$0xff]  ;;  %v56_v43 = vld [vmem:[%s741_s1 + $0x138] sm:$0xff]  ;;  %v524_v47 = vcombine.high %v51_v39, %v55_v40  ;;  %v523_v54 = vcombine.low %v51_v39, %v55_v40 }
   0x5   :  { %v512_v11 = vcombine.high %v41_v7, %v45_v8  ;;  %v33_v14 = vld [vmem:[%s741_s1 + $0x80] sm:$0xff]  ;;  %284 = vmatprep.subr.bf16.mxu0 %v520_v4  ;;  %v514_v15 = vcombine.high %v42_v12, %v46_v13  ;;  %v34_v17 = vld [vmem:[%s741_s1 + $0x88] sm:$0xff]  ;;  %327 = vmatprep.subr.bf16.mxu1 %v522_v9  ;;  %v511_v19 = vcombine.low %v41_v7, %v45_v8  ;;  %v43_v49 = vld [vmem:[%s741_s1 + $0xd0] sm:$0xff] }
   0x6   :  { %v37_v16 = vld [vmem:[%s741_s1 + $0xa0] sm:$0xff]  ;;  %v38_v18 = vld [vmem:[%s741_s1 + $0xa8] sm:$0xff]  ;;  %285 = vmatpush1.bf16.msra.mxu0 %v519_v6  ;;  %328 = vmatpush1.bf16.msra.mxu1 %v521_v10  ;;  %v513_v20 = vcombine.low %v42_v12, %v46_v13  ;;  %v526_v48 = vcombine.high %v52_v42, %v56_v43  ;;  %v47_v50 = vld [vmem:[%s741_s1 + $0xf0] sm:$0xff]  ;;  %v525_v55 = vcombine.low %v52_v42, %v56_v43 }
   0x7   :  { %286 = vmatprep.subr.bf16.mxu0 %v512_v11  ;;  %v504_v21 = vcombine.high %v33_v14, %v37_v16  ;;  %329 = vmatprep.subr.bf16.mxu1 %v514_v15  ;;  %v506_v22 = vcombine.high %v34_v17, %v38_v18  ;;  %v25_v23 = vld [vmem:[%s741_s1 + $0x40] sm:$0xff]  ;;  %v26_v25 = vld [vmem:[%s741_s1 + $0x48] sm:$0xff]  ;;  %v503_v27 = vcombine.low %v33_v14, %v37_v16  ;;  %v44_v52 = vld [vmem:[%s741_s1 + $0xd8] sm:$0xff] }
   0x8   :  { %v29_v24 = vld [vmem:[%s741_s1 + $0x60] sm:$0xff]  ;;  %v30_v26 = vld [vmem:[%s741_s1 + $0x68] sm:$0xff]  ;;  %v505_v28 = vcombine.low %v34_v17, %v38_v18  ;;  %v48_v53 = vld [vmem:[%s741_s1 + $0xf8] sm:$0xff]  ;;  %v516_v56 = vcombine.high %v43_v49, %v47_v50  ;;  %v515_v62 = vcombine.low %v43_v49, %v47_v50 }
   0x9   :  { %v496_v29 = vcombine.high %v25_v23, %v29_v24  ;;  %v498_v30 = vcombine.high %v26_v25, %v30_v26  ;;  %v17_v31 = vld [vmem:[%s741_s1] sm:$0xff]  ;;  %v18_v33 = vld [vmem:[%s741_s1 + $0x8] sm:$0xff]  ;;  %v495_v35 = vcombine.low %v25_v23, %v29_v24  ;;  %v497_v36 = vcombine.low %v26_v25, %v30_v26  ;;  %v35_v58 = vld [vmem:[%s741_s1 + $0x90] sm:$0xff] }
   0xa   :  { %287 = vmatpush1.bf16.msra.mxu0 %v511_v19  ;;  %330 = vmatpush1.bf16.msra.mxu1 %v513_v20  ;;  %v21_v32 = vld [vmem:[%s741_s1 + $0x20] sm:$0xff]  ;;  %v22_v34 = vld [vmem:[%s741_s1 + $0x28] sm:$0xff]  ;;  %v518_v57 = vcombine.high %v44_v52, %v48_v53  ;;  %v39_v59 = vld [vmem:[%s741_s1 + $0xb0] sm:$0xff]  ;;  %v517_v63 = vcombine.low %v44_v52, %v48_v53 }
   0xb   :  { %288 = vmatprep.subr.bf16.mxu0 %v504_v21  ;;  %331 = vmatprep.subr.bf16.mxu1 %v506_v22  ;;  %v488_v37 = vcombine.high %v17_v31, %v21_v32  ;;  %v490_v38 = vcombine.high %v18_v33, %v22_v34  ;;  %v57_v41 = vld [vmem:[%s743_s2] sm:$0xff]  ;;  %v487_v44 = vcombine.low %v17_v31, %v21_v32  ;;  %v58_v45 = vld [vmem:[%s743_s2 + $0x8] sm:$0xff]  ;;  %v36_v60 = vld [vmem:[%s741_s1 + $0x98] sm:$0xff] }
   0xc   :  { %61 = vperm.xlu0 %532, %v57_v41   ;;  %v489_v46 = vcombine.low %v18_v33, %v22_v34  ;;  %v533_v51 = vld [vmem:[%s742_s0] sm:$0xff]   ;;  %v40_v61 = vld [vmem:[%s741_s1 + $0xb8] sm:$0xff]  ;;  %v508_v0 = vcombine.high %v35_v58, %v39_v59  ;;  %v27_v2 = vld [vmem:[%s741_s1 + $0x50] sm:$0xff]  ;;  %v507_v7 = vcombine.low %v35_v58, %v39_v59 }
   0xd   :  { %v510_v1 = vcombine.high %v36_v60, %v40_v61  ;;  %v31_v4 = vld [vmem:[%s741_s1 + $0x70] sm:$0xff]  ;;  %v28_v5 = vld [vmem:[%s741_s1 + $0x58] sm:$0xff]  ;;  %v509_v8 = vcombine.low %v36_v60, %v40_v61 }
   0xe   :  { %289 = vmatpush1.bf16.msra.mxu0 %v503_v27  ;;  %332 = vmatpush1.bf16.msra.mxu1 %v505_v28  ;;  %v32_v6 = vld [vmem:[%s741_s1 + $0x78] sm:$0xff]  ;;  %v500_v9 = vcombine.high %v27_v2, %v31_v4  ;;  %v19_v11 = vld [vmem:[%s741_s1 + $0x10] sm:$0xff]  ;;  %v499_v14 = vcombine.low %v27_v2, %v31_v4 }
   0xf   :  { %290 = vmatprep.subr.bf16.mxu0 %v496_v29  ;;  %333 = vmatprep.subr.bf16.mxu1 %v498_v30  ;;  %v502_v10 = vcombine.high %v28_v5, %v32_v6  ;;  %v23_v12 = vld [vmem:[%s741_s1 + $0x30] sm:$0xff]  ;;  %v24_v13 = vld [vmem:[%s741_s1 + $0x38] sm:$0xff]  ;;  %v501_v15 = vcombine.low %v28_v5, %v32_v6 }
  0x10   :  { %66 = vperm.xlu0 %532, %v58_v45   ;;  %v492_v16 = vcombine.high %v19_v11, %v23_v12  ;;  %v491_v18 = vcombine.low %v19_v11, %v23_v12 }
  0x12   :  { %291 = vmatpush1.bf16.msra.mxu0 %v495_v35  ;;  %334 = vmatpush1.bf16.msra.mxu1 %v497_v36 }
  0x13   :  { %292 = vmatprep.subr.bf16.mxu0 %v488_v37  ;;  %335 = vmatprep.subr.bf16.mxu1 %v490_v38 }
  0x16   :  { %293 = vmatpush1.bf16.msra.mxu0 %v487_v44  ;;  %336 = vmatpush1.bf16.msra.mxu1 %v489_v46 }
  0x17   :  { %370 = vmatprep.subr.bf16.mxu0 %v524_v47  ;;  %413 = vmatprep.subr.bf16.mxu1 %v526_v48 }
  0x19   :  { %527 = vmatmul.mubr.msk.bf16.vlgmr.msra.gmra.mxu0 %vm274_vm0, %v533_v51  ;;  %528 = vmatmul.mubr.msk.bf16.vlgmr.msra.gmra.mxu1 %vm274_vm0, %v533_v51 }
  0x1a   :  { %371 = vmatpush1.bf16.msra.mxu0 %v523_v54  ;;  %414 = vmatpush1.bf16.msra.mxu1 %v525_v55 }
  0x1b   :  { %372 = vmatprep.subr.bf16.mxu0 %v516_v56  ;;  %415 = vmatprep.subr.bf16.mxu1 %v518_v57 }
  0x1c   :  { %396 = vmatprep.mubr.bf16.mxu0 %v534_v3  ;;  %439 = vmatprep.mubr.bf16.mxu1 %v534_v3  ;;  %v20_v3 = vld [vmem:[%s741_s1 + $0x18] sm:$0xff] }
  0x1d   :  { %v494_v17 = vcombine.high %v20_v3, %v24_v13  ;;  %v493_v19 = vcombine.low %v20_v3, %v24_v13 }
  0x1e   :  { %373 = vmatpush1.bf16.msra.mxu0 %v515_v62  ;;  %416 = vmatpush1.bf16.msra.mxu1 %v517_v63 }
  0x1f   :  { %374 = vmatprep.subr.bf16.mxu0 %v508_v0  ;;  %417 = vmatprep.subr.bf16.mxu1 %v510_v1 }
  0x22   :  { %375 = vmatpush1.bf16.msra.mxu0 %v507_v7  ;;  %418 = vmatpush1.bf16.msra.mxu1 %v509_v8 }
  0x23   :  { %376 = vmatprep.subr.bf16.mxu0 %v500_v9  ;;  %419 = vmatprep.subr.bf16.mxu1 %v502_v10 }
  0x26   :  { %377 = vmatpush1.bf16.msra.mxu0 %v499_v14  ;;  %420 = vmatpush1.bf16.msra.mxu1 %v501_v15 }
  0x27   :  { %378 = vmatprep.subr.bf16.mxu0 %v492_v16  ;;  %421 = vmatprep.subr.bf16.mxu1 %v494_v17 }
  0x2a   :  { %379 = vmatpush1.bf16.msra.mxu0 %v491_v18  ;;  %422 = vmatpush1.bf16.msra.mxu1 %v493_v19 }
  0x2d   :  { %529 = vmatmul.mubr.msk.bf16.vlgmr.msra.gmra.mxu0 %vm274_vm0, %v533_v51  ;;  %530 = vmatmul.mubr.msk.bf16.vlgmr.msra.gmra.mxu1 %vm274_vm0, %v533_v51 }
  0x87   :  { %v62_v20 = vpop.permute.xlu0 %61 }
  0x8b   :  { %v67_v26 = vpop.permute.xlu0 %66 }
  0xd9   :  { %v312_v21 = vpop.f32.mrf.mxu0  ;;  %v355_v23 = vpop.f32.mrf.mxu1 }
  0xda   :  { %v313_v22 = vadd.f32 %v312_v21, %v62_v20  ;;  %v356_v24 = vadd.f32 %v355_v23, %v62_v20 }
  0xdb   :  { %v314_v25 = vpop.f32.mrf.mxu0  ;;  %v357_v29 = vpop.f32.mrf.mxu1 }
  0xdc   :  { %v450_v27 = vmax.f32 %v313_v22, 0.0  ;;  %v315_v28 = vadd.f32 %v314_v25, %v62_v20  ;;  %v452_v30 = vmax.f32 %v356_v24, 0.0  ;;  %v358_v31 = vadd.f32 %v357_v29, %v62_v20 }
  0xdd   :  { %v316_v32 = vpop.f32.mrf.mxu0  ;;  %v359_v35 = vpop.f32.mrf.mxu1 }
  0xde   :  { %466 = vst [vmem:[%s744_s3] sm:$0xff] %v450_v27  ;;  %v451_v33 = vmax.f32 %v315_v28, 0.0  ;;  %v317_v34 = vadd.f32 %v316_v32, %v67_v26  ;;  %468 = vst [vmem:[%s744_s3 + $0x10] sm:$0xff] %v452_v30  ;;  %v453_v36 = vmax.f32 %v358_v31, 0.0  ;;  %v360_v37 = vadd.f32 %v359_v35, %v67_v26 }
  0xdf   :  { %v318_v38 = vpop.f32.mrf.mxu0  ;;  %v361_v41 = vpop.f32.mrf.mxu1 }
  0xe0   :  { %467 = vst [vmem:[%s744_s3 + $0x8] sm:$0xff] %v451_v33  ;;  %v458_v39 = vmax.f32 %v317_v34, 0.0  ;;  %v319_v40 = vadd.f32 %v318_v38, %v67_v26  ;;  %469 = vst [vmem:[%s744_s3 + $0x18] sm:$0xff] %v453_v36  ;;  %v460_v42 = vmax.f32 %v360_v37, 0.0  ;;  %v362_v43 = vadd.f32 %v361_v41, %v67_v26 }
  0xe2   :  { %474 = vst [vmem:[%s744_s3 + $0x40] sm:$0xff] %v458_v39  ;;  %v459_v44 = vmax.f32 %v319_v40, 0.0  ;;  %476 = vst [vmem:[%s744_s3 + $0x50] sm:$0xff] %v460_v42  ;;  %v461_v45 = vmax.f32 %v362_v43, 0.0 }
  0xe4   :  { %475 = vst [vmem:[%s744_s3 + $0x48] sm:$0xff] %v459_v44  ;;  %477 = vst [vmem:[%s744_s3 + $0x58] sm:$0xff] %v461_v45 }
  0xed   :  { %v398_v46 = vpop.f32.mrf.mxu0  ;;  %v441_v48 = vpop.f32.mrf.mxu1 }
  0xee   :  { %v399_v47 = vadd.f32 %v398_v46, %v62_v20  ;;  %v442_v49 = vadd.f32 %v441_v48, %v62_v20 }
  0xef   :  { %v400_v50 = vpop.f32.mrf.mxu0  ;;  %v443_v53 = vpop.f32.mrf.mxu1 }
  0xf0   :  { %v454_v51 = vmax.f32 %v399_v47, 0.0  ;;  %v401_v52 = vadd.f32 %v400_v50, %v62_v20  ;;  %v456_v54 = vmax.f32 %v442_v49, 0.0  ;;  %v444_v55 = vadd.f32 %v443_v53, %v62_v20 }
  0xf1   :  { %v402_v56 = vpop.f32.mrf.mxu0  ;;  %v445_v59 = vpop.f32.mrf.mxu1 }
  0xf2   :  { %470 = vst [vmem:[%s744_s3 + $0x20] sm:$0xff] %v454_v51  ;;  %v455_v57 = vmax.f32 %v401_v52, 0.0  ;;  %v403_v58 = vadd.f32 %v402_v56, %v67_v26  ;;  %472 = vst [vmem:[%s744_s3 + $0x30] sm:$0xff] %v456_v54  ;;  %v457_v60 = vmax.f32 %v444_v55, 0.0  ;;  %v446_v61 = vadd.f32 %v445_v59, %v67_v26 }
  0xf3   :  { %v404_v62 = vpop.f32.mrf.mxu0  ;;  %v447_v1 = vpop.f32.mrf.mxu1 }
  0xf4   :  { %471 = vst [vmem:[%s744_s3 + $0x28] sm:$0xff] %v455_v57  ;;  %v462_v63 = vmax.f32 %v403_v58, 0.0  ;;  %v405_v0 = vadd.f32 %v404_v62, %v67_v26  ;;  %473 = vst [vmem:[%s744_s3 + $0x38] sm:$0xff] %v457_v60  ;;  %v464_v2 = vmax.f32 %v446_v61, 0.0  ;;  %v448_v4 = vadd.f32 %v447_v1, %v67_v26 }
  0xf6   :  { %478 = vst [vmem:[%s744_s3 + $0x60] sm:$0xff] %v462_v63  ;;  %v463_v5 = vmax.f32 %v405_v0, 0.0  ;;  %480 = vst [vmem:[%s744_s3 + $0x70] sm:$0xff] %v464_v2  ;;  %v465_v6 = vmax.f32 %v448_v4, 0.0 }
  0xf8   :  { %479 = vst [vmem:[%s744_s3 + $0x68] sm:$0xff] %v463_v5  ;;  %481 = vst [vmem:[%s744_s3 + $0x78] sm:$0xff] %v465_v6 }

// kernel: similarity_reg_net_forward.8
= control target key start
LH: loop header
LB: loop body
LE: loop exit
PB: predicated region body
PF: predicated region fallthrough
CT: control target
= control target key end

     0   :  { %v327_v1 = vmov 0   ;;  %vm169_vm0 = vcmask 130048   ;;  %s450_s1 = inlined_call_operand.vmem [shape: bf16[144,256], index: 1, kind: input, shape index: {}]   ;;  %s451_s0 = inlined_call_operand.vmem [shape: bf16[32,144], index: 0, kind: input, shape index: {}]   ;;  %s452_s2 = inlined_call_operand.vmem [shape: f32[32,1], index: 2, kind: input, shape index: {}]   ;;  %s453_s3 = inlined_call_operand.vmem [shape: f32[32,256], index: 3, kind: output, shape index: {}]  }
   0x1   :  { %v294_v0 = vld [vmem:[%s450_s1 + $0x74] ss:$8 sps:$4 sm:$0xff]   ;;  %293 = vset.pattern.permute.xlu1 %v327_v1  ;;  %292 = vset.pattern.permute.xlu0 %v327_v1  ;;  %v296_v2 = vld [vmem:[%s450_s1 + $0x70] ss:$8 sps:$4 sm:$0xff]   ;;  %v297_v3 = vld [vmem:[%s450_s1 + $0x64] ss:$8 sps:$4 sm:$0xff]  }
   0x2   :  { %176 = vmatprep.subr.bf16.mxu0 %v294_v0  ;;  %273 = vmatprep.subr.bf16.mxu1 %v294_v0  ;;  %v299_v4 = vld [vmem:[%s450_s1 + $0x60] ss:$8 sps:$4 sm:$0xff]   ;;  %v300_v5 = vld [vmem:[%s450_s1 + $0x54] ss:$8 sps:$4 sm:$0xff]   ;;  %v302_v6 = vld [vmem:[%s450_s1 + $0x50] ss:$8 sps:$4 sm:$0xff]  }
   0x3   :  { %177 = vmatpush1.bf16.msra.mxu0 %v296_v2  ;;  %282 = vmatpush1.bf16.msra.mxu1 %v296_v2  ;;  %v303_v7 = vld [vmem:[%s450_s1 + $0x44] ss:$8 sps:$4 sm:$0xff]   ;;  %v305_v8 = vld [vmem:[%s450_s1 + $0x40] ss:$8 sps:$4 sm:$0xff]   ;;  %v306_v9 = vld [vmem:[%s450_s1 + $0x34] ss:$8 sps:$4 sm:$0xff]  }
   0x4   :  { %178 = vmatprep.subr.bf16.mxu0 %v297_v3  ;;  %274 = vmatprep.subr.bf16.mxu1 %v297_v3  ;;  %v323_v10 = vld [vmem:[%s451_s0 + $0x4] ss:$8 sps:$4 sm:$0xff]   ;;  %v326_v11 = vld [vmem:[%s451_s0 + $0x14] ss:$8 sps:$4 sm:$0xff]   ;;  %v308_v12 = vld [vmem:[%s450_s1 + $0x30] ss:$8 sps:$4 sm:$0xff]  }
   0x5   :  { %v39_v13 = vld [vmem:[%s452_s2 + $0x10] sm:$0xff]  ;;  %v37_v14 = vld [vmem:[%s452_s2] sm:$0xff]  ;;  %271 = vmatprep.mubr.msk.bf16.mxu0 %vm169_vm0, %v323_v10  ;;  %272 = vmatprep.mubr.msk.bf16.mxu1 %vm169_vm0, %v326_v11  ;;  %v40_v17 = vld [vmem:[%s452_s2 + $0x18] sm:$0xff] }
   0x6   :  { %v309_v15 = vld [vmem:[%s450_s1 + $0x24] ss:$8 sps:$4 sm:$0xff]   ;;  %53 = vperm.xlu1 %293, %v39_v13   ;;  %43 = vperm.xlu0 %292, %v37_v14   ;;  %v311_v16 = vld [vmem:[%s450_s1 + $0x20] ss:$8 sps:$4 sm:$0xff]   ;;  %v312_v19 = vld [vmem:[%s450_s1 + $0x14] ss:$8 sps:$4 sm:$0xff]  }
   0x7   :  { %179 = vmatpush1.bf16.msra.mxu0 %v299_v4  ;;  %283 = vmatpush1.bf16.msra.mxu1 %v299_v4  ;;  %v38_v18 = vld [vmem:[%s452_s2 + $0x8] sm:$0xff]  ;;  %v314_v20 = vld [vmem:[%s450_s1 + $0x10] ss:$8 sps:$4 sm:$0xff]  }
   0x8   :  { %180 = vmatprep.subr.bf16.mxu0 %v300_v5  ;;  %275 = vmatprep.subr.bf16.mxu1 %v300_v5  ;;  %v315_v21 = vld [vmem:[%s450_s1 + $0x4] ss:$8 sps:$4 sm:$0xff]   ;;  %v317_v22 = vld [vmem:[%s450_s1] ss:$8 sps:$4 sm:$0xff]   ;;  %v324_v26 = vld [vmem:[%s451_s0 + $0x10] ss:$8 sps:$4 sm:$0xff]  }
   0x9   :  { %v318_v23 = vld [vmem:[%s450_s1 + $0x84] ss:$8 sps:$4 sm:$0xff]   ;;  %v320_v24 = vld [vmem:[%s450_s1 + $0x80] ss:$8 sps:$4 sm:$0xff]  }
   0xa   :  { %58 = vperm.xlu1 %293, %v40_v17   ;;  %48 = vperm.xlu0 %292, %v38_v18   ;;  %v321_v25 = vld [vmem:[%s451_s0] ss:$8 sps:$4 sm:$0xff]  }
   0xb   :  { %181 = vmatpush1.bf16.msra.mxu0 %v302_v6  ;;  %284 = vmatpush1.bf16.msra.mxu1 %v302_v6 }
   0xc   :  { %182 = vmatprep.subr.bf16.mxu0 %v303_v7  ;;  %276 = vmatprep.subr.bf16.mxu1 %v303_v7 }
   0xf   :  { %183 = vmatpush1.bf16.msra.mxu0 %v305_v8  ;;  %285 = vmatpush1.bf16.msra.mxu1 %v305_v8 }
  0x10   :  { %184 = vmatprep.subr.bf16.mxu0 %v306_v9  ;;  %277 = vmatprep.subr.bf16.mxu1 %v306_v9 }
  0x13   :  { %185 = vmatpush1.bf16.msra.mxu0 %v308_v12  ;;  %286 = vmatpush1.bf16.msra.mxu1 %v308_v12 }
  0x14   :  { %186 = vmatprep.subr.bf16.mxu0 %v309_v15  ;;  %278 = vmatprep.subr.bf16.mxu1 %v309_v15 }
  0x17   :  { %187 = vmatpush1.bf16.msra.mxu0 %v311_v16  ;;  %287 = vmatpush1.bf16.msra.mxu1 %v311_v16 }
  0x18   :  { %188 = vmatprep.subr.bf16.mxu0 %v312_v19  ;;  %279 = vmatprep.subr.bf16.mxu1 %v312_v19 }
  0x1b   :  { %189 = vmatpush1.bf16.msra.mxu0 %v314_v20  ;;  %288 = vmatpush1.bf16.msra.mxu1 %v314_v20 }
  0x1c   :  { %190 = vmatprep.subr.bf16.mxu0 %v315_v21  ;;  %280 = vmatprep.subr.bf16.mxu1 %v315_v21 }
  0x1f   :  { %191 = vmatpush1.bf16.msra.mxu0 %v317_v22  ;;  %289 = vmatpush1.bf16.msra.mxu1 %v317_v22 }
  0x20   :  { %206 = vmatprep.subr.bf16.mxu0 %v318_v23  ;;  %281 = vmatprep.subr.bf16.mxu1 %v318_v23 }
  0x23   :  { %207 = vmatpush2.bf16.msra.mxu0 %v320_v24  ;;  %290 = vmatpush2.bf16.msra.mxu1 %v320_v24 }
  0x26   :  { %209 = vmatmul.mubr.bf16.vlgmr.msra.gmra.mxu0 %v321_v25  ;;  %219 = vmatmul.mubr.bf16.vlgmr.msra.gmra.mxu1 %v324_v26 }
  0x81   :  { %v54_v27 = vpop.permute.xlu1 %53  ;;  %v44_v28 = vpop.permute.xlu0 %43 }
  0x85   :  { %v59_v37 = vpop.permute.xlu1 %58  ;;  %v49_v38 = vpop.permute.xlu0 %48 }
  0xe6   :  { %v210_v29 = vpop.f32.mrf.mxu0  ;;  %v220_v30 = vpop.f32.mrf.mxu1 }
  0xe7   :  { %v211_v31 = vadd.f32 %v210_v29, %v44_v28  ;;  %v221_v32 = vadd.f32 %v220_v30, %v54_v27 }
  0xe8   :  { %v212_v33 = vpop.f32.mrf.mxu0  ;;  %v222_v34 = vpop.f32.mrf.mxu1 }
  0xe9   :  { %v229_v35 = vmax.f32 %v211_v31, 0.0  ;;  %v233_v36 = vmax.f32 %v221_v32, 0.0  ;;  %v213_v39 = vadd.f32 %v212_v33, %v44_v28  ;;  %v223_v40 = vadd.f32 %v222_v34, %v54_v27 }
  0xea   :  { %v214_v41 = vpop.f32.mrf.mxu0  ;;  %v224_v42 = vpop.f32.mrf.mxu1 }
  0xeb   :  { %237 = vst [vmem:[%s453_s3] sm:$0xff] %v229_v35  ;;  %241 = vst [vmem:[%s453_s3 + $0x20] sm:$0xff] %v233_v36  ;;  %v230_v43 = vmax.f32 %v213_v39, 0.0  ;;  %v234_v44 = vmax.f32 %v223_v40, 0.0  ;;  %v215_v45 = vadd.f32 %v214_v41, %v49_v38  ;;  %v225_v46 = vadd.f32 %v224_v42, %v59_v37 }
  0xec   :  { %v216_v47 = vpop.f32.mrf.mxu0  ;;  %v226_v48 = vpop.f32.mrf.mxu1 }
  0xed   :  { %238 = vst [vmem:[%s453_s3 + $0x8] sm:$0xff] %v230_v43  ;;  %242 = vst [vmem:[%s453_s3 + $0x28] sm:$0xff] %v234_v44  ;;  %v231_v49 = vmax.f32 %v215_v45, 0.0  ;;  %v235_v50 = vmax.f32 %v225_v46, 0.0  ;;  %v217_v51 = vadd.f32 %v216_v47, %v49_v38  ;;  %v227_v52 = vadd.f32 %v226_v48, %v59_v37 }
  0xef   :  { %239 = vst [vmem:[%s453_s3 + $0x10] sm:$0xff] %v231_v49  ;;  %243 = vst [vmem:[%s453_s3 + $0x30] sm:$0xff] %v235_v50  ;;  %v232_v53 = vmax.f32 %v217_v51, 0.0  ;;  %v236_v54 = vmax.f32 %v227_v52, 0.0 }
  0xf1   :  { %240 = vst [vmem:[%s453_s3 + $0x18] sm:$0xff] %v232_v53  ;;  %244 = vst [vmem:[%s453_s3 + $0x38] sm:$0xff] %v236_v54 }

// kernel: similarity_reg_net_forward.9
= control target key start
LH: loop header
LB: loop body
LE: loop exit
PB: predicated region body
PF: predicated region fallthrough
CT: control target
= control target key end

     0   :  { %s3865_s16 = smov 118   ;;  %s3866_s29 = smov 106   ;;  %v6133_v8 = vmov 0   ;;  %vm183_vm0 = vcmask 1043456   ;;  %vm611_vm1 = vcmask 965632   ;;  %vm1676_vm2 = vcmask 867328   ;;  %s6127_s0 = inlined_call_operand.vmem [shape: bf16[1,32,1536], index: 0, kind: input, shape index: {}]   ;;  %s6128_s1 = inlined_call_operand.vmem [shape: bf16[16,288], index: 1, kind: input, shape index: {}]   ;;  %s6129_s2 = inlined_call_operand.vmem [shape: f32[16,1], index: 2, kind: input, shape index: {}]   ;;  %s6130_s3 = inlined_call_operand.vmem [shape: f32[16,1408], index: 3, kind: output, shape index: {}]  }
   0x1   :  { %v3899_v0 = vld [vmem:[%s6127_s0 + $0x90] sm:$0xff]  ;;  %v3904_v1 = vld [vmem:[%s6127_s0 + $0x60] sm:$0xff]  ;;  %v3913_v2 = vld [vmem:[%s6127_s0 + $0x98] sm:$0xff]  ;;  %s3867_s30 = smov 126   ;;  %3102 = vmatprep.mubr.bf16.mxu1 %v6133_v8  ;;  %3817 = vset.pattern.permute.xlu1 %v6133_v8  ;;  %s3869_s8 = smov 127   ;;  %vm398_vm3 = vcmask 1031168  }
   0x2   :  { %574 = vrot.lane.b32.xlu1 %v3899_v0, %s3865_s16  ;;  %562 = vrot.lane.b32.xlu0 %v3904_v1, %s3865_s16  ;;  %v3918_v3 = vld [vmem:[%s6127_s0 + $0x68] sm:$0xff]  ;;  %v3932_v5 = vld [vmem:[%s6127_s0] sm:$0xff]  ;;  %s3870_s18 = smov 107   ;;  %s3871_s23 = smov 108   ;;  %vm3023_vm4 = vcmask 261120   ;;  %vm185_vm5 = vcmask 1039360  }
   0x3   :  { %v3927_v4 = vld [vmem:[%s6127_s0 + $0x8] sm:$0xff]  ;;  %v3941_v6 = vld [vmem:[%s6127_s0 + $0x38] sm:$0xff]  ;;  %v3946_v7 = vld [vmem:[%s6127_s0 + $0x30] sm:$0xff]  ;;  %3816 = vset.pattern.permute.xlu0 %v6133_v8  ;;  %s3872_s28 = smov 116   ;;  %s3873_s4 = smov 117   ;;  %vm1463_vm6 = vcmask 875520  }
   0x4   :  { %v3990_v9 = vld [vmem:[%s6127_s0 + $0xa0] sm:$0xff]  ;;  %v3995_v10 = vld [vmem:[%s6127_s0 + $0x70] sm:$0xff]  ;;  %v4080_v17 = vld [vmem:[%s6127_s0 + $0x68] sm:$0xff]  ;;  %vm1250_vm7 = vcmask 883712   ;;  %vm1037_vm8 = vcmask 949248   ;;  %vm824_vm9 = vcmask 957440  }
   0x5   :  { %v4012_v11 = vld [vmem:[%s6127_s0 + $0x40] sm:$0xff]  ;;  %v4017_v12 = vld [vmem:[%s6127_s0 + $0x10] sm:$0xff]  ;;  %v4085_v18 = vld [vmem:[%s6127_s0 + $0x98] sm:$0xff]  ;;  %vm3875_vm10 = vmmov 0  }
   0x6   :  { %576 = vrot.lane.b32.xlu1 %v3913_v2, %s3865_s16  ;;  %564 = vrot.lane.b32.xlu0 %v3918_v3, %s3865_s16  ;;  %v4042_v13 = vld [vmem:[%s6127_s0] sm:$0xff]  ;;  %v4047_v14 = vld [vmem:[%s6127_s0 + $0x30] sm:$0xff]  ;;  %v3582_v19 = vcombine.high %v4080_v17, %v4085_v18  ;;  %v3581_v20 = vcombine.low %v4080_v17, %v4085_v18 }
   0x7   :  { %v3569_v15 = vcombine.high %v4042_v13, %v4047_v14  ;;  %v3568_v16 = vcombine.low %v4042_v13, %v4047_v14  ;;  %v4098_v21 = vld [vmem:[%s6127_s0 + $0x8] sm:$0xff]  ;;  %v4103_v22 = vld [vmem:[%s6127_s0 + $0x38] sm:$0xff] }
   0x8   :  { %v3571_v23 = vcombine.high %v4098_v21, %v4103_v22  ;;  %v3570_v24 = vcombine.low %v4098_v21, %v4103_v22 }
   0xa   :  { %540 = vrot.lane.b32.xlu1 %v3927_v4, %s3865_s16  ;;  %538 = vrot.lane.b32.xlu0 %v3932_v5, %s3865_s16 }
   0xe   :  { %552 = vrot.lane.b32.xlu1 %v3941_v6, %s3865_s16  ;;  %550 = vrot.lane.b32.xlu0 %v3946_v7, %s3865_s16 }
  0x12   :  { %1629 = vrot.lane.b32.xlu1 %v3918_v3, %s3866_s29  ;;  %1627 = vrot.lane.b32.xlu0 %v3904_v1, %s3866_s29 }
  0x16   :  { %1641 = vrot.lane.b32.xlu1 %v3913_v2, %s3866_s29  ;;  %1639 = vrot.lane.b32.xlu0 %v3899_v0, %s3866_s29 }
  0x1a   :  { %351 = vrot.lane.b32.xlu1 %v3918_v3, %s3867_s30  ;;  %349 = vrot.lane.b32.xlu0 %v3904_v1, %s3867_s30 }
  0x1e   :  { %363 = vrot.lane.b32.xlu1 %v3913_v2, %s3867_s30  ;;  %361 = vrot.lane.b32.xlu0 %v3899_v0, %s3867_s30 }
  0x22   :  { %1605 = vrot.lane.b32.xlu1 %v3927_v4, %s3866_s29  ;;  %1603 = vrot.lane.b32.xlu0 %v3932_v5, %s3866_s29 }
  0x26   :  { %1617 = vrot.lane.b32.xlu1 %v3941_v6, %s3866_s29  ;;  %1615 = vrot.lane.b32.xlu0 %v3946_v7, %s3866_s29 }
  0x2a   :  { %327 = vrot.lane.b32.xlu1 %v3927_v4, %s3867_s30  ;;  %325 = vrot.lane.b32.xlu0 %v3932_v5, %s3867_s30 }
  0x2e   :  { %339 = vrot.lane.b32.xlu1 %v3941_v6, %s3867_s30  ;;  %337 = vrot.lane.b32.xlu0 %v3946_v7, %s3867_s30 }
  0x32   :  { %578 = vrot.lane.b32.xlu1 %v3990_v9, %s3865_s16  ;;  %566 = vrot.lane.b32.xlu0 %v3995_v10, %s3865_s16 }
  0x36   :  { %137 = vrot.lane.b32.xlu1 %v3918_v3, %s3869_s8  ;;  %135 = vrot.lane.b32.xlu0 %v3904_v1, %s3869_s8 }
  0x3a   :  { %149 = vrot.lane.b32.xlu1 %v3913_v2, %s3869_s8  ;;  %147 = vrot.lane.b32.xlu0 %v3899_v0, %s3869_s8 }
  0x3e   :  { %554 = vrot.lane.b32.xlu1 %v4012_v11, %s3865_s16  ;;  %542 = vrot.lane.b32.xlu0 %v4017_v12, %s3865_s16 }
  0x42   :  { %113 = vrot.lane.b32.xlu1 %v3927_v4, %s3869_s8  ;;  %111 = vrot.lane.b32.xlu0 %v3932_v5, %s3869_s8 }
  0x46   :  { %125 = vrot.lane.b32.xlu1 %v3941_v6, %s3869_s8  ;;  %123 = vrot.lane.b32.xlu0 %v3946_v7, %s3869_s8 }
  0x4a   :  { %365 = vrot.lane.b32.xlu1 %v3990_v9, %s3867_s30  ;;  %353 = vrot.lane.b32.xlu0 %v3995_v10, %s3867_s30 }
  0x4e   :  { %341 = vrot.lane.b32.xlu1 %v4012_v11, %s3867_s30  ;;  %329 = vrot.lane.b32.xlu0 %v4017_v12, %s3867_s30 }
  0x52   :  { %151 = vrot.lane.b32.xlu1 %v3990_v9, %s3869_s8  ;;  %139 = vrot.lane.b32.xlu0 %v3995_v10, %s3869_s8 }
  0x56   :  { %127 = vrot.lane.b32.xlu1 %v4012_v11, %s3869_s8  ;;  %115 = vrot.lane.b32.xlu0 %v4017_v12, %s3869_s8 }
  0x5a   :  { %1416 = vrot.lane.b32.xlu1 %v3918_v3, %s3870_s18  ;;  %1414 = vrot.lane.b32.xlu0 %v3904_v1, %s3870_s18 }
  0x5e   :  { %1428 = vrot.lane.b32.xlu1 %v3913_v2, %s3870_s18  ;;  %1426 = vrot.lane.b32.xlu0 %v3899_v0, %s3870_s18 }
  0x62   :  { %1392 = vrot.lane.b32.xlu1 %v3927_v4, %s3870_s18  ;;  %1390 = vrot.lane.b32.xlu0 %v3932_v5, %s3870_s18 }
  0x66   :  { %1404 = vrot.lane.b32.xlu1 %v3941_v6, %s3870_s18  ;;  %1402 = vrot.lane.b32.xlu0 %v3946_v7, %s3870_s18 }
  0x6a   :  { %1203 = vrot.lane.b32.xlu1 %v3918_v3, %s3871_s23  ;;  %1201 = vrot.lane.b32.xlu0 %v3904_v1, %s3871_s23 }
  0x6e   :  { %1215 = vrot.lane.b32.xlu1 %v3913_v2, %s3871_s23  ;;  %1213 = vrot.lane.b32.xlu0 %v3899_v0, %s3871_s23 }
  0x72   :  { %1179 = vrot.lane.b32.xlu1 %v3927_v4, %s3871_s23  ;;  %1177 = vrot.lane.b32.xlu0 %v3932_v5, %s3871_s23 }
  0x74   :  { %v575_v25 = vpop.permute.xlu1 %574  ;;  %v563_v26 = vpop.permute.xlu0 %562 }
  0x75   :  { %v604_v29 = vrot.slane %v575_v25, 4  ;;  %v598_v30 = vrot.slane %v563_v26, 4 }
  0x76   :  { %1191 = vrot.lane.b32.xlu1 %v3941_v6, %s3871_s23  ;;  %1189 = vrot.lane.b32.xlu0 %v3946_v7, %s3871_s23 }
  0x78   :  { %v4121_v27 = vpop.permute.xlu1 %576  ;;  %v4123_v28 = vpop.permute.xlu0 %564 }
  0x79   :  { %v605_v31 = vrot.slane %v4121_v27, 4  ;;  %v599_v32 = vrot.slane %v4123_v28, 4 }
  0x7a   :  { %1430 = vrot.lane.b32.xlu1 %v3990_v9, %s3870_s18  ;;  %1418 = vrot.lane.b32.xlu0 %v3995_v10, %s3870_s18 }
  0x7b   :  { %v644_v33 = vsel %vm183_vm0, %v604_v29, %v605_v31  ;;  %v633_v34 = vsel %vm183_vm0, %v598_v30, %v599_v32 }
  0x7c   :  { %v645_v35 = vsel %vm611_vm1, %v575_v25, %v644_v33  ;;  %v634_v36 = vsel %vm611_vm1, %v563_v26, %v633_v34  ;;  %v4139_v37 = vpop.permute.xlu1 %540  ;;  %v539_v38 = vpop.permute.xlu0 %538 }
  0x7d   :  { %v587_v39 = vrot.slane %v4139_v37, 4  ;;  %v586_v40 = vrot.slane %v539_v38, 4  ;;  %v3646_v41 = vcombine.high %v634_v36, %v645_v35  ;;  %v3645_v42 = vcombine.low %v634_v36, %v645_v35 }
  0x7e   :  { %990 = vrot.lane.b32.xlu1 %v3918_v3, %s3872_s28  ;;  %988 = vrot.lane.b32.xlu0 %v3904_v1, %s3872_s28 }
  0x7f   :  { %v610_v43 = vsel %vm183_vm0, %v586_v40, %v587_v39  ;;  %3027 = vmatprep.subr.bf16.mxu0 %v3646_v41 }
  0x80   :  { %v612_v44 = vsel %vm611_vm1, %v539_v38, %v610_v43  ;;  %v4150_v45 = vpop.permute.xlu1 %552  ;;  %v551_v46 = vpop.permute.xlu0 %550  ;;  %3028 = vmatpush1.bf16.msra.mxu0 %v3645_v42 }
  0x81   :  { %v593_v47 = vrot.slane %v4150_v45, 4  ;;  %v592_v48 = vrot.slane %v551_v46, 4 }
  0x82   :  { %1002 = vrot.lane.b32.xlu1 %v3913_v2, %s3872_s28  ;;  %1000 = vrot.lane.b32.xlu0 %v3899_v0, %s3872_s28 }
  0x83   :  { %v622_v49 = vsel %vm183_vm0, %v592_v48, %v593_v47 }
  0x84   :  { %v623_v50 = vsel %vm611_vm1, %v551_v46, %v622_v49  ;;  %v4161_v51 = vpop.permute.xlu1 %1629  ;;  %v1628_v52 = vpop.permute.xlu0 %1627 }
  0x85   :  { %v6135_v53 = vrot.slane %v4161_v51, 4  ;;  %v1663_v54 = vrot.slane %v1628_v52, 4  ;;  %v3635_v55 = vcombine.high %v612_v44, %v623_v50  ;;  %v3634_v56 = vcombine.low %v612_v44, %v623_v50 }
  0x86   :  { %1406 = vrot.lane.b32.xlu1 %v4012_v11, %s3870_s18  ;;  %1394 = vrot.lane.b32.xlu0 %v4017_v12, %s3870_s18 }
  0x87   :  { %v1698_v57 = vsel %vm183_vm0, %v1663_v54, %v6135_v53  ;;  %3029 = vmatprep.subr.bf16.mxu0 %v3635_v55 }
  0x88   :  { %v1699_v58 = vsel %vm1676_vm2, %v1628_v52, %v1698_v57  ;;  %v4172_v59 = vpop.permute.xlu1 %1641  ;;  %v1640_v60 = vpop.permute.xlu0 %1639  ;;  %3030 = vmatpush1.bf16.msra.mxu0 %v3634_v56 }
  0x89   :  { %v6136_v61 = vrot.slane %v4172_v59, 4  ;;  %v1669_v62 = vrot.slane %v1640_v60, 4 }
  0x8a   :  { %966 = vrot.lane.b32.xlu1 %v3927_v4, %s3872_s28  ;;  %964 = vrot.lane.b32.xlu0 %v3932_v5, %s3872_s28 }
  0x8b   :  { %v1709_v63 = vsel %vm183_vm0, %v1669_v62, %v6136_v61 }
  0x8c   :  { %v1710_v25 = vsel %vm1676_vm2, %v1640_v60, %v1709_v63  ;;  %v4183_v26 = vpop.permute.xlu1 %351  ;;  %v350_v29 = vpop.permute.xlu0 %349 }
  0x8d   :  { %v386_v30 = vrot.slane %v4183_v26, 4  ;;  %v385_v33 = vrot.slane %v350_v29, 4  ;;  %v3756_v34 = vcombine.high %v1699_v58, %v1710_v25  ;;  %v3755_v35 = vcombine.low %v1699_v58, %v1710_v25 }
  0x8e   :  { %978 = vrot.lane.b32.xlu1 %v3941_v6, %s3872_s28  ;;  %976 = vrot.lane.b32.xlu0 %v3946_v7, %s3872_s28 }
  0x8f   :  { %v420_v36 = vsel %vm183_vm0, %v385_v33, %v386_v30  ;;  %3082 = vmatprep.subr.bf16.mxu1 %v3756_v34 }
  0x90   :  { %v421_v38 = vsel %vm398_vm3, %v350_v29, %v420_v36  ;;  %v4194_v40 = vpop.permute.xlu1 %363  ;;  %v362_v41 = vpop.permute.xlu0 %361  ;;  %3083 = vmatpush1.bf16.msra.mxu1 %v3755_v35 }
  0x91   :  { %v392_v42 = vrot.slane %v4194_v40, 4  ;;  %v391_v43 = vrot.slane %v362_v41, 4 }
  0x92   :  { %1217 = vrot.lane.b32.xlu1 %v3990_v9, %s3871_s23  ;;  %1205 = vrot.lane.b32.xlu0 %v3995_v10, %s3871_s23 }
  0x93   :  { %v431_v44 = vsel %vm183_vm0, %v391_v43, %v392_v42 }
  0x94   :  { %v432_v46 = vsel %vm398_vm3, %v362_v41, %v431_v44  ;;  %v4205_v48 = vpop.permute.xlu1 %1605  ;;  %v1604_v49 = vpop.permute.xlu0 %1603  ;;  %v3818_v41 = vld [vmem:[%s6128_s1 + $0x8] ss:$12 sps:$4 sm:$0xff]  }
  0x95   :  { %v6131_v50 = vrot.slane %v4205_v48, 4  ;;  %v1651_v52 = vrot.slane %v1604_v49, 4  ;;  %v3624_v54 = vcombine.high %v421_v38, %v432_v46  ;;  %v3623_v55 = vcombine.low %v421_v38, %v432_v46 }
  0x96   :  { %777 = vrot.lane.b32.xlu1 %v3918_v3, %s3873_s4  ;;  %775 = vrot.lane.b32.xlu0 %v3904_v1, %s3873_s4 }
  0x97   :  { %v1675_v56 = vsel %vm183_vm0, %v1651_v52, %v6131_v50  ;;  %3031 = vmatprep.subr.bf16.mxu0 %v3624_v54 }
  0x98   :  { %v1677_v57 = vsel %vm1676_vm2, %v1604_v49, %v1675_v56  ;;  %v4216_v58 = vpop.permute.xlu1 %1617  ;;  %v1616_v60 = vpop.permute.xlu0 %1615  ;;  %3032 = vmatpush1.bf16.msra.mxu0 %v3623_v55 }
  0x99   :  { %v6132_v62 = vrot.slane %v4216_v58, 4  ;;  %v1657_v63 = vrot.slane %v1616_v60, 4 }
  0x9a   :  { %789 = vrot.lane.b32.xlu1 %v3913_v2, %s3873_s4  ;;  %787 = vrot.lane.b32.xlu0 %v3899_v0, %s3873_s4 }
  0x9b   :  { %v1687_v3 = vsel %vm183_vm0, %v1657_v63, %v6132_v62 }
  0x9c   :  { %v1688_v25 = vsel %vm1676_vm2, %v1616_v60, %v1687_v3  ;;  %v4227_v29 = vpop.permute.xlu1 %327  ;;  %v326_v33 = vpop.permute.xlu0 %325 }
  0x9d   :  { %v374_v34 = vrot.slane %v4227_v29, 4  ;;  %v373_v35 = vrot.slane %v326_v33, 4  ;;  %v3745_v36 = vcombine.high %v1677_v57, %v1688_v25  ;;  %v3744_v38 = vcombine.low %v1677_v57, %v1688_v25 }
  0x9e   :  { %1193 = vrot.lane.b32.xlu1 %v4012_v11, %s3871_s23  ;;  %1181 = vrot.lane.b32.xlu0 %v4017_v12, %s3871_s23 }
  0x9f   :  { %v397_v2 = vsel %vm183_vm0, %v373_v35, %v374_v34  ;;  %3084 = vmatprep.subr.bf16.mxu1 %v3745_v36 }
  0xa0   :  { %v399_v43 = vsel %vm398_vm3, %v326_v33, %v397_v2  ;;  %v4241_v44 = vpop.permute.xlu1 %339  ;;  %v338_v46 = vpop.permute.xlu0 %337  ;;  %3085 = vmatpush1.bf16.msra.mxu1 %v3744_v38 }
  0xa1   :  { %v380_v49 = vrot.slane %v4241_v44, 4  ;;  %v379_v52 = vrot.slane %v338_v46, 4 }
  0xa2   :  { %753 = vrot.lane.b32.xlu1 %v3927_v4, %s3873_s4  ;;  %751 = vrot.lane.b32.xlu0 %v3932_v5, %s3873_s4  ;;  %v4262_v5 = vld [vmem:[%s6128_s1 + $0x4] ss:$12 sps:$4 sm:$0xff]  }
  0xa3   :  { %v409_v54 = vsel %vm183_vm0, %v379_v52, %v380_v49  ;;  %3766 = vmatmul.mubr.msk.bf16.vlgmr.msra.gmra.mxu1 %vm3023_vm4, %v3818_v41  ;;  %3059 = vmatprep.mubr.bf16.mxu0 %v4262_v5  ;;  %v4302_v41 = vld [vmem:[%s6127_s0 + $0x78] sm:$0xff] }
  0xa4   :  { %v410_v55 = vsel %vm398_vm3, %v338_v46, %v409_v54  ;;  %v4253_v56 = vpop.permute.xlu1 %578  ;;  %v4255_v57 = vpop.permute.xlu0 %566  ;;  %3145 = vmatprep.mubr.bf16.mxu1 %v4262_v5 }
  0xa5   :  { %v6157_v60 = vrot.slane %v4253_v56, 4  ;;  %v6156_v63 = vrot.slane %v4255_v57, 4  ;;  %v3613_v4 = vcombine.high %v399_v43, %v410_v55  ;;  %v3612_v3 = vcombine.low %v399_v43, %v410_v55 }
  0xa6   :  { %765 = vrot.lane.b32.xlu1 %v3941_v6, %s3873_s4  ;;  %763 = vrot.lane.b32.xlu0 %v3946_v7, %s3873_s4 }
  0xa7   :  { %v646_v25 = vsel %vm183_vm0, %v605_v31, %v6157_v60  ;;  %v635_v33 = vsel %vm183_vm0, %v599_v32, %v6156_v63  ;;  %3033 = vmatprep.subr.bf16.mxu0 %v3613_v4 }
  0xa8   :  { %v647_v6 = vsel %vm611_vm1, %v4121_v27, %v646_v25  ;;  %v636_v7 = vsel %vm611_vm1, %v4123_v28, %v635_v33  ;;  %v4283_v35 = vpop.permute.xlu1 %137  ;;  %v136_v36 = vpop.permute.xlu0 %135  ;;  %3034 = vmatpush1.bf16.msra.mxu0 %v3612_v3  ;;  %v4297_v28 = vld [vmem:[%s6127_s0 + $0xa8] sm:$0xff] }
  0xa9   :  { %v172_v31 = vrot.slane %v4283_v35, 4  ;;  %v171_v38 = vrot.slane %v136_v36, 4  ;;  %v3647_v32 = vcombine.low %v636_v7, %v647_v6  ;;  %v3648_v2 = vcombine.high %v636_v7, %v647_v6 }
  0xaa   :  { %1004 = vrot.lane.b32.xlu1 %v3990_v9, %s3872_s28  ;;  %992 = vrot.lane.b32.xlu0 %v3995_v10, %s3872_s28 }
  0xab   :  { %v207_v27 = vsel %vm183_vm0, %v171_v38, %v172_v31  ;;  %3113 = vmatprep.subr.bf16.mxu1 %v3648_v2 }
  0xac   :  { %v208_v43 = vsel %vm185_vm5, %v136_v36, %v207_v27  ;;  %v4305_v46 = vpop.permute.xlu1 %149  ;;  %v148_v52 = vpop.permute.xlu0 %147  ;;  %3114 = vmatpush1.bf16.msra.mxu1 %v3647_v32  ;;  %v4339_v27 = vld [vmem:[%s6127_s0 + $0x48] sm:$0xff] }
  0xad   :  { %v178_v54 = vrot.slane %v4305_v46, 4  ;;  %v177_v55 = vrot.slane %v148_v52, 4 }
  0xae   :  { %580 = vrot.lane.b32.xlu1 %v4297_v28, %s3865_s16  ;;  %568 = vrot.lane.b32.xlu0 %v4302_v41, %s3865_s16 }
  0xaf   :  { %v218_v4 = vsel %vm183_vm0, %v177_v55, %v178_v54 }
  0xb0   :  { %v219_v3 = vsel %vm185_vm5, %v148_v52, %v218_v4  ;;  %v4316_v25 = vpop.permute.xlu1 %554  ;;  %v4318_v33 = vpop.permute.xlu0 %542 }
  0xb1   :  { %v6152_v6 = vrot.slane %v4316_v25, 4  ;;  %v6138_v7 = vrot.slane %v4318_v33, 4  ;;  %v3602_v36 = vcombine.high %v208_v43, %v219_v3  ;;  %v3601_v38 = vcombine.low %v208_v43, %v219_v3  ;;  %v4344_v43 = vld [vmem:[%s6127_s0 + $0x18] sm:$0xff] }
  0xb2   :  { %980 = vrot.lane.b32.xlu1 %v4012_v11, %s3872_s28  ;;  %968 = vrot.lane.b32.xlu0 %v4017_v12, %s3872_s28 }
  0xb3   :  { %v624_v32 = vsel %vm183_vm0, %v593_v47, %v6152_v6  ;;  %v613_v2 = vsel %vm183_vm0, %v587_v39, %v6138_v7  ;;  %3035 = vmatprep.subr.bf16.mxu0 %v3602_v36  ;;  %v4772_v6 = vld [vmem:[%s6127_s0 + $0x18] sm:$0xff] }
  0xb4   :  { %v625_v47 = vsel %vm611_vm1, %v4150_v45, %v624_v32  ;;  %v614_v52 = vsel %vm611_vm1, %v4139_v37, %v613_v2  ;;  %v4350_v55 = vpop.permute.xlu1 %113  ;;  %v112_v39 = vpop.permute.xlu0 %111  ;;  %3036 = vmatpush1.bf16.msra.mxu0 %v3601_v38 }
  0xb5   :  { %v160_v4 = vrot.slane %v4350_v55, 4  ;;  %v159_v3 = vrot.slane %v112_v39, 4  ;;  %v3636_v50 = vcombine.low %v614_v52, %v625_v47  ;;  %v3637_v62 = vcombine.high %v614_v52, %v625_v47 }
  0xb6   :  { %556 = vrot.lane.b32.xlu1 %v4339_v27, %s3865_s16  ;;  %544 = vrot.lane.b32.xlu0 %v4344_v43, %s3865_s16 }
  0xb7   :  { %v184_v45 = vsel %vm183_vm0, %v159_v3, %v160_v4  ;;  %3115 = vmatprep.subr.bf16.mxu1 %v3637_v62 }
  0xb8   :  { %v186_v37 = vsel %vm185_vm5, %v112_v39, %v184_v45  ;;  %v4361_v36 = vpop.permute.xlu1 %125  ;;  %v124_v38 = vpop.permute.xlu0 %123  ;;  %3116 = vmatpush1.bf16.msra.mxu1 %v3636_v50  ;;  %v3580_v50 = vcombine.high %v3904_v1, %v3899_v0 }
  0xb9   :  { %v166_v32 = vrot.slane %v4361_v36, 4  ;;  %v165_v2 = vrot.slane %v124_v38, 4 }
  0xba   :  { %791 = vrot.lane.b32.xlu1 %v3990_v9, %s3873_s4  ;;  %779 = vrot.lane.b32.xlu0 %v3995_v10, %s3873_s4 }
  0xbb   :  { %v196_v47 = vsel %vm183_vm0, %v165_v2, %v166_v32 }
  0xbc   :  { %v197_v62 = vsel %vm185_vm5, %v124_v38, %v196_v47  ;;  %v4372_v52 = vpop.permute.xlu1 %365  ;;  %v4374_v39 = vpop.permute.xlu0 %353 }
  0xbd   :  { %v6137_v3 = vrot.slane %v4372_v52, 4  ;;  %v6148_v45 = vrot.slane %v4374_v39, 4  ;;  %v3591_v8 = vcombine.high %v186_v37, %v197_v62  ;;  %v3590_v53 = vcombine.low %v186_v37, %v197_v62 }
  0xbe   :  { %367 = vrot.lane.b32.xlu1 %v4297_v28, %s3867_s30  ;;  %355 = vrot.lane.b32.xlu0 %v4302_v41, %s3867_s30 }
  0xbf   :  { %v433_v38 = vsel %vm183_vm0, %v392_v42, %v6137_v3  ;;  %v422_v2 = vsel %vm183_vm0, %v386_v30, %v6148_v45  ;;  %3037 = vmatprep.subr.bf16.mxu0 %v3591_v8  ;;  %v3579_v42 = vcombine.low %v3904_v1, %v3899_v0 }
  0xc0   :  { %v434_v37 = vsel %vm398_vm3, %v4194_v40, %v433_v38  ;;  %v423_v47 = vsel %vm398_vm3, %v4183_v26, %v422_v2  ;;  %v4398_v62 = vpop.permute.xlu1 %341  ;;  %v4400_v61 = vpop.permute.xlu0 %329  ;;  %3038 = vmatpush1.bf16.msra.mxu0 %v3590_v53 }
  0xc1   :  { %v6146_v3 = vrot.slane %v4398_v62, 4  ;;  %v6144_v7 = vrot.slane %v4400_v61, 4  ;;  %v3625_v30 = vcombine.low %v423_v47, %v434_v37  ;;  %v3626_v8 = vcombine.high %v423_v47, %v434_v37  ;;  %3039 = vmatprep.subr.bf16.mxu0 %v3580_v50 }
  0xc2   :  { %767 = vrot.lane.b32.xlu1 %v4012_v11, %s3873_s4  ;;  %755 = vrot.lane.b32.xlu0 %v4017_v12, %s3873_s4 }
  0xc3   :  { %v411_v53 = vsel %vm183_vm0, %v380_v49, %v6146_v3  ;;  %v400_v0 = vsel %vm183_vm0, %v374_v34, %v6144_v7  ;;  %3117 = vmatprep.subr.bf16.mxu1 %v3626_v8 }
  0xc4   :  { %v412_v1 = vsel %vm398_vm3, %v4241_v44, %v411_v53  ;;  %v401_v26 = vsel %vm398_vm3, %v4227_v29, %v400_v0  ;;  %v4424_v40 = vpop.permute.xlu1 %151  ;;  %v4426_v50 = vpop.permute.xlu0 %139  ;;  %3118 = vmatpush1.bf16.msra.mxu1 %v3625_v30  ;;  %3040 = vmatpush1.bf16.msra.mxu0 %v3579_v42 }
  0xc5   :  { %v6143_v49 = vrot.slane %v4424_v40, 4  ;;  %v6141_v38 = vrot.slane %v4426_v50, 4  ;;  %v3614_v2 = vcombine.low %v401_v26, %v412_v1  ;;  %v3615_v37 = vcombine.high %v401_v26, %v412_v1  ;;  %3041 = vmatprep.subr.bf16.mxu0 %v3569_v15 }
  0xc6   :  { %343 = vrot.lane.b32.xlu1 %v4339_v27, %s3867_s30  ;;  %331 = vrot.lane.b32.xlu0 %v4344_v43, %s3867_s30 }
  0xc7   :  { %v220_v29 = vsel %vm183_vm0, %v178_v54, %v6143_v49  ;;  %v209_v34 = vsel %vm183_vm0, %v172_v31, %v6141_v38  ;;  %3119 = vmatprep.subr.bf16.mxu1 %v3615_v37 }
  0xc8   :  { %v221_v15 = vsel %vm185_vm5, %v4305_v46, %v220_v29  ;;  %v210_v44 = vsel %vm185_vm5, %v4283_v35, %v209_v34  ;;  %v4451_v47 = vpop.permute.xlu1 %127  ;;  %v4453_v42 = vpop.permute.xlu0 %115  ;;  %3120 = vmatpush1.bf16.msra.mxu1 %v3614_v2  ;;  %3042 = vmatpush1.bf16.msra.mxu0 %v3568_v16 }
  0xc9   :  { %v6140_v54 = vrot.slane %v4451_v47, 4  ;;  %v6139_v31 = vrot.slane %v4453_v42, 4  ;;  %v3603_v30 = vcombine.low %v210_v44, %v221_v15  ;;  %v3604_v8 = vcombine.high %v210_v44, %v221_v15 }
  0xca   :  { %1643 = vrot.lane.b32.xlu1 %v3990_v9, %s3866_s29  ;;  %1631 = vrot.lane.b32.xlu0 %v3995_v10, %s3866_s29 }
  0xcb   :  { %v198_v35 = vsel %vm183_vm0, %v166_v32, %v6140_v54  ;;  %v187_v13 = vsel %vm183_vm0, %v160_v4, %v6139_v31  ;;  %3121 = vmatprep.subr.bf16.mxu1 %v3604_v8  ;;  %v4533_v8 = vld [vmem:[%s6127_s0 + $0xa0] sm:$0xff] }
  0xcc   :  { %v199_v14 = vsel %vm185_vm5, %v4361_v36, %v198_v35  ;;  %v188_v9 = vsel %vm185_vm5, %v4350_v55, %v187_v13  ;;  %v4478_v10 = vpop.permute.xlu1 %1416  ;;  %v1415_v16 = vpop.permute.xlu0 %1414  ;;  %3122 = vmatpush1.bf16.msra.mxu1 %v3603_v30 }
  0xcd   :  { %v1451_v46 = vrot.slane %v4478_v10, 4  ;;  %v1450_v32 = vrot.slane %v1415_v16, 4  ;;  %v3592_v53 = vcombine.low %v188_v9, %v199_v14  ;;  %v3593_v0 = vcombine.high %v188_v9, %v199_v14 }
  0xce   :  { %153 = vrot.lane.b32.xlu1 %v4297_v28, %s3869_s8  ;;  %141 = vrot.lane.b32.xlu0 %v4302_v41, %s3869_s8 }
  0xcf   :  { %v1485_v55 = vsel %vm183_vm0, %v1450_v32, %v1451_v46  ;;  %3123 = vmatprep.subr.bf16.mxu1 %v3593_v0  ;;  %v4553_v32 = vld [vmem:[%s6127_s0 + $0x10] sm:$0xff] }
  0xd0   :  { %v1486_v4 = vsel %vm1463_vm6, %v1415_v16, %v1485_v55  ;;  %v4489_v36 = vpop.permute.xlu1 %1428  ;;  %v1427_v1 = vpop.permute.xlu0 %1426  ;;  %3124 = vmatpush1.bf16.msra.mxu1 %v3592_v53  ;;  %v4558_v53 = vld [vmem:[%s6127_s0 + $0x40] sm:$0xff] }
  0xd1   :  { %v1457_v26 = vrot.slane %v4489_v36, 4  ;;  %v1456_v2 = vrot.slane %v1427_v1, 4  ;;  %3125 = vmatprep.subr.bf16.mxu1 %v3582_v19 }
  0xd2   :  { %1619 = vrot.lane.b32.xlu1 %v4012_v11, %s3866_s29  ;;  %1607 = vrot.lane.b32.xlu0 %v4017_v12, %s3866_s29 }
  0xd3   :  { %v1496_v37 = vsel %vm183_vm0, %v1456_v2, %v1457_v26 }
  0xd4   :  { %v1497_v29 = vsel %vm1463_vm6, %v1427_v1, %v1496_v37  ;;  %v4503_v34 = vpop.permute.xlu1 %1392  ;;  %v1391_v15 = vpop.permute.xlu0 %1390  ;;  %3126 = vmatpush1.bf16.msra.mxu1 %v3581_v20 }
  0xd5   :  { %v1439_v19 = vrot.slane %v4503_v34, 4  ;;  %v1438_v44 = vrot.slane %v1391_v15, 4  ;;  %v3734_v11 = vcombine.high %v1486_v4, %v1497_v29  ;;  %v3733_v30 = vcombine.low %v1486_v4, %v1497_v29  ;;  %3127 = vmatprep.subr.bf16.mxu1 %v3571_v23  ;;  %v4528_v23 = vld [vmem:[%s6127_s0 + $0x70] sm:$0xff] }
  0xd6   :  { %129 = vrot.lane.b32.xlu1 %v4339_v27, %s3869_s8  ;;  %117 = vrot.lane.b32.xlu0 %v4344_v43, %s3869_s8 }
  0xd7   :  { %v1462_v12 = vsel %vm183_vm0, %v1438_v44, %v1439_v19  ;;  %3043 = vmatprep.subr.bf16.mxu0 %v3734_v11  ;;  %v4580_v44 = vld [vmem:[%s6127_s0 + $0x80] sm:$0xff] }
  0xd8   :  { %v1464_v17 = vsel %vm1463_vm6, %v1391_v15, %v1462_v12  ;;  %v4520_v18 = vpop.permute.xlu1 %1404  ;;  %v1403_v20 = vpop.permute.xlu0 %1402  ;;  %3044 = vmatpush2.bf16.msra.mxu0 %v3733_v30  ;;  %3128 = vmatpush1.bf16.msra.mxu1 %v3570_v24  ;;  %v4575_v15 = vld [vmem:[%s6127_s0 + $0xb0] sm:$0xff] }
  0xd9   :  { %v1445_v35 = vrot.slane %v4520_v18, 4  ;;  %v1444_v13 = vrot.slane %v1403_v20, 4 }
  0xda   :  { %1645 = vrot.lane.b32.xlu1 %v4297_v28, %s3866_s29  ;;  %1633 = vrot.lane.b32.xlu0 %v4302_v41, %s3866_s29 }
  0xdb   :  { %v1474_v22 = vsel %vm183_vm0, %v1444_v13, %v1445_v35 }
  0xdc   :  { %v1475_v24 = vsel %vm1463_vm6, %v1403_v20, %v1474_v22  ;;  %v4548_v9 = vpop.permute.xlu1 %1203  ;;  %v1202_v16 = vpop.permute.xlu0 %1201  ;;  %v4596_v22 = vld [vmem:[%s6127_s0 + $0x50] sm:$0xff] }
  0xdd   :  { %v1238_v0 = vrot.slane %v4548_v9, 4  ;;  %v1237_v55 = vrot.slane %v1202_v16, 4  ;;  %v3723_v4 = vcombine.high %v1464_v17, %v1475_v24  ;;  %v3722_v1 = vcombine.low %v1464_v17, %v1475_v24  ;;  %v4601_v24 = vld [vmem:[%s6127_s0 + $0x20] sm:$0xff] }
  0xde   :  { %1621 = vrot.lane.b32.xlu1 %v4339_v27, %s3866_s29  ;;  %1609 = vrot.lane.b32.xlu0 %v4344_v43, %s3866_s29 }
  0xdf   :  { %v1272_v29 = vsel %vm183_vm0, %v1237_v55, %v1238_v0  ;;  %3045 = vmatprep.subr.bf16.mxu0 %v3723_v4 }
  0xe0   :  { %v1273_v11 = vsel %vm1250_vm7, %v1202_v16, %v1272_v29  ;;  %v4583_v30 = vpop.permute.xlu1 %1215  ;;  %v1214_v12 = vpop.permute.xlu0 %1213  ;;  %3046 = vmatpush2.bf16.msra.mxu0 %v3722_v1 }
  0xe1   :  { %v1244_v17 = vrot.slane %v4583_v30, 4  ;;  %v1243_v20 = vrot.slane %v1214_v12, 4 }
  0xe2   :  { %582 = vrot.lane.b32.xlu1 %v4575_v15, %s3865_s16  ;;  %570 = vrot.lane.b32.xlu0 %v4580_v44, %s3865_s16 }
  0xe3   :  { %v1283_v13 = vsel %vm183_vm0, %v1243_v20, %v1244_v17 }
  0xe4   :  { %v1284_v16 = vsel %vm1250_vm7, %v1214_v12, %v1283_v13  ;;  %v4604_v55 = vpop.permute.xlu1 %1179  ;;  %v1178_v4 = vpop.permute.xlu0 %1177 }
  0xe5   :  { %v1226_v1 = vrot.slane %v4604_v55, 4  ;;  %v1225_v29 = vrot.slane %v1178_v4, 4  ;;  %v3712_v2 = vcombine.high %v1273_v11, %v1284_v16  ;;  %v3711_v20 = vcombine.low %v1273_v11, %v1284_v16 }
  0xe6   :  { %558 = vrot.lane.b32.xlu1 %v4596_v22, %s3865_s16  ;;  %546 = vrot.lane.b32.xlu0 %v4601_v24, %s3865_s16 }
  0xe7   :  { %v1249_v37 = vsel %vm183_vm0, %v1225_v29, %v1226_v1  ;;  %3047 = vmatprep.subr.bf16.mxu0 %v3712_v2 }
  0xe8   :  { %v1251_v12 = vsel %vm1250_vm7, %v1178_v4, %v1249_v37  ;;  %v4615_v13 = vpop.permute.xlu1 %1191  ;;  %v1190_v21 = vpop.permute.xlu0 %1189  ;;  %3048 = vmatpush2.bf16.msra.mxu0 %v3711_v20 }
  0xe9   :  { %v1232_v14 = vrot.slane %v4615_v13, 4  ;;  %v1231_v11 = vrot.slane %v1190_v21, 4 }
  0xea   :  { %1432 = vrot.lane.b32.xlu1 %v4297_v28, %s3870_s18  ;;  %1420 = vrot.lane.b32.xlu0 %v4302_v41, %s3870_s18 }
  0xeb   :  { %v1261_v16 = vsel %vm183_vm0, %v1231_v11, %v1232_v14 }
  0xec   :  { %v1262_v2 = vsel %vm1250_vm7, %v1190_v21, %v1261_v16  ;;  %v4626_v37 = vpop.permute.xlu1 %1430  ;;  %v4628_v4 = vpop.permute.xlu0 %1418 }
  0xed   :  { %v6142_v29 = vrot.slane %v4626_v37, 4  ;;  %v6145_v20 = vrot.slane %v4628_v4, 4  ;;  %v3701_v31 = vcombine.high %v1251_v12, %v1262_v2  ;;  %v3700_v54 = vcombine.low %v1251_v12, %v1262_v2 }
  0xee   :  { %369 = vrot.lane.b32.xlu1 %v4575_v15, %s3867_s30  ;;  %357 = vrot.lane.b32.xlu0 %v4580_v44, %s3867_s30 }
  0xef   :  { %v1498_v21 = vsel %vm183_vm0, %v1457_v26, %v6142_v29  ;;  %v1487_v11 = vsel %vm183_vm0, %v1451_v46, %v6145_v20  ;;  %3049 = vmatprep.subr.bf16.mxu0 %v3701_v31 }
  0xf0   :  { %v1499_v12 = vsel %vm1463_vm6, %v4489_v36, %v1498_v21  ;;  %v1488_v16 = vsel %vm1463_vm6, %v4478_v10, %v1487_v11  ;;  %v4650_v2 = vpop.permute.xlu1 %990  ;;  %v989_v38 = vpop.permute.xlu0 %988  ;;  %3050 = vmatpush2.bf16.msra.mxu0 %v3700_v54 }
  0xf1   :  { %v6158_v26 = vrot.slane %v4650_v2, 4  ;;  %v1024_v29 = vrot.slane %v989_v38, 4  ;;  %v3735_v49 = vcombine.low %v1488_v16, %v1499_v12  ;;  %v3736_v7 = vcombine.high %v1488_v16, %v1499_v12 }
  0xf2   :  { %1408 = vrot.lane.b32.xlu1 %v4339_v27, %s3870_s18  ;;  %1396 = vrot.lane.b32.xlu0 %v4344_v43, %s3870_s18 }
  0xf3   :  { %v1059_v31 = vsel %vm183_vm0, %v1024_v29, %v6158_v26  ;;  %3129 = vmatprep.subr.bf16.mxu1 %v3736_v7 }
  0xf4   :  { %v1060_v10 = vsel %vm1037_vm8, %v989_v38, %v1059_v31  ;;  %v4661_v46 = vpop.permute.xlu1 %1002  ;;  %v1001_v54 = vpop.permute.xlu0 %1000  ;;  %3130 = vmatpush2.bf16.msra.mxu1 %v3735_v49 }
  0xf5   :  { %v1031_v36 = vrot.slane %v4661_v46, 4  ;;  %v1030_v21 = vrot.slane %v1001_v54, 4 }
  0xf6   :  { %345 = vrot.lane.b32.xlu1 %v4596_v22, %s3867_s30  ;;  %333 = vrot.lane.b32.xlu0 %v4601_v24, %s3867_s30 }
  0xf7   :  { %v1070_v29 = vsel %vm183_vm0, %v1030_v21, %v1031_v36 }
  0xf8   :  { %v1071_v7 = vsel %vm1037_vm8, %v1001_v54, %v1070_v29  ;;  %v4672_v38 = vpop.permute.xlu1 %1406  ;;  %v4674_v11 = vpop.permute.xlu0 %1394 }
  0xf9   :  { %v6147_v49 = vrot.slane %v4672_v38, 4  ;;  %v6149_v12 = vrot.slane %v4674_v11, 4  ;;  %v3690_v16 = vcombine.high %v1060_v10, %v1071_v7  ;;  %v3689_v31 = vcombine.low %v1060_v10, %v1071_v7 }
  0xfa   :  { %1219 = vrot.lane.b32.xlu1 %v4297_v28, %s3871_s23  ;;  %1207 = vrot.lane.b32.xlu0 %v4302_v41, %s3871_s23 }
  0xfb   :  { %v1476_v54 = vsel %vm183_vm0, %v1445_v35, %v6147_v49  ;;  %v1465_v21 = vsel %vm183_vm0, %v1439_v19, %v6149_v12  ;;  %3051 = vmatprep.subr.bf16.mxu0 %v3690_v16 }
  0xfc   :  { %v1477_v10 = vsel %vm1463_vm6, %v4520_v18, %v1476_v54  ;;  %v1466_v29 = vsel %vm1463_vm6, %v4503_v34, %v1465_v21  ;;  %v4696_v7 = vpop.permute.xlu1 %966  ;;  %v965_v20 = vpop.permute.xlu0 %964  ;;  %3052 = vmatpush2.bf16.msra.mxu0 %v3689_v31 }
  0xfd   :  { %v6153_v3 = vrot.slane %v4696_v7, 4  ;;  %v1012_v35 = vrot.slane %v965_v20, 4  ;;  %v3724_v49 = vcombine.low %v1466_v29, %v1477_v10  ;;  %v3725_v45 = vcombine.high %v1466_v29, %v1477_v10 }
  0xfe   :  { %155 = vrot.lane.b32.xlu1 %v4575_v15, %s3869_s8  ;;  %143 = vrot.lane.b32.xlu0 %v4580_v44, %s3869_s8 }
  0xff   :  { %v1036_v19 = vsel %vm183_vm0, %v1012_v35, %v6153_v3  ;;  %3131 = vmatprep.subr.bf16.mxu1 %v3725_v45 }
 0x100   :  { %v1038_v34 = vsel %vm1037_vm8, %v965_v20, %v1036_v19  ;;  %v4707_v18 = vpop.permute.xlu1 %978  ;;  %v977_v16 = vpop.permute.xlu0 %976  ;;  %3132 = vmatpush2.bf16.msra.mxu1 %v3724_v49 }
 0x101   :  { %v6155_v31 = vrot.slane %v4707_v18, 4  ;;  %v1018_v54 = vrot.slane %v977_v16, 4 }
 0x102   :  { %1195 = vrot.lane.b32.xlu1 %v4339_v27, %s3871_s23  ;;  %1183 = vrot.lane.b32.xlu0 %v4344_v43, %s3871_s23 }
 0x103   :  { %v1048_v21 = vsel %vm183_vm0, %v1018_v54, %v6155_v31 }
 0x104   :  { %v1049_v45 = vsel %vm1037_vm8, %v977_v16, %v1048_v21  ;;  %v4718_v20 = vpop.permute.xlu1 %1217  ;;  %v4720_v10 = vpop.permute.xlu0 %1205 }
 0x105   :  { %v6151_v49 = vrot.slane %v4718_v20, 4  ;;  %v6150_v29 = vrot.slane %v4720_v10, 4  ;;  %v3679_v35 = vcombine.high %v1038_v34, %v1049_v45  ;;  %v3678_v19 = vcombine.low %v1038_v34, %v1049_v45 }
 0x106   :  { %131 = vrot.lane.b32.xlu1 %v4596_v22, %s3869_s8  ;;  %119 = vrot.lane.b32.xlu0 %v4601_v24, %s3869_s8 }
 0x107   :  { %v1285_v16 = vsel %vm183_vm0, %v1244_v17, %v6151_v49  ;;  %v1274_v54 = vsel %vm183_vm0, %v1238_v0, %v6150_v29  ;;  %3053 = vmatprep.subr.bf16.mxu0 %v3679_v35  ;;  %v4747_v17 = vld [vmem:[%s6127_s0 + $0x78] sm:$0xff]  ;;  %v4752_v0 = vld [vmem:[%s6127_s0 + $0xa8] sm:$0xff] }
 0x108   :  { %v1286_v34 = vsel %vm1250_vm7, %v4583_v30, %v1285_v16  ;;  %v1275_v21 = vsel %vm1250_vm7, %v4548_v9, %v1274_v54  ;;  %v4742_v45 = vpop.permute.xlu1 %777  ;;  %v776_v12 = vpop.permute.xlu0 %775  ;;  %3054 = vmatpush2.bf16.msra.mxu0 %v3678_v19  ;;  %v4778_v54 = vld [vmem:[%s6127_s0 + $0x48] sm:$0xff] }
 0x109   :  { %v6154_v30 = vrot.slane %v4742_v45, 4  ;;  %v811_v35 = vrot.slane %v776_v12, 4  ;;  %v3713_v16 = vcombine.low %v1275_v21, %v1286_v34  ;;  %v3714_v9 = vcombine.high %v1275_v21, %v1286_v34 }
 0x10a   :  { %1006 = vrot.lane.b32.xlu1 %v4297_v28, %s3872_s28  ;;  %994 = vrot.lane.b32.xlu0 %v4302_v41, %s3872_s28 }
 0x10b   :  { %v846_v29 = vsel %vm183_vm0, %v811_v35, %v6154_v30  ;;  %3133 = vmatprep.subr.bf16.mxu1 %v3714_v9 }
 0x10c   :  { %v847_v49 = vsel %vm824_vm9, %v776_v12, %v846_v29  ;;  %v4767_v34 = vpop.permute.xlu1 %789  ;;  %v788_v21 = vpop.permute.xlu0 %787  ;;  %3134 = vmatpush2.bf16.msra.mxu1 %v3713_v16 }
 0x10d   :  { %v818_v19 = vrot.slane %v4767_v34, 4  ;;  %v817_v3 = vrot.slane %v788_v21, 4 }
 0x10e   :  { %982 = vrot.lane.b32.xlu1 %v4339_v27, %s3872_s28  ;;  %970 = vrot.lane.b32.xlu0 %v4344_v43, %s3872_s28 }
 0x10f   :  { %v857_v35 = vsel %vm183_vm0, %v817_v3, %v818_v19 }
 0x110   :  { %v858_v16 = vsel %vm824_vm9, %v788_v21, %v857_v35  ;;  %v4792_v9 = vpop.permute.xlu1 %1193  ;;  %v4794_v30 = vpop.permute.xlu0 %1181 }
 0x111   :  { %v6162_v31 = vrot.slane %v4792_v9, 4  ;;  %v6161_v63 = vrot.slane %v4794_v30, 4  ;;  %v3668_v60 = vcombine.high %v847_v49, %v858_v16  ;;  %v3667_v26 = vcombine.low %v847_v49, %v858_v16 }
 0x112   :  { %793 = vrot.lane.b32.xlu1 %v4297_v28, %s3873_s4  ;;  %781 = vrot.lane.b32.xlu0 %v4302_v41, %s3873_s4 }
 0x113   :  { %v1263_v3 = vsel %vm183_vm0, %v1232_v14, %v6162_v31  ;;  %v1252_v21 = vsel %vm183_vm0, %v1226_v1, %v6161_v63  ;;  %3055 = vmatprep.subr.bf16.mxu0 %v3668_v60 }
 0x114   :  { %v1264_v49 = vsel %vm1250_vm7, %v4615_v13, %v1263_v3  ;;  %v1253_v28 = vsel %vm1250_vm7, %v4604_v55, %v1252_v21  ;;  %v4816_v41 = vpop.permute.xlu1 %753  ;;  %v752_v35 = vpop.permute.xlu0 %751  ;;  %3056 = vmatpush2.bf16.msra.mxu0 %v3667_v26 }
 0x115   :  { %v6170_v16 = vrot.slane %v4816_v41, 4  ;;  %v799_v14 = vrot.slane %v752_v35, 4  ;;  %v3702_v12 = vcombine.low %v1253_v28, %v1264_v49  ;;  %v3703_v29 = vcombine.high %v1253_v28, %v1264_v49 }
 0x116   :  { %769 = vrot.lane.b32.xlu1 %v4339_v27, %s3873_s4  ;;  %757 = vrot.lane.b32.xlu0 %v4344_v43, %s3873_s4 }
 0x117   :  { %v823_v60 = vsel %vm183_vm0, %v799_v14, %v6170_v16  ;;  %3135 = vmatprep.subr.bf16.mxu1 %v3703_v29 }
 0x118   :  { %v825_v55 = vsel %vm824_vm9, %v752_v35, %v823_v60  ;;  %v4827_v1 = vpop.permute.xlu1 %765  ;;  %v764_v13 = vpop.permute.xlu0 %763  ;;  %3136 = vmatpush2.bf16.msra.mxu1 %v3702_v12  ;;  %v6220_v60 = vrot.slane %v4650_v2, 4 }
 0x119   :  { %v806_v26 = vrot.slane %v4827_v1, 4  ;;  %v805_v3 = vrot.slane %v764_v13, 4 }
 0x11a   :  { %1434 = vrot.lane.b32.xlu1 %v4575_v15, %s3870_s18  ;;  %1422 = vrot.lane.b32.xlu0 %v4580_v44, %s3870_s18 }
 0x11b   :  { %v835_v27 = vsel %vm183_vm0, %v805_v3, %v806_v26 }
 0x11c   :  { %v836_v43 = vsel %vm824_vm9, %v764_v13, %v835_v27  ;;  %v4838_v29 = vpop.permute.xlu1 %1004  ;;  %v4840_v21 = vpop.permute.xlu0 %992 }
 0x11d   :  { %v6159_v12 = vrot.slane %v4838_v29, 4  ;;  %v6160_v49 = vrot.slane %v4840_v21, 4  ;;  %v3657_v28 = vcombine.high %v825_v55, %v836_v43  ;;  %v3656_v35 = vcombine.low %v825_v55, %v836_v43  ;;  %v4861_v55 = vld [vmem:[%s6128_s1] ss:$12 sps:$4 sm:$0xff]  }
 0x11e   :  { %1410 = vrot.lane.b32.xlu1 %v4596_v22, %s3870_s18  ;;  %1398 = vrot.lane.b32.xlu0 %v4601_v24, %s3870_s18  ;;  %6221 = vst [vmem:[#allocation3_spill] sm:$0xff] %v4861_v55 }
 0x11f   :  { %v1072_v14 = vsel %vm183_vm0, %v1031_v36, %v6159_v12  ;;  %v1061_v13 = vsel %vm183_vm0, %v6220_v60, %v6160_v49  ;;  %3057 = vmatprep.subr.bf16.mxu0 %v3657_v28 }
 0x120   :  { %v1073_v3 = vsel %vm1037_vm8, %v4661_v46, %v1072_v14  ;;  %v1062_v27 = vsel %vm1037_vm8, %v4650_v2, %v1061_v13  ;;  %v4867_v43 = vpop.permute.xlu1 %580  ;;  %v4869_v36 = vpop.permute.xlu0 %568  ;;  %3058 = vmatpush2.bf16.msra.mxu0 %v3656_v35  ;;  %v6222_v2 = vrot.slane %v4253_v56, 4  ;;  %v6223_v35 = vrot.slane %v4255_v57, 4 }
 0x121   :  { %v6165_v12 = vrot.slane %v4867_v43, 4  ;;  %v6164_v28 = vrot.slane %v4869_v36, 4  ;;  %v3691_v60 = vcombine.low %v1062_v27, %v1073_v3  ;;  %v3692_v49 = vcombine.high %v1062_v27, %v1073_v3 }
 0x122   :  { %1647 = vrot.lane.b32.xlu1 %v4575_v15, %s3866_s29  ;;  %1635 = vrot.lane.b32.xlu0 %v4580_v44, %s3866_s29 }
 0x123   :  { %v648_v46 = vsel %vm183_vm0, %v6222_v2, %v6165_v12  ;;  %v637_v14 = vsel %vm183_vm0, %v6223_v35, %v6164_v28  ;;  %3137 = vmatprep.subr.bf16.mxu1 %v3692_v49  ;;  %3060 = vmatmul.mubr.bf16.vlgmr.msra.gmra.mxu0 %v4861_v55 }
 0x124   :  { %v649_v13 = vsel %vm611_vm1, %v4253_v56, %v648_v46  ;;  %v638_v3 = vsel %vm611_vm1, %v4255_v57, %v637_v14  ;;  %v4892_v27 = vpop.permute.xlu1 %980  ;;  %v4894_v63 = vpop.permute.xlu0 %968  ;;  %3138 = vmatpush2.bf16.msra.mxu1 %v3691_v60  ;;  %3231 = vmatprep.mubr.bf16.mxu0 %v4262_v5  ;;  %v6224_v56 = vrot.slane %v4707_v18, 4  ;;  %v6225_v5 = vrot.slane %v4696_v7, 4 }
 0x125   :  { %v6163_v2 = vrot.slane %v4892_v27, 4  ;;  %v6166_v35 = vrot.slane %v4894_v63, 4  ;;  %v3649_v49 = vcombine.low %v638_v3, %v649_v13  ;;  %v3650_v31 = vcombine.high %v638_v3, %v649_v13 }
 0x126   :  { %1221 = vrot.lane.b32.xlu1 %v4575_v15, %s3871_s23  ;;  %1209 = vrot.lane.b32.xlu0 %v4580_v44, %s3871_s23 }
 0x127   :  { %v1050_v57 = vsel %vm183_vm0, %v6224_v56, %v6163_v2  ;;  %v1039_v60 = vsel %vm183_vm0, %v6225_v5, %v6166_v35  ;;  %3199 = vmatprep.subr.bf16.mxu0 %v3650_v31  ;;  %v6227_v31 = vrot.slane %v4318_v33, 4  ;;  %v4945_v5 = vld [vmem:[%s6127_s0 + $0x88] sm:$0xff] }
 0x128   :  { %v1051_v46 = vsel %vm1037_vm8, %v4707_v18, %v1050_v57  ;;  %v1040_v14 = vsel %vm1037_vm8, %v4696_v7, %v1039_v60  ;;  %v4917_v13 = vpop.permute.xlu1 %556  ;;  %v4919_v3 = vpop.permute.xlu0 %544  ;;  %3200 = vmatpush1.bf16.msra.mxu0 %v3649_v49  ;;  %v6226_v7 = vrot.slane %v4316_v25, 4  ;;  %v4940_v57 = vld [vmem:[%s6127_s0 + $0xb8] sm:$0xff] }
 0x129   :  { %v6168_v56 = vrot.slane %v4917_v13, 4  ;;  %v6167_v2 = vrot.slane %v4919_v3, 4  ;;  %v3680_v28 = vcombine.low %v1040_v14, %v1051_v46  ;;  %v3681_v12 = vcombine.high %v1040_v14, %v1051_v46 }
 0x12a   :  { %1623 = vrot.lane.b32.xlu1 %v4596_v22, %s3866_s29  ;;  %1611 = vrot.lane.b32.xlu0 %v4601_v24, %s3866_s29 }
 0x12b   :  { %v626_v18 = vsel %vm183_vm0, %v6226_v7, %v6168_v56  ;;  %v615_v49 = vsel %vm183_vm0, %v6227_v31, %v6167_v2  ;;  %3139 = vmatprep.subr.bf16.mxu1 %v3681_v12 }
 0x12c   :  { %v627_v60 = vsel %vm611_vm1, %v4316_v25, %v626_v18  ;;  %v616_v46 = vsel %vm611_vm1, %v4318_v33, %v615_v49  ;;  %v4951_v14 = vpop.permute.xlu1 %791  ;;  %v4953_v7 = vpop.permute.xlu0 %779  ;;  %3140 = vmatpush2.bf16.msra.mxu1 %v3680_v28  ;;  %v6228_v33 = vrot.slane %v4742_v45, 4 }
 0x12d   :  { %v6169_v31 = vrot.slane %v4951_v14, 4  ;;  %v6171_v35 = vrot.slane %v4953_v7, 4  ;;  %v3638_v2 = vcombine.low %v616_v46, %v627_v60  ;;  %v3639_v56 = vcombine.high %v616_v46, %v627_v60 }
 0x12e   :  { %584 = vrot.lane.b32.xlu1 %v4940_v57, %s3865_s16  ;;  %572 = vrot.lane.b32.xlu0 %v4945_v5, %s3865_s16 }
 0x12f   :  { %v859_v25 = vsel %vm183_vm0, %v818_v19, %v6169_v31  ;;  %v848_v12 = vsel %vm183_vm0, %v6228_v33, %v6171_v35  ;;  %3201 = vmatprep.subr.bf16.mxu0 %v3639_v56  ;;  %v5003_v33 = vld [vmem:[%s6127_s0 + $0x28] sm:$0xff] }
 0x130   :  { %v860_v28 = vsel %vm824_vm9, %v4767_v34, %v859_v25  ;;  %v849_v18 = vsel %vm824_vm9, %v4742_v45, %v848_v12  ;;  %v4975_v49 = vpop.permute.xlu1 %367  ;;  %v4977_v60 = vpop.permute.xlu0 %355  ;;  %3202 = vmatpush1.bf16.msra.mxu0 %v3638_v2  ;;  %v6229_v45 = vrot.slane %v4372_v52, 4  ;;  %v6230_v2 = vrot.slane %v4374_v39, 4  ;;  %v4998_v25 = vld [vmem:[%s6127_s0 + $0x58] sm:$0xff] }
 0x131   :  { %v6173_v19 = vrot.slane %v4975_v49, 4  ;;  %v6172_v46 = vrot.slane %v4977_v60, 4  ;;  %v3669_v31 = vcombine.low %v849_v18, %v860_v28  ;;  %v3670_v16 = vcombine.high %v849_v18, %v860_v28 }
 0x132   :  { %1197 = vrot.lane.b32.xlu1 %v4596_v22, %s3871_s23  ;;  %1185 = vrot.lane.b32.xlu0 %v4601_v24, %s3871_s23 }
 0x133   :  { %v435_v34 = vsel %vm183_vm0, %v6229_v45, %v6173_v19  ;;  %v424_v56 = vsel %vm183_vm0, %v6230_v2, %v6172_v46  ;;  %3141 = vmatprep.subr.bf16.mxu1 %v3670_v16 }
 0x134   :  { %v436_v12 = vsel %vm398_vm3, %v4372_v52, %v435_v34  ;;  %v425_v28 = vsel %vm398_vm3, %v4374_v39, %v424_v56  ;;  %v5009_v18 = vpop.permute.xlu1 %767  ;;  %v5011_v45 = vpop.permute.xlu0 %755  ;;  %3142 = vmatpush2.bf16.msra.mxu1 %v3669_v31  ;;  %v6233_v39 = vrot.slane %v4816_v41, 4 }
 0x135   :  { %6231 = vst [vmem:[#allocation4_spill] sm:$0xff] %v5009_v18  ;;  %6232 = vst [vmem:[#allocation5_spill] sm:$0xff] %v5011_v45  ;;  %v6174_v2 = vrot.slane %v5009_v18, 4  ;;  %v6177_v35 = vrot.slane %v5011_v45, 4  ;;  %v3627_v46 = vcombine.low %v425_v28, %v436_v12  ;;  %v3628_v19 = vcombine.high %v425_v28, %v436_v12 }
 0x136   :  { %560 = vrot.lane.b32.xlu1 %v4998_v25, %s3865_s16  ;;  %548 = vrot.lane.b32.xlu0 %v5003_v33, %s3865_s16 }
 0x137   :  { %v837_v52 = vsel %vm183_vm0, %v806_v26, %v6174_v2  ;;  %v826_v16 = vsel %vm183_vm0, %v6233_v39, %v6177_v35  ;;  %3203 = vmatprep.subr.bf16.mxu0 %v3628_v19  ;;  %v6235_v19 = vrot.slane %v4400_v61, 4 }
 0x138   :  { %v838_v31 = vsel %vm824_vm9, %v4827_v1, %v837_v52  ;;  %v827_v34 = vsel %vm824_vm9, %v4816_v41, %v826_v16  ;;  %v5033_v56 = vpop.permute.xlu1 %343  ;;  %v5035_v12 = vpop.permute.xlu0 %331  ;;  %3204 = vmatpush1.bf16.msra.mxu0 %v3627_v46  ;;  %v6234_v41 = vrot.slane %v4398_v62, 4 }
 0x139   :  { %v6178_v26 = vrot.slane %v5033_v56, 4  ;;  %v6179_v28 = vrot.slane %v5035_v12, 4  ;;  %v3658_v2 = vcombine.low %v827_v34, %v838_v31  ;;  %v3659_v45 = vcombine.high %v827_v34, %v838_v31 }
 0x13a   :  { %1008 = vrot.lane.b32.xlu1 %v4575_v15, %s3872_s28  ;;  %996 = vrot.lane.b32.xlu0 %v4580_v44, %s3872_s28 }
 0x13b   :  { %v413_v1 = vsel %vm183_vm0, %v6234_v41, %v6178_v26  ;;  %v402_v46 = vsel %vm183_vm0, %v6235_v19, %v6179_v28  ;;  %3143 = vmatprep.subr.bf16.mxu1 %v3659_v45  ;;  %v6237_v45 = vrot.slane %v4161_v51, 4 }
 0x13c   :  { %v414_v52 = vsel %vm398_vm3, %v4398_v62, %v413_v1  ;;  %v403_v39 = vsel %vm398_vm3, %v4400_v61, %v402_v46  ;;  %v5057_v16 = vpop.permute.xlu1 %1643  ;;  %v5059_v31 = vpop.permute.xlu0 %1631  ;;  %3144 = vmatpush2.bf16.msra.mxu1 %v3658_v2  ;;  %v6236_v61 = vrot.slane %v4172_v59, 4 }
 0x13d   :  { %v6182_v34 = vrot.slane %v5057_v16, 4  ;;  %v6180_v41 = vrot.slane %v5059_v31, 4  ;;  %v3616_v35 = vcombine.low %v403_v39, %v414_v52  ;;  %v3617_v26 = vcombine.high %v403_v39, %v414_v52 }
 0x13e   :  { %371 = vrot.lane.b32.xlu1 %v4940_v57, %s3867_s30  ;;  %359 = vrot.lane.b32.xlu0 %v4945_v5, %s3867_s30  ;;  %v6238_v39 = vmov 0  }
 0x13f   :  { %v1711_v62 = vsel %vm183_vm0, %v6236_v61, %v6182_v34  ;;  %v1700_v2 = vsel %vm183_vm0, %v6237_v45, %v6180_v41  ;;  %3205 = vmatprep.subr.bf16.mxu0 %v3617_v26  ;;  %3146 = vmatmul.mubr.bf16.vlgmr.msra.gmra.mxu1 %v4861_v55 }
 0x140   :  { %v1712_v1 = vsel %vm1676_vm2, %v4172_v59, %v1711_v62  ;;  %v1701_v19 = vsel %vm1676_vm2, %v4161_v51, %v1700_v2  ;;  %v5082_v46 = vpop.permute.xlu1 %153  ;;  %v5084_v52 = vpop.permute.xlu0 %141  ;;  %3206 = vmatpush1.bf16.msra.mxu0 %v3616_v35  ;;  %3188 = vmatprep.mubr.bf16.mxu1 %v6238_v39  ;;  %v6239_v51 = vrot.slane %v4424_v40, 4  ;;  %v6240_v35 = vrot.slane %v4426_v50, 4 }
 0x141   :  { %v6181_v61 = vrot.slane %v5082_v46, 4  ;;  %v6184_v45 = vrot.slane %v5084_v52, 4  ;;  %v3757_v26 = vcombine.low %v1701_v19, %v1712_v1  ;;  %v3758_v28 = vcombine.high %v1701_v19, %v1712_v1 }
 0x142   :  { %984 = vrot.lane.b32.xlu1 %v4596_v22, %s3872_s28  ;;  %972 = vrot.lane.b32.xlu0 %v4601_v24, %s3872_s28 }
 0x143   :  { %v222_v59 = vsel %vm183_vm0, %v6239_v51, %v6181_v61  ;;  %v211_v62 = vsel %vm183_vm0, %v6240_v35, %v6184_v45  ;;  %3168 = vmatprep.subr.bf16.mxu1 %v3758_v28  ;;  %v6242_v28 = vrot.slane %v4205_v48, 4 }
 0x144   :  { %v223_v2 = vsel %vm185_vm5, %v4424_v40, %v222_v59  ;;  %v212_v1 = vsel %vm185_vm5, %v4426_v50, %v211_v62  ;;  %v5107_v19 = vpop.permute.xlu1 %1619  ;;  %v5109_v41 = vpop.permute.xlu0 %1607  ;;  %3169 = vmatpush1.bf16.msra.mxu1 %v3757_v26  ;;  %v6241_v40 = vrot.slane %v4216_v58, 4 }
 0x145   :  { %v1659_v51 = vrot.slane %v5107_v19, 4  ;;  %v1653_v61 = vrot.slane %v5109_v41, 4  ;;  %v3605_v34 = vcombine.low %v212_v1, %v223_v2  ;;  %v3606_v55 = vcombine.high %v212_v1, %v223_v2 }
 0x146   :  { %347 = vrot.lane.b32.xlu1 %v4998_v25, %s3867_s30  ;;  %335 = vrot.lane.b32.xlu0 %v5003_v33, %s3867_s30 }
 0x147   :  { %v1689_v50 = vsel %vm183_vm0, %v6241_v40, %v1659_v51  ;;  %v1678_v26 = vsel %vm183_vm0, %v6242_v28, %v1653_v61  ;;  %3207 = vmatprep.subr.bf16.mxu0 %v3606_v55  ;;  %v6244_v55 = vrot.slane %v4453_v42, 4 }
 0x148   :  { %v1690_v59 = vsel %vm1676_vm2, %v4216_v58, %v1689_v50  ;;  %v1679_v35 = vsel %vm1676_vm2, %v4205_v48, %v1678_v26  ;;  %v5127_v62 = vpop.permute.xlu1 %129  ;;  %v5129_v2 = vpop.permute.xlu0 %117  ;;  %3208 = vmatpush1.bf16.msra.mxu0 %v3605_v34  ;;  %v6243_v48 = vrot.slane %v4451_v47, 4 }
 0x149   :  { %v168_v1 = vrot.slane %v5127_v62, 4  ;;  %v162_v40 = vrot.slane %v5129_v2, 4  ;;  %v3746_v45 = vcombine.low %v1679_v35, %v1690_v59  ;;  %v3747_v18 = vcombine.high %v1679_v35, %v1690_v59 }
 0x14a   :  { %795 = vrot.lane.b32.xlu1 %v4575_v15, %s3873_s4  ;;  %783 = vrot.lane.b32.xlu0 %v4580_v44, %s3873_s4 }
 0x14b   :  { %v200_v58 = vsel %vm183_vm0, %v6243_v48, %v168_v1  ;;  %v189_v34 = vsel %vm183_vm0, %v6244_v55, %v162_v40  ;;  %3170 = vmatprep.subr.bf16.mxu1 %v3747_v18  ;;  %v6246_v18 = vrot.slane %v5059_v31, 4 }
 0x14c   :  { %v201_v50 = vsel %vm185_vm5, %v4451_v47, %v200_v58  ;;  %v190_v15 = vsel %vm185_vm5, %v4453_v42, %v189_v34  ;;  %v5151_v44 = vpop.permute.xlu1 %1645  ;;  %v5153_v28 = vpop.permute.xlu0 %1633  ;;  %3171 = vmatpush1.bf16.msra.mxu1 %v3746_v45  ;;  %v6245_v47 = vrot.slane %v5057_v16, 4  ;;  %v5174_v58 = vld [vmem:[%s6128_s1 + $0x8] ss:$12 sps:$4 sm:$0xff]  }
 0x14d   :  { %v6188_v26 = vrot.slane %v5151_v44, 4  ;;  %v6187_v59 = vrot.slane %v5153_v28, 4  ;;  %v3594_v35 = vcombine.low %v190_v15, %v201_v50  ;;  %v3595_v48 = vcombine.high %v190_v15, %v201_v50 }
 0x14e   :  { %157 = vrot.lane.b32.xlu1 %v4940_v57, %s3869_s8  ;;  %145 = vrot.lane.b32.xlu0 %v4945_v5, %s3869_s8 }
 0x14f   :  { %v1713_v42 = vsel %vm183_vm0, %v6245_v47, %v6188_v26  ;;  %v1702_v45 = vsel %vm183_vm0, %v6246_v18, %v6187_v59  ;;  %3209 = vmatprep.subr.bf16.mxu0 %v3595_v48  ;;  %3767 = vmatmul.mubr.msk.bf16.vlgmr.msra.gmra.mxu1 %vm3023_vm4, %v5174_v58  ;;  %v6247_v26 = vcombine.high %v4528_v23, %v4533_v8 }
 0x150   :  { %v1714_v55 = vsel %vm1676_vm2, %v5057_v16, %v1713_v42  ;;  %v1703_v34 = vsel %vm1676_vm2, %v5059_v31, %v1702_v45  ;;  %v5182_v50 = vpop.permute.xlu1 %1621  ;;  %v5184_v15 = vpop.permute.xlu0 %1609  ;;  %3210 = vmatpush1.bf16.msra.mxu0 %v3594_v35  ;;  %3274 = vmatprep.mubr.bf16.mxu1 %v6238_v39  ;;  %v5195_v16 = vld [vmem:[%s6127_s0 + $0x80] sm:$0xff]  ;;  %v5200_v31 = vld [vmem:[%s6127_s0 + $0xb0] sm:$0xff] }
 0x151   :  { %v6194_v48 = vrot.slane %v5182_v50, 4  ;;  %v6189_v47 = vrot.slane %v5184_v15, 4  ;;  %v3759_v18 = vcombine.low %v1703_v34, %v1714_v55  ;;  %v3760_v59 = vcombine.high %v1703_v34, %v1714_v55  ;;  %3211 = vmatprep.subr.bf16.mxu0 %v6247_v26 }
 0x152   :  { %771 = vrot.lane.b32.xlu1 %v4596_v22, %s3873_s4  ;;  %759 = vrot.lane.b32.xlu0 %v4601_v24, %s3873_s4 }
 0x153   :  { %v1691_v26 = vsel %vm183_vm0, %v1659_v51, %v6194_v48  ;;  %v1680_v42 = vsel %vm183_vm0, %v1653_v61, %v6189_v47  ;;  %3254 = vmatprep.subr.bf16.mxu1 %v3760_v59  ;;  %v6248_v51 = vcombine.low %v4528_v23, %v4533_v8  ;;  %v5240_v23 = vld [vmem:[%s6127_s0 + $0x50] sm:$0xff] }
 0x154   :  { %v1692_v22 = vsel %vm1676_vm2, %v5107_v19, %v1691_v26  ;;  %v1681_v24 = vsel %vm1676_vm2, %v5109_v41, %v1680_v42  ;;  %v5220_v55 = vpop.permute.xlu1 %582  ;;  %v5222_v34 = vpop.permute.xlu0 %570  ;;  %3255 = vmatpush1.bf16.msra.mxu1 %v3759_v18  ;;  %v6249_v19 = vcombine.high %v4553_v32, %v4558_v53  ;;  %v5235_v41 = vld [vmem:[%s6127_s0 + $0x20] sm:$0xff]  ;;  %v6250_v18 = vrot.slane %v4867_v43, 4 }
 0x155   :  { %3212 = vmatpush1.bf16.msra.mxu0 %v6248_v51  ;;  %v6193_v61 = vrot.slane %v5220_v55, 4  ;;  %v6190_v59 = vrot.slane %v5222_v34, 4  ;;  %v3748_v45 = vcombine.low %v1681_v24, %v1692_v22  ;;  %v3749_v35 = vcombine.high %v1681_v24, %v1692_v22 }
 0x156   :  { %3213 = vmatprep.subr.bf16.mxu0 %v6249_v19  ;;  %133 = vrot.lane.b32.xlu1 %v4998_v25, %s3869_s8  ;;  %v6251_v42 = vrot.slane %v4869_v36, 4 }
 0x157   :  { %121 = vrot.lane.b32.xlu0 %v5003_v33, %s3869_s8  ;;  %v650_v26 = vsel %vm183_vm0, %v6250_v18, %v6193_v61  ;;  %3256 = vmatprep.subr.bf16.mxu1 %v3749_v35  ;;  %v6252_v18 = vcombine.low %v4553_v32, %v4558_v53  ;;  %v6254_v32 = vrot.slane %v4919_v3, 4 }
 0x158   :  { %v639_v22 = vsel %vm183_vm0, %v6251_v42, %v6190_v59  ;;  %v651_v51 = vsel %vm611_vm1, %v4867_v43, %v650_v26  ;;  %v5264_v8 = vpop.permute.xlu1 %558  ;;  %v5266_v47 = vpop.permute.xlu0 %546  ;;  %3257 = vmatpush1.bf16.msra.mxu1 %v3748_v45  ;;  %v6253_v43 = vrot.slane %v4917_v13, 4 }
 0x159   :  { %v640_v19 = vsel %vm611_vm1, %v4869_v36, %v639_v22  ;;  %3214 = vmatpush1.bf16.msra.mxu0 %v6252_v18  ;;  %v6192_v35 = vrot.slane %v5264_v8, 4  ;;  %v6191_v42 = vrot.slane %v5266_v47, 4 }
 0x15a   :  { %v3651_v24 = vcombine.low %v640_v19, %v651_v51  ;;  %v3652_v59 = vcombine.high %v640_v19, %v651_v51  ;;  %1649 = vrot.lane.b32.xlu1 %v4940_v57, %s3866_s29  ;;  %v5300_v19 = vld [vmem:[%s6128_s1 + $0x4] ss:$12 sps:$4 sm:$0xff]  }
 0x15b   :  { %1637 = vrot.lane.b32.xlu0 %v4945_v5, %s3866_s29  ;;  %v628_v36 = vsel %vm183_vm0, %v6253_v43, %v6192_v35  ;;  %v617_v53 = vsel %vm183_vm0, %v6254_v32, %v6191_v42  ;;  %3768 = vmatmul.mubr.msk.bf16.vlgmr.msra.gmra.mxu1 %vm3023_vm4, %v5174_v58 }
 0x15c   :  { %3285 = vmatprep.subr.bf16.mxu1 %v3652_v59  ;;  %v629_v45 = vsel %vm611_vm1, %v4917_v13, %v628_v36  ;;  %v618_v26 = vsel %vm611_vm1, %v4919_v3, %v617_v53  ;;  %v5293_v22 = vpop.permute.xlu1 %1432  ;;  %v5295_v51 = vpop.permute.xlu0 %1420  ;;  %3317 = vmatprep.mubr.bf16.mxu1 %v5300_v19  ;;  %v6255_v3 = vrot.slane %v4626_v37, 4  ;;  %v6256_v36 = vrot.slane %v4628_v4, 4 }
 0x15d   :  { %3286 = vmatpush1.bf16.msra.mxu1 %v3651_v24  ;;  %v1459_v59 = vrot.slane %v5293_v22, 4  ;;  %v6196_v18 = vrot.slane %v5295_v51, 4  ;;  %v3640_v13 = vcombine.low %v618_v26, %v629_v45  ;;  %v3641_v43 = vcombine.high %v618_v26, %v629_v45 }
 0x15e   :  { %1625 = vrot.lane.b32.xlu1 %v4998_v25, %s3866_s29 }
 0x15f   :  { %1613 = vrot.lane.b32.xlu0 %v5003_v33, %s3866_s29  ;;  %v1500_v24 = vsel %vm183_vm0, %v6255_v3, %v1459_v59  ;;  %v1489_v32 = vsel %vm183_vm0, %v6256_v36, %v6196_v18  ;;  %3287 = vmatprep.subr.bf16.mxu1 %v3641_v43 }
 0x160   :  { %v1501_v53 = vsel %vm1463_vm6, %v4626_v37, %v1500_v24  ;;  %v1490_v45 = vsel %vm1463_vm6, %v4628_v4, %v1489_v32  ;;  %v5323_v26 = vpop.permute.xlu1 %369  ;;  %v5325_v42 = vpop.permute.xlu0 %357  ;;  %v6257_v37 = vrot.slane %v4975_v49, 4 }
 0x161   :  { %3288 = vmatpush1.bf16.msra.mxu1 %v3640_v13  ;;  %v6195_v3 = vrot.slane %v5323_v26, 4  ;;  %v6197_v35 = vrot.slane %v5325_v42, 4  ;;  %v3737_v61 = vcombine.low %v1490_v45, %v1501_v53  ;;  %v3738_v48 = vcombine.high %v1490_v45, %v1501_v53 }
 0x162   :  { %1436 = vrot.lane.b32.xlu1 %v4940_v57, %s3870_s18  ;;  %v6258_v13 = vrot.slane %v4977_v60, 4 }
 0x163   :  { %1424 = vrot.lane.b32.xlu0 %v4945_v5, %s3870_s18  ;;  %v437_v4 = vsel %vm183_vm0, %v6257_v37, %v6195_v3  ;;  %3215 = vmatprep.subr.bf16.mxu0 %v3738_v48  ;;  %v6260_v48 = vrot.slane %v4674_v11, 4 }
 0x164   :  { %v426_v43 = vsel %vm183_vm0, %v6258_v13, %v6197_v35  ;;  %v438_v24 = vsel %vm398_vm3, %v4975_v49, %v437_v4  ;;  %v5347_v32 = vpop.permute.xlu1 %1408  ;;  %v5349_v53 = vpop.permute.xlu0 %1396  ;;  %3216 = vmatpush2.bf16.msra.mxu0 %v3737_v61  ;;  %v6259_v49 = vrot.slane %v4672_v38, 4 }
 0x165   :  { %v427_v36 = vsel %vm398_vm3, %v4977_v60, %v426_v43  ;;  %v6198_v45 = vrot.slane %v5347_v32, 4  ;;  %v6200_v37 = vrot.slane %v5349_v53, 4 }
 0x166   :  { %v3629_v3 = vcombine.low %v427_v36, %v438_v24  ;;  %v3630_v18 = vcombine.high %v427_v36, %v438_v24  ;;  %1412 = vrot.lane.b32.xlu1 %v4998_v25, %s3870_s18 }
 0x167   :  { %1400 = vrot.lane.b32.xlu0 %v5003_v33, %s3870_s18  ;;  %v1478_v60 = vsel %vm183_vm0, %v6259_v49, %v6198_v45  ;;  %v1467_v61 = vsel %vm183_vm0, %v6260_v48, %v6200_v37 }
 0x168   :  { %3289 = vmatprep.subr.bf16.mxu1 %v3630_v18  ;;  %v1479_v4 = vsel %vm1463_vm6, %v4672_v38, %v1478_v60  ;;  %v1468_v13 = vsel %vm1463_vm6, %v4674_v11, %v1467_v61  ;;  %v5371_v43 = vpop.permute.xlu1 %345  ;;  %v5373_v24 = vpop.permute.xlu0 %333  ;;  %v6261_v38 = vrot.slane %v5033_v56, 4  ;;  %v6262_v18 = vrot.slane %v5035_v12, 4 }
 0x169   :  { %3290 = vmatpush1.bf16.msra.mxu1 %v3629_v3  ;;  %v6199_v36 = vrot.slane %v5371_v43, 4  ;;  %v6201_v49 = vrot.slane %v5373_v24, 4  ;;  %v3726_v35 = vcombine.low %v1468_v13, %v1479_v4  ;;  %v3727_v45 = vcombine.high %v1468_v13, %v1479_v4 }
 0x16a   :  { %1223 = vrot.lane.b32.xlu1 %v4940_v57, %s3871_s23 }
 0x16b   :  { %1211 = vrot.lane.b32.xlu0 %v4945_v5, %s3871_s23  ;;  %v415_v11 = vsel %vm183_vm0, %v6261_v38, %v6199_v36  ;;  %v404_v3 = vsel %vm183_vm0, %v6262_v18, %v6201_v49  ;;  %3217 = vmatprep.subr.bf16.mxu0 %v3727_v45 }
 0x16c   :  { %v416_v60 = vsel %vm398_vm3, %v5033_v56, %v415_v11  ;;  %v405_v48 = vsel %vm398_vm3, %v5035_v12, %v404_v3  ;;  %v5395_v61 = vpop.permute.xlu1 %1219  ;;  %v5397_v4 = vpop.permute.xlu0 %1207  ;;  %3218 = vmatpush2.bf16.msra.mxu0 %v3726_v35  ;;  %v6263_v56 = vrot.slane %v4718_v20, 4  ;;  %v6264_v35 = vrot.slane %v4720_v10, 4 }
 0x16d   :  { %v6202_v13 = vrot.slane %v5395_v61, 4  ;;  %v6204_v38 = vrot.slane %v5397_v4, 4  ;;  %v3618_v36 = vcombine.low %v405_v48, %v416_v60  ;;  %v3619_v37 = vcombine.high %v405_v48, %v416_v60 }
 0x16e   :  { %1199 = vrot.lane.b32.xlu1 %v4998_v25, %s3871_s23 }
 0x16f   :  { %1187 = vrot.lane.b32.xlu0 %v5003_v33, %s3871_s23  ;;  %v1287_v12 = vsel %vm183_vm0, %v6263_v56, %v6202_v13  ;;  %v1276_v45 = vsel %vm183_vm0, %v6264_v35, %v6204_v38  ;;  %3291 = vmatprep.subr.bf16.mxu1 %v3619_v37  ;;  %v32_v37 = vld [vmem:[%s6127_s0 + $0x88] sm:$0xf] }
 0x170   :  { %v1288_v11 = vsel %vm1250_vm7, %v4718_v20, %v1287_v12  ;;  %v1277_v18 = vsel %vm1250_vm7, %v4720_v10, %v1276_v45  ;;  %v5419_v3 = vpop.permute.xlu1 %155  ;;  %v5421_v60 = vpop.permute.xlu0 %143  ;;  %3292 = vmatpush1.bf16.msra.mxu1 %v3618_v36  ;;  %v38_v20 = vld [vmem:[%s6127_s0 + $0xb8] sm:$0xf]  ;;  %56 = vst [vmem:[#allocation2 + $0x80] sm:$0xf] %v32_v37  ;;  %v6265_v10 = vrot.slane %v5082_v46, 4  ;;  %v6266_v12 = vrot.slane %v5084_v52, 4 }
 0x171   :  { %v6203_v48 = vrot.slane %v5419_v3, 4  ;;  %v6205_v56 = vrot.slane %v5421_v60, 4  ;;  %v3715_v49 = vcombine.low %v1277_v18, %v1288_v11  ;;  %v3716_v13 = vcombine.high %v1277_v18, %v1288_v11  ;;  %62 = vst [vmem:[#allocation2 + $0xac] sm:$0xf] %v38_v20 }
 0x172   :  { %1010 = vrot.lane.b32.xlu1 %v4940_v57, %s3872_s28 }
 0x173   :  { %998 = vrot.lane.b32.xlu0 %v4945_v5, %s3872_s28  ;;  %v224_v36 = vsel %vm183_vm0, %v6265_v10, %v6203_v48  ;;  %v213_v35 = vsel %vm183_vm0, %v6266_v12, %v6205_v56  ;;  %3219 = vmatprep.subr.bf16.mxu0 %v3716_v13  ;;  %v20_v13 = vld [vmem:[%s6127_s0 + $0x28] sm:$0xf] }
 0x174   :  { %v225_v45 = vsel %vm185_vm5, %v5082_v46, %v224_v36  ;;  %v214_v11 = vsel %vm185_vm5, %v5084_v52, %v213_v35  ;;  %v5449_v18 = vpop.permute.xlu1 %1195  ;;  %v5451_v37 = vpop.permute.xlu0 %1183  ;;  %3220 = vmatpush2.bf16.msra.mxu0 %v3715_v49  ;;  %v26_v46 = vld [vmem:[%s6127_s0 + $0x58] sm:$0xf]  ;;  %44 = vst [vmem:[#allocation2 + $0x28] sm:$0xf] %v20_v13  ;;  %v6267_v52 = vrot.slane %v4792_v9, 4  ;;  %v6268_v36 = vrot.slane %v4794_v30, 4 }
 0x175   :  { %v6206_v20 = vrot.slane %v5449_v18, 4  ;;  %v1228_v10 = vrot.slane %v5451_v37, 4  ;;  %v3607_v48 = vcombine.low %v214_v11, %v225_v45  ;;  %v3608_v38 = vcombine.high %v214_v11, %v225_v45  ;;  %50 = vst [vmem:[#allocation2 + $0x54] sm:$0xf] %v26_v46 }
 0x176   :  { %986 = vrot.lane.b32.xlu1 %v4998_v25, %s3872_s28 }
 0x177   :  { %974 = vrot.lane.b32.xlu0 %v5003_v33, %s3872_s28  ;;  %v1265_v49 = vsel %vm183_vm0, %v6267_v52, %v6206_v20  ;;  %v1254_v12 = vsel %vm183_vm0, %v6268_v36, %v1228_v10  ;;  %3293 = vmatprep.subr.bf16.mxu1 %v3608_v38 }
 0x178   :  { %v1266_v35 = vsel %vm1250_vm7, %v4792_v9, %v1265_v49  ;;  %v1255_v45 = vsel %vm1250_vm7, %v4794_v30, %v1254_v12  ;;  %v5479_v11 = vpop.permute.xlu1 %131  ;;  %v5481_v13 = vpop.permute.xlu0 %119  ;;  %3294 = vmatpush1.bf16.msra.mxu1 %v3607_v48 }
 0x179   :  { %v6208_v46 = vrot.slane %v5479_v11, 4  ;;  %v6207_v52 = vrot.slane %v5481_v13, 4  ;;  %v3704_v56 = vcombine.low %v1255_v45, %v1266_v35  ;;  %v3705_v20 = vcombine.high %v1255_v45, %v1266_v35 }
 0x17a   :  { %797 = vrot.lane.b32.xlu1 %v4940_v57, %s3873_s4 }
 0x17b   :  { %785 = vrot.lane.b32.xlu0 %v4945_v5, %s3873_s4  ;;  %v202_v30 = vsel %vm183_vm0, %v168_v1, %v6208_v46  ;;  %v191_v9 = vsel %vm183_vm0, %v162_v40, %v6207_v52  ;;  %3221 = vmatprep.subr.bf16.mxu0 %v3705_v20  ;;  %v6270_v40 = vrot.slane %v4840_v21, 4 }
 0x17c   :  { %v203_v38 = vsel %vm185_vm5, %v5127_v62, %v202_v30  ;;  %v192_v57 = vsel %vm185_vm5, %v5129_v2, %v191_v9  ;;  %v5503_v5 = vpop.permute.xlu1 %1006  ;;  %v5505_v48 = vpop.permute.xlu0 %994  ;;  %3222 = vmatpush2.bf16.msra.mxu0 %v3704_v56  ;;  %v6269_v62 = vrot.slane %v4838_v29, 4 }
 0x17d   :  { %v1033_v1 = vrot.slane %v5503_v5, 4  ;;  %v1027_v49 = vrot.slane %v5505_v48, 4  ;;  %v3596_v36 = vcombine.low %v192_v57, %v203_v38  ;;  %v3597_v12 = vcombine.high %v192_v57, %v203_v38 }
 0x17e   :  { %773 = vrot.lane.b32.xlu1 %v4998_v25, %s3873_s4  ;;  %v1989_v25 = vld [vmem:[%s6129_s2 + $0x8] sm:$0xff] }
 0x17f   :  { %761 = vrot.lane.b32.xlu0 %v5003_v33, %s3873_s4  ;;  %v1074_v2 = vsel %vm183_vm0, %v6269_v62, %v1033_v1  ;;  %v1063_v56 = vsel %vm183_vm0, %v6270_v40, %v1027_v49  ;;  %3295 = vmatprep.subr.bf16.mxu1 %v3597_v12  ;;  %v1988_v33 = vld [vmem:[%s6129_s2] sm:$0xff]  ;;  %v6271_v62 = vcombine.high %v4747_v17, %v4752_v0 }
 0x180   :  { %v1075_v20 = vsel %vm1037_vm8, %v4838_v29, %v1074_v2  ;;  %v1064_v35 = vsel %vm1037_vm8, %v4840_v21, %v1063_v56  ;;  %v5533_v45 = vpop.permute.xlu1 %982  ;;  %v5535_v30 = vpop.permute.xlu0 %970  ;;  %3296 = vmatpush1.bf16.msra.mxu1 %v3596_v36  ;;  %v6272_v29 = vrot.slane %v4892_v27, 4  ;;  %v6273_v36 = vrot.slane %v4894_v63, 4 }
 0x181   :  { %v1021_v9 = vrot.slane %v5533_v45, 4  ;;  %v1015_v38 = vrot.slane %v5535_v30, 4  ;;  %v3693_v57 = vcombine.low %v1064_v35, %v1075_v20  ;;  %v3694_v12 = vcombine.high %v1064_v35, %v1075_v20  ;;  %3297 = vmatprep.subr.bf16.mxu1 %v6271_v62 }
 0x182   :  { %1997 = vperm.xlu1 %3817, %v1989_v25   ;;  %v6274_v20 = vcombine.low %v4747_v17, %v4752_v0  ;;  %v6277_v17 = vrot.slane %v4953_v7, 4 }
 0x183   :  { %1992 = vperm.xlu0 %3816, %v1988_v33   ;;  %v1052_v21 = vsel %vm183_vm0, %v6272_v29, %v1021_v9  ;;  %v1041_v2 = vsel %vm183_vm0, %v6273_v36, %v1015_v38  ;;  %3223 = vmatprep.subr.bf16.mxu0 %v3694_v12 }
 0x184   :  { %v1053_v40 = vsel %vm1037_vm8, %v4892_v27, %v1052_v21  ;;  %v1042_v56 = vsel %vm1037_vm8, %v4894_v63, %v1041_v2  ;;  %v5556_v25 = vpop.permute.xlu1 %793  ;;  %v5558_v33 = vpop.permute.xlu0 %781  ;;  %3224 = vmatpush2.bf16.msra.mxu0 %v3693_v57  ;;  %3298 = vmatpush1.bf16.msra.mxu1 %v6274_v20  ;;  %v6275_v27 = vcombine.high %v4772_v6, %v4778_v54  ;;  %v6276_v63 = vrot.slane %v4951_v14, 4 }
 0x185   :  { %v820_v35 = vrot.slane %v5556_v25, 4  ;;  %v814_v62 = vrot.slane %v5558_v33, 4  ;;  %v3682_v12 = vcombine.low %v1042_v56, %v1053_v40  ;;  %v3683_v29 = vcombine.high %v1042_v56, %v1053_v40 }
 0x186   :  { %3299 = vmatprep.subr.bf16.mxu1 %v6275_v27  ;;  %v6278_v56 = vcombine.low %v4772_v6, %v4778_v54 }
 0x187   :  { %v861_v57 = vsel %vm183_vm0, %v6276_v63, %v820_v35  ;;  %v850_v0 = vsel %vm183_vm0, %v6277_v17, %v814_v62  ;;  %3225 = vmatprep.subr.bf16.mxu0 %v3683_v29  ;;  %v6281_v17 = vld [vmem:[#allocation5_spill] sm:$0xff] }
 0x188   :  { %v862_v21 = vsel %vm824_vm9, %v4951_v14, %v861_v57  ;;  %v851_v36 = vsel %vm824_vm9, %v4953_v7, %v850_v0  ;;  %v5582_v2 = vpop.permute.xlu1 %769  ;;  %v5584_v40 = vpop.permute.xlu0 %757  ;;  %3226 = vmatpush2.bf16.msra.mxu0 %v3682_v12  ;;  %3300 = vmatpush1.bf16.msra.mxu1 %v6278_v56  ;;  %v6279_v14 = vld [vmem:[#allocation4_spill] sm:$0xff]  ;;  %v6282_v12 = vrot.slane %v6281_v17, 4 }
 0x189   :  { %v6219_v20 = vrot.slane %v5582_v2, 4  ;;  %v6217_v27 = vrot.slane %v5584_v40, 4  ;;  %v3671_v29 = vcombine.low %v851_v36, %v862_v21  ;;  %v3672_v63 = vcombine.high %v851_v36, %v862_v21 }
 0x18a   :  { %v6280_v57 = vrot.slane %v6279_v14, 4 }
 0x18b   :  { %v828_v0 = vsel %vm183_vm0, %v6282_v12, %v6217_v27  ;;  %3227 = vmatprep.subr.bf16.mxu0 %v3672_v63 }
 0x18c   :  { %v839_v7 = vsel %vm183_vm0, %v6280_v57, %v6219_v20  ;;  %v829_v54 = vsel %vm824_vm9, %v6281_v17, %v828_v0  ;;  %v5605_v21 = vpop.permute.xlu1 %1434  ;;  %v5607_v36 = vpop.permute.xlu0 %1422  ;;  %3228 = vmatpush2.bf16.msra.mxu0 %v3671_v29 }
 0x18d   :  { %v840_v6 = vsel %vm824_vm9, %v6279_v14, %v839_v7  ;;  %v6209_v56 = vrot.slane %v5605_v21, 4  ;;  %v6212_v57 = vrot.slane %v5607_v36, 4  ;;  %v6283_v14 = vrot.slane %v5295_v51, 4 }
 0x18e   :  { %v3660_v52 = vcombine.low %v829_v54, %v840_v6  ;;  %v3661_v46 = vcombine.high %v829_v54, %v840_v6 }
 0x18f   :  { %v1502_v63 = vsel %vm183_vm0, %v1459_v59, %v6209_v56  ;;  %v1491_v7 = vsel %vm183_vm0, %v6283_v14, %v6212_v57  ;;  %v6286_v14 = vld [vmem:[#allocation3_spill] sm:$0xff] }
 0x190   :  { %3229 = vmatprep.subr.bf16.mxu0 %v3661_v46  ;;  %v1503_v29 = vsel %vm1463_vm6, %v5293_v22, %v1502_v63  ;;  %v1492_v17 = vsel %vm1463_vm6, %v5295_v51, %v1491_v7  ;;  %v5625_v12 = vpop.permute.xlu1 %1410  ;;  %v5627_v0 = vpop.permute.xlu0 %1398  ;;  %v6284_v46 = vrot.slane %v5347_v32, 4  ;;  %v6285_v51 = vrot.slane %v5349_v53, 4 }
 0x191   :  { %3230 = vmatpush2.bf16.msra.mxu0 %v3660_v52  ;;  %v6211_v59 = vrot.slane %v5625_v12, 4  ;;  %v6210_v6 = vrot.slane %v5627_v0, 4  ;;  %v3739_v54 = vcombine.low %v1492_v17, %v1503_v29  ;;  %v3740_v56 = vcombine.high %v1492_v17, %v1503_v29 }
 0x193   :  { %v1480_v22 = vsel %vm183_vm0, %v6284_v46, %v6211_v59  ;;  %v1469_v63 = vsel %vm183_vm0, %v6285_v51, %v6210_v6  ;;  %3301 = vmatprep.subr.bf16.mxu1 %v3740_v56 }
 0x194   :  { %3232 = vmatmul.mubr.bf16.vlgmr.msra.gmra.mxu0 %v6286_v14  ;;  %v1481_v52 = vsel %vm1463_vm6, %v5347_v32, %v1480_v22  ;;  %v1470_v7 = vsel %vm1463_vm6, %v5349_v53, %v1469_v63  ;;  %v5646_v29 = vpop.permute.xlu1 %1647  ;;  %v5648_v17 = vpop.permute.xlu0 %1635  ;;  %3302 = vmatpush2.bf16.msra.mxu1 %v3739_v54  ;;  %v6287_v32 = vrot.slane %v5151_v44, 4  ;;  %v6288_v53 = vrot.slane %v5153_v28, 4 }
 0x195   :  { %3360 = vmatprep.mubr.bf16.mxu0 %v6238_v39  ;;  %v6213_v46 = vrot.slane %v5646_v29, 4  ;;  %v6215_v51 = vrot.slane %v5648_v17, 4  ;;  %v3728_v6 = vcombine.low %v1470_v7, %v1481_v52  ;;  %v3729_v14 = vcombine.high %v1470_v7, %v1481_v52 }
 0x197   :  { %v1715_v56 = vsel %vm183_vm0, %v6287_v32, %v6213_v46  ;;  %v1704_v54 = vsel %vm183_vm0, %v6288_v53, %v6215_v51  ;;  %3303 = vmatprep.subr.bf16.mxu1 %v3729_v14  ;;  %v6289_v14 = vrot.slane %v5395_v61, 4 }
 0x198   :  { %v1716_v22 = vsel %vm1676_vm2, %v5151_v44, %v1715_v56  ;;  %v1705_v63 = vsel %vm1676_vm2, %v5153_v28, %v1704_v54  ;;  %v5667_v52 = vpop.permute.xlu1 %1221  ;;  %v5669_v7 = vpop.permute.xlu0 %1209  ;;  %3304 = vmatpush2.bf16.msra.mxu1 %v3728_v6  ;;  %v6290_v28 = vrot.slane %v5397_v4, 4 }
 0x199   :  { %v6214_v32 = vrot.slane %v5667_v52, 4  ;;  %v6216_v59 = vrot.slane %v5669_v7, 4  ;;  %v3761_v57 = vcombine.low %v1705_v63, %v1716_v22  ;;  %v3762_v46 = vcombine.high %v1705_v63, %v1716_v22 }
 0x19b   :  { %v1289_v44 = vsel %vm183_vm0, %v6289_v14, %v6214_v32  ;;  %v1278_v56 = vsel %vm183_vm0, %v6290_v28, %v6216_v59  ;;  %3340 = vmatprep.subr.bf16.mxu0 %v3762_v46  ;;  %v6291_v46 = vrot.slane %v5182_v50, 4 }
 0x19c   :  { %v1290_v6 = vsel %vm1250_vm7, %v5395_v61, %v1289_v44  ;;  %v1279_v53 = vsel %vm1250_vm7, %v5397_v4, %v1278_v56  ;;  %v5687_v54 = vpop.permute.xlu1 %1623  ;;  %v5689_v22 = vpop.permute.xlu0 %1611  ;;  %3341 = vmatpush1.bf16.msra.mxu0 %v3761_v57  ;;  %v6292_v4 = vrot.slane %v5184_v15, 4 }
 0x19d   :  { %v6218_v63 = vrot.slane %v5687_v54, 4  ;;  %v1655_v14 = vrot.slane %v5689_v22, 4  ;;  %v3717_v32 = vcombine.low %v1279_v53, %v1290_v6  ;;  %v3718_v51 = vcombine.high %v1279_v53, %v1290_v6 }
 0x19f   :  { %v1693_v61 = vsel %vm183_vm0, %v6291_v46, %v6218_v63  ;;  %v1682_v44 = vsel %vm183_vm0, %v6292_v4, %v1655_v14  ;;  %3305 = vmatprep.subr.bf16.mxu1 %v3718_v51  ;;  %v6293_v63 = vrot.slane %v5220_v55, 4  ;;  %v6294_v51 = vrot.slane %v5222_v34, 4 }
 0x1a0   :  { %v1694_v57 = vsel %vm1676_vm2, %v5182_v50, %v1693_v61  ;;  %v1683_v28 = vsel %vm1676_vm2, %v5184_v15, %v1682_v44  ;;  %v585_v56 = vpop.permute.xlu1 %584  ;;  %v573_v6 = vpop.permute.xlu0 %572  ;;  %3306 = vmatpush2.bf16.msra.mxu1 %v3717_v32 }
 0x1a1   :  { %v609_v53 = vrot.slane %v585_v56, 4  ;;  %v603_v59 = vrot.slane %v573_v6, 4  ;;  %v3750_v27 = vcombine.low %v1683_v28, %v1694_v57  ;;  %v3751_v46 = vcombine.high %v1683_v28, %v1694_v57 }
 0x1a3   :  { %v652_v20 = vsel %vm183_vm0, %v6293_v63, %v609_v53  ;;  %v654_v4 = vsel %vm611_vm1, %v585_v56, %v609_v53  ;;  %v641_v50 = vsel %vm183_vm0, %v6294_v51, %v603_v59  ;;  %v643_v61 = vsel %vm611_vm1, %v573_v6, %v603_v59  ;;  %3342 = vmatprep.subr.bf16.mxu0 %v3751_v46 }
 0x1a4   :  { %v653_v15 = vsel %vm611_vm1, %v5220_v55, %v652_v20  ;;  %702 = vst [vmem:[#allocation2 + $0x2bc] sm:$0xf] %v654_v4  ;;  %v642_v32 = vsel %vm611_vm1, %v5222_v34, %v641_v50  ;;  %696 = vst [vmem:[#allocation2 + $0x290] sm:$0xf] %v643_v61  ;;  %v5719_v44 = vpop.permute.xlu1 %1197  ;;  %v5721_v63 = vpop.permute.xlu0 %1185  ;;  %3343 = vmatpush1.bf16.msra.mxu0 %v3750_v27  ;;  %v6295_v55 = vrot.slane %v5449_v18, 4 }
 0x1a5   :  { %v1235_v57 = vrot.slane %v5719_v44, 4  ;;  %v1229_v28 = vrot.slane %v5721_v63, 4  ;;  %v3653_v56 = vcombine.low %v642_v32, %v653_v15  ;;  %v3654_v59 = vcombine.high %v642_v32, %v653_v15 }
 0x1a7   :  { %v1267_v20 = vsel %vm183_vm0, %v6295_v55, %v1235_v57  ;;  %v1256_v34 = vsel %vm183_vm0, %v1228_v10, %v1229_v28  ;;  %3371 = vmatprep.subr.bf16.mxu0 %v3654_v59  ;;  %3769 = vmatmul.mubr.msk.bf16.vlgmr.msra.gmra.mxu0 %vm3023_vm4, %v5174_v58  ;;  %v6296_v10 = vrot.slane %v5264_v8, 4 }
 0x1a8   :  { %v1268_v27 = vsel %vm1250_vm7, %v5449_v18, %v1267_v20  ;;  %v1257_v6 = vsel %vm1250_vm7, %v5451_v37, %v1256_v34  ;;  %v561_v53 = vpop.permute.xlu1 %560  ;;  %v549_v46 = vpop.permute.xlu0 %548  ;;  %3372 = vmatpush1.bf16.msra.mxu0 %v3653_v56  ;;  %3403 = vmatprep.mubr.bf16.mxu0 %v5300_v19  ;;  %v6297_v18 = vrot.slane %v5266_v47, 4 }
 0x1a9   :  { %v597_v4 = vrot.slane %v561_v53, 4  ;;  %v591_v51 = vrot.slane %v549_v46, 4  ;;  %v3706_v50 = vcombine.low %v1257_v6, %v1268_v27  ;;  %v3707_v61 = vcombine.high %v1257_v6, %v1268_v27 }
 0x1ab   :  { %v630_v15 = vsel %vm183_vm0, %v6296_v10, %v597_v4  ;;  %v632_v58 = vsel %vm611_vm1, %v561_v53, %v597_v4  ;;  %v619_v32 = vsel %vm183_vm0, %v6297_v18, %v591_v51  ;;  %v621_v37 = vsel %vm611_vm1, %v549_v46, %v591_v51  ;;  %3307 = vmatprep.subr.bf16.mxu1 %v3707_v61 }
 0x1ac   :  { %v631_v19 = vsel %vm611_vm1, %v5264_v8, %v630_v15  ;;  %690 = vst [vmem:[#allocation2 + $0x264] sm:$0xf] %v632_v58  ;;  %v620_v56 = vsel %vm611_vm1, %v5266_v47, %v619_v32  ;;  %684 = vst [vmem:[#allocation2 + $0x238] sm:$0xf] %v621_v37  ;;  %v5754_v59 = vpop.permute.xlu1 %1008  ;;  %v5756_v55 = vpop.permute.xlu0 %996  ;;  %3308 = vmatpush2.bf16.msra.mxu1 %v3706_v50  ;;  %v6298_v15 = vrot.slane %v5323_v26, 4  ;;  %v6299_v18 = vrot.slane %v5325_v42, 4 }
 0x1ad   :  { %v1034_v20 = vrot.slane %v5754_v59, 4  ;;  %v1028_v34 = vrot.slane %v5756_v55, 4  ;;  %v3642_v27 = vcombine.low %v620_v56, %v631_v19  ;;  %v3643_v6 = vcombine.high %v620_v56, %v631_v19 }
 0x1af   :  { %v1076_v8 = vsel %vm183_vm0, %v1033_v1, %v1034_v20  ;;  %v1065_v47 = vsel %vm183_vm0, %v1027_v49, %v1028_v34  ;;  %3373 = vmatprep.subr.bf16.mxu0 %v3643_v6 }
 0x1b0   :  { %v1077_v53 = vsel %vm1037_vm8, %v5503_v5, %v1076_v8  ;;  %v1066_v46 = vsel %vm1037_vm8, %v5505_v48, %v1065_v47  ;;  %v372_v4 = vpop.permute.xlu1 %371  ;;  %v360_v51 = vpop.permute.xlu0 %359  ;;  %3374 = vmatpush1.bf16.msra.mxu0 %v3642_v27 }
 0x1b1   :  { %v396_v50 = vrot.slane %v372_v4, 4  ;;  %v390_v61 = vrot.slane %v360_v51, 4  ;;  %v3695_v10 = vcombine.low %v1066_v46, %v1077_v53  ;;  %v3696_v1 = vcombine.high %v1066_v46, %v1077_v53 }
 0x1b3   :  { %v439_v58 = vsel %vm183_vm0, %v6298_v15, %v396_v50  ;;  %v441_v49 = vsel %vm398_vm3, %v372_v4, %v396_v50  ;;  %v428_v5 = vsel %vm183_vm0, %v6299_v18, %v390_v61  ;;  %v430_v32 = vsel %vm398_vm3, %v360_v51, %v390_v61  ;;  %3309 = vmatprep.subr.bf16.mxu1 %v3696_v1 }
 0x1b4   :  { %v440_v48 = vsel %vm398_vm3, %v5323_v26, %v439_v58  ;;  %489 = vst [vmem:[#allocation2 + $0x20c] sm:$0xf] %v441_v49  ;;  %v429_v37 = vsel %vm398_vm3, %v5325_v42, %v428_v5  ;;  %483 = vst [vmem:[#allocation2 + $0x1e0] sm:$0xf] %v430_v32  ;;  %v5786_v19 = vpop.permute.xlu1 %984  ;;  %v5788_v56 = vpop.permute.xlu0 %972  ;;  %3310 = vmatpush2.bf16.msra.mxu1 %v3695_v10  ;;  %v6300_v1 = vrot.slane %v5371_v43, 4  ;;  %v6301_v58 = vrot.slane %v5373_v24, 4 }
 0x1b5   :  { %v1022_v27 = vrot.slane %v5786_v19, 4  ;;  %v1016_v6 = vrot.slane %v5788_v56, 4  ;;  %v3631_v8 = vcombine.low %v429_v37, %v440_v48  ;;  %v3632_v47 = vcombine.high %v429_v37, %v440_v48 }
 0x1b7   :  { %v1054_v26 = vsel %vm183_vm0, %v1021_v9, %v1022_v27  ;;  %v1043_v42 = vsel %vm183_vm0, %v1015_v38, %v1016_v6  ;;  %3375 = vmatprep.subr.bf16.mxu0 %v3632_v47 }
 0x1b8   :  { %v1055_v53 = vsel %vm1037_vm8, %v5533_v45, %v1054_v26  ;;  %v1044_v46 = vsel %vm1037_vm8, %v5535_v30, %v1043_v42  ;;  %v348_v4 = vpop.permute.xlu1 %347  ;;  %v336_v51 = vpop.permute.xlu0 %335  ;;  %3376 = vmatpush1.bf16.msra.mxu0 %v3631_v8 }
 0x1b9   :  { %v384_v50 = vrot.slane %v348_v4, 4  ;;  %v378_v61 = vrot.slane %v336_v51, 4  ;;  %v3684_v10 = vcombine.low %v1044_v46, %v1055_v53  ;;  %v3685_v9 = vcombine.high %v1044_v46, %v1055_v53 }
 0x1bb   :  { %v417_v15 = vsel %vm183_vm0, %v6300_v1, %v384_v50  ;;  %v419_v38 = vsel %vm398_vm3, %v348_v4, %v384_v50  ;;  %v406_v45 = vsel %vm183_vm0, %v6301_v58, %v378_v61  ;;  %v408_v49 = vsel %vm398_vm3, %v336_v51, %v378_v61  ;;  %3311 = vmatprep.subr.bf16.mxu1 %v3685_v9 }
 0x1bc   :  { %v418_v30 = vsel %vm398_vm3, %v5371_v43, %v417_v15  ;;  %477 = vst [vmem:[#allocation2 + $0x1b4] sm:$0xf] %v419_v38  ;;  %v407_v18 = vsel %vm398_vm3, %v5373_v24, %v406_v45  ;;  %471 = vst [vmem:[#allocation2 + $0x188] sm:$0xf] %v408_v49  ;;  %v5818_v5 = vpop.permute.xlu1 %795  ;;  %v5820_v32 = vpop.permute.xlu0 %783  ;;  %3312 = vmatpush2.bf16.msra.mxu1 %v3684_v10  ;;  %v6302_v61 = vrot.slane %v5419_v3, 4  ;;  %v6303_v9 = vrot.slane %v5421_v60, 4 }
 0x1bd   :  { %v821_v48 = vrot.slane %v5818_v5, 4  ;;  %v815_v37 = vrot.slane %v5820_v32, 4  ;;  %v3620_v8 = vcombine.low %v407_v18, %v418_v30  ;;  %v3621_v47 = vcombine.high %v407_v18, %v418_v30 }
 0x1bf   :  { %v863_v43 = vsel %vm183_vm0, %v820_v35, %v821_v48  ;;  %v852_v24 = vsel %vm183_vm0, %v814_v62, %v815_v37  ;;  %3377 = vmatprep.subr.bf16.mxu0 %v3621_v47 }
 0x1c0   :  { %v864_v26 = vsel %vm824_vm9, %v5556_v25, %v863_v43  ;;  %v853_v42 = vsel %vm824_vm9, %v5558_v33, %v852_v24  ;;  %v158_v53 = vpop.permute.xlu1 %157  ;;  %v146_v46 = vpop.permute.xlu0 %145  ;;  %3378 = vmatpush1.bf16.msra.mxu0 %v3620_v8 }
 0x1c1   :  { %v182_v4 = vrot.slane %v158_v53, 4  ;;  %v176_v51 = vrot.slane %v146_v46, 4  ;;  %v3673_v50 = vcombine.low %v853_v42, %v864_v26  ;;  %v3674_v35 = vcombine.high %v853_v42, %v864_v26 }
 0x1c3   :  { %v226_v10 = vsel %vm183_vm0, %v6302_v61, %v182_v4  ;;  %v228_v62 = vsel %vm185_vm5, %v158_v53, %v182_v4  ;;  %v215_v25 = vsel %vm183_vm0, %v6303_v9, %v176_v51  ;;  %v217_v1 = vsel %vm185_vm5, %v146_v46, %v176_v51  ;;  %3313 = vmatprep.subr.bf16.mxu1 %v3674_v35 }
 0x1c4   :  { %v227_v33 = vsel %vm185_vm5, %v5419_v3, %v226_v10  ;;  %276 = vst [vmem:[#allocation2 + $0x15c] sm:$0xf] %v228_v62  ;;  %v216_v15 = vsel %vm185_vm5, %v5421_v60, %v215_v25  ;;  %270 = vst [vmem:[#allocation2 + $0x130] sm:$0xf] %v217_v1  ;;  %v5850_v38 = vpop.permute.xlu1 %771  ;;  %v5852_v58 = vpop.permute.xlu0 %759  ;;  %3314 = vmatpush2.bf16.msra.mxu1 %v3673_v50  ;;  %v6304_v3 = vrot.slane %v5582_v2, 4  ;;  %v6305_v60 = vrot.slane %v5584_v40, 4 }
 0x1c5   :  { %v809_v45 = vrot.slane %v5850_v38, 4  ;;  %v803_v49 = vrot.slane %v5852_v58, 4  ;;  %v3609_v30 = vcombine.low %v216_v15, %v227_v33  ;;  %v3610_v18 = vcombine.high %v216_v15, %v227_v33 }
 0x1c6   :  { %v6306_v50 = vrot.slane %v5479_v11, 4  ;;  %v6307_v10 = vrot.slane %v5481_v13, 4 }
 0x1c7   :  { %v841_v8 = vsel %vm183_vm0, %v6304_v3, %v809_v45  ;;  %v830_v47 = vsel %vm183_vm0, %v6305_v60, %v803_v49  ;;  %3379 = vmatprep.subr.bf16.mxu0 %v3610_v18  ;;  %v6308_v3 = vrot.slane %v5646_v29, 4 }
 0x1c8   :  { %v842_v43 = vsel %vm824_vm9, %v5582_v2, %v841_v8  ;;  %v831_v24 = vsel %vm824_vm9, %v5584_v40, %v830_v47  ;;  %v134_v26 = vpop.permute.xlu1 %133  ;;  %3380 = vmatpush1.bf16.msra.mxu0 %v3609_v30 }
 0x1c9   :  { %v122_v42 = vpop.permute.xlu0 %121  ;;  %v170_v53 = vrot.slane %v134_v26, 4  ;;  %v3662_v4 = vcombine.low %v831_v24, %v842_v43  ;;  %v3663_v51 = vcombine.high %v831_v24, %v842_v43  ;;  %v5893_v43 = vld [vmem:[%s6128_s1] ss:$12 sps:$4 sm:$0xff]  }
 0x1ca   :  { %v164_v46 = vrot.slane %v122_v42, 4 }
 0x1cb   :  { %v204_v35 = vsel %vm183_vm0, %v6306_v50, %v170_v53  ;;  %v206_v61 = vsel %vm185_vm5, %v134_v26, %v170_v53  ;;  %3315 = vmatprep.subr.bf16.mxu1 %v3663_v51 }
 0x1cc   :  { %v193_v2 = vsel %vm183_vm0, %v6307_v10, %v164_v46  ;;  %v195_v62 = vsel %vm185_vm5, %v122_v42, %v164_v46  ;;  %v205_v40 = vsel %vm185_vm5, %v5479_v11, %v204_v35  ;;  %264 = vst [vmem:[#allocation2 + $0x104] sm:$0xf] %v206_v61  ;;  %v1650_v25 = vpop.permute.xlu1 %1649  ;;  %3316 = vmatpush2.bf16.msra.mxu1 %v3662_v4  ;;  %v6309_v11 = vrot.slane %v5648_v17, 4 }
 0x1cd   :  { %v194_v9 = vsel %vm185_vm5, %v5481_v13, %v193_v2  ;;  %258 = vst [vmem:[#allocation2 + $0xd8] sm:$0xf] %v195_v62  ;;  %v1638_v1 = vpop.permute.xlu0 %1637  ;;  %v1674_v33 = vrot.slane %v1650_v25, 4  ;;  %v6310_v35 = vcombine.high %v5195_v16, %v5200_v31 }
 0x1ce   :  { %v1668_v15 = vrot.slane %v1638_v1, 4  ;;  %v3598_v30 = vcombine.low %v194_v9, %v205_v40  ;;  %v3599_v18 = vcombine.high %v194_v9, %v205_v40 }
 0x1cf   :  { %v1717_v8 = vsel %vm183_vm0, %v6308_v3, %v1674_v33  ;;  %v1719_v60 = vsel %vm1676_vm2, %v1650_v25, %v1674_v33  ;;  %3318 = vmatmul.mubr.bf16.vlgmr.msra.gmra.mxu1 %v5893_v43  ;;  %v6312_v33 = vcombine.low %v5195_v16, %v5200_v31  ;;  %v6315_v3 = vrot.slane %v5607_v36, 4 }
 0x1d0   :  { %v1706_v47 = vsel %vm183_vm0, %v6309_v11, %v1668_v15  ;;  %v1708_v13 = vsel %vm1676_vm2, %v1638_v1, %v1668_v15  ;;  %v1718_v24 = vsel %vm1676_vm2, %v5646_v29, %v1717_v8  ;;  %1767 = vst [vmem:[#allocation2 + $0x62c] sm:$0xf] %v1719_v60  ;;  %v1626_v42 = vpop.permute.xlu1 %1625  ;;  %3381 = vmatprep.subr.bf16.mxu0 %v3599_v18  ;;  %v6311_v29 = vrot.slane %v5687_v54, 4 }
 0x1d1   :  { %v1707_v26 = vsel %vm1676_vm2, %v5648_v17, %v1706_v47  ;;  %1761 = vst [vmem:[#allocation2 + $0x600] sm:$0xf] %v1708_v13  ;;  %v1614_v53 = vpop.permute.xlu0 %1613  ;;  %3446 = vmatprep.mubr.bf16.mxu1 %v6238_v39  ;;  %v1662_v46 = vrot.slane %v1626_v42, 4  ;;  %3382 = vmatpush1.bf16.msra.mxu0 %v3598_v30  ;;  %v6313_v30 = vcombine.high %v5235_v41, %v5240_v23 }
 0x1d2   :  { %v1656_v4 = vrot.slane %v1614_v53, 4  ;;  %v3763_v51 = vcombine.low %v1707_v26, %v1718_v24  ;;  %v3764_v50 = vcombine.high %v1707_v26, %v1718_v24  ;;  %3383 = vmatprep.subr.bf16.mxu0 %v6310_v35  ;;  %v6316_v26 = vcombine.low %v5235_v41, %v5240_v23 }
 0x1d3   :  { %v1695_v61 = vsel %vm183_vm0, %v6311_v29, %v1662_v46  ;;  %v1697_v17 = vsel %vm1676_vm2, %v1626_v42, %v1662_v46  ;;  %v6317_v46 = vrot.slane %v5625_v12, 4 }
 0x1d4   :  { %v1684_v10 = vsel %vm183_vm0, %v1655_v14, %v1656_v4  ;;  %v1686_v39 = vsel %vm1676_vm2, %v1614_v53, %v1656_v4  ;;  %3426 = vmatprep.subr.bf16.mxu1 %v3764_v50  ;;  %v1696_v2 = vsel %vm1676_vm2, %v5687_v54, %v1695_v61  ;;  %1755 = vst [vmem:[#allocation2 + $0x5d4] sm:$0xf] %v1697_v17  ;;  %v1437_v40 = vpop.permute.xlu1 %1436  ;;  %v6314_v54 = vrot.slane %v5605_v21, 4  ;;  %v5952_v61 = vld [vmem:[%s6128_s1 + $0x8] ss:$12 sps:$4 sm:$0xff]  }
 0x1d5   :  { %v1685_v62 = vsel %vm1676_vm2, %v5689_v22, %v1684_v10  ;;  %1749 = vst [vmem:[#allocation2 + $0x5a8] sm:$0xf] %v1686_v39  ;;  %v1425_v9 = vpop.permute.xlu0 %1424  ;;  %3427 = vmatpush1.bf16.msra.mxu1 %v3763_v51  ;;  %v1461_v25 = vrot.slane %v1437_v40, 4  ;;  %3384 = vmatpush1.bf16.msra.mxu0 %v6312_v33 }
 0x1d6   :  { %v1455_v1 = vrot.slane %v1425_v9, 4  ;;  %v3752_v14 = vcombine.low %v1685_v62, %v1696_v2  ;;  %v3753_v15 = vcombine.high %v1685_v62, %v1696_v2  ;;  %3385 = vmatprep.subr.bf16.mxu0 %v6313_v30  ;;  %v6319_v2 = vrot.slane %v5667_v52, 4 }
 0x1d7   :  { %v1504_v22 = vsel %vm183_vm0, %v6314_v54, %v1461_v25  ;;  %v1506_v18 = vsel %vm1463_vm6, %v1437_v40, %v1461_v25 }
 0x1d8   :  { %v1493_v8 = vsel %vm183_vm0, %v6315_v3, %v1455_v1  ;;  %v1495_v60 = vsel %vm1463_vm6, %v1425_v9, %v1455_v1  ;;  %3428 = vmatprep.subr.bf16.mxu1 %v3753_v15  ;;  %v1505_v16 = vsel %vm1463_vm6, %v5605_v21, %v1504_v22  ;;  %1554 = vst [vmem:[#allocation2 + $0x57c] sm:$0xf] %v1506_v18  ;;  %v1413_v11 = vpop.permute.xlu1 %1412  ;;  %v6320_v9 = vrot.slane %v5669_v7, 4  ;;  %v3843_v22 = vld [vmem:[#allocation2 + $0x290] ss:$44 sps:$4 sm:$0xff]  }
 0x1d9   :  { %v1494_v31 = vsel %vm1463_vm6, %v5607_v36, %v1493_v8  ;;  %1548 = vst [vmem:[#allocation2 + $0x550] sm:$0xf] %v1495_v60  ;;  %v1401_v47 = vpop.permute.xlu0 %1400  ;;  %3429 = vmatpush1.bf16.msra.mxu1 %v3752_v14  ;;  %v1449_v13 = vrot.slane %v1413_v11, 4  ;;  %3386 = vmatpush1.bf16.msra.mxu0 %v6316_v26  ;;  %v6318_v36 = vrot.slane %v5627_v0, 4  ;;  %v3845_v26 = vld [vmem:[#allocation2 + $0x238] ss:$44 sps:$4 sm:$0xff]  }
 0x1da   :  { %v1443_v24 = vrot.slane %v1401_v47, 4  ;;  %v3741_v42 = vcombine.low %v1494_v31, %v1505_v16  ;;  %v3742_v53 = vcombine.high %v1494_v31, %v1505_v16 }
 0x1db   :  { %v1482_v21 = vsel %vm183_vm0, %v6317_v46, %v1449_v13  ;;  %v1484_v4 = vsel %vm1463_vm6, %v1413_v11, %v1449_v13 }
 0x1dc   :  { %v1471_v51 = vsel %vm183_vm0, %v6318_v36, %v1443_v24  ;;  %v1473_v50 = vsel %vm1463_vm6, %v1401_v47, %v1443_v24  ;;  %3387 = vmatprep.subr.bf16.mxu0 %v3742_v53  ;;  %v1483_v35 = vsel %vm1463_vm6, %v5625_v12, %v1482_v21  ;;  %1542 = vst [vmem:[#allocation2 + $0x524] sm:$0xf] %v1484_v4  ;;  %v1224_v23 = vpop.permute.xlu1 %1223 }
 0x1dd   :  { %v1472_v41 = vsel %vm1463_vm6, %v5627_v0, %v1471_v51  ;;  %1536 = vst [vmem:[#allocation2 + $0x4f8] sm:$0xf] %v1473_v50  ;;  %v1212_v29 = vpop.permute.xlu0 %1211  ;;  %3770 = vmatmul.mubr.msk.bf16.vlgmr.msra.gmra.mxu1 %vm3023_vm4, %v5952_v61  ;;  %v1248_v17 = vrot.slane %v1224_v23, 4  ;;  %3388 = vmatpush2.bf16.msra.mxu0 %v3741_v42  ;;  %v3864_v0 = vld [vmem:[%s6128_s1 + $0x4] ss:$12 sps:$4 sm:$0xff]  }
 0x1de   :  { %v1242_v10 = vrot.slane %v1212_v29, 4  ;;  %v3730_v39 = vcombine.low %v1472_v41, %v1483_v35  ;;  %v3731_v12 = vcombine.high %v1472_v41, %v1483_v35  ;;  %3489 = vmatprep.mubr.bf16.mxu1 %v3864_v0  ;;  %v3847_v41 = vld [vmem:[#allocation2 + $0x1e0] ss:$44 sps:$4 sm:$0xff]  }
 0x1df   :  { %v1291_v62 = vsel %vm183_vm0, %v6319_v2, %v1248_v17  ;;  %v1293_v40 = vsel %vm1250_vm7, %v1224_v23, %v1248_v17 }
 0x1e0   :  { %v1280_v25 = vsel %vm183_vm0, %v6320_v9, %v1242_v10  ;;  %v1282_v1 = vsel %vm1250_vm7, %v1212_v29, %v1242_v10  ;;  %v3842_v33 = vld [vmem:[#allocation2 + $0x550] ss:$44 sps:$4 sm:$0xff]   ;;  %3389 = vmatprep.subr.bf16.mxu0 %v3731_v12  ;;  %v1292_v14 = vsel %vm1250_vm7, %v5667_v52, %v1291_v62  ;;  %1341 = vst [vmem:[#allocation2 + $0x4cc] sm:$0xf] %v1293_v40  ;;  %v1200_v30 = vpop.permute.xlu1 %1199  ;;  %v3849_v40 = vld [vmem:[#allocation2 + $0x188] ss:$44 sps:$4 sm:$0xff]  }
 0x1e1   :  { %v1281_v15 = vsel %vm1250_vm7, %v5669_v7, %v1280_v25  ;;  %1335 = vst [vmem:[#allocation2 + $0x4a0] sm:$0xf] %v1282_v1  ;;  %v1188_v54 = vpop.permute.xlu0 %1187  ;;  %v1236_v18 = vrot.slane %v1200_v30, 4  ;;  %3772 = vmatprep.subr.bf16.mxu1 %v3842_v33  ;;  %3390 = vmatpush2.bf16.msra.mxu0 %v3730_v39 }
 0x1e2   :  { %v1230_v3 = vrot.slane %v1188_v54, 4  ;;  %v3719_v8 = vcombine.low %v1281_v15, %v1292_v14  ;;  %v3720_v60 = vcombine.high %v1281_v15, %v1292_v14  ;;  %3773 = vmatpush3.bf16.msra.mxu1 %v3843_v22 }
 0x1e3   :  { %v1269_v16 = vsel %vm183_vm0, %v1235_v57, %v1236_v18  ;;  %v1271_v52 = vsel %vm1250_vm7, %v1200_v30, %v1236_v18  ;;  %v3061_v30 = vpop.f32.mrf.mxu0 }
 0x1e4   :  { %v1258_v7 = vsel %vm183_vm0, %v1229_v28, %v1230_v3  ;;  %v1260_v31 = vsel %vm1250_vm7, %v1188_v54, %v1230_v3  ;;  %v3844_v11 = vld [vmem:[#allocation2 + $0x4f8] ss:$44 sps:$4 sm:$0xff]   ;;  %3391 = vmatprep.subr.bf16.mxu0 %v3720_v60  ;;  %v1270_v47 = vsel %vm1250_vm7, %v5719_v44, %v1269_v16  ;;  %1329 = vst [vmem:[#allocation2 + $0x474] sm:$0xf] %v1271_v52  ;;  %v1011_v24 = vpop.permute.xlu1 %1010  ;;  %v3104_v54 = vpop.f32.mrf.mxu1 }
 0x1e5   :  { %v1259_v13 = vsel %vm1250_vm7, %v5721_v63, %v1258_v7  ;;  %1323 = vst [vmem:[#allocation2 + $0x448] sm:$0xf] %v1260_v31  ;;  %v999_v57 = vpop.permute.xlu0 %998  ;;  %v1035_v42 = vrot.slane %v1011_v24, 4  ;;  %3774 = vmatprep.subr.bf16.mxu1 %v3844_v11  ;;  %3392 = vmatpush2.bf16.msra.mxu0 %v3719_v8  ;;  %v3851_v8 = vld [vmem:[#allocation2 + $0x130] ss:$44 sps:$4 sm:$0xff]  }
 0x1e6   :  { %v1029_v53 = vrot.slane %v999_v57, 4  ;;  %v3708_v28 = vcombine.low %v1259_v13, %v1270_v47  ;;  %v3709_v46 = vcombine.high %v1259_v13, %v1270_v47  ;;  %3775 = vmatpush3.bf16.msra.mxu1 %v3845_v26  ;;  %v3063_v47 = vpop.f32.mrf.mxu0 }
 0x1e7   :  { %v1078_v21 = vsel %vm183_vm0, %v1034_v20, %v1035_v42  ;;  %v1080_v44 = vsel %vm1037_vm8, %v1011_v24, %v1035_v42 }
 0x1e8   :  { %v1067_v63 = vsel %vm183_vm0, %v1028_v34, %v1029_v53  ;;  %v1069_v4 = vsel %vm1037_vm8, %v999_v57, %v1029_v53  ;;  %v3846_v36 = vld [vmem:[#allocation2 + $0x4a0] ss:$44 sps:$4 sm:$0xff]   ;;  %3393 = vmatprep.subr.bf16.mxu0 %v3709_v46  ;;  %v1079_v51 = vsel %vm1037_vm8, %v5754_v59, %v1078_v21  ;;  %1128 = vst [vmem:[#allocation2 + $0x41c] sm:$0xf] %v1080_v44  ;;  %v987_v35 = vpop.permute.xlu1 %986  ;;  %v3106_v57 = vpop.f32.mrf.mxu1 }
 0x1e9   :  { %v1068_v50 = vsel %vm1037_vm8, %v5756_v55, %v1067_v63  ;;  %1122 = vst [vmem:[#allocation2 + $0x3f0] sm:$0xf] %v1069_v4  ;;  %v975_v20 = vpop.permute.xlu0 %974  ;;  %v1023_v23 = vrot.slane %v987_v35, 4  ;;  %3776 = vmatprep.subr.bf16.mxu1 %v3846_v36  ;;  %3394 = vmatpush2.bf16.msra.mxu0 %v3708_v28  ;;  %v3065_v28 = vpop.f32.mrf.mxu0 }
 0x1ea   :  { %v1017_v29 = vrot.slane %v975_v20, 4  ;;  %v3697_v34 = vcombine.low %v1068_v50, %v1079_v51  ;;  %v3698_v17 = vcombine.high %v1068_v50, %v1079_v51  ;;  %3777 = vmatpush3.bf16.msra.mxu1 %v3847_v41  ;;  %v3108_v46 = vpop.f32.mrf.mxu1 }
 0x1eb   :  { %v1056_v10 = vsel %vm183_vm0, %v1022_v27, %v1023_v23  ;;  %v1058_v59 = vsel %vm1037_vm8, %v987_v35, %v1023_v23  ;;  %v3067_v44 = vpop.f32.mrf.mxu0  ;;  %v3858_v23 = vld [vmem:[#allocation2 + $0x600] ss:$44 sps:$4 sm:$0xff]  }
 0x1ec   :  { %v1045_v55 = vsel %vm183_vm0, %v1016_v6, %v1017_v29  ;;  %v1047_v39 = vsel %vm1037_vm8, %v975_v20, %v1017_v29  ;;  %v3848_v12 = vld [vmem:[#allocation2 + $0x448] ss:$44 sps:$4 sm:$0xff]   ;;  %3395 = vmatprep.subr.bf16.mxu0 %v3698_v17  ;;  %v1057_v0 = vsel %vm1037_vm8, %v5786_v19, %v1056_v10  ;;  %1116 = vst [vmem:[#allocation2 + $0x3c4] sm:$0xf] %v1058_v59  ;;  %v798_v62 = vpop.permute.xlu1 %797  ;;  %v3874_v20 = vmov 0.0  }
 0x1ed   :  { %v1046_v2 = vsel %vm1037_vm8, %v5788_v56, %v1045_v55  ;;  %1110 = vst [vmem:[#allocation2 + $0x398] sm:$0xf] %v1047_v39  ;;  %v786_v27 = vpop.permute.xlu0 %785  ;;  %v822_v9 = vrot.slane %v798_v62, 4  ;;  %3778 = vmatprep.subr.bf16.mxu1 %v3848_v12  ;;  %3396 = vmatpush2.bf16.msra.mxu0 %v3697_v34  ;;  %v3859_v59 = vld [vmem:[#allocation2 + $0x5a8] ss:$44 sps:$4 sm:$0xff]  }
 0x1ee   :  { %v816_v25 = vrot.slane %v786_v27, 4  ;;  %v3686_v6 = vcombine.low %v1046_v2, %v1057_v0  ;;  %v3687_v1 = vcombine.high %v1046_v2, %v1057_v0  ;;  %3779 = vmatpush3.bf16.msra.mxu1 %v3849_v40 }
 0x1ef   :  { %v865_v33 = vsel %vm183_vm0, %v821_v48, %v822_v9  ;;  %v867_v19 = vsel %vm824_vm9, %v798_v62, %v822_v9 }
 0x1f0   :  { %v854_v56 = vsel %vm183_vm0, %v815_v37, %v816_v25  ;;  %v856_v14 = vsel %vm824_vm9, %v786_v27, %v816_v25  ;;  %v3850_v15 = vld [vmem:[#allocation2 + $0x3f0] ss:$44 sps:$4 sm:$0xff]   ;;  %3397 = vmatprep.subr.bf16.mxu0 %v3687_v1  ;;  %v866_v22 = vsel %vm824_vm9, %v5818_v5, %v865_v33  ;;  %915 = vst [vmem:[#allocation2 + $0x36c] sm:$0xf] %v867_v19  ;;  %v774_v48 = vpop.permute.xlu1 %773 }
 0x1f1   :  { %v855_v18 = vsel %vm824_vm9, %v5820_v32, %v854_v56  ;;  %909 = vst [vmem:[#allocation2 + $0x340] sm:$0xf] %v856_v14  ;;  %v762_v3 = vpop.permute.xlu0 %761  ;;  %v810_v60 = vrot.slane %v774_v48, 4  ;;  %3780 = vmatprep.subr.bf16.mxu1 %v3850_v15  ;;  %3398 = vmatpush2.bf16.msra.mxu0 %v3686_v6 }
 0x1f2   :  { %v804_v16 = vrot.slane %v762_v3, 4  ;;  %v3675_v37 = vcombine.low %v855_v18, %v866_v22  ;;  %v3676_v52 = vcombine.high %v855_v18, %v866_v22  ;;  %3781 = vmatpush3.bf16.msra.mxu1 %v3851_v8 }
 0x1f3   :  { %v843_v7 = vsel %vm183_vm0, %v809_v45, %v810_v60  ;;  %v845_v5 = vsel %vm824_vm9, %v774_v48, %v810_v60  ;;  %v3853_v45 = vld [vmem:[#allocation2 + $0xd8] ss:$44 sps:$4 sm:$0xff]  }
 0x1f4   :  { %v832_v32 = vsel %vm183_vm0, %v803_v49, %v804_v16  ;;  %v834_v31 = vsel %vm824_vm9, %v762_v3, %v804_v16  ;;  %v3852_v11 = vld [vmem:[#allocation2 + $0x398] ss:$44 sps:$4 sm:$0xff]   ;;  %3399 = vmatprep.subr.bf16.mxu0 %v3676_v52  ;;  %v844_v13 = vsel %vm824_vm9, %v5850_v38, %v843_v7  ;;  %903 = vst [vmem:[#allocation2 + $0x314] sm:$0xf] %v845_v5  ;;  %v3855_v49 = vld [vmem:[#allocation2 + $0x80] ss:$44 sps:$4 sm:$0xff]  }
 0x1f5   :  { %v833_v24 = vsel %vm824_vm9, %v5852_v58, %v832_v32  ;;  %897 = vst [vmem:[#allocation2 + $0x2e8] sm:$0xf] %v834_v31  ;;  %3782 = vmatprep.subr.bf16.mxu1 %v3852_v11  ;;  %3400 = vmatpush2.bf16.msra.mxu0 %v3675_v37  ;;  %v3857_v38 = vld [vmem:[#allocation2 + $0x28] ss:$44 sps:$4 sm:$0xff]   ;;  %v3110_v58 = vpop.f32.mrf.mxu1 }
 0x1f6   :  { %v3664_v26 = vcombine.low %v833_v24, %v844_v13  ;;  %v3665_v42 = vcombine.high %v833_v24, %v844_v13  ;;  %3783 = vmatpush3.bf16.msra.mxu1 %v3853_v45 }
 0x1f8   :  { %v3854_v53 = vld [vmem:[#allocation2 + $0x340] ss:$44 sps:$4 sm:$0xff]   ;;  %3401 = vmatprep.subr.bf16.mxu0 %v3665_v42 }
 0x1f9   :  { %3784 = vmatprep.subr.bf16.mxu1 %v3854_v53  ;;  %3402 = vmatpush2.bf16.msra.mxu0 %v3664_v26 }
 0x1fa   :  { %3785 = vmatpush3.bf16.msra.mxu1 %v3855_v49 }
 0x1fc   :  { %v3856_v21 = vld [vmem:[#allocation2 + $0x2e8] ss:$44 sps:$4 sm:$0xff]   ;;  %3404 = vmatmul.mubr.bf16.vlgmr.msra.gmra.mxu0 %v5893_v43 }
 0x1fd   :  { %3786 = vmatprep.subr.bf16.mxu1 %v3856_v21  ;;  %v6032_v63 = vpop.permute.xlu1 %1997 }
 0x1fe   :  { %v6034_v4 = vpop.permute.xlu0 %1992  ;;  %3787 = vmatpush3.bf16.msra.mxu1 %v3857_v38  ;;  %v3066_v36 = vadd.f32 %v3065_v28, %v6032_v63  ;;  %v3068_v35 = vadd.f32 %v3067_v44, %v6032_v63 }
 0x1ff   :  { %v3062_v51 = vadd.f32 %v3061_v30, %v6034_v4  ;;  %v3064_v50 = vadd.f32 %v3063_v47, %v6034_v4  ;;  %3797 = vmatprep.subr.bf16.mxu1 %v3874_v20  ;;  %v3147_v41 = vpop.f32.mrf.mxu1 }
 0x200   :  { %v3109_v29 = vadd.f32 %v3108_v46, %v3066_v36  ;;  %v3111_v10 = vadd.f32 %v3110_v58, %v3068_v35  ;;  %v3148_v12 = vadd.f32 %v3147_v41, %v6034_v4 }
 0x201   :  { %v3105_v34 = vadd.f32 %v3104_v54, %v3062_v51  ;;  %v3107_v17 = vadd.f32 %v3106_v57, %v3064_v50  ;;  %3490 = vmatmul.mubr.bf16.vlgmr.msra.gmra.mxu1 %v5893_v43  ;;  %v3149_v43 = vpop.f32.mrf.mxu1 }
 0x202   :  { %3798 = vmatpush3.bf16.msra.mxu1 %v3858_v23  ;;  %3550 = vst [vmem:[%s6130_s3 + $0x58] sm:$0xff] %v3109_v29  ;;  %3801 = vmatprep.mubr.msk.bf16.mxu1 %vm3875_vm10, %v3874_v20  ;;  %3551 = vst [vmem:[%s6130_s3 + $0x60] sm:$0xff] %v3111_v10  ;;  %v3150_v0 = vadd.f32 %v3149_v43, %v6034_v4 }
 0x203   :  { %3539 = vst [vmem:[%s6130_s3] sm:$0xff] %v3105_v34  ;;  %3540 = vst [vmem:[%s6130_s3 + $0x8] sm:$0xff] %v3107_v17  ;;  %3799 = vmatprep.subr.bf16.mxu1 %v3874_v20  ;;  %v3151_v55 = vpop.f32.mrf.mxu1 }
 0x204   :  { %v3152_v62 = vadd.f32 %v3151_v55, %v6032_v63 }
 0x205   :  { %v3153_v39 = vpop.f32.mrf.mxu1 }
 0x206   :  { %3800 = vmatpush3.bf16.msra.mxu1 %v3859_v59  ;;  %v3154_v9 = vadd.f32 %v3153_v39, %v6032_v63 }
 0x209   :  { %3802 = vmatmul.mubr.msk.bf16.vlgmr.msra.gmra.mxu1 %vm3023_vm4, %v5952_v61 }
 0x20f   :  { %v3190_v2 = vpop.f32.mrf.mxu1 }
 0x210   :  { %v3191_v27 = vadd.f32 %v3190_v2, %v3148_v12 }
 0x211   :  { %v3192_v40 = vpop.f32.mrf.mxu1 }
 0x212   :  { %3541 = vst [vmem:[%s6130_s3 + $0x10] sm:$0xff] %v3191_v27  ;;  %v3193_v25 = vadd.f32 %v3192_v40, %v3150_v0 }
 0x213   :  { %v3194_v6 = vpop.f32.mrf.mxu1 }
 0x214   :  { %3542 = vst [vmem:[%s6130_s3 + $0x18] sm:$0xff] %v3193_v25  ;;  %v3195_v61 = vadd.f32 %v3194_v6, %v3152_v62 }
 0x215   :  { %v3196_v1 = vpop.f32.mrf.mxu1 }
 0x216   :  { %3552 = vst [vmem:[%s6130_s3 + $0x68] sm:$0xff] %v3195_v61  ;;  %v3197_v33 = vadd.f32 %v3196_v1, %v3154_v9 }
 0x218   :  { %3553 = vst [vmem:[%s6130_s3 + $0x70] sm:$0xff] %v3197_v33 }
 0x21b   :  { %v3276_v19 = vpop.f32.mrf.mxu1 }
 0x21d   :  { %v3278_v56 = vpop.f32.mrf.mxu1 }
 0x21f   :  { %v3280_v30 = vpop.f32.mrf.mxu1 }
 0x221   :  { %v3282_v60 = vpop.f32.mrf.mxu1 }
 0x254   :  { %v3233_v14 = vpop.f32.mrf.mxu0 }
 0x255   :  { %v3234_v15 = vadd.f32 %v3233_v14, %v6034_v4 }
 0x256   :  { %v3235_v54 = vpop.f32.mrf.mxu0 }
 0x257   :  { %v3277_v22 = vadd.f32 %v3276_v19, %v3234_v15  ;;  %v3236_v18 = vadd.f32 %v3235_v54, %v6034_v4 }
 0x258   :  { %v3237_v48 = vpop.f32.mrf.mxu0 }
 0x259   :  { %3543 = vst [vmem:[%s6130_s3 + $0x20] sm:$0xff] %v3277_v22  ;;  %v3279_v3 = vadd.f32 %v3278_v56, %v3236_v18  ;;  %v3238_v8 = vadd.f32 %v3237_v48, %v6032_v63 }
 0x25a   :  { %v3239_v16 = vpop.f32.mrf.mxu0 }
 0x25b   :  { %3544 = vst [vmem:[%s6130_s3 + $0x28] sm:$0xff] %v3279_v3  ;;  %v3281_v37 = vadd.f32 %v3280_v30, %v3238_v8  ;;  %v3240_v52 = vadd.f32 %v3239_v16, %v6032_v63 }
 0x25d   :  { %3554 = vst [vmem:[%s6130_s3 + $0x78] sm:$0xff] %v3281_v37  ;;  %v3283_v7 = vadd.f32 %v3282_v60, %v3240_v52 }
 0x25f   :  { %3555 = vst [vmem:[%s6130_s3 + $0x80] sm:$0xff] %v3283_v7 }
 0x267   :  { %v3362_v5 = vpop.f32.mrf.mxu0 }
 0x269   :  { %v3364_v32 = vpop.f32.mrf.mxu0 }
 0x26b   :  { %v3366_v45 = vpop.f32.mrf.mxu0 }
 0x26d   :  { %v3368_v46 = vpop.f32.mrf.mxu0 }
 0x28f   :  { %v3319_v31 = vpop.f32.mrf.mxu1 }
 0x290   :  { %v3320_v11 = vadd.f32 %v3319_v31, %v6034_v4 }
 0x291   :  { %v3321_v47 = vpop.f32.mrf.mxu1 }
 0x292   :  { %v3363_v13 = vadd.f32 %v3362_v5, %v3320_v11  ;;  %v3322_v24 = vadd.f32 %v3321_v47, %v6034_v4 }
 0x293   :  { %v3323_v57 = vpop.f32.mrf.mxu1 }
 0x294   :  { %3545 = vst [vmem:[%s6130_s3 + $0x30] sm:$0xff] %v3363_v13  ;;  %v3365_v26 = vadd.f32 %v3364_v32, %v3322_v24  ;;  %v3324_v42 = vadd.f32 %v3323_v57, %v6032_v63 }
 0x295   :  { %v3325_v49 = vpop.f32.mrf.mxu1 }
 0x296   :  { %3546 = vst [vmem:[%s6130_s3 + $0x38] sm:$0xff] %v3365_v26  ;;  %v3367_v53 = vadd.f32 %v3366_v45, %v3324_v42  ;;  %v3326_v28 = vadd.f32 %v3325_v49, %v6032_v63 }
 0x298   :  { %3556 = vst [vmem:[%s6130_s3 + $0x88] sm:$0xff] %v3367_v53  ;;  %v3369_v38 = vadd.f32 %v3368_v46, %v3326_v28 }
 0x29a   :  { %3557 = vst [vmem:[%s6130_s3 + $0x90] sm:$0xff] %v3369_v38 }
 0x29d   :  { %v3448_v21 = vpop.f32.mrf.mxu1 }
 0x29f   :  { %v3450_v44 = vpop.f32.mrf.mxu1 }
 0x2a1   :  { %v3452_v58 = vpop.f32.mrf.mxu1 }
 0x2a3   :  { %v3454_v35 = vpop.f32.mrf.mxu1 }
 0x2bc   :  { %v3405_v36 = vpop.f32.mrf.mxu0 }
 0x2bd   :  { %v3406_v51 = vadd.f32 %v3405_v36, %v6034_v4 }
 0x2be   :  { %v3407_v50 = vpop.f32.mrf.mxu0 }
 0x2bf   :  { %v3449_v20 = vadd.f32 %v3448_v21, %v3406_v51  ;;  %v3408_v41 = vadd.f32 %v3407_v50, %v6034_v4 }
 0x2c0   :  { %v3409_v23 = vpop.f32.mrf.mxu0 }
 0x2c1   :  { %3547 = vst [vmem:[%s6130_s3 + $0x40] sm:$0xff] %v3449_v20  ;;  %v3788_v29 = vpop.f32.mrf.mxu1  ;;  %v3451_v34 = vadd.f32 %v3450_v44, %v3408_v41  ;;  %v3410_v17 = vadd.f32 %v3409_v23, %v6032_v63 }
 0x2c2   :  { %v3411_v10 = vpop.f32.mrf.mxu0 }
 0x2c3   :  { %3548 = vst [vmem:[%s6130_s3 + $0x48] sm:$0xff] %v3451_v34  ;;  %v3789_v43 = vpop.f32.mrf.mxu1  ;;  %v3453_v59 = vadd.f32 %v3452_v58, %v3410_v17  ;;  %v3412_v55 = vadd.f32 %v3411_v10, %v6032_v63 }
 0x2c4   :  { %v3790_v39 = vadd.f32 %v3789_v43, %v3788_v29 }
 0x2c5   :  { %3558 = vst [vmem:[%s6130_s3 + $0x98] sm:$0xff] %v3453_v59  ;;  %v3791_v12 = vpop.f32.mrf.mxu1  ;;  %v3455_v0 = vadd.f32 %v3454_v35, %v3412_v55 }
 0x2c6   :  { %v3492_v27 = vadd.f32 %v3790_v39, %v6034_v4 }
 0x2c7   :  { %3559 = vst [vmem:[%s6130_s3 + $0xa0] sm:$0xff] %v3455_v0  ;;  %v3792_v2 = vpop.f32.mrf.mxu1 }
 0x2c8   :  { %v3793_v62 = vadd.f32 %v3792_v2, %v3791_v12 }
 0x2c9   :  { %v3532_v40 = vpop.f32.mrf.mxu1 }
 0x2ca   :  { %v3533_v9 = vadd.f32 %v3532_v40, %v3492_v27  ;;  %v3495_v6 = vadd.f32 %v3793_v62, %v6032_v63 }
 0x2cb   :  { %v3803_v25 = vpop.f32.mrf.mxu1 }
 0x2cc   :  { %3549 = vst [vmem:[%s6130_s3 + $0x50] sm:$0xff] %v3533_v9 }
 0x2cd   :  { %v3535_v61 = vpop.f32.mrf.mxu1 }
 0x2ce   :  { %v3536_v1 = vadd.f32 %v3535_v61, %v3495_v6 }
 0x2cf   :  { %v3804_v33 = vpop.f32.mrf.mxu1 }
 0x2d0   :  { %3560 = vst [vmem:[%s6130_s3 + $0xa8] sm:$0xff] %v3536_v1 }

// kernel: similarity_reg_net_forward.10
= control target key start
LH: loop header
LB: loop body
LE: loop exit
PB: predicated region body
PF: predicated region fallthrough
CT: control target
= control target key end

     0   :  { %s5602_s12 = smov 0   ;;  %s8303_s0 = inlined_call_operand.vmem [shape: bf16[3,32,2176], index: 0, kind: input, shape index: {}]   ;;  %s8304_s1 = inlined_call_operand.vmem [shape: bf16[8,288], index: 1, kind: input, shape index: {}]   ;;  %s8305_s2 = inlined_call_operand.vmem [shape: f32[8,1], index: 2, kind: input, shape index: {}]   ;;  %s8306_s3 = inlined_call_operand.vmem [shape: f32[8,6144], index: 3, kind: output, shape index: {}]  }
   0x1 LB: > { %s5608_s13 = sadd.s32 4294967295, %s5571_s12   ;;  %p5192_p0 = scmp.ge.s32.totalorder %s5571_s12, 1  ;;  %s5571_s12 = sphi %s5602_s12, %s13_s12  }
   0x2   : > { %p137_p1 = scmp.lt.s32.totalorder %s5571_s12, 4 }
   0x4   : > { %p138_p2 = pnand %p5192_p0, %p137_p1 }
   0x6   : > { %141 = sbr.rel (%p138_p2) target bundleno = 916 (0x394), region = 32 }
   0xb   : > { %p161_p3 = scmp.lt.s32.totalorder %s5608_s13, 2  ;;  %s5573_s19 = smov 127   ;;  %v8315_v20 = vmov 0   ;;  %vm417_vm0 = vcmask 1043456   ;;  %vm419_vm1 = vcmask 1039360   ;;  %vm2582_vm2 = vcmask 736256  }
   0xc   : > { %s5574_s20 = smov 90   ;;  %s5575_s21 = smov 110   ;;  %4533 = vmatprep.mubr.bf16.mxu1 %v8315_v20  ;;  %5515 = vset.pattern.permute.xlu0 %v8315_v20  ;;  %vm1037_vm3 = vcmask 900096   ;;  %vm4456_vm4 = vcmask 261120   ;;  %vm728_vm5 = vcmask 1031168   ;;  %vm2273_vm6 = vcmask 744448  }
   0xd   : > { %s162_s14 = scalar_select %p161_p3, %s5608_s13, 2  ;;  %vm1964_vm7 = vcmask 752640   ;;  %vm1655_vm8 = vcmask 883712   ;;  %vm1346_vm9 = vcmask 891904  }
   0xe   : > { %s5577_s22 = smov 126   ;;  %s5578_s23 = smov 91  }
   0xf   : > { %s5497_s15 = smul.u32 272, %s162_s14  ;;  %s5579_s24 = smov 92  }
  0x10   : > { %s5580_s25 = smov 108   ;;  %s5581_s26 = smov 109  }
  0x11   : > { %s5617_s18 = scalar_lea.vmem %s8303_s0, %s5497_s15  ;;  %s5194_s10 = sshll.u32 %s5608_s13, 4 }
  0x12   : > { %v5620_v0 = vld [vmem:[%s5617_s18 + $0x10] sm:$0xff]  ;;  %v5623_v1 = vld [vmem:[%s5617_s18] sm:$0xff]  ;;  %v5630_v2 = vld [vmem:[%s5617_s18 + $0x18] sm:$0xff]  ;;  %p167_p4 = scmp.lt.s32.totalorder %s5194_s10, 47 }
  0x13   : > { %313 = vrot.lane.b32.xlu1 %v5620_v0, %s5573_s19  ;;  %309 = vrot.lane.b32.xlu0 %v5623_v1, %s5573_s19  ;;  %v5633_v3 = vld [vmem:[%s5617_s18 + $0x8] sm:$0xff]  ;;  %v5641_v5 = vld [vmem:[%s5617_s18 + $0x20] sm:$0xff] }
  0x14   : > { %v242_v4 = vld [vmem:[%s5617_s18 + $0x28] sm:$0xff]  ;;  %v244_v6 = vld [vmem:[%s5617_s18 + $0x38] sm:$0xff]  ;;  %v243_v7 = vld [vmem:[%s5617_s18 + $0x30] sm:$0xff]  ;;  %s8587_s10 = smov (!%p167_p4, %s5194_s10), 47 }
  0x15   : > { %v5649_v8 = vld [vmem:[%s5617_s18 + $0x44] sm:$0xff]  ;;  %v245_v9 = vld [vmem:[%s5617_s18 + $0x40] sm:$0xf]  ;;  %v5658_v10 = vld [vmem:[%s5617_s18 + $0x54] sm:$0xff]  ;;  %s5195_s11 = sshll.u32 %s8587_s10, 3 }
  0x16   : > { %v5661_v11 = vld [vmem:[%s5617_s18 + $0x4c] sm:$0xff]  ;;  %v5668_v12 = vld [vmem:[%s5617_s18 + $0x64] sm:$0xff]  ;;  %v5671_v13 = vld [vmem:[%s5617_s18 + $0x5c] sm:$0xff]  ;;  %s8258_s15 = scalar_lea.vmem %s8306_s3, %s5195_s11 }
  0x17   : > { %315 = vrot.lane.b32.xlu1 %v5630_v2, %s5573_s19  ;;  %311 = vrot.lane.b32.xlu0 %v5633_v3, %s5573_s19  ;;  %v5678_v14 = vld [vmem:[%s5617_s18 + $0x88] sm:$0xff]  ;;  %v5688_v17 = vld [vmem:[%s5617_s18 + $0x90] sm:$0xff] }
  0x18   : > { %v251_v15 = vld [vmem:[%s5617_s18 + $0x6c] sm:$0xff]  ;;  %v5695_v18 = vld [vmem:[%s5617_s18 + $0xd4] sm:$0xff]  ;;  %v5731_v21 = vld [vmem:[%s5617_s18 + $0xdc] sm:$0xff] }
  0x19   : > { %v5685_v16 = vld [vmem:[%s5617_s18 + $0xcc] sm:$0xff]  ;;  %v5722_v19 = vld [vmem:[%s5617_s18 + $0x98] sm:$0xff] }
  0x1b   : > { %319 = vrot.lane.b32.xlu1 %v242_v4, %s5573_s19  ;;  %317 = vrot.lane.b32.xlu0 %v5641_v5, %s5573_s19 }
  0x1f   : > { %323 = vrot.lane.b32.xlu1 %v244_v6, %s5573_s19  ;;  %321 = vrot.lane.b32.xlu0 %v243_v7, %s5573_s19 }
  0x23   : > { %327 = vrot.lane.b32.xlu1 %v5649_v8, %s5573_s19  ;;  %325 = vrot.lane.b32.xlu0 %v245_v9, %s5573_s19 }
  0x27   : > { %331 = vrot.lane.b32.xlu1 %v5658_v10, %s5573_s19  ;;  %329 = vrot.lane.b32.xlu0 %v5661_v11, %s5573_s19 }
  0x2b   : > { %335 = vrot.lane.b32.xlu1 %v5668_v12, %s5573_s19  ;;  %333 = vrot.lane.b32.xlu0 %v5671_v13, %s5573_s19 }
  0x2f   : > { %2509 = vrot.lane.b32.xlu1 %v5678_v14, %s5574_s20  ;;  %337 = vrot.lane.b32.xlu0 %v251_v15, %s5573_s19 }
  0x33   : > { %2527 = vrot.lane.b32.xlu1 %v5685_v16, %s5574_s20  ;;  %2511 = vrot.lane.b32.xlu0 %v5688_v17, %s5574_s20 }
  0x37   : > { %964 = vrot.lane.b32.xlu1 %v5678_v14, %s5575_s21  ;;  %2529 = vrot.lane.b32.xlu0 %v5695_v18, %s5574_s20 }
  0x3b   : > { %982 = vrot.lane.b32.xlu1 %v5685_v16, %s5575_s21  ;;  %966 = vrot.lane.b32.xlu0 %v5688_v17, %s5575_s21 }
  0x3f   : > { %2473 = vrot.lane.b32.xlu1 %v5623_v1, %s5574_s20  ;;  %984 = vrot.lane.b32.xlu0 %v5695_v18, %s5575_s21 }
  0x43   : > { %2491 = vrot.lane.b32.xlu1 %v5649_v8, %s5574_s20  ;;  %2475 = vrot.lane.b32.xlu0 %v5633_v3, %s5574_s20 }
  0x47   : > { %928 = vrot.lane.b32.xlu1 %v5623_v1, %s5575_s21  ;;  %2493 = vrot.lane.b32.xlu0 %v5661_v11, %s5574_s20 }
  0x4b   : > { %946 = vrot.lane.b32.xlu1 %v5649_v8, %s5575_s21  ;;  %930 = vrot.lane.b32.xlu0 %v5633_v3, %s5575_s21 }
  0x4f   : > { %968 = vrot.lane.b32.xlu1 %v5722_v19, %s5575_s21  ;;  %948 = vrot.lane.b32.xlu0 %v5661_v11, %s5575_s21 }
  0x53   : > { %655 = vrot.lane.b32.xlu1 %v5678_v14, %s5577_s22  ;;  %986 = vrot.lane.b32.xlu0 %v5731_v21, %s5575_s21 }
  0x57   : > { %673 = vrot.lane.b32.xlu1 %v5685_v16, %s5577_s22  ;;  %657 = vrot.lane.b32.xlu0 %v5688_v17, %s5577_s22 }
  0x5b   : > { %932 = vrot.lane.b32.xlu1 %v5620_v0, %s5575_s21  ;;  %675 = vrot.lane.b32.xlu0 %v5695_v18, %s5577_s22 }
  0x5f   : > { %619 = vrot.lane.b32.xlu1 %v5623_v1, %s5577_s22  ;;  %950 = vrot.lane.b32.xlu0 %v5658_v10, %s5575_s21 }
  0x63   : > { %637 = vrot.lane.b32.xlu1 %v5649_v8, %s5577_s22  ;;  %621 = vrot.lane.b32.xlu0 %v5633_v3, %s5577_s22 }
  0x67   : > { %659 = vrot.lane.b32.xlu1 %v5722_v19, %s5577_s22  ;;  %639 = vrot.lane.b32.xlu0 %v5661_v11, %s5577_s22 }
  0x6b   : > { %345 = vrot.lane.b32.xlu1 %v5678_v14, %s5573_s19  ;;  %677 = vrot.lane.b32.xlu0 %v5731_v21, %s5577_s22 }
  0x6f   : > { %363 = vrot.lane.b32.xlu1 %v5685_v16, %s5573_s19  ;;  %347 = vrot.lane.b32.xlu0 %v5688_v17, %s5573_s19 }
  0x73   : > { %623 = vrot.lane.b32.xlu1 %v5620_v0, %s5577_s22  ;;  %365 = vrot.lane.b32.xlu0 %v5695_v18, %s5573_s19 }
  0x77   : > { %349 = vrot.lane.b32.xlu1 %v5722_v19, %s5573_s19  ;;  %641 = vrot.lane.b32.xlu0 %v5658_v10, %s5577_s22 }
  0x7b   : > { %2200 = vrot.lane.b32.xlu1 %v5678_v14, %s5578_s23  ;;  %367 = vrot.lane.b32.xlu0 %v5731_v21, %s5573_s19 }
  0x7f   : > { %2218 = vrot.lane.b32.xlu1 %v5685_v16, %s5578_s23  ;;  %2202 = vrot.lane.b32.xlu0 %v5688_v17, %s5578_s23 }
  0x83   : > { %2164 = vrot.lane.b32.xlu1 %v5623_v1, %s5578_s23  ;;  %2220 = vrot.lane.b32.xlu0 %v5695_v18, %s5578_s23 }
  0x85   : > { %v5785_v22 = vpop.permute.xlu1 %313  ;;  %v5787_v23 = vpop.permute.xlu0 %309 }
  0x86   : > { %v8319_v35 = vrot.slane %v5785_v22, 4 }
  0x87   : > { %2182 = vrot.lane.b32.xlu1 %v5649_v8, %s5578_s23  ;;  %2166 = vrot.lane.b32.xlu0 %v5633_v3, %s5578_s23 }
  0x89   : > { %v5793_v24 = vpop.permute.xlu1 %315  ;;  %v5795_v25 = vpop.permute.xlu0 %311 }
  0x8a   : > { %v8309_v32 = vrot.slane %v5793_v24, 4 }
  0x8b   : > { %2204 = vrot.lane.b32.xlu1 %v5722_v19, %s5578_s23  ;;  %2184 = vrot.lane.b32.xlu0 %v5661_v11, %s5578_s23 }
  0x8c   : > { %v423_v38 = vsel %vm417_vm0, %v8319_v35, %v8309_v32 }
  0x8d   : > { %v5801_v26 = vpop.permute.xlu1 %319  ;;  %v5803_v27 = vpop.permute.xlu0 %317  ;;  %v5861_v46 = vsel %vm419_vm1, %v5785_v22, %v423_v38 }
  0x8e   : > { %8439 = vst [vmem:[#allocation3_spill] sm:$0xff] %v5801_v26  ;;  %v8308_v39 = vrot.slane %v5801_v26, 4  ;;  %v8310_v40 = vrot.slane %v5803_v27, 4 }
  0x8f   : > { %1891 = vrot.lane.b32.xlu1 %v5678_v14, %s5579_s24  ;;  %2222 = vrot.lane.b32.xlu0 %v5731_v21, %s5578_s23 }
  0x90   : > { %v427_v48 = vsel %vm417_vm0, %v8310_v40, %v8308_v39 }
  0x91   : > { %v5809_v28 = vpop.permute.xlu1 %323  ;;  %v5811_v29 = vpop.permute.xlu0 %321  ;;  %v5889_v54 = vsel %vm419_vm1, %v5803_v27, %v427_v48 }
  0x92   : > { %8440 = vst [vmem:[#allocation4_spill] sm:$0xff] %v5809_v28  ;;  %8441 = vst [vmem:[#allocation5_spill] sm:$0xff] %v5811_v29 }
  0x93   : > { %1909 = vrot.lane.b32.xlu1 %v5685_v16, %s5579_s24  ;;  %1893 = vrot.lane.b32.xlu0 %v5688_v17, %s5579_s24  ;;  %8444 = vst [vmem:[#allocation8_spill] sm:$0xff] %v5889_v54 }
  0x95   : > { %v5817_v30 = vpop.permute.xlu1 %327  ;;  %v5819_v31 = vpop.permute.xlu0 %325 }
  0x96   : > { %8442 = vst [vmem:[#allocation6_spill] sm:$0xff] %v5819_v31 }
  0x97   : > { %2168 = vrot.lane.b32.xlu1 %v5620_v0, %s5578_s23  ;;  %1911 = vrot.lane.b32.xlu0 %v5695_v18, %s5579_s24 }
  0x99   : > { %v5826_v33 = vpop.permute.xlu1 %331  ;;  %v5828_v34 = vpop.permute.xlu0 %329 }
  0x9a   : > { %v8322_v41 = vrot.slane %v5826_v33, 4 }
  0x9b   : > { %1855 = vrot.lane.b32.xlu1 %v5623_v1, %s5579_s24  ;;  %2186 = vrot.lane.b32.xlu0 %v5658_v10, %s5578_s23 }
  0x9d   : > { %v5835_v36 = vpop.permute.xlu1 %335  ;;  %v5837_v37 = vpop.permute.xlu0 %333 }
  0x9e   : > { %v8311_v42 = vrot.slane %v5837_v37, 4  ;;  %v8312_v49 = vrot.slane %v5835_v36, 4 }
  0x9f   : > { %1873 = vrot.lane.b32.xlu1 %v5649_v8, %s5579_s24  ;;  %1857 = vrot.lane.b32.xlu0 %v5633_v3, %s5579_s24 }
  0xa0   : > { %v439_v43 = vsel %vm417_vm0, %v8322_v41, %v8311_v42 }
  0xa1   : > { %v2510_v44 = vpop.permute.xlu1 %2509  ;;  %v5857_v45 = vpop.permute.xlu0 %337  ;;  %v5865_v47 = vsel %vm419_vm1, %v5826_v33, %v439_v43 }
  0xa2   : > { %8443 = vst [vmem:[#allocation7_spill] sm:$0xff] %v5857_v45  ;;  %v8307_v50 = vrot.slane %v5857_v45, 4  ;;  %v2563_v61 = vrot.slane %v2510_v44, 4 }
  0xa3   : > { %1895 = vrot.lane.b32.xlu1 %v5722_v19, %s5579_s24  ;;  %1875 = vrot.lane.b32.xlu0 %v5661_v11, %s5579_s24 }
  0xa4   : > { %v443_v53 = vsel %vm417_vm0, %v8312_v49, %v8307_v50 }
  0xa5   : > { %v2528_v55 = vpop.permute.xlu1 %2527  ;;  %v5891_v56 = vpop.permute.xlu0 %2511  ;;  %v5895_v57 = vsel %vm419_vm1, %v5835_v36, %v443_v53 }
  0xa6   : > { %8445 = vst [vmem:[#allocation9_spill] sm:$0xff] %v5895_v57  ;;  %v8318_v58 = vrot.slane %v5891_v56, 4  ;;  %v2572_v4 = vrot.slane %v2528_v55, 4 }
  0xa7   : > { %1582 = vrot.lane.b32.xlu1 %v5678_v14, %s5580_s25  ;;  %1913 = vrot.lane.b32.xlu0 %v5731_v21, %s5579_s24 }
  0xa8   : > { %v2614_v7 = vsel %vm417_vm0, %v2563_v61, %v8318_v58 }
  0xa9   : > { %v965_v62 = vpop.permute.xlu1 %964  ;;  %v5906_v63 = vpop.permute.xlu0 %2529  ;;  %v2615_v43 = vsel %vm2582_vm2, %v2510_v44, %v2614_v7 }
  0xaa   : > { %v8317_v6 = vrot.slane %v5906_v63, 4  ;;  %v1018_v50 = vrot.slane %v965_v62, 4 }
  0xab   : > { %1600 = vrot.lane.b32.xlu1 %v5685_v16, %s5580_s25  ;;  %1584 = vrot.lane.b32.xlu0 %v5688_v17, %s5580_s25 }
  0xac   : > { %v2630_v9 = vsel %vm417_vm0, %v2572_v4, %v8317_v6 }
  0xad   : > { %v983_v15 = vpop.permute.xlu1 %982  ;;  %v5919_v38 = vpop.permute.xlu0 %966  ;;  %v2631_v48 = vsel %vm2582_vm2, %v2528_v55, %v2630_v9 }
  0xae   : > { %v1019_v53 = vrot.slane %v5919_v38, 4  ;;  %v5472_v61 = vcombine.high %v2615_v43, %v2631_v48  ;;  %v5471_v59 = vcombine.low %v2615_v43, %v2631_v48  ;;  %v1027_v60 = vrot.slane %v983_v15, 4 }
  0xaf   : > { %1859 = vrot.lane.b32.xlu1 %v5620_v0, %s5579_s24  ;;  %1602 = vrot.lane.b32.xlu0 %v5695_v18, %s5580_s25 }
  0xb0   : > { %4513 = vmatprep.subr.bf16.mxu1 %v5472_v61  ;;  %v1069_v55 = vsel %vm417_vm0, %v1018_v50, %v1019_v53 }
  0xb1   : > { %v2474_v4 = vpop.permute.xlu1 %2473  ;;  %4514 = vmatpush1.bf16.msra.mxu1 %v5471_v59  ;;  %v5928_v39 = vpop.permute.xlu0 %984  ;;  %v1070_v43 = vsel %vm1037_vm3, %v965_v62, %v1069_v55 }
  0xb2   : > { %v1028_v44 = vrot.slane %v5928_v39, 4  ;;  %v2545_v32 = vrot.slane %v2474_v4, 4 }
  0xb3   : > { %1546 = vrot.lane.b32.xlu1 %v5623_v1, %s5580_s25  ;;  %1877 = vrot.lane.b32.xlu0 %v5658_v10, %s5579_s24 }
  0xb4   : > { %v1085_v59 = vsel %vm417_vm0, %v1027_v60, %v1028_v44 }
  0xb5   : > { %v2492_v7 = vpop.permute.xlu1 %2491  ;;  %v5941_v9 = vpop.permute.xlu0 %2475  ;;  %v1086_v48 = vsel %vm1037_vm3, %v983_v15, %v1085_v59 }
  0xb6   : > { %v8314_v61 = vrot.slane %v5941_v9, 4  ;;  %v5312_v50 = vcombine.high %v1070_v43, %v1086_v48  ;;  %v5311_v51 = vcombine.low %v1070_v43, %v1086_v48  ;;  %v2554_v52 = vrot.slane %v2492_v7, 4 }
  0xb7   : > { %1564 = vrot.lane.b32.xlu1 %v5649_v8, %s5580_s25  ;;  %1548 = vrot.lane.b32.xlu0 %v5633_v3, %s5580_s25 }
  0xb8   : > { %4460 = vmatprep.subr.bf16.mxu0 %v5312_v50  ;;  %v2581_v15 = vsel %vm417_vm0, %v2545_v32, %v8314_v61 }
  0xb9   : > { %v929_v60 = vpop.permute.xlu1 %928  ;;  %4461 = vmatpush1.bf16.msra.mxu0 %v5311_v51  ;;  %v5950_v40 = vpop.permute.xlu0 %2493  ;;  %v2583_v43 = vsel %vm2582_vm2, %v2474_v4, %v2581_v15 }
  0xba   : > { %v8313_v62 = vrot.slane %v5950_v40, 4  ;;  %v1000_v49 = vrot.slane %v929_v60, 4 }
  0xbb   : > { %1586 = vrot.lane.b32.xlu1 %v5722_v19, %s5580_s25  ;;  %1566 = vrot.lane.b32.xlu0 %v5661_v11, %s5580_s25 }
  0xbc   : > { %v2598_v55 = vsel %vm417_vm0, %v2554_v52, %v8313_v62  ;;  %v5516_v52 = vld [vmem:[%s8304_s1 + $0x8] ss:$0 sps:$4 sm:$0xff]  }
  0xbd   : > { %v947_v51 = vpop.permute.xlu1 %946  ;;  %v5963_v59 = vpop.permute.xlu0 %930  ;;  %v2599_v48 = vsel %vm2582_vm2, %v2492_v7, %v2598_v55 }
  0xbe   : > { %v1001_v50 = vrot.slane %v5963_v59, 4  ;;  %v5456_v32 = vcombine.high %v2583_v43, %v2599_v48  ;;  %v5455_v42 = vcombine.low %v2583_v43, %v2599_v48  ;;  %v1009_v15 = vrot.slane %v947_v51, 4 }
  0xbf   : > { %1273 = vrot.lane.b32.xlu1 %v5678_v14, %s5581_s26  ;;  %1604 = vrot.lane.b32.xlu0 %v5731_v21, %s5580_s25 }
  0xc0   : > { %4515 = vmatprep.subr.bf16.mxu1 %v5456_v32  ;;  %v1036_v48 = vsel %vm417_vm0, %v1000_v49, %v1001_v50 }
  0xc1   : > { %v5975_v4 = vpop.permute.xlu1 %968  ;;  %4516 = vmatpush1.bf16.msra.mxu1 %v5455_v42  ;;  %v5977_v7 = vpop.permute.xlu0 %948  ;;  %v1038_v61 = vsel %vm1037_vm3, %v929_v60, %v1036_v48 }
  0xc2   : > { %v8321_v55 = vrot.slane %v5975_v4, 4  ;;  %v1010_v43 = vrot.slane %v5977_v7, 4 }
  0xc3   : > { %1291 = vrot.lane.b32.xlu1 %v5685_v16, %s5581_s26  ;;  %1275 = vrot.lane.b32.xlu0 %v5688_v17, %s5581_s26 }
  0xc4   : > { %v1053_v42 = vsel %vm417_vm0, %v1009_v15, %v1010_v43  ;;  %5487 = vmatmul.mubr.msk.bf16.vlgmr.msra.gmra.mxu1 %vm4456_vm4, %v5516_v52  ;;  %v1071_v35 = vsel %vm417_vm0, %v1019_v53, %v8321_v55 }
  0xc5   : > { %v656_v32 = vpop.permute.xlu1 %655  ;;  %v5990_v62 = vpop.permute.xlu0 %986  ;;  %v1054_v20 = vsel %vm1037_vm3, %v947_v51, %v1053_v42  ;;  %v1072_v53 = vsel %vm1037_vm3, %v5919_v38, %v1071_v35 }
  0xc6   : > { %v8320_v6 = vrot.slane %v5990_v62, 4  ;;  %v5296_v49 = vcombine.high %v1038_v61, %v1054_v20  ;;  %v5295_v58 = vcombine.low %v1038_v61, %v1054_v20 }
  0xc7   : > { %1550 = vrot.lane.b32.xlu1 %v5620_v0, %s5580_s25  ;;  %1293 = vrot.lane.b32.xlu0 %v5695_v18, %s5581_s26 }
  0xc8   : > { %4462 = vmatprep.subr.bf16.mxu0 %v5296_v49  ;;  %v1087_v60 = vsel %vm417_vm0, %v1028_v44, %v8320_v6  ;;  %v709_v44 = vrot.slane %v656_v32, 4 }
  0xc9   : > { %v674_v20 = vpop.permute.xlu1 %673  ;;  %4463 = vmatpush1.bf16.msra.mxu0 %v5295_v58  ;;  %v6009_v61 = vpop.permute.xlu0 %657  ;;  %v1088_v51 = vsel %vm1037_vm3, %v5928_v39, %v1087_v60 }
  0xca   : > { %v710_v52 = vrot.slane %v6009_v61, 4  ;;  %v5313_v15 = vcombine.low %v1072_v53, %v1088_v51  ;;  %v5314_v48 = vcombine.high %v1072_v53, %v1088_v51  ;;  %v718_v35 = vrot.slane %v674_v20, 4 }
  0xcb   : > { %1237 = vrot.lane.b32.xlu1 %v5623_v1, %s5581_s26  ;;  %1568 = vrot.lane.b32.xlu0 %v5658_v10, %s5580_s25 }
  0xcc   : > { %4542 = vmatprep.subr.bf16.mxu1 %v5314_v48  ;;  %v760_v49 = vsel %vm417_vm0, %v709_v44, %v710_v52 }
  0xcd   : > { %v6020_v58 = vpop.permute.xlu1 %932  ;;  %4543 = vmatpush1.bf16.msra.mxu1 %v5313_v15  ;;  %v6022_v42 = vpop.permute.xlu0 %675  ;;  %v761_v15 = vsel %vm728_vm5, %v656_v32, %v760_v49 }
  0xce   : > { %v8324_v39 = vrot.slane %v6020_v58, 4  ;;  %v719_v38 = vrot.slane %v6022_v42, 4 }
  0xcf   : > { %1255 = vrot.lane.b32.xlu1 %v5649_v8, %s5581_s26  ;;  %1239 = vrot.lane.b32.xlu0 %v5633_v3, %s5581_s26  ;;  %v6047_v3 = vld [vmem:[%s8304_s1] sm:$0xff] }
  0xd0   : > { %v776_v60 = vsel %vm417_vm0, %v718_v35, %v719_v38  ;;  %v1039_v44 = vsel %vm417_vm0, %v1001_v50, %v8324_v39  ;;  %v6055_v32 = vcombine.high %v6047_v3, %v6047_v3 }
  0xd1   : > { %v620_v53 = vpop.permute.xlu1 %619  ;;  %v6034_v51 = vpop.permute.xlu0 %950  ;;  %v777_v48 = vsel %vm728_vm5, %v674_v20, %v776_v60  ;;  %v1040_v49 = vsel %vm1037_vm3, %v5963_v59, %v1039_v44 }
  0xd2   : > { %v8323_v6 = vrot.slane %v6034_v51, 4  ;;  %v5280_v55 = vcombine.high %v761_v15, %v777_v48  ;;  %v5279_v41 = vcombine.low %v761_v15, %v777_v48  ;;  %8446 = vst [vmem:[#allocation10_spill] sm:$0xff] %v6055_v32  ;;  %4492 = vmatprep.mubr.bf16.mxu0 %v6055_v32  ;;  %4574 = vmatprep.mubr.bf16.mxu1 %v6055_v32 }
  0xd3   : > { %1277 = vrot.lane.b32.xlu1 %v5722_v19, %s5581_s26  ;;  %1257 = vrot.lane.b32.xlu0 %v5661_v11, %s5581_s26 }
  0xd4   : > { %4464 = vmatprep.subr.bf16.mxu0 %v5280_v55  ;;  %v1055_v50 = vsel %vm417_vm0, %v1010_v43, %v8323_v6 }
  0xd5   : > { %v638_v20 = vpop.permute.xlu1 %637  ;;  %4465 = vmatpush1.bf16.msra.mxu0 %v5279_v41  ;;  %v6060_v35 = vpop.permute.xlu0 %621  ;;  %v1056_v60 = vsel %vm1037_vm3, %v5977_v7, %v1055_v50  ;;  %v691_v41 = vrot.slane %v620_v53, 4 }
  0xd6   : > { %v8328_v11 = vrot.slane %v6060_v35, 4  ;;  %v5297_v15 = vcombine.low %v1040_v49, %v1056_v60  ;;  %v5298_v55 = vcombine.high %v1040_v49, %v1056_v60  ;;  %v700_v43 = vrot.slane %v638_v20, 4 }
  0xd7   : > { %2513 = vrot.lane.b32.xlu1 %v5722_v19, %s5574_s20  ;;  %1295 = vrot.lane.b32.xlu0 %v5731_v21, %s5581_s26  ;;  %v8448_v45 = vrot.slane %v6060_v35, 4 }
  0xd8   : > { %4544 = vmatprep.subr.bf16.mxu1 %v5298_v55  ;;  %v727_v19 = vsel %vm417_vm0, %v691_v41, %v8328_v11 }
  0xd9   : > { %v6073_v59 = vpop.permute.xlu1 %659  ;;  %4545 = vmatpush1.bf16.msra.mxu1 %v5297_v15  ;;  %v6075_v7 = vpop.permute.xlu0 %639  ;;  %v729_v15 = vsel %vm728_vm5, %v620_v53, %v727_v19  ;;  %v6104_v53 = vld [vmem:[%s5617_s18 + $0xa0] sm:$0xff] }
  0xda   : > { %v8325_v48 = vrot.slane %v6073_v59, 4  ;;  %v8327_v44 = vrot.slane %v6075_v7, 4 }
  0xdb   : > { %1241 = vrot.lane.b32.xlu1 %v5620_v0, %s5581_s26  ;;  %2531 = vrot.lane.b32.xlu0 %v5731_v21, %s5574_s20 }
  0xdc   : > { %v744_v50 = vsel %vm417_vm0, %v700_v43, %v8327_v44  ;;  %v762_v21 = vsel %vm417_vm0, %v710_v52, %v8325_v48  ;;  %v391_v43 = vrot.slane %v5828_v34, 4  ;;  %v390_v48 = vrot.slane %v5817_v30, 4 }
  0xdd   : > { %v346_v49 = vpop.permute.xlu1 %345  ;;  %v6089_v60 = vpop.permute.xlu0 %677  ;;  %v745_v55 = vsel %vm728_vm5, %v638_v20, %v744_v50 }
  0xde   : > { %v8326_v6 = vrot.slane %v6089_v60, 4  ;;  %v5264_v41 = vcombine.high %v729_v15, %v745_v55  ;;  %v5263_v39 = vcombine.low %v729_v15, %v745_v55 }
  0xdf   : > { %2477 = vrot.lane.b32.xlu1 %v5620_v0, %s5574_s20  ;;  %1259 = vrot.lane.b32.xlu0 %v5658_v10, %s5581_s26  ;;  %v763_v0 = vsel %vm728_vm5, %v6009_v61, %v762_v21  ;;  %v6124_v61 = vld [vmem:[%s5617_s18 + $0xe4] sm:$0xff] }
  0xe0   : > { %4466 = vmatprep.subr.bf16.mxu0 %v5264_v41  ;;  %v778_v20 = vsel %vm417_vm0, %v719_v38, %v8326_v6  ;;  %v399_v38 = vrot.slane %v346_v49, 4 }
  0xe1   : > { %v364_v19 = vpop.permute.xlu1 %363  ;;  %4467 = vmatpush1.bf16.msra.mxu0 %v5263_v39  ;;  %v6110_v50 = vpop.permute.xlu0 %347  ;;  %v779_v52 = vsel %vm728_vm5, %v6022_v42, %v778_v20  ;;  %v382_v39 = vrot.slane %v5795_v25, 4  ;;  %v381_v42 = vrot.slane %v5787_v23, 4 }
  0xe2   : > { %v400_v15 = vrot.slane %v6110_v50, 4  ;;  %v5281_v55 = vcombine.low %v763_v0, %v779_v52  ;;  %v5282_v41 = vcombine.high %v763_v0, %v779_v52  ;;  %v435_v0 = vsel %vm417_vm0, %v390_v48, %v391_v43 }
  0xe3   : > { %2515 = vrot.lane.b32.xlu1 %v6104_v53, %s5574_s20  ;;  %2495 = vrot.lane.b32.xlu0 %v5658_v10, %s5574_s20  ;;  %v408_v52 = vrot.slane %v364_v19, 4  ;;  %v418_v11 = vsel %vm417_vm0, %v381_v42, %v382_v39 }
  0xe4   : > { %4546 = vmatprep.subr.bf16.mxu1 %v5282_v41  ;;  %v451_v10 = vsel %vm417_vm0, %v399_v38, %v400_v15  ;;  %v436_v38 = vsel %vm419_vm1, %v5817_v30, %v435_v0  ;;  %v420_v30 = vsel %vm419_vm1, %v5787_v23, %v418_v11  ;;  %v5216_v11 = vcombine.high %v5678_v14, %v5685_v16 }
  0xe5   : > { %v6127_v21 = vpop.permute.xlu1 %623  ;;  %4547 = vmatpush1.bf16.msra.mxu1 %v5281_v55  ;;  %v366_v20 = vpop.permute.xlu0 %365  ;;  %v452_v48 = vsel %vm419_vm1, %v346_v49, %v451_v10  ;;  %v5232_v49 = vcombine.high %v420_v30, %v436_v38 }
  0xe6   : > { %v409_v44 = vrot.slane %v366_v20, 4  ;;  %v8447_v28 = vrot.slane %v6127_v21, 4 }
  0xe7   : > { %970 = vrot.lane.b32.xlu1 %v6104_v53, %s5575_s21  ;;  %2533 = vrot.lane.b32.xlu0 %v6124_v61, %s5574_s20 }
  0xe8   : > { %v467_v41 = vsel %vm417_vm0, %v408_v52, %v409_v44  ;;  %v730_v26 = vsel %vm417_vm0, %v8448_v45, %v8447_v28  ;;  %v8449_v28 = vrot.slane %v6075_v7, 4 }
  0xe9   : > { %v6138_v55 = vpop.permute.xlu1 %349  ;;  %v6140_v31 = vpop.permute.xlu0 %641  ;;  %v468_v6 = vsel %vm419_vm1, %v364_v19, %v467_v41  ;;  %v8450_v19 = vrot.slane %v5826_v33, 4  ;;  %v731_v23 = vsel %vm728_vm5, %v6060_v35, %v730_v26  ;;  %v5231_v26 = vcombine.low %v420_v30, %v436_v38 }
  0xea   : > { %v8349_v52 = vrot.slane %v6138_v55, 4  ;;  %v8350_v42 = vrot.slane %v6140_v31, 4  ;;  %v5248_v57 = vcombine.high %v452_v48, %v468_v6  ;;  %v5247_v54 = vcombine.low %v452_v48, %v468_v6 }
  0xeb   : > { %2479 = vrot.lane.b32.xlu1 %v5630_v2, %s5574_s20  ;;  %988 = vrot.lane.b32.xlu0 %v6124_v61, %s5575_s21  ;;  %v437_v6 = vsel %vm417_vm0, %v391_v43, %v8450_v19  ;;  %v8451_v35 = vrot.slane %v5785_v22, 4  ;;  %v6187_v43 = vld [vmem:[%s5617_s18 + $0xa8] sm:$0xff] }
  0xec   : > { %4468 = vmatprep.subr.bf16.mxu0 %v5248_v57  ;;  %v746_v45 = vsel %vm417_vm0, %v8449_v28, %v8350_v42 }
  0xed   : > { %v2201_v0 = vpop.permute.xlu1 %2200  ;;  %4469 = vmatpush1.bf16.msra.mxu0 %v5247_v54  ;;  %v6167_v10 = vpop.permute.xlu0 %367  ;;  %v747_v57 = vsel %vm728_vm5, %v6075_v7, %v746_v45  ;;  %v453_v54 = vsel %vm417_vm0, %v400_v15, %v8349_v52  ;;  %v421_v7 = vsel %vm417_vm0, %v382_v39, %v8451_v35  ;;  %v5215_v15 = vcombine.low %v5678_v14, %v5685_v16 }
  0xee   : > { %v8346_v41 = vrot.slane %v6167_v10, 4  ;;  %4470 = vmatprep.subr.bf16.mxu0 %v5232_v49  ;;  %v5265_v33 = vcombine.low %v731_v23, %v747_v57  ;;  %v5266_v48 = vcombine.high %v731_v23, %v747_v57  ;;  %v454_v39 = vsel %vm419_vm1, %v6110_v50, %v453_v54 }
  0xef   : > { %934 = vrot.lane.b32.xlu1 %v5630_v2, %s5575_s21  ;;  %2497 = vrot.lane.b32.xlu0 %v5671_v13, %s5574_s20  ;;  %v438_v2 = vsel %vm419_vm1, %v5828_v34, %v437_v6  ;;  %v5200_v14 = vcombine.high %v5623_v1, %v5649_v8  ;;  %v422_v16 = vsel %vm419_vm1, %v5795_v25, %v421_v7  ;;  %v2254_v34 = vrot.slane %v2201_v0, 4 }
  0xf0   : > { %4548 = vmatprep.subr.bf16.mxu1 %v5266_v48  ;;  %v469_v49 = vsel %vm417_vm0, %v409_v44, %v8346_v41  ;;  %v5234_v50 = vcombine.high %v422_v16, %v438_v2  ;;  %v5199_v23 = vcombine.low %v5623_v1, %v5649_v8  ;;  %v5233_v48 = vcombine.low %v422_v16, %v438_v2 }
  0xf1   : > { %v2219_v28 = vpop.permute.xlu1 %2218  ;;  %4471 = vmatpush1.bf16.msra.mxu0 %v5231_v26  ;;  %4549 = vmatpush1.bf16.msra.mxu1 %v5265_v33  ;;  %v6196_v22 = vpop.permute.xlu0 %2202  ;;  %v470_v38 = vsel %vm419_vm1, %v366_v20, %v469_v49  ;;  %v6211_v20 = vld [vmem:[%s5617_s18 + $0xec] sm:$0xff]  ;;  %v5218_v33 = vcombine.high %v5688_v17, %v5695_v18  ;;  %v5217_v7 = vcombine.low %v5688_v17, %v5695_v18 }
  0xf2   : > { %v2255_v30 = vrot.slane %v6196_v22, 4  ;;  %4472 = vmatprep.subr.bf16.mxu0 %v5216_v11  ;;  %v5249_v44 = vcombine.low %v454_v39, %v470_v38  ;;  %v5250_v45 = vcombine.high %v454_v39, %v470_v38  ;;  %v2263_v25 = vrot.slane %v2219_v28, 4  ;;  %v5525_v39 = vld [vmem:[%s5617_s18 + $0xc] ss:$68 sps:$4 sm:$0xff]  }
  0xf3   : > { %972 = vrot.lane.b32.xlu1 %v6187_v43, %s5575_s21  ;;  %952 = vrot.lane.b32.xlu0 %v5671_v13, %s5575_s21  ;;  %v5523_v17 = vld [vmem:[%s5617_s18 + $0x8] ss:$68 sps:$4 sm:$0xff]  }
  0xf4   : > { %4550 = vmatprep.subr.bf16.mxu1 %v5250_v45  ;;  %v2305_v11 = vsel %vm417_vm0, %v2254_v34, %v2255_v30 }
  0xf5   : > { %v2165_v19 = vpop.permute.xlu1 %2164  ;;  %4551 = vmatpush1.bf16.msra.mxu1 %v5249_v44  ;;  %v2221_v6 = vpop.permute.xlu0 %2220  ;;  %4473 = vmatpush1.bf16.msra.mxu0 %v5215_v15  ;;  %v2306_v26 = vsel %vm2273_vm6, %v2201_v0, %v2305_v11  ;;  %v6238_v0 = vld [vmem:[%s5617_s18 + $0x18] sm:$0xff] }
  0xf6   : > { %v2264_v57 = vrot.slane %v2221_v6, 4  ;;  %4552 = vmatprep.subr.bf16.mxu1 %v5234_v50  ;;  %4474 = vmatprep.subr.bf16.mxu0 %v5200_v14  ;;  %v2236_v38 = vrot.slane %v2165_v19, 4 }
  0xf7   : > { %661 = vrot.lane.b32.xlu1 %v6104_v53, %s5577_s22  ;;  %990 = vrot.lane.b32.xlu0 %v6211_v20, %s5575_s21 }
  0xf8   : > { %v2321_v1 = vsel %vm417_vm0, %v2263_v25, %v2264_v57 }
  0xf9   : > { %v2183_v8 = vpop.permute.xlu1 %2182  ;;  %4553 = vmatpush1.bf16.msra.mxu1 %v5233_v48  ;;  %v6225_v54 = vpop.permute.xlu0 %2166  ;;  %4475 = vmatpush1.bf16.msra.mxu0 %v5199_v23  ;;  %v2322_v35 = vsel %vm2273_vm6, %v2219_v28, %v2321_v1 }
  0xfa   : > { %v2237_v49 = vrot.slane %v6225_v54, 4  ;;  %v5440_v15 = vcombine.high %v2306_v26, %v2322_v35  ;;  %v5439_v2 = vcombine.low %v2306_v26, %v2322_v35  ;;  %4554 = vmatprep.subr.bf16.mxu1 %v5218_v33  ;;  %v2245_v18 = vrot.slane %v2183_v8, 4 }
  0xfb   : > { %936 = vrot.lane.b32.xlu1 %v5641_v5, %s5575_s21  ;;  %679 = vrot.lane.b32.xlu0 %v6124_v61, %s5577_s22 }
  0xfc   : > { %4476 = vmatprep.subr.bf16.mxu0 %v5440_v15  ;;  %v2272_v5 = vsel %vm417_vm0, %v2236_v38, %v2237_v49 }
  0xfd   : > { %v6240_v28 = vpop.permute.xlu1 %2204  ;;  %v6242_v44 = vpop.permute.xlu0 %2184  ;;  %4477 = vmatpush2.bf16.msra.mxu0 %v5439_v2  ;;  %4555 = vmatpush1.bf16.msra.mxu1 %v5217_v7  ;;  %v2274_v23 = vsel %vm2273_vm6, %v2165_v19, %v2272_v5 }
  0xfe   : > { %v8345_v45 = vrot.slane %v6240_v28, 4  ;;  %v2246_v14 = vrot.slane %v6242_v44, 4  ;;  %4556 = vmatprep.subr.bf16.mxu1 %v5525_v39 }
  0xff   : > { %625 = vrot.lane.b32.xlu1 %v6238_v0, %s5577_s22  ;;  %954 = vrot.lane.b32.xlu0 %v5668_v12, %s5575_s21 }
 0x100   : > { %v2289_v16 = vsel %vm417_vm0, %v2245_v18, %v2246_v14  ;;  %v2307_v12 = vsel %vm417_vm0, %v2255_v30, %v8345_v45  ;;  %v6299_v18 = vld [vmem:[%s5617_s18 + $0x64] sm:$0xff] }
 0x101   : > { %v1892_v34 = vpop.permute.xlu1 %1891  ;;  %v6255_v50 = vpop.permute.xlu0 %2222  ;;  %v2290_v25 = vsel %vm2273_vm6, %v2183_v8, %v2289_v16  ;;  %4557 = vmatpush1.bf16.msra.mxu1 %v5523_v17  ;;  %v2308_v26 = vsel %vm2273_vm6, %v6196_v22, %v2307_v12 }
 0x102   : > { %v8342_v11 = vrot.slane %v6255_v50, 4  ;;  %v5424_v33 = vcombine.high %v2274_v23, %v2290_v25  ;;  %v5423_v48 = vcombine.low %v2274_v23, %v2290_v25 }
 0x103   : > { %663 = vrot.lane.b32.xlu1 %v6187_v43, %s5577_s22  ;;  %643 = vrot.lane.b32.xlu0 %v5671_v13, %s5577_s22  ;;  %v1945_v13 = vrot.slane %v1892_v34, 4 }
 0x104   : > { %4478 = vmatprep.subr.bf16.mxu0 %v5424_v33  ;;  %v2323_v19 = vsel %vm417_vm0, %v2264_v57, %v8342_v11  ;;  %v6283_v57 = vld [vmem:[%s5617_s18 + $0x20] sm:$0xff] }
 0x105   : > { %v1910_v1 = vpop.permute.xlu1 %1909  ;;  %v6272_v8 = vpop.permute.xlu0 %1893  ;;  %4479 = vmatpush2.bf16.msra.mxu0 %v5423_v48  ;;  %v2324_v30 = vsel %vm2273_vm6, %v2221_v6, %v2323_v19 }
 0x106   : > { %v1946_v35 = vrot.slane %v6272_v8, 4  ;;  %v5441_v7 = vcombine.low %v2308_v26, %v2324_v30  ;;  %v5442_v15 = vcombine.high %v2308_v26, %v2324_v30  ;;  %v1954_v6 = vrot.slane %v1910_v1, 4 }
 0x107   : > { %351 = vrot.lane.b32.xlu1 %v6104_v53, %s5573_s19  ;;  %681 = vrot.lane.b32.xlu0 %v6211_v20, %s5577_s22 }
 0x108   : > { %4558 = vmatprep.subr.bf16.mxu1 %v5442_v15  ;;  %v1996_v17 = vsel %vm417_vm0, %v1945_v13, %v1946_v35 }
 0x109   : > { %v6285_v2 = vpop.permute.xlu1 %2168  ;;  %v6287_v22 = vpop.permute.xlu0 %1911  ;;  %4559 = vmatpush2.bf16.msra.mxu1 %v5441_v7  ;;  %v1997_v25 = vsel %vm1964_vm7, %v1892_v34, %v1996_v17 }
 0x10a   : > { %v8341_v39 = vrot.slane %v6285_v2, 4  ;;  %v1955_v38 = vrot.slane %v6287_v22, 4 }
 0x10b   : > { %627 = vrot.lane.b32.xlu1 %v6283_v57, %s5577_s22  ;;  %369 = vrot.lane.b32.xlu0 %v6124_v61, %s5573_s19 }
 0x10c   : > { %v2012_v5 = vsel %vm417_vm0, %v1954_v6, %v1955_v38  ;;  %v2275_v26 = vsel %vm417_vm0, %v2237_v49, %v8341_v39 }
 0x10d   : > { %v1856_v16 = vpop.permute.xlu1 %1855  ;;  %v6302_v23 = vpop.permute.xlu0 %2186  ;;  %v2013_v33 = vsel %vm1964_vm7, %v1910_v1, %v2012_v5  ;;  %v2276_v7 = vsel %vm2273_vm6, %v6225_v54, %v2275_v26 }
 0x10e   : > { %v8338_v48 = vrot.slane %v6302_v23, 4  ;;  %v5408_v12 = vcombine.high %v1997_v25, %v2013_v33  ;;  %v5407_v19 = vcombine.low %v1997_v25, %v2013_v33 }
 0x10f   : > { %353 = vrot.lane.b32.xlu1 %v6187_v43, %s5573_s19  ;;  %645 = vrot.lane.b32.xlu0 %v6299_v18, %s5577_s22 }
 0x110   : > { %4480 = vmatprep.subr.bf16.mxu0 %v5408_v12  ;;  %v2291_v34 = vsel %vm417_vm0, %v2246_v14, %v8338_v48  ;;  %v1927_v14 = vrot.slane %v1856_v16, 4  ;;  %v6339_v12 = vld [vmem:[%s5617_s18 + $0x5c] sm:$0xff] }
 0x111   : > { %v1874_v1 = vpop.permute.xlu1 %1873  ;;  %v6319_v30 = vpop.permute.xlu0 %1857  ;;  %4481 = vmatpush2.bf16.msra.mxu0 %v5407_v19  ;;  %v2292_v49 = vsel %vm2273_vm6, %v6242_v44, %v2291_v34 }
 0x112   : > { %v1928_v15 = vrot.slane %v6319_v30, 4  ;;  %v5425_v13 = vcombine.low %v2276_v7, %v2292_v49  ;;  %v5426_v6 = vcombine.high %v2276_v7, %v2292_v49  ;;  %v1936_v54 = vrot.slane %v1874_v1, 4 }
 0x113   : > { %2206 = vrot.lane.b32.xlu1 %v6104_v53, %s5578_s23  ;;  %371 = vrot.lane.b32.xlu0 %v6211_v20, %s5573_s19 }
 0x114   : > { %4560 = vmatprep.subr.bf16.mxu1 %v5426_v6  ;;  %v1963_v33 = vsel %vm417_vm0, %v1927_v14, %v1928_v15 }
 0x115   : > { %v6330_v17 = vpop.permute.xlu1 %1895  ;;  %v1876_v5 = vpop.permute.xlu0 %1875  ;;  %4561 = vmatpush2.bf16.msra.mxu1 %v5425_v13  ;;  %v1965_v7 = vsel %vm1964_vm7, %v1856_v16, %v1963_v33 }
 0x116   : > { %v8340_v44 = vrot.slane %v6330_v17, 4  ;;  %v1937_v25 = vrot.slane %v1876_v5, 4 }
 0x117   : > { %2170 = vrot.lane.b32.xlu1 %v6238_v0, %s5578_s23  ;;  %2224 = vrot.lane.b32.xlu0 %v6124_v61, %s5578_s23 }
 0x118   : > { %v1980_v19 = vsel %vm417_vm0, %v1936_v54, %v1937_v25  ;;  %v1998_v48 = vsel %vm417_vm0, %v1946_v35, %v8340_v44 }
 0x119   : > { %v1583_v26 = vpop.permute.xlu1 %1582  ;;  %v6342_v34 = vpop.permute.xlu0 %1913  ;;  %v1981_v49 = vsel %vm1964_vm7, %v1874_v1, %v1980_v19  ;;  %v1999_v33 = vsel %vm1964_vm7, %v6272_v8, %v1998_v48 }
 0x11a   : > { %v8339_v13 = vrot.slane %v6342_v34, 4  ;;  %v5392_v6 = vcombine.high %v1965_v7, %v1981_v49  ;;  %v5391_v14 = vcombine.low %v1965_v7, %v1981_v49 }
 0x11b   : > { %2208 = vrot.lane.b32.xlu1 %v6187_v43, %s5578_s23  ;;  %2188 = vrot.lane.b32.xlu0 %v6339_v12, %s5578_s23 }
 0x11c   : > { %4482 = vmatprep.subr.bf16.mxu0 %v5392_v6  ;;  %v2014_v16 = vsel %vm417_vm0, %v1955_v38, %v8339_v13  ;;  %v1636_v38 = vrot.slane %v1583_v26, 4 }
 0x11d   : > { %v1601_v1 = vpop.permute.xlu1 %1600  ;;  %v6359_v54 = vpop.permute.xlu0 %1584  ;;  %4483 = vmatpush2.bf16.msra.mxu0 %v5391_v14  ;;  %v2015_v35 = vsel %vm1964_vm7, %v6287_v22, %v2014_v16 }
 0x11e   : > { %v1637_v19 = vrot.slane %v6359_v54, 4  ;;  %v5409_v7 = vcombine.low %v1999_v33, %v2015_v35  ;;  %v5410_v49 = vcombine.high %v1999_v33, %v2015_v35  ;;  %v1645_v8 = vrot.slane %v1601_v1, 4 }
 0x11f   : > { %1897 = vrot.lane.b32.xlu1 %v6104_v53, %s5579_s24  ;;  %2226 = vrot.lane.b32.xlu0 %v6211_v20, %s5578_s23 }
 0x120   : > { %4562 = vmatprep.subr.bf16.mxu1 %v5410_v49  ;;  %v1687_v16 = vsel %vm417_vm0, %v1636_v38, %v1637_v19 }
 0x121   : > { %v6370_v6 = vpop.permute.xlu1 %1859  ;;  %v1603_v14 = vpop.permute.xlu0 %1602  ;;  %4563 = vmatpush2.bf16.msra.mxu1 %v5409_v7  ;;  %v1688_v7 = vsel %vm1655_vm8, %v1583_v26, %v1687_v16 }
 0x122   : > { %v8344_v22 = vrot.slane %v6370_v6, 4  ;;  %v1646_v48 = vrot.slane %v1603_v14, 4 }
 0x123   : > { %2172 = vrot.lane.b32.xlu1 %v6283_v57, %s5578_s23  ;;  %1915 = vrot.lane.b32.xlu0 %v6124_v61, %s5579_s24 }
 0x124   : > { %v1703_v33 = vsel %vm417_vm0, %v1645_v8, %v1646_v48  ;;  %v1966_v38 = vsel %vm417_vm0, %v1928_v15, %v8344_v22 }
 0x125   : > { %v1547_v35 = vpop.permute.xlu1 %1546  ;;  %v6379_v49 = vpop.permute.xlu0 %1877  ;;  %v1704_v13 = vsel %vm1655_vm8, %v1601_v1, %v1703_v33 }
 0x126   : > { %v8343_v44 = vrot.slane %v6379_v49, 4  ;;  %v5376_v39 = vcombine.high %v1688_v7, %v1704_v13  ;;  %v5375_v11 = vcombine.low %v1688_v7, %v1704_v13  ;;  %v1967_v13 = vsel %vm1964_vm7, %v6319_v30, %v1966_v38 }
 0x127   : > { %1861 = vrot.lane.b32.xlu1 %v6238_v0, %s5579_s24  ;;  %2190 = vrot.lane.b32.xlu0 %v6299_v18, %s5578_s23 }
 0x128   : > { %4484 = vmatprep.subr.bf16.mxu0 %v5376_v39  ;;  %v1982_v26 = vsel %vm417_vm0, %v1937_v25, %v8343_v44  ;;  %v1618_v39 = vrot.slane %v1547_v35, 4 }
 0x129   : > { %v1565_v1 = vpop.permute.xlu1 %1564  ;;  %v6394_v8 = vpop.permute.xlu0 %1548  ;;  %4485 = vmatpush2.bf16.msra.mxu0 %v5375_v11  ;;  %v1983_v15 = vsel %vm1964_vm7, %v1876_v5, %v1982_v26 }
 0x12a   : > { %v1619_v16 = vrot.slane %v6394_v8, 4  ;;  %v5393_v33 = vcombine.low %v1967_v13, %v1983_v15  ;;  %v5394_v7 = vcombine.high %v1967_v13, %v1983_v15  ;;  %v1627_v44 = vrot.slane %v1565_v1, 4 }
 0x12b   : > { %1899 = vrot.lane.b32.xlu1 %v6187_v43, %s5579_s24  ;;  %1879 = vrot.lane.b32.xlu0 %v6339_v12, %s5579_s24 }
 0x12c   : > { %4564 = vmatprep.subr.bf16.mxu1 %v5394_v7  ;;  %v1654_v38 = vsel %vm417_vm0, %v1618_v39, %v1619_v16 }
 0x12d   : > { %v6404_v25 = vpop.permute.xlu1 %1586  ;;  %v1567_v11 = vpop.permute.xlu0 %1566  ;;  %4565 = vmatpush2.bf16.msra.mxu1 %v5393_v33  ;;  %v1656_v7 = vsel %vm1655_vm8, %v1547_v35, %v1654_v38 }
 0x12e   : > { %v8348_v30 = vrot.slane %v6404_v25, 4  ;;  %v1628_v5 = vrot.slane %v1567_v11, 4 }
 0x12f   : > { %1588 = vrot.lane.b32.xlu1 %v6104_v53, %s5580_s25  ;;  %1917 = vrot.lane.b32.xlu0 %v6211_v20, %s5579_s24 }
 0x130   : > { %v1671_v26 = vsel %vm417_vm0, %v1627_v44, %v1628_v5  ;;  %v1689_v39 = vsel %vm417_vm0, %v1637_v19, %v8348_v30 }
 0x131   : > { %v1274_v13 = vpop.permute.xlu1 %1273  ;;  %v6413_v15 = vpop.permute.xlu0 %1604  ;;  %v1672_v33 = vsel %vm1655_vm8, %v1565_v1, %v1671_v26  ;;  %v1690_v38 = vsel %vm1655_vm8, %v6359_v54, %v1689_v39 }
 0x132   : > { %v8347_v22 = vrot.slane %v6413_v15, 4  ;;  %v5360_v45 = vcombine.high %v1656_v7, %v1672_v33  ;;  %v5359_v41 = vcombine.low %v1656_v7, %v1672_v33 }
 0x133   : > { %1863 = vrot.lane.b32.xlu1 %v6283_v57, %s5579_s24  ;;  %1606 = vrot.lane.b32.xlu0 %v6124_v61, %s5580_s25 }
 0x134   : > { %4486 = vmatprep.subr.bf16.mxu0 %v5360_v45  ;;  %v1705_v44 = vsel %vm417_vm0, %v1646_v48, %v8347_v22  ;;  %v1327_v45 = vrot.slane %v1274_v13, 4 }
 0x135   : > { %v1292_v35 = vpop.permute.xlu1 %1291  ;;  %v6428_v1 = vpop.permute.xlu0 %1275  ;;  %4487 = vmatpush2.bf16.msra.mxu0 %v5359_v41  ;;  %v1706_v19 = vsel %vm1655_vm8, %v1603_v14, %v1705_v44 }
 0x136   : > { %v1328_v26 = vrot.slane %v6428_v1, 4  ;;  %v5377_v7 = vcombine.low %v1690_v38, %v1706_v19  ;;  %v5378_v33 = vcombine.high %v1690_v38, %v1706_v19  ;;  %v1336_v54 = vrot.slane %v1292_v35, 4 }
 0x137   : > { %1552 = vrot.lane.b32.xlu1 %v6238_v0, %s5580_s25  ;;  %1881 = vrot.lane.b32.xlu0 %v6299_v18, %s5579_s24 }
 0x138   : > { %4566 = vmatprep.subr.bf16.mxu1 %v5378_v33  ;;  %v1378_v44 = vsel %vm417_vm0, %v1327_v45, %v1328_v26 }
 0x139   : > { %v6438_v48 = vpop.permute.xlu1 %1550  ;;  %v6440_v41 = vpop.permute.xlu0 %1293  ;;  %4567 = vmatpush2.bf16.msra.mxu1 %v5377_v7  ;;  %v1379_v7 = vsel %vm1346_vm9, %v1274_v13, %v1378_v44 }
 0x13a   : > { %v8352_v14 = vrot.slane %v6438_v48, 4  ;;  %v1337_v39 = vrot.slane %v6440_v41, 4 }
 0x13b   : > { %1590 = vrot.lane.b32.xlu1 %v6187_v43, %s5580_s25  ;;  %1570 = vrot.lane.b32.xlu0 %v6339_v12, %s5580_s25 }
 0x13c   : > { %v1394_v38 = vsel %vm417_vm0, %v1336_v54, %v1337_v39  ;;  %v1657_v45 = vsel %vm417_vm0, %v1619_v16, %v8352_v14 }
 0x13d   : > { %v1238_v19 = vpop.permute.xlu1 %1237  ;;  %v6450_v33 = vpop.permute.xlu0 %1568  ;;  %v1395_v22 = vsel %vm1346_vm9, %v1292_v35, %v1394_v38 }
 0x13e   : > { %v8351_v30 = vrot.slane %v6450_v33, 4  ;;  %v5344_v52 = vcombine.high %v1379_v7, %v1395_v22  ;;  %v5343_v42 = vcombine.low %v1379_v7, %v1395_v22  ;;  %v1658_v22 = vsel %vm1655_vm8, %v6394_v8, %v1657_v45 }
 0x13f   : > { %1279 = vrot.lane.b32.xlu1 %v6104_v53, %s5581_s26  ;;  %1608 = vrot.lane.b32.xlu0 %v6211_v20, %s5580_s25 }
 0x140   : > { %4488 = vmatprep.subr.bf16.mxu0 %v5344_v52  ;;  %v1673_v13 = vsel %vm417_vm0, %v1628_v5, %v8351_v30  ;;  %v1309_v52 = vrot.slane %v1238_v19, 4 }
 0x141   : > { %v1256_v35 = vpop.permute.xlu1 %1255  ;;  %v6465_v54 = vpop.permute.xlu0 %1239  ;;  %4489 = vmatpush2.bf16.msra.mxu0 %v5343_v42  ;;  %v1674_v16 = vsel %vm1655_vm8, %v1567_v11, %v1673_v13 }
 0x142   : > { %v1310_v44 = vrot.slane %v6465_v54, 4  ;;  %v5361_v53 = vcombine.low %v1658_v22, %v1674_v16  ;;  %v5362_v38 = vcombine.high %v1658_v22, %v1674_v16  ;;  %v1318_v7 = vrot.slane %v1256_v35, 4 }
 0x143   : > { %1554 = vrot.lane.b32.xlu1 %v6283_v57, %s5580_s25  ;;  %1297 = vrot.lane.b32.xlu0 %v6124_v61, %s5581_s26 }
 0x144   : > { %4568 = vmatprep.subr.bf16.mxu1 %v5362_v38  ;;  %v1345_v45 = vsel %vm417_vm0, %v1309_v52, %v1310_v44 }
 0x145   : > { %v6475_v5 = vpop.permute.xlu1 %1277  ;;  %v1258_v42 = vpop.permute.xlu0 %1257  ;;  %4569 = vmatpush2.bf16.msra.mxu1 %v5361_v53  ;;  %v1347_v16 = vsel %vm1346_vm9, %v1238_v19, %v1345_v45 }
 0x146   : > { %v8354_v8 = vrot.slane %v6475_v5, 4  ;;  %v1319_v11 = vrot.slane %v1258_v42, 4 }
 0x147   : > { %1243 = vrot.lane.b32.xlu1 %v6238_v0, %s5581_s26  ;;  %1572 = vrot.lane.b32.xlu0 %v6299_v18, %s5580_s25 }
 0x148   : > { %v1362_v61 = vsel %vm417_vm0, %v1318_v7, %v1319_v11  ;;  %v1380_v38 = vsel %vm417_vm0, %v1328_v26, %v8354_v8  ;;  %v6504_v26 = vcombine.low %v6047_v3, %v6047_v3 }
 0x149   : > { %v6484_v13 = vpop.permute.xlu1 %2513  ;;  %v6486_v22 = vpop.permute.xlu0 %1295  ;;  %v1363_v53 = vsel %vm1346_vm9, %v1256_v35, %v1362_v61  ;;  %v1381_v45 = vsel %vm1346_vm9, %v6428_v1, %v1380_v38  ;;  %v8453_v1 = vrot.slane %v5906_v63, 4 }
 0x14a   : > { %v2565_v52 = vrot.slane %v6484_v13, 4  ;;  %v8353_v0 = vrot.slane %v6486_v22, 4  ;;  %v5328_v30 = vcombine.high %v1347_v16, %v1363_v53  ;;  %v5327_v14 = vcombine.low %v1347_v16, %v1363_v53 }
 0x14b   : > { %1281 = vrot.lane.b32.xlu1 %v6187_v43, %s5581_s26  ;;  %1261 = vrot.lane.b32.xlu0 %v6339_v12, %s5581_s26 }
 0x14c   : > { %4490 = vmatprep.subr.bf16.mxu0 %v5328_v30  ;;  %v1396_v19 = vsel %vm417_vm0, %v1337_v39, %v8353_v0  ;;  %v8452_v30 = vrot.slane %v5891_v56, 4 }
 0x14d   : > { %v6506_v35 = vpop.permute.xlu1 %1241  ;;  %v6508_v7 = vpop.permute.xlu0 %2531  ;;  %4491 = vmatpush2.bf16.msra.mxu0 %v5327_v14  ;;  %v1397_v61 = vsel %vm1346_vm9, %v6440_v41, %v1396_v19 }
 0x14e   : > { %v2616_v16 = vsel %vm417_vm0, %v8452_v30, %v2565_v52  ;;  %v8358_v39 = vrot.slane %v6506_v35, 4  ;;  %v2574_v3 = vrot.slane %v6508_v7, 4  ;;  %v5345_v53 = vcombine.low %v1381_v45, %v1397_v61 }
 0x14f   : > { %v5346_v0 = vcombine.high %v1381_v45, %v1397_v61  ;;  %2517 = vrot.lane.b32.xlu1 %v6187_v43, %s5574_s20  ;;  %1299 = vrot.lane.b32.xlu0 %v6211_v20, %s5581_s26  ;;  %v2617_v19 = vsel %vm2582_vm2, %v5891_v56, %v2616_v16  ;;  %v8454_v45 = vmov 0  }
 0x150   : > { %v2632_v41 = vsel %vm417_vm0, %v8453_v1, %v2574_v3  ;;  %4493 = vmatmul.mubr.bf16.vlgmr.msra.gmra.mxu0 %v6504_v26 }
 0x151   : > { %4570 = vmatprep.subr.bf16.mxu1 %v5346_v0  ;;  %v6527_v14 = vpop.permute.xlu1 %2477  ;;  %v6529_v38 = vpop.permute.xlu0 %1259  ;;  %v2633_v43 = vsel %vm2582_vm2, %v5906_v63, %v2632_v41  ;;  %v1348_v0 = vsel %vm417_vm0, %v1310_v44, %v8358_v39  ;;  %4615 = vmatprep.mubr.bf16.mxu0 %v8454_v45 }
 0x152   : > { %4571 = vmatpush2.bf16.msra.mxu1 %v5345_v53  ;;  %v2547_v61 = vrot.slane %v6527_v14, 4  ;;  %v8355_v30 = vrot.slane %v6529_v38, 4  ;;  %v5473_v1 = vcombine.low %v2617_v19, %v2633_v43  ;;  %v5474_v8 = vcombine.high %v2617_v19, %v2633_v43 }
 0x153   : > { %1245 = vrot.lane.b32.xlu1 %v6283_v57, %s5581_s26  ;;  %2535 = vrot.lane.b32.xlu0 %v6211_v20, %s5574_s20  ;;  %v1349_v16 = vsel %vm1346_vm9, %v6465_v54, %v1348_v0  ;;  %v8455_v20 = vrot.slane %v5941_v9, 4  ;;  %v6567_v54 = vld [vmem:[%s5617_s18 + $0xb0] sm:$0xff] }
 0x154   : > { %4595 = vmatprep.subr.bf16.mxu0 %v5474_v8  ;;  %v1364_v56 = vsel %vm417_vm0, %v1319_v11, %v8355_v30 }
 0x155   : > { %v6548_v63 = vpop.permute.xlu1 %2515  ;;  %v6550_v44 = vpop.permute.xlu0 %2495  ;;  %4596 = vmatpush1.bf16.msra.mxu0 %v5473_v1  ;;  %v1365_v53 = vsel %vm1346_vm9, %v1258_v42, %v1364_v56  ;;  %v2584_v8 = vsel %vm417_vm0, %v8455_v20, %v2547_v61  ;;  %v8456_v42 = vrot.slane %v5950_v40, 4 }
 0x156   : > { %v8357_v41 = vrot.slane %v6548_v63, 4  ;;  %v2556_v11 = vrot.slane %v6550_v44, 4  ;;  %v5329_v19 = vcombine.low %v1349_v16, %v1365_v53  ;;  %v5330_v43 = vcombine.high %v1349_v16, %v1365_v53 }
 0x157   : > { %2481 = vrot.lane.b32.xlu1 %v6283_v57, %s5574_s20  ;;  %1263 = vrot.lane.b32.xlu0 %v6299_v18, %s5581_s26  ;;  %v2585_v16 = vsel %vm2582_vm2, %v5941_v9, %v2584_v8  ;;  %v6590_v9 = vld [vmem:[%s5617_s18 + $0xf4] sm:$0xff] }
 0x158   : > { %4572 = vmatprep.subr.bf16.mxu1 %v5330_v43  ;;  %v2600_v0 = vsel %vm417_vm0, %v8456_v42, %v2556_v11  ;;  %v2618_v53 = vsel %vm417_vm0, %v2565_v52, %v8357_v41 }
 0x159   : > { %v6572_v1 = vpop.permute.xlu1 %970  ;;  %v6574_v56 = vpop.permute.xlu0 %2533  ;;  %4573 = vmatpush2.bf16.msra.mxu1 %v5329_v19  ;;  %v2601_v57 = vsel %vm2582_vm2, %v5950_v40, %v2600_v0  ;;  %v2619_v19 = vsel %vm2582_vm2, %v6484_v13, %v2618_v53  ;;  %v6617_v13 = vld [vmem:[%s5617_s18 + $0x28] sm:$0xff] }
 0x15a   : > { %v8360_v20 = vrot.slane %v6572_v1, 4  ;;  %v8356_v43 = vrot.slane %v6574_v56, 4  ;;  %v5457_v42 = vcombine.low %v2585_v16, %v2601_v57  ;;  %v5458_v30 = vcombine.high %v2585_v16, %v2601_v57 }
 0x15b   : > { %2519 = vrot.lane.b32.xlu1 %v6567_v54, %s5574_s20  ;;  %2499 = vrot.lane.b32.xlu0 %v6299_v18, %s5574_s20 }
 0x15c   : > { %4597 = vmatprep.subr.bf16.mxu0 %v5458_v30  ;;  %v2634_v40 = vsel %vm417_vm0, %v2574_v3, %v8356_v43  ;;  %4575 = vmatmul.mubr.bf16.vlgmr.msra.gmra.mxu1 %v6504_v26  ;;  %v8458_v30 = vrot.slane %v5975_v4, 4 }
 0x15d   : > { %v6596_v52 = vpop.permute.xlu1 %2479  ;;  %v6598_v8 = vpop.permute.xlu0 %988  ;;  %4598 = vmatpush1.bf16.msra.mxu0 %v5457_v42  ;;  %v2635_v18 = vsel %vm2582_vm2, %v6508_v7, %v2634_v40  ;;  %4697 = vmatprep.mubr.bf16.mxu1 %v8454_v45  ;;  %v8459_v7 = vrot.slane %v5990_v62, 4  ;;  %v6625_v40 = vld [vmem:[%s8304_s1 + $0x8] ss:$0 sps:$4 sm:$0xff]  }
 0x15e   : > { %8457 = vst [vmem:[#allocation11_spill] sm:$0xff] %v6596_v52  ;;  %v1073_v3 = vsel %vm417_vm0, %v8458_v30, %v8360_v20  ;;  %v8359_v0 = vrot.slane %v6596_v52, 4  ;;  %v1030_v16 = vrot.slane %v6598_v8, 4  ;;  %v5475_v57 = vcombine.low %v2619_v19, %v2635_v18  ;;  %8460 = vst [vmem:[#allocation12_spill] sm:$0xff] %v6625_v40 }
 0x15f   : > { %v5476_v42 = vcombine.high %v2619_v19, %v2635_v18  ;;  %974 = vrot.lane.b32.xlu1 %v6567_v54, %s5575_s21  ;;  %2537 = vrot.lane.b32.xlu0 %v6590_v9, %s5574_s20  ;;  %v1074_v30 = vsel %vm1037_vm3, %v5975_v4, %v1073_v3 }
 0x160   : > { %v1089_v53 = vsel %vm417_vm0, %v8459_v7, %v1030_v16  ;;  %5488 = vmatmul.mubr.msk.bf16.vlgmr.msra.gmra.mxu0 %vm4456_vm4, %v6625_v40  ;;  %v2586_v7 = vsel %vm417_vm0, %v2547_v61, %v8359_v0 }
 0x161   : > { %4677 = vmatprep.subr.bf16.mxu1 %v5476_v42  ;;  %v6629_v19 = vpop.permute.xlu1 %934  ;;  %v6631_v18 = vpop.permute.xlu0 %2497  ;;  %v1090_v42 = vsel %vm1037_vm3, %v5990_v62, %v1089_v53  ;;  %4656 = vmatprep.mubr.bf16.mxu0 %v6055_v32  ;;  %v6650_v62 = vld [vmem:[%s5617_s18 + $0x6c] sm:$0xff]  ;;  %v2587_v53 = vsel %vm2582_vm2, %v6527_v14, %v2586_v7  ;;  %v8463_v14 = vrot.slane %v6034_v51, 4 }
 0x162   : > { %8461 = vst [vmem:[#allocation13_spill] sm:$0xff] %v6631_v18  ;;  %4678 = vmatpush1.bf16.msra.mxu1 %v5475_v57  ;;  %v1003_v43 = vrot.slane %v6629_v19, 4  ;;  %v8361_v41 = vrot.slane %v6631_v18, 4  ;;  %v5315_v39 = vcombine.low %v1074_v30, %v1090_v42  ;;  %v5316_v57 = vcombine.high %v1074_v30, %v1090_v42 }
 0x163   : > { %2483 = vrot.lane.b32.xlu1 %v6617_v13, %s5574_s20  ;;  %992 = vrot.lane.b32.xlu0 %v6590_v9, %s5575_s21  ;;  %v8462_v42 = vrot.slane %v6020_v58, 4 }
 0x164   : > { %4624 = vmatprep.subr.bf16.mxu0 %v5316_v57  ;;  %v2602_v4 = vsel %vm417_vm0, %v2556_v11, %v8361_v41 }
 0x165   : > { %v6655_v61 = vpop.permute.xlu1 %972  ;;  %v6657_v3 = vpop.permute.xlu0 %952  ;;  %4625 = vmatpush1.bf16.msra.mxu0 %v5315_v39  ;;  %v2603_v30 = vsel %vm2582_vm2, %v6550_v44, %v2602_v4  ;;  %v1041_v57 = vsel %vm417_vm0, %v8462_v42, %v1003_v43  ;;  %v6673_v39 = vld [vmem:[%s5617_s18 + $0xb8] sm:$0xff] }
 0x166   : > { %v8368_v0 = vrot.slane %v6655_v61, 4  ;;  %v1012_v20 = vrot.slane %v6657_v3, 4  ;;  %v5459_v11 = vcombine.low %v2587_v53, %v2603_v30  ;;  %v5460_v41 = vcombine.high %v2587_v53, %v2603_v30 }
 0x167   : > { %938 = vrot.lane.b32.xlu1 %v6617_v13, %s5575_s21  ;;  %2501 = vrot.lane.b32.xlu0 %v6650_v62, %s5574_s20  ;;  %v1042_v53 = vsel %vm1037_vm3, %v6020_v58, %v1041_v57  ;;  %v6698_v58 = vld [vmem:[%s5617_s18 + $0xfc] sm:$0xff] }
 0x168   : > { %4679 = vmatprep.subr.bf16.mxu1 %v5460_v41  ;;  %v1057_v44 = vsel %vm417_vm0, %v8463_v14, %v1012_v20  ;;  %v8464_v41 = vrot.slane %v6572_v1, 4 }
 0x169   : > { %v6678_v7 = vpop.permute.xlu1 %661  ;;  %v6680_v4 = vpop.permute.xlu0 %990  ;;  %4680 = vmatpush1.bf16.msra.mxu1 %v5459_v11  ;;  %v1058_v30 = vsel %vm1037_vm3, %v6034_v51, %v1057_v44 }
 0x16a   : > { %v1075_v42 = vsel %vm417_vm0, %v8464_v41, %v8368_v0  ;;  %v712_v29 = vrot.slane %v6678_v7, 4  ;;  %v8367_v14 = vrot.slane %v6680_v4, 4  ;;  %v5299_v18 = vcombine.low %v1042_v53, %v1058_v30 }
 0x16b   : > { %v5300_v52 = vcombine.high %v1042_v53, %v1058_v30  ;;  %976 = vrot.lane.b32.xlu1 %v6673_v39, %s5575_s21  ;;  %956 = vrot.lane.b32.xlu0 %v6650_v62, %s5575_s21  ;;  %v1076_v44 = vsel %vm1037_vm3, %v6572_v1, %v1075_v42  ;;  %v8466_v53 = vrot.slane %v6073_v59, 4  ;;  %v6724_v1 = vld [vmem:[%s5617_s18 + $0x30] sm:$0xff] }
 0x16c   : > { %v1091_v51 = vsel %vm417_vm0, %v1030_v16, %v8367_v14  ;;  %5489 = vmatmul.mubr.msk.bf16.vlgmr.msra.gmra.mxu1 %vm4456_vm4, %v6625_v40 }
 0x16d   : > { %4626 = vmatprep.subr.bf16.mxu0 %v5300_v52  ;;  %v6705_v57 = vpop.permute.xlu1 %936  ;;  %v6707_v11 = vpop.permute.xlu0 %679  ;;  %v1092_v52 = vsel %vm1037_vm3, %v6598_v8, %v1091_v51  ;;  %v764_v30 = vsel %vm417_vm0, %v8466_v53, %v712_v29  ;;  %4738 = vmatprep.mubr.bf16.mxu1 %v6055_v32  ;;  %v8467_v8 = vrot.slane %v6089_v60, 4 }
 0x16e   : > { %8465 = vst [vmem:[#allocation14_spill] sm:$0xff] %v6705_v57  ;;  %4627 = vmatpush1.bf16.msra.mxu0 %v5299_v18  ;;  %v8373_v16 = vrot.slane %v6705_v57, 4  ;;  %v721_v41 = vrot.slane %v6707_v11, 4  ;;  %v5317_v14 = vcombine.low %v1076_v44, %v1092_v52  ;;  %v5318_v0 = vcombine.high %v1076_v44, %v1092_v52 }
 0x16f   : > { %665 = vrot.lane.b32.xlu1 %v6567_v54, %s5577_s22  ;;  %994 = vrot.lane.b32.xlu0 %v6698_v58, %s5575_s21  ;;  %v765_v44 = vsel %vm728_vm5, %v6073_v59, %v764_v30  ;;  %v6747_v59 = vld [vmem:[%s5617_s18 + $0x74] sm:$0xff] }
 0x170   : > { %4706 = vmatprep.subr.bf16.mxu1 %v5318_v0  ;;  %v780_v18 = vsel %vm417_vm0, %v8467_v8, %v721_v41  ;;  %v1043_v0 = vsel %vm417_vm0, %v1003_v43, %v8373_v16 }
 0x171   : > { %v6729_v42 = vpop.permute.xlu1 %625  ;;  %v6731_v51 = vpop.permute.xlu0 %954  ;;  %4707 = vmatpush1.bf16.msra.mxu1 %v5317_v14  ;;  %v781_v52 = vsel %vm728_vm5, %v6089_v60, %v780_v18  ;;  %v1044_v30 = vsel %vm1037_vm3, %v6629_v19, %v1043_v0 }
 0x172   : > { %8468 = vst [vmem:[#allocation15_spill] sm:$0xff] %v6731_v51  ;;  %v694_v53 = vrot.slane %v6729_v42, 4  ;;  %v8379_v32 = vrot.slane %v6731_v51, 4  ;;  %v5283_v8 = vcombine.low %v765_v44, %v781_v52  ;;  %v5284_v40 = vcombine.high %v765_v44, %v781_v52 }
 0x173   : > { %940 = vrot.lane.b32.xlu1 %v6724_v1, %s5575_s21  ;;  %683 = vrot.lane.b32.xlu0 %v6590_v9, %s5577_s22  ;;  %v8469_v44 = vrot.slane %v6127_v21, 4 }
 0x174   : > { %4628 = vmatprep.subr.bf16.mxu0 %v5284_v40  ;;  %v1059_v60 = vsel %vm417_vm0, %v1012_v20, %v8379_v32  ;;  %v8470_v20 = vrot.slane %v6140_v31, 4 }
 0x175   : > { %v6752_v43 = vpop.permute.xlu1 %663  ;;  %v644_v14 = vpop.permute.xlu0 %643  ;;  %4629 = vmatpush1.bf16.msra.mxu0 %v5283_v8  ;;  %v1060_v18 = vsel %vm1037_vm3, %v6657_v3, %v1059_v60  ;;  %v732_v40 = vsel %vm417_vm0, %v8469_v44, %v694_v53 }
 0x176   : > { %v8378_v52 = vrot.slane %v6752_v43, 4  ;;  %v703_v16 = vrot.slane %v644_v14, 4  ;;  %v5301_v51 = vcombine.low %v1044_v30, %v1060_v18  ;;  %v5302_v57 = vcombine.high %v1044_v30, %v1060_v18 }
 0x177   : > { %629 = vrot.lane.b32.xlu1 %v6617_v13, %s5577_s22  ;;  %958 = vrot.lane.b32.xlu0 %v6747_v59, %s5575_s21  ;;  %v733_v8 = vsel %vm728_vm5, %v6127_v21, %v732_v40 }
 0x178   : > { %4708 = vmatprep.subr.bf16.mxu1 %v5302_v57  ;;  %v748_v19 = vsel %vm417_vm0, %v8470_v20, %v703_v16  ;;  %v766_v30 = vsel %vm417_vm0, %v712_v29, %v8378_v52 }
 0x179   : > { %v6769_v3 = vpop.permute.xlu1 %351  ;;  %v6771_v0 = vpop.permute.xlu0 %681  ;;  %4709 = vmatpush1.bf16.msra.mxu1 %v5301_v51  ;;  %v749_v60 = vsel %vm728_vm5, %v6140_v31, %v748_v19  ;;  %v767_v51 = vsel %vm728_vm5, %v6678_v7, %v766_v30  ;;  %v8471_v19 = vrot.slane %v6138_v55, 4  ;;  %v8472_v7 = vrot.slane %v6167_v10, 4 }
 0x17a   : > { %v402_v57 = vrot.slane %v6769_v3, 4  ;;  %v722_v18 = vrot.slane %v6771_v0, 4  ;;  %v5267_v44 = vcombine.low %v733_v8, %v749_v60  ;;  %v5268_v20 = vcombine.high %v733_v8, %v749_v60 }
 0x17b   : > { %667 = vrot.lane.b32.xlu1 %v6673_v39, %s5577_s22  ;;  %647 = vrot.lane.b32.xlu0 %v6650_v62, %s5577_s22 }
 0x17c   : > { %4630 = vmatprep.subr.bf16.mxu0 %v5268_v20  ;;  %v782_v31 = vsel %vm417_vm0, %v721_v41, %v722_v18  ;;  %v455_v8 = vsel %vm417_vm0, %v8471_v19, %v402_v57 }
 0x17d   : > { %v6789_v21 = vpop.permute.xlu1 %627  ;;  %v370_v29 = vpop.permute.xlu0 %369  ;;  %4631 = vmatpush1.bf16.msra.mxu0 %v5267_v44  ;;  %v783_v40 = vsel %vm728_vm5, %v6707_v11, %v782_v31  ;;  %v456_v44 = vsel %vm419_vm1, %v6138_v55, %v455_v8 }
 0x17e   : > { %v8383_v60 = vrot.slane %v6789_v21, 4  ;;  %v411_v20 = vrot.slane %v370_v29, 4  ;;  %v5285_v52 = vcombine.low %v767_v51, %v783_v40  ;;  %v5286_v32 = vcombine.high %v767_v51, %v783_v40 }
 0x17f   : > { %355 = vrot.lane.b32.xlu1 %v6567_v54, %s5573_s19  ;;  %685 = vrot.lane.b32.xlu0 %v6698_v58, %s5577_s22 }
 0x180   : > { %4710 = vmatprep.subr.bf16.mxu1 %v5286_v32  ;;  %v471_v11 = vsel %vm417_vm0, %v8472_v7, %v411_v20  ;;  %v734_v51 = vsel %vm417_vm0, %v694_v53, %v8383_v60  ;;  %v8474_v53 = vrot.slane %v5837_v37, 4 }
 0x181   : > { %v6806_v41 = vpop.permute.xlu1 %353  ;;  %v6808_v30 = vpop.permute.xlu0 %645  ;;  %4711 = vmatpush1.bf16.msra.mxu1 %v5285_v52  ;;  %v472_v31 = vsel %vm419_vm1, %v6167_v10, %v471_v11  ;;  %v8473_v10 = vrot.slane %v5835_v36, 4 }
 0x182   : > { %v8382_v32 = vrot.slane %v6806_v41, 4  ;;  %v8380_v40 = vrot.slane %v6808_v30, 4  ;;  %v5251_v19 = vcombine.low %v456_v44, %v472_v31  ;;  %v5252_v7 = vcombine.high %v456_v44, %v472_v31 }
 0x183   : > { %631 = vrot.lane.b32.xlu1 %v6724_v1, %s5577_s22  ;;  %373 = vrot.lane.b32.xlu0 %v6590_v9, %s5573_s19  ;;  %v441_v52 = vsel %vm417_vm0, %v8474_v53, %v8473_v10  ;;  %v735_v44 = vsel %vm728_vm5, %v6729_v42, %v734_v51  ;;  %v5530_v10 = vld [vmem:[%s5617_s18 + $0x9c] ss:$68 sps:$4 sm:$0xff]   ;;  %v8476_v42 = vrot.slane %v5803_v27, 4  ;;  %v8478_v27 = vcombine.low %v5861_v46, %v5865_v47 }
 0x184   : > { %4632 = vmatprep.subr.bf16.mxu0 %v5252_v7  ;;  %v750_v55 = vsel %vm417_vm0, %v703_v16, %v8380_v40  ;;  %v8475_v16 = vcombine.high %v5861_v46, %v5865_v47  ;;  %v457_v53 = vsel %vm417_vm0, %v402_v57, %v8382_v32 }
 0x185   : > { %v6831_v8 = vpop.permute.xlu1 %2206  ;;  %v6833_v11 = vpop.permute.xlu0 %371  ;;  %4633 = vmatpush1.bf16.msra.mxu0 %v5251_v19  ;;  %v751_v31 = vsel %vm728_vm5, %v644_v14, %v750_v55  ;;  %v8477_v14 = vrot.slane %v5793_v24, 4  ;;  %v442_v55 = vsel %vm419_vm1, %v5837_v37, %v441_v52  ;;  %v5533_v37 = vld [vmem:[%s5617_s18 + $0x14] ss:$68 sps:$4 sm:$0xff]  }
 0x186   : > { %v8381_v7 = vrot.slane %v6833_v11, 4  ;;  %4634 = vmatprep.subr.bf16.mxu0 %v8475_v16  ;;  %v5269_v36 = vcombine.low %v735_v44, %v751_v31  ;;  %v5270_v40 = vcombine.high %v735_v44, %v751_v31  ;;  %v2257_v19 = vrot.slane %v6831_v8, 4  ;;  %v5528_v16 = vld [vmem:[%s5617_s18 + $0x98] ss:$68 sps:$4 sm:$0xff]  }
 0x187   : > { %357 = vrot.lane.b32.xlu1 %v6673_v39, %s5573_s19  ;;  %649 = vrot.lane.b32.xlu0 %v6747_v59, %s5577_s22  ;;  %v425_v51 = vsel %vm417_vm0, %v8477_v14, %v8476_v42  ;;  %v458_v42 = vsel %vm419_vm1, %v6769_v3, %v457_v53  ;;  %v8479_v3 = vrot.slane %v6240_v28, 4 }
 0x188   : > { %4712 = vmatprep.subr.bf16.mxu1 %v5270_v40  ;;  %v473_v57 = vsel %vm417_vm0, %v411_v20, %v8381_v7  ;;  %v426_v52 = vsel %vm419_vm1, %v5793_v24, %v425_v51  ;;  %v5531_v51 = vld [vmem:[%s5617_s18 + $0x10] ss:$68 sps:$4 sm:$0xff]  }
 0x189   : > { %v6861_v44 = vpop.permute.xlu1 %2170  ;;  %v2225_v31 = vpop.permute.xlu0 %2224  ;;  %4635 = vmatpush1.bf16.msra.mxu0 %v8478_v27  ;;  %4713 = vmatpush1.bf16.msra.mxu1 %v5269_v36  ;;  %v474_v40 = vsel %vm419_vm1, %v370_v29, %v473_v57  ;;  %v5238_v47 = vcombine.high %v426_v52, %v442_v55  ;;  %v2309_v29 = vsel %vm417_vm0, %v8479_v3, %v2257_v19  ;;  %v8480_v36 = vrot.slane %v6255_v50, 4  ;;  %v5536_v27 = vld [vmem:[%s5617_s18 + $0xa4] ss:$68 sps:$4 sm:$0xff]  }
 0x18a   : > { %v2266_v14 = vrot.slane %v2225_v31, 4  ;;  %4636 = vmatprep.subr.bf16.mxu0 %v5530_v10  ;;  %v5253_v20 = vcombine.low %v458_v42, %v474_v40  ;;  %v5254_v7 = vcombine.high %v458_v42, %v474_v40  ;;  %v2239_v46 = vrot.slane %v6861_v44, 4  ;;  %v176_v40 = vld [vmem:[%s5617_s18 + $0x18] sm:$0xff] }
 0x18b   : > { %339 = vrot.lane.b32.xlu1 %v6747_v59, %s5573_s19  ;;  %375 = vrot.lane.b32.xlu0 %v6698_v58, %s5573_s19  ;;  %v5237_v42 = vcombine.low %v426_v52, %v442_v55  ;;  %v8482_v55 = vrot.slane %v6302_v23, 4  ;;  %v5206_v32 = vcombine.high %v176_v40, %v6339_v12 }
 0x18c   : > { %4714 = vmatprep.subr.bf16.mxu1 %v5254_v7  ;;  %v2325_v24 = vsel %vm417_vm0, %v8480_v36, %v2266_v14 }
 0x18d   : > { %v6884_v10 = vpop.permute.xlu1 %2208  ;;  %v6886_v53 = vpop.permute.xlu0 %2188  ;;  %4637 = vmatpush1.bf16.msra.mxu0 %v5528_v16  ;;  %4715 = vmatpush1.bf16.msra.mxu1 %v5253_v20  ;;  %v2326_v7 = vsel %vm2273_vm6, %v6255_v50, %v2325_v24  ;;  %v2310_v16 = vsel %vm2273_vm6, %v6240_v28, %v2309_v29  ;;  %v5534_v28 = vld [vmem:[%s5617_s18 + $0xa0] ss:$68 sps:$4 sm:$0xff]  }
 0x18e   : > { %v2248_v57 = vrot.slane %v6886_v53, 4  ;;  %4716 = vmatprep.subr.bf16.mxu1 %v5238_v47  ;;  %4638 = vmatprep.subr.bf16.mxu0 %v5533_v37  ;;  %v8410_v20 = vrot.slane %v6884_v10, 4  ;;  %v5444_v50 = vcombine.high %v2310_v16, %v2326_v7  ;;  %v8481_v47 = vrot.slane %v6285_v2, 4 }
 0x18f   : > { %2228 = vrot.lane.b32.xlu1 %v6590_v9, %s5578_s23  ;;  %2210 = vrot.lane.b32.xlu0 %v6567_v54, %s5578_s23  ;;  %v5443_v60 = vcombine.low %v2310_v16, %v2326_v7  ;;  %v5205_v16 = vcombine.low %v176_v40, %v6339_v12 }
 0x190   : > { %v2277_v37 = vsel %vm417_vm0, %v8481_v47, %v2239_v46  ;;  %v2293_v52 = vsel %vm417_vm0, %v8482_v55, %v2248_v57 }
 0x191   : > { %v6911_v3 = vpop.permute.xlu1 %1897  ;;  %v6913_v36 = vpop.permute.xlu0 %2226  ;;  %4639 = vmatpush1.bf16.msra.mxu0 %v5531_v51  ;;  %4717 = vmatpush1.bf16.msra.mxu1 %v5237_v42  ;;  %v2294_v29 = vsel %vm2273_vm6, %v6302_v23, %v2293_v52  ;;  %v2278_v51 = vsel %vm2273_vm6, %v6285_v2, %v2277_v37  ;;  %v2311_v23 = vsel %vm417_vm0, %v2257_v19, %v8410_v20  ;;  %v8483_v19 = vrot.slane %v6330_v17, 4 }
 0x192   : > { %v1948_v24 = vrot.slane %v6911_v3, 4  ;;  %v8411_v47 = vrot.slane %v6913_v36, 4  ;;  %4640 = vmatprep.subr.bf16.mxu0 %v5444_v50  ;;  %4718 = vmatprep.subr.bf16.mxu1 %v5536_v27  ;;  %v5428_v42 = vcombine.high %v2278_v51, %v2294_v29  ;;  %v5427_v52 = vcombine.low %v2278_v51, %v2294_v29 }
 0x193   : > { %2192 = vrot.lane.b32.xlu1 %v6650_v62, %s5578_s23  ;;  %2174 = vrot.lane.b32.xlu0 %v6617_v13, %s5578_s23  ;;  %v2312_v12 = vsel %vm2273_vm6, %v6831_v8, %v2311_v23 }
 0x194   : > { %v2327_v27 = vsel %vm417_vm0, %v2266_v14, %v8411_v47  ;;  %v2000_v14 = vsel %vm417_vm0, %v8483_v19, %v1948_v24  ;;  %v5541_v47 = vld [vmem:[%s5617_s18 + $0xac] ss:$68 sps:$4 sm:$0xff]  }
 0x195   : > { %v6933_v50 = vpop.permute.xlu1 %2172  ;;  %v6935_v7 = vpop.permute.xlu0 %1915  ;;  %4641 = vmatpush2.bf16.msra.mxu0 %v5443_v60  ;;  %4719 = vmatpush1.bf16.msra.mxu1 %v5534_v28  ;;  %v2328_v55 = vsel %vm2273_vm6, %v2225_v31, %v2327_v27  ;;  %v8484_v31 = vrot.slane %v6342_v34, 4  ;;  %v2001_v29 = vsel %vm1964_vm7, %v6330_v17, %v2000_v14 }
 0x196   : > { %v8405_v2 = vrot.slane %v6933_v50, 4  ;;  %v1957_v37 = vrot.slane %v6935_v7, 4  ;;  %4642 = vmatprep.subr.bf16.mxu0 %v5428_v42  ;;  %4720 = vmatprep.subr.bf16.mxu1 %v5206_v32  ;;  %v5446_v60 = vcombine.high %v2312_v12, %v2328_v55 }
 0x197   : > { %2230 = vrot.lane.b32.xlu1 %v6698_v58, %s5578_s23  ;;  %2212 = vrot.lane.b32.xlu0 %v6673_v39, %s5578_s23 }
 0x198   : > { %v2016_v32 = vsel %vm417_vm0, %v8484_v31, %v1957_v37  ;;  %v2279_v8 = vsel %vm417_vm0, %v2239_v46, %v8405_v2 }
 0x199   : > { %v6955_v40 = vpop.permute.xlu1 %1861  ;;  %v6957_v28 = vpop.permute.xlu0 %2190  ;;  %4643 = vmatpush2.bf16.msra.mxu0 %v5427_v52  ;;  %4721 = vmatpush1.bf16.msra.mxu1 %v5205_v16  ;;  %v2017_v51 = vsel %vm1964_vm7, %v6342_v34, %v2016_v32  ;;  %v5445_v16 = vcombine.low %v2312_v12, %v2328_v55  ;;  %v2280_v55 = vsel %vm2273_vm6, %v6861_v44, %v2279_v8  ;;  %v8485_v52 = vrot.slane %v6370_v6, 4 }
 0x19a   : > { %v1930_v42 = vrot.slane %v6955_v40, 4  ;;  %v8406_v23 = vrot.slane %v6957_v28, 4  ;;  %4722 = vmatprep.subr.bf16.mxu1 %v5446_v60  ;;  %v5411_v27 = vcombine.low %v2001_v29, %v2017_v51  ;;  %v5412_v19 = vcombine.high %v2001_v29, %v2017_v51 }
 0x19b   : > { %1919 = vrot.lane.b32.xlu1 %v6590_v9, %s5579_s24  ;;  %1901 = vrot.lane.b32.xlu0 %v6567_v54, %s5579_s24  ;;  %v8486_v44 = vrot.slane %v6379_v49, 4 }
 0x19c   : > { %4644 = vmatprep.subr.bf16.mxu0 %v5412_v19  ;;  %v2295_v17 = vsel %vm417_vm0, %v2248_v57, %v8406_v23  ;;  %v1968_v12 = vsel %vm417_vm0, %v8485_v52, %v1930_v42 }
 0x19d   : > { %v6979_v34 = vpop.permute.xlu1 %1899  ;;  %v1880_v46 = vpop.permute.xlu0 %1879  ;;  %4645 = vmatpush2.bf16.msra.mxu0 %v5411_v27  ;;  %4723 = vmatpush2.bf16.msra.mxu1 %v5445_v16  ;;  %v2296_v14 = vsel %vm2273_vm6, %v6886_v53, %v2295_v17  ;;  %v1969_v8 = vsel %vm1964_vm7, %v6370_v6, %v1968_v12 }
 0x19e   : > { %v8398_v60 = vrot.slane %v6979_v34, 4  ;;  %v1939_v31 = vrot.slane %v1880_v46, 4  ;;  %v5429_v32 = vcombine.low %v2280_v55, %v2296_v14  ;;  %v5430_v57 = vcombine.high %v2280_v55, %v2296_v14 }
 0x19f   : > { %2194 = vrot.lane.b32.xlu1 %v6747_v59, %s5578_s23  ;;  %2176 = vrot.lane.b32.xlu0 %v6724_v1, %s5578_s23 }
 0x1a0   : > { %4724 = vmatprep.subr.bf16.mxu1 %v5430_v57  ;;  %v1984_v53 = vsel %vm417_vm0, %v8486_v44, %v1939_v31  ;;  %v2002_v19 = vsel %vm417_vm0, %v1948_v24, %v8398_v60 }
 0x1a1   : > { %v6996_v29 = vpop.permute.xlu1 %1588  ;;  %v6998_v51 = vpop.permute.xlu0 %1917  ;;  %4725 = vmatpush2.bf16.msra.mxu1 %v5429_v32  ;;  %v1985_v27 = vsel %vm1964_vm7, %v6379_v49, %v1984_v53  ;;  %v2003_v52 = vsel %vm1964_vm7, %v6911_v3, %v2002_v19  ;;  %v8487_v32 = vrot.slane %v6404_v25, 4  ;;  %v8488_v3 = vrot.slane %v6413_v15, 4 }
 0x1a2   : > { %v1639_v16 = vrot.slane %v6996_v29, 4  ;;  %v8404_v17 = vrot.slane %v6998_v51, 4  ;;  %v5395_v55 = vcombine.low %v1969_v8, %v1985_v27  ;;  %v5396_v14 = vcombine.high %v1969_v8, %v1985_v27 }
 0x1a3   : > { %1883 = vrot.lane.b32.xlu1 %v6650_v62, %s5579_s24  ;;  %1865 = vrot.lane.b32.xlu0 %v6617_v13, %s5579_s24 }
 0x1a4   : > { %4646 = vmatprep.subr.bf16.mxu0 %v5396_v14  ;;  %v2018_v6 = vsel %vm417_vm0, %v1957_v37, %v8404_v17  ;;  %v1691_v57 = vsel %vm417_vm0, %v8487_v32, %v1639_v16 }
 0x1a5   : > { %v7018_v49 = vpop.permute.xlu1 %1863  ;;  %v1607_v24 = vpop.permute.xlu0 %1606  ;;  %4647 = vmatpush2.bf16.msra.mxu0 %v5395_v55  ;;  %v2019_v12 = vsel %vm1964_vm7, %v6935_v7, %v2018_v6  ;;  %v1692_v55 = vsel %vm1655_vm8, %v6404_v25, %v1691_v57 }
 0x1a6   : > { %v8384_v44 = vrot.slane %v7018_v49, 4  ;;  %v1648_v53 = vrot.slane %v1607_v24, 4  ;;  %v5413_v8 = vcombine.low %v2003_v52, %v2019_v12  ;;  %v5414_v27 = vcombine.high %v2003_v52, %v2019_v12 }
 0x1a7   : > { %1921 = vrot.lane.b32.xlu1 %v6698_v58, %s5579_s24  ;;  %1903 = vrot.lane.b32.xlu0 %v6673_v39, %s5579_s24 }
 0x1a8   : > { %4726 = vmatprep.subr.bf16.mxu1 %v5414_v27  ;;  %v1707_v7 = vsel %vm417_vm0, %v8488_v3, %v1648_v53  ;;  %v1970_v6 = vsel %vm417_vm0, %v1930_v42, %v8384_v44  ;;  %v8489_v3 = vrot.slane %v6438_v48, 4 }
 0x1a9   : > { %v7035_v37 = vpop.permute.xlu1 %1552  ;;  %v7037_v19 = vpop.permute.xlu0 %1881  ;;  %4727 = vmatpush2.bf16.msra.mxu1 %v5413_v8  ;;  %v1708_v14 = vsel %vm1655_vm8, %v6413_v15, %v1707_v7  ;;  %v1971_v57 = vsel %vm1964_vm7, %v6955_v40, %v1970_v6  ;;  %v8490_v40 = vrot.slane %v6450_v33, 4 }
 0x1aa   : > { %v1621_v52 = vrot.slane %v7035_v37, 4  ;;  %v8386_v12 = vrot.slane %v7037_v19, 4  ;;  %v5379_v32 = vcombine.low %v1692_v55, %v1708_v14  ;;  %v5380_v27 = vcombine.high %v1692_v55, %v1708_v14 }
 0x1ab   : > { %1610 = vrot.lane.b32.xlu1 %v6590_v9, %s5580_s25  ;;  %1592 = vrot.lane.b32.xlu0 %v6567_v54, %s5580_s25 }
 0x1ac   : > { %4648 = vmatprep.subr.bf16.mxu0 %v5380_v27  ;;  %v1986_v25 = vsel %vm417_vm0, %v1939_v31, %v8386_v12  ;;  %v1659_v7 = vsel %vm417_vm0, %v8489_v3, %v1621_v52 }
 0x1ad   : > { %v7055_v15 = vpop.permute.xlu1 %1590  ;;  %v1571_v42 = vpop.permute.xlu0 %1570  ;;  %4649 = vmatpush2.bf16.msra.mxu0 %v5379_v32  ;;  %v1987_v8 = vsel %vm1964_vm7, %v1880_v46, %v1986_v25  ;;  %v1660_v32 = vsel %vm1655_vm8, %v6438_v48, %v1659_v7 }
 0x1ae   : > { %v8385_v55 = vrot.slane %v7055_v15, 4  ;;  %v1630_v14 = vrot.slane %v1571_v42, 4  ;;  %v5397_v27 = vcombine.low %v1971_v57, %v1987_v8  ;;  %v5398_v44 = vcombine.high %v1971_v57, %v1987_v8 }
 0x1af   : > { %1885 = vrot.lane.b32.xlu1 %v6747_v59, %s5579_s24  ;;  %1867 = vrot.lane.b32.xlu0 %v6724_v1, %s5579_s24 }
 0x1b0   : > { %4728 = vmatprep.subr.bf16.mxu1 %v5398_v44  ;;  %v1675_v46 = vsel %vm417_vm0, %v8490_v40, %v1630_v14  ;;  %v1693_v57 = vsel %vm417_vm0, %v1639_v16, %v8385_v55 }
 0x1b1   : > { %v7071_v31 = vpop.permute.xlu1 %1279  ;;  %v7073_v6 = vpop.permute.xlu0 %1608  ;;  %4729 = vmatpush2.bf16.msra.mxu1 %v5397_v27  ;;  %v1676_v25 = vsel %vm1655_vm8, %v6450_v33, %v1675_v46  ;;  %v1694_v7 = vsel %vm1655_vm8, %v6996_v29, %v1693_v57  ;;  %v8491_v46 = vrot.slane %v6475_v5, 4  ;;  %v8492_v29 = vrot.slane %v6486_v22, 4 }
 0x1b2   : > { %v1330_v44 = vrot.slane %v7071_v31, 4  ;;  %v8397_v8 = vrot.slane %v7073_v6, 4  ;;  %v5363_v3 = vcombine.low %v1660_v32, %v1676_v25  ;;  %v5364_v40 = vcombine.high %v1660_v32, %v1676_v25 }
 0x1b3   : > { %1574 = vrot.lane.b32.xlu1 %v6650_v62, %s5580_s25  ;;  %1556 = vrot.lane.b32.xlu0 %v6617_v13, %s5580_s25 }
 0x1b4   : > { %4650 = vmatprep.subr.bf16.mxu0 %v5364_v40  ;;  %v1709_v48 = vsel %vm417_vm0, %v1648_v53, %v8397_v8  ;;  %v1382_v32 = vsel %vm417_vm0, %v8491_v46, %v1330_v44 }
 0x1b5   : > { %v7091_v33 = vpop.permute.xlu1 %1554  ;;  %v1298_v16 = vpop.permute.xlu0 %1297  ;;  %4651 = vmatpush2.bf16.msra.mxu0 %v5363_v3  ;;  %v1710_v27 = vsel %vm1655_vm8, %v1607_v24, %v1709_v48  ;;  %v1383_v3 = vsel %vm1346_vm9, %v6475_v5, %v1382_v32 }
 0x1b6   : > { %v8394_v25 = vrot.slane %v7091_v33, 4  ;;  %v1339_v40 = vrot.slane %v1298_v16, 4  ;;  %v5381_v55 = vcombine.low %v1694_v7, %v1710_v27  ;;  %v5382_v12 = vcombine.high %v1694_v7, %v1710_v27 }
 0x1b7   : > { %1612 = vrot.lane.b32.xlu1 %v6698_v58, %s5580_s25  ;;  %1594 = vrot.lane.b32.xlu0 %v6673_v39, %s5580_s25 }
 0x1b8   : > { %4730 = vmatprep.subr.bf16.mxu1 %v5382_v12  ;;  %v1398_v24 = vsel %vm417_vm0, %v8492_v29, %v1339_v40  ;;  %v1661_v7 = vsel %vm417_vm0, %v1621_v52, %v8394_v25 }
 0x1b9   : > { %v7107_v53 = vpop.permute.xlu1 %1243  ;;  %v7109_v57 = vpop.permute.xlu0 %1572  ;;  %4731 = vmatpush2.bf16.msra.mxu1 %v5381_v55  ;;  %v1399_v48 = vsel %vm1346_vm9, %v6486_v22, %v1398_v24  ;;  %v1662_v55 = vsel %vm1655_vm8, %v7035_v37, %v1661_v7  ;;  %v8493_v24 = vrot.slane %v6506_v35, 4  ;;  %v8494_v37 = vrot.slane %v6529_v38, 4 }
 0x1ba   : > { %v1312_v12 = vrot.slane %v7107_v53, 4  ;;  %v8395_v27 = vrot.slane %v7109_v57, 4  ;;  %v5347_v46 = vcombine.low %v1383_v3, %v1399_v48  ;;  %v5348_v29 = vcombine.high %v1383_v3, %v1399_v48 }
 0x1bb   : > { %1301 = vrot.lane.b32.xlu1 %v6590_v9, %s5581_s26  ;;  %1283 = vrot.lane.b32.xlu0 %v6567_v54, %s5581_s26 }
 0x1bc   : > { %4652 = vmatprep.subr.bf16.mxu0 %v5348_v29  ;;  %v1677_v5 = vsel %vm417_vm0, %v1630_v14, %v8395_v27  ;;  %v1350_v9 = vsel %vm417_vm0, %v8493_v24, %v1312_v12 }
 0x1bd   : > { %v7127_v22 = vpop.permute.xlu1 %1281  ;;  %v1262_v52 = vpop.permute.xlu0 %1261  ;;  %4653 = vmatpush2.bf16.msra.mxu0 %v5347_v46  ;;  %v1678_v32 = vsel %vm1655_vm8, %v1571_v42, %v1677_v5  ;;  %v1351_v46 = vsel %vm1346_vm9, %v6506_v35, %v1350_v9 }
 0x1be   : > { %v8391_v54 = vrot.slane %v7127_v22, 4  ;;  %v1321_v3 = vrot.slane %v1262_v52, 4  ;;  %v5365_v48 = vcombine.low %v1662_v55, %v1678_v32  ;;  %v5366_v29 = vcombine.high %v1662_v55, %v1678_v32 }
 0x1bf   : > { %1576 = vrot.lane.b32.xlu1 %v6747_v59, %s5580_s25  ;;  %1558 = vrot.lane.b32.xlu0 %v6724_v1, %s5580_s25 }
 0x1c0   : > { %4732 = vmatprep.subr.bf16.mxu1 %v5366_v29  ;;  %v1366_v42 = vsel %vm417_vm0, %v8494_v37, %v1321_v3  ;;  %v1384_v55 = vsel %vm417_vm0, %v1330_v44, %v8391_v54 }
 0x1c1   : > { %v7143_v14 = vpop.permute.xlu1 %2517  ;;  %v7145_v7 = vpop.permute.xlu0 %1299  ;;  %4733 = vmatpush2.bf16.msra.mxu1 %v5365_v48  ;;  %v1367_v5 = vsel %vm1346_vm9, %v6529_v38, %v1366_v42  ;;  %v1385_v9 = vsel %vm1346_vm9, %v7071_v31, %v1384_v55  ;;  %v8496_v31 = vrot.slane %v6574_v56, 4 }
 0x1c2   : > { %v2567_v32 = vrot.slane %v7143_v14, 4  ;;  %v8392_v24 = vrot.slane %v7145_v7, 4  ;;  %v5331_v29 = vcombine.low %v1351_v46, %v1367_v5  ;;  %v5332_v37 = vcombine.high %v1351_v46, %v1367_v5 }
 0x1c3   : > { %1265 = vrot.lane.b32.xlu1 %v6650_v62, %s5581_s26  ;;  %1247 = vrot.lane.b32.xlu0 %v6617_v13, %s5581_s26  ;;  %v8495_v62 = vrot.slane %v6548_v63, 4 }
 0x1c4   : > { %4654 = vmatprep.subr.bf16.mxu0 %v5332_v37  ;;  %v1400_v35 = vsel %vm417_vm0, %v1339_v40, %v8392_v24 }
 0x1c5   : > { %v7163_v38 = vpop.permute.xlu1 %1245  ;;  %v7165_v44 = vpop.permute.xlu0 %2535  ;;  %4655 = vmatpush2.bf16.msra.mxu0 %v5331_v29  ;;  %v1401_v48 = vsel %vm1346_vm9, %v1298_v16, %v1400_v35  ;;  %v2620_v42 = vsel %vm417_vm0, %v8495_v62, %v2567_v32 }
 0x1c6   : > { %v8387_v13 = vrot.slane %v7163_v38, 4  ;;  %v2576_v46 = vrot.slane %v7165_v44, 4  ;;  %v5349_v5 = vcombine.low %v1385_v9, %v1401_v48  ;;  %v5350_v40 = vcombine.high %v1385_v9, %v1401_v48 }
 0x1c7   : > { %1303 = vrot.lane.b32.xlu1 %v6698_v58, %s5581_s26  ;;  %1285 = vrot.lane.b32.xlu0 %v6673_v39, %s5581_s26  ;;  %v2621_v37 = vsel %vm2582_vm2, %v6548_v63, %v2620_v42 }
 0x1c8   : > { %4734 = vmatprep.subr.bf16.mxu1 %v5350_v40  ;;  %v2636_v16 = vsel %vm417_vm0, %v8496_v31, %v2576_v46  ;;  %4657 = vmatmul.mubr.bf16.vlgmr.msra.gmra.mxu0 %v6504_v26  ;;  %v1352_v9 = vsel %vm417_vm0, %v1312_v12, %v8387_v13 }
 0x1c9   : > { %v7183_v55 = vpop.permute.xlu1 %2481  ;;  %v7185_v29 = vpop.permute.xlu0 %1263  ;;  %4735 = vmatpush2.bf16.msra.mxu1 %v5349_v5  ;;  %v2637_v35 = vsel %vm2582_vm2, %v6574_v56, %v2636_v16  ;;  %4779 = vmatprep.mubr.bf16.mxu0 %v8454_v45  ;;  %v1353_v42 = vsel %vm1346_vm9, %v7107_v53, %v1352_v9  ;;  %v8497_v16 = vld [vmem:[#allocation11_spill] sm:$0xff]  ;;  %v8499_v53 = vld [vmem:[#allocation13_spill] sm:$0xff] }
 0x1ca   : > { %v2549_v48 = vrot.slane %v7183_v55, 4  ;;  %v8388_v62 = vrot.slane %v7185_v29, 4  ;;  %v5477_v40 = vcombine.low %v2621_v37, %v2637_v35  ;;  %v5478_v31 = vcombine.high %v2621_v37, %v2637_v35 }
 0x1cb   : > { %2539 = vrot.lane.b32.xlu1 %v6698_v58, %s5574_s20  ;;  %2521 = vrot.lane.b32.xlu0 %v6673_v39, %s5574_s20  ;;  %v8498_v58 = vrot.slane %v8497_v16, 4 }
 0x1cc   : > { %4759 = vmatprep.subr.bf16.mxu0 %v5478_v31  ;;  %v1368_v63 = vsel %vm417_vm0, %v1321_v3, %v8388_v62 }
 0x1cd   : > { %v7204_v56 = vpop.permute.xlu1 %2519  ;;  %v7206_v12 = vpop.permute.xlu0 %2499  ;;  %4760 = vmatpush1.bf16.msra.mxu0 %v5477_v40  ;;  %v1369_v5 = vsel %vm1346_vm9, %v1262_v52, %v1368_v63  ;;  %v2588_v37 = vsel %vm417_vm0, %v8498_v58, %v2549_v48  ;;  %v8500_v52 = vrot.slane %v8499_v53, 4 }
 0x1ce   : > { %v8389_v39 = vrot.slane %v7204_v56, 4  ;;  %v2558_v35 = vrot.slane %v7206_v12, 4  ;;  %v5333_v31 = vcombine.low %v1353_v42, %v1369_v5  ;;  %v5334_v3 = vcombine.high %v1353_v42, %v1369_v5 }
 0x1cf   : > { %1267 = vrot.lane.b32.xlu1 %v6747_v59, %s5581_s26  ;;  %1249 = vrot.lane.b32.xlu0 %v6724_v1, %s5581_s26  ;;  %v2589_v42 = vsel %vm2582_vm2, %v8497_v16, %v2588_v37  ;;  %v7241_v16 = vld [vmem:[%s5617_s18 + $0x104] sm:$0xff] }
 0x1d0   : > { %4736 = vmatprep.subr.bf16.mxu1 %v5334_v3  ;;  %v2604_v9 = vsel %vm417_vm0, %v8500_v52, %v2558_v35  ;;  %v2622_v58 = vsel %vm417_vm0, %v2567_v32, %v8389_v39  ;;  %v7244_v37 = vld [vmem:[%s5617_s18 + $0xc0] sm:$0xff] }
 0x1d1   : > { %v7223_v40 = vpop.permute.xlu1 %974  ;;  %v7225_v63 = vpop.permute.xlu0 %2537  ;;  %4737 = vmatpush2.bf16.msra.mxu1 %v5333_v31  ;;  %v2605_v5 = vsel %vm2582_vm2, %v8499_v53, %v2604_v9 }
 0x1d2   : > { %v1023_v3 = vrot.slane %v7223_v40, 4  ;;  %v8390_v13 = vrot.slane %v7225_v63, 4  ;;  %v5461_v52 = vcombine.low %v2589_v42, %v2605_v5  ;;  %v5462_v62 = vcombine.high %v2589_v42, %v2605_v5 }
 0x1d3   : > { %2503 = vrot.lane.b32.xlu1 %v6747_v59, %s5574_s20  ;;  %2485 = vrot.lane.b32.xlu0 %v6724_v1, %s5574_s20  ;;  %v2623_v59 = vsel %vm2582_vm2, %v7143_v14, %v2622_v58  ;;  %v8502_v14 = vrot.slane %v6680_v4, 4  ;;  %v8503_v58 = vld [vmem:[#allocation12_spill] sm:$0xff] }
 0x1d4   : > { %4761 = vmatprep.subr.bf16.mxu0 %v5462_v62  ;;  %v2638_v32 = vsel %vm417_vm0, %v2576_v46, %v8390_v13  ;;  %4739 = vmatmul.mubr.bf16.vlgmr.msra.gmra.mxu1 %v6504_v26  ;;  %v8501_v62 = vrot.slane %v6655_v61, 4 }
 0x1d5   : > { %v7250_v31 = vpop.permute.xlu1 %2483  ;;  %v7252_v53 = vpop.permute.xlu0 %992  ;;  %4762 = vmatpush1.bf16.msra.mxu0 %v5461_v52  ;;  %v2639_v1 = vsel %vm2582_vm2, %v7165_v44, %v2638_v32  ;;  %4861 = vmatprep.mubr.bf16.mxu1 %v8454_v45 }
 0x1d6   : > { %v1077_v9 = vsel %vm417_vm0, %v8501_v62, %v1023_v3  ;;  %v8393_v46 = vrot.slane %v7250_v31, 4  ;;  %v1032_v42 = vrot.slane %v7252_v53, 4  ;;  %v5479_v5 = vcombine.low %v2623_v59, %v2639_v1 }
 0x1d7   : > { %v5480_v52 = vcombine.high %v2623_v59, %v2639_v1  ;;  %2541 = vrot.lane.b32.xlu1 %v7241_v16, %s5574_s20  ;;  %2523 = vrot.lane.b32.xlu0 %v7244_v37, %s5574_s20  ;;  %v1078_v59 = vsel %vm1037_vm3, %v6655_v61, %v1077_v9  ;;  %v7294_v61 = vld [vmem:[%s5617_s18 + $0x7c] sm:$0xff] }
 0x1d8   : > { %v1093_v44 = vsel %vm417_vm0, %v8502_v14, %v1032_v42  ;;  %5490 = vmatmul.mubr.msk.bf16.vlgmr.msra.gmra.mxu0 %vm4456_vm4, %v8503_v58  ;;  %v8504_v14 = vld [vmem:[#allocation10_spill] sm:$0xff] }
 0x1d9   : > { %4841 = vmatprep.subr.bf16.mxu1 %v5480_v52  ;;  %v7275_v32 = vpop.permute.xlu1 %938  ;;  %v7277_v62 = vpop.permute.xlu0 %2501  ;;  %v1094_v1 = vsel %vm1037_vm3, %v6680_v4, %v1093_v44  ;;  %v2590_v52 = vsel %vm417_vm0, %v2549_v48, %v8393_v46  ;;  %4820 = vmatprep.mubr.bf16.mxu0 %v8504_v14  ;;  %v7297_v4 = vld [vmem:[%s5617_s18 + $0x38] sm:$0xff] }
 0x1da   : > { %4842 = vmatpush1.bf16.msra.mxu1 %v5479_v5  ;;  %v1005_v39 = vrot.slane %v7275_v32, 4  ;;  %v8396_v13 = vrot.slane %v7277_v62, 4  ;;  %v5319_v54 = vcombine.low %v1078_v59, %v1094_v1  ;;  %v5320_v24 = vcombine.high %v1078_v59, %v1094_v1 }
 0x1db   : > { %996 = vrot.lane.b32.xlu1 %v7241_v16, %s5575_s21  ;;  %978 = vrot.lane.b32.xlu0 %v7244_v37, %s5575_s21  ;;  %v2591_v44 = vsel %vm2582_vm2, %v7183_v55, %v2590_v52 }
 0x1dc   : > { %4788 = vmatprep.subr.bf16.mxu0 %v5320_v24  ;;  %v2606_v48 = vsel %vm417_vm0, %v2558_v35, %v8396_v13  ;;  %v8505_v24 = vld [vmem:[#allocation14_spill] sm:$0xff] }
 0x1dd   : > { %v7302_v9 = vpop.permute.xlu1 %976  ;;  %v7304_v5 = vpop.permute.xlu0 %956  ;;  %4789 = vmatpush1.bf16.msra.mxu0 %v5319_v54  ;;  %v2607_v59 = vsel %vm2582_vm2, %v7206_v12, %v2606_v48  ;;  %v8506_v1 = vrot.slane %v8505_v24, 4  ;;  %v8507_v54 = vld [vmem:[#allocation15_spill] sm:$0xff] }
 0x1de   : > { %v8399_v25 = vrot.slane %v7302_v9, 4  ;;  %v1014_v27 = vrot.slane %v7304_v5, 4  ;;  %v5463_v35 = vcombine.low %v2591_v44, %v2607_v59  ;;  %v5464_v13 = vcombine.high %v2591_v44, %v2607_v59 }
 0x1df   : > { %v1045_v46 = vsel %vm417_vm0, %v8506_v1, %v1005_v39  ;;  %2505 = vrot.lane.b32.xlu1 %v7294_v61, %s5574_s20  ;;  %2487 = vrot.lane.b32.xlu0 %v7297_v4, %s5574_s20  ;;  %v8508_v55 = vrot.slane %v8507_v54, 4 }
 0x1e0   : > { %4843 = vmatprep.subr.bf16.mxu1 %v5464_v13  ;;  %v1046_v44 = vsel %vm1037_vm3, %v8505_v24, %v1045_v46  ;;  %v1079_v13 = vsel %vm417_vm0, %v1023_v3, %v8399_v25  ;;  %v891_v46 = vld [vmem:[%s5617_s18 + $0x10c] sm:$0xf]  ;;  %v882_v24 = vld [vmem:[%s5617_s18 + $0xc8] sm:$0xf] }
 0x1e1   : > { %v1061_v12 = vsel %vm417_vm0, %v8508_v55, %v1014_v27  ;;  %v7322_v52 = vpop.permute.xlu1 %665  ;;  %v7324_v48 = vpop.permute.xlu0 %994  ;;  %4844 = vmatpush1.bf16.msra.mxu1 %v5463_v35 }
 0x1e2   : > { %v1062_v59 = vsel %vm1037_vm3, %v8507_v54, %v1061_v12  ;;  %v714_v1 = vrot.slane %v7322_v52, 4  ;;  %v8402_v55 = vrot.slane %v7324_v48, 4  ;;  %v1080_v12 = vsel %vm1037_vm3, %v7223_v40, %v1079_v13 }
 0x1e3   : > { %v5303_v8 = vcombine.low %v1046_v44, %v1062_v59  ;;  %v5304_v60 = vcombine.high %v1046_v44, %v1062_v59  ;;  %960 = vrot.lane.b32.xlu1 %v7294_v61, %s5575_s21  ;;  %942 = vrot.lane.b32.xlu0 %v7297_v4, %s5575_s21  ;;  %v8509_v44 = vrot.slane %v6752_v43, 4 }
 0x1e4   : > { %v1095_v35 = vsel %vm417_vm0, %v1032_v42, %v8402_v55  ;;  %5491 = vmatmul.mubr.msk.bf16.vlgmr.msra.gmra.mxu1 %vm4456_vm4, %v8503_v58 }
 0x1e5   : > { %4790 = vmatprep.subr.bf16.mxu0 %v5304_v60  ;;  %v7348_v3 = vpop.permute.xlu1 %940  ;;  %v7350_v54 = vpop.permute.xlu0 %683  ;;  %v1096_v60 = vsel %vm1037_vm3, %v7252_v53, %v1095_v35  ;;  %v768_v42 = vsel %vm417_vm0, %v8509_v44, %v714_v1  ;;  %4902 = vmatprep.mubr.bf16.mxu1 %v8504_v14 }
 0x1e6   : > { %4791 = vmatpush1.bf16.msra.mxu0 %v5303_v8  ;;  %v8400_v58 = vrot.slane %v7348_v3, 4  ;;  %v723_v59 = vrot.slane %v7350_v54, 4  ;;  %v5321_v25 = vcombine.low %v1080_v12, %v1096_v60  ;;  %v5322_v8 = vcombine.high %v1080_v12, %v1096_v60 }
 0x1e7   : > { %998 = vrot.lane.b32.xlu1 %v891_v46, %s5575_s21  ;;  %980 = vrot.lane.b32.xlu0 %v882_v24, %s5575_s21  ;;  %v769_v35 = vsel %vm728_vm5, %v6752_v43, %v768_v42  ;;  %v873_v43 = vld [vmem:[%s5617_s18 + $0x84] sm:$0xf] }
 0x1e8   : > { %4870 = vmatprep.subr.bf16.mxu1 %v5322_v8  ;;  %v784_v40 = vsel %vm417_vm0, %v722_v18, %v723_v59  ;;  %v1047_v24 = vsel %vm417_vm0, %v1005_v39, %v8400_v58 }
 0x1e9   : > { %v7369_v53 = vpop.permute.xlu1 %629  ;;  %v7371_v13 = vpop.permute.xlu0 %958  ;;  %4871 = vmatpush1.bf16.msra.mxu1 %v5321_v25  ;;  %v785_v46 = vsel %vm728_vm5, %v6771_v0, %v784_v40  ;;  %v864_v25 = vld [vmem:[%s5617_s18 + $0x40] sm:$0xf]  ;;  %v1048_v8 = vsel %vm1037_vm3, %v7275_v32, %v1047_v24 }
 0x1ea   : > { %v696_v12 = vrot.slane %v7369_v53, 4  ;;  %v8401_v60 = vrot.slane %v7371_v13, 4  ;;  %v5287_v18 = vcombine.low %v769_v35, %v785_v46  ;;  %v5288_v44 = vcombine.high %v769_v35, %v785_v46  ;;  %v7408_v32 = vpop.f32.mrf.mxu1 }
 0x1eb   : > { %687 = vrot.lane.b32.xlu1 %v7241_v16, %s5577_s22  ;;  %669 = vrot.lane.b32.xlu0 %v7244_v37, %s5577_s22  ;;  %v8510_v35 = vrot.slane %v6789_v21, 4 }
 0x1ec   : > { %4792 = vmatprep.subr.bf16.mxu0 %v5288_v44  ;;  %v1063_v0 = vsel %vm417_vm0, %v1014_v27, %v8401_v60  ;;  %v7428_v55 = vpop.f32.mrf.mxu1 }
 0x1ed   : > { %v7391_v39 = vpop.permute.xlu1 %667  ;;  %v7393_v42 = vpop.permute.xlu0 %647  ;;  %4793 = vmatpush1.bf16.msra.mxu0 %v5287_v18  ;;  %v1064_v40 = vsel %vm1037_vm3, %v7304_v5, %v1063_v0  ;;  %v736_v46 = vsel %vm417_vm0, %v8510_v35, %v696_v12  ;;  %v8511_v5 = vrot.slane %v6808_v30, 4 }
 0x1ee   : > { %v8403_v44 = vrot.slane %v7391_v39, 4  ;;  %v705_v27 = vrot.slane %v7393_v42, 4  ;;  %v5305_v58 = vcombine.low %v1048_v8, %v1064_v40  ;;  %v5306_v60 = vcombine.high %v1048_v8, %v1064_v40 }
 0x1ef   : > { %962 = vrot.lane.b32.xlu1 %v873_v43, %s5575_s21  ;;  %944 = vrot.lane.b32.xlu0 %v864_v25, %s5575_s21  ;;  %v737_v8 = vsel %vm728_vm5, %v6789_v21, %v736_v46  ;;  %v582_v21 = vld [vmem:[%s5617_s18 + $0x10c] sm:$0xf] }
 0x1f0   : > { %4872 = vmatprep.subr.bf16.mxu1 %v5306_v60  ;;  %v752_v24 = vsel %vm417_vm0, %v8511_v5, %v705_v27  ;;  %v770_v60 = vsel %vm417_vm0, %v714_v1, %v8403_v44  ;;  %v8512_v44 = vrot.slane %v6806_v41, 4 }
 0x1f1   : > { %v7413_v18 = vpop.permute.xlu1 %355  ;;  %v7415_v0 = vpop.permute.xlu0 %685  ;;  %4873 = vmatpush1.bf16.msra.mxu1 %v5305_v58  ;;  %v753_v43 = vsel %vm728_vm5, %v6808_v30, %v752_v24  ;;  %v573_v30 = vld [vmem:[%s5617_s18 + $0xc8] sm:$0xf] }
 0x1f2   : > { %v404_v25 = vrot.slane %v7413_v18, 4  ;;  %v8409_v40 = vrot.slane %v7415_v0, 4  ;;  %v5271_v35 = vcombine.low %v737_v8, %v753_v43  ;;  %v5272_v5 = vcombine.high %v737_v8, %v753_v43  ;;  %v4539_v58 = vpop.f32.mrf.mxu1 }
 0x1f3   : > { %651 = vrot.lane.b32.xlu1 %v7294_v61, %s5577_s22  ;;  %633 = vrot.lane.b32.xlu0 %v7297_v4, %s5577_s22  ;;  %v771_v8 = vsel %vm728_vm5, %v7322_v52, %v770_v60  ;;  %v8513_v52 = vrot.slane %v6833_v11, 4 }
 0x1f4   : > { %4794 = vmatprep.subr.bf16.mxu0 %v5272_v5  ;;  %v786_v1 = vsel %vm417_vm0, %v723_v59, %v8409_v40  ;;  %v459_v5 = vsel %vm417_vm0, %v8512_v44, %v404_v25  ;;  %v4540_v58 = vpop.f32.mrf.mxu1 }
 0x1f5   : > { %v7439_v46 = vpop.permute.xlu1 %631  ;;  %v374_v24 = vpop.permute.xlu0 %373  ;;  %4795 = vmatpush1.bf16.msra.mxu0 %v5271_v35  ;;  %v787_v43 = vsel %vm728_vm5, %v7350_v54, %v786_v1  ;;  %v460_v35 = vsel %vm419_vm1, %v6806_v41, %v459_v5  ;;  %v8514_v41 = vld [vmem:[#allocation5_spill] sm:$0xff]  ;;  %v555_v5 = vld [vmem:[%s5617_s18 + $0x40] sm:$0xf] }
 0x1f6   : > { %v8407_v17 = vrot.slane %v7439_v46, 4  ;;  %v413_v2 = vrot.slane %v374_v24, 4  ;;  %v5289_v23 = vcombine.low %v771_v8, %v787_v43  ;;  %v5290_v59 = vcombine.high %v771_v8, %v787_v43 }
 0x1f7   : > { %689 = vrot.lane.b32.xlu1 %v582_v21, %s5577_s22  ;;  %671 = vrot.lane.b32.xlu0 %v573_v30, %s5577_s22 }
 0x1f8   : > { %4874 = vmatprep.subr.bf16.mxu1 %v5290_v59  ;;  %v475_v54 = vsel %vm417_vm0, %v8513_v52, %v413_v2  ;;  %v738_v30 = vsel %vm417_vm0, %v696_v12, %v8407_v17  ;;  %v8515_v17 = vld [vmem:[#allocation8_spill] sm:$0xff] }
 0x1f9   : > { %v7454_v60 = vpop.permute.xlu1 %357  ;;  %v7456_v44 = vpop.permute.xlu0 %649  ;;  %4875 = vmatpush1.bf16.msra.mxu1 %v5289_v23  ;;  %v476_v21 = vsel %vm419_vm1, %v6833_v11, %v475_v54  ;;  %v8412_v11 = vrot.slane %v8514_v41, 4  ;;  %v564_v23 = vld [vmem:[%s5617_s18 + $0x84] sm:$0xf]  ;;  %v739_v54 = vsel %vm728_vm5, %v7369_v53, %v738_v30  ;;  %v263_v53 = vld [vmem:[%s5617_s18 + $0xc8] sm:$0xf] }
 0x1fa   : > { %v8414_v1 = vrot.slane %v7454_v60, 4  ;;  %v8408_v8 = vrot.slane %v7456_v44, 4  ;;  %v5255_v43 = vcombine.low %v460_v35, %v476_v21  ;;  %v5256_v59 = vcombine.high %v460_v35, %v476_v21 }
 0x1fb   : > { %377 = vrot.lane.b32.xlu1 %v7241_v16, %s5573_s19  ;;  %359 = vrot.lane.b32.xlu0 %v7244_v37, %s5573_s19 }
 0x1fc   : > { %4796 = vmatprep.subr.bf16.mxu0 %v5256_v59  ;;  %v754_v12 = vsel %vm417_vm0, %v705_v27, %v8408_v8  ;;  %v461_v21 = vsel %vm417_vm0, %v404_v25, %v8414_v1  ;;  %v8516_v8 = vld [vmem:[#allocation9_spill] sm:$0xff]  ;;  %v8518_v25 = vld [vmem:[#allocation3_spill] sm:$0xff] }
 0x1fd   : > { %v7479_v58 = vpop.permute.xlu1 %339  ;;  %v7481_v52 = vpop.permute.xlu0 %375  ;;  %4797 = vmatpush1.bf16.msra.mxu0 %v5255_v43  ;;  %v755_v35 = vsel %vm728_vm5, %v7393_v42, %v754_v12  ;;  %v8517_v40 = vcombine.high %v8515_v17, %v8516_v8  ;;  %v8519_v30 = vrot.slane %v8518_v25, 4  ;;  %v8520_v12 = vld [vmem:[#allocation7_spill] sm:$0xff] }
 0x1fe   : > { %v8413_v59 = vrot.slane %v7479_v58, 4  ;;  %v8415_v27 = vrot.slane %v7481_v52, 4  ;;  %v5273_v43 = vcombine.low %v739_v54, %v755_v35  ;;  %v5274_v20 = vcombine.high %v739_v54, %v755_v35  ;;  %v5539_v35 = vld [vmem:[%s5617_s18 + $0xa8] ss:$68 sps:$4 sm:$0xff]  }
 0x1ff   : > { %4798 = vmatprep.subr.bf16.mxu0 %v8517_v40  ;;  %653 = vrot.lane.b32.xlu1 %v564_v23, %s5577_s22  ;;  %v429_v40 = vsel %vm417_vm0, %v8519_v30, %v8412_v11  ;;  %v8521_v54 = vrot.slane %v8520_v12, 4  ;;  %v462_v30 = vsel %vm419_vm1, %v7413_v18, %v461_v21 }
 0x200   : > { %635 = vrot.lane.b32.xlu0 %v555_v5, %s5577_s22  ;;  %4876 = vmatprep.subr.bf16.mxu1 %v5274_v20  ;;  %v477_v42 = vsel %vm417_vm0, %v413_v2, %v8415_v27  ;;  %v8522_v2 = vcombine.low %v8515_v17, %v8516_v8  ;;  %v5544_v8 = vld [vmem:[%s5617_s18 + $0x24] ss:$68 sps:$4 sm:$0xff]   ;;  %v430_v18 = vsel %vm419_vm1, %v8518_v25, %v429_v40 }
 0x201   : > { %v445_v23 = vsel %vm417_vm0, %v8521_v54, %v8413_v59  ;;  %v7512_v5 = vpop.permute.xlu1 %2228  ;;  %v7514_v20 = vpop.permute.xlu0 %2210  ;;  %4877 = vmatpush1.bf16.msra.mxu1 %v5273_v43  ;;  %v478_v11 = vsel %vm419_vm1, %v374_v24, %v477_v42  ;;  %v8523_v24 = vrot.slane %v6913_v36, 4  ;;  %v272_v42 = vld [vmem:[%s5617_s18 + $0x10c] sm:$0xf]  ;;  %v5542_v25 = vld [vmem:[%s5617_s18 + $0x20] ss:$68 sps:$4 sm:$0xff]  }
 0x202   : > { %4799 = vmatpush1.bf16.msra.mxu0 %v8522_v2  ;;  %v446_v54 = vsel %vm419_vm1, %v8520_v12, %v445_v23  ;;  %v2268_v59 = vrot.slane %v7512_v5, 4  ;;  %v2259_v1 = vrot.slane %v7514_v20, 4  ;;  %v5257_v27 = vcombine.low %v462_v30, %v478_v11 }
 0x203   : > { %4800 = vmatprep.subr.bf16.mxu0 %v5541_v47  ;;  %v5258_v17 = vcombine.high %v462_v30, %v478_v11  ;;  %361 = vrot.lane.b32.xlu1 %v263_v53, %s5573_s19  ;;  %v5242_v43 = vcombine.high %v430_v18, %v446_v54  ;;  %v254_v47 = vld [vmem:[%s5617_s18 + $0x84] sm:$0xf]  ;;  %v8524_v11 = vrot.slane %v6884_v10, 4 }
 0x204   : > { %341 = vrot.lane.b32.xlu0 %v7294_v61, %s5573_s19  ;;  %v2329_v21 = vsel %vm417_vm0, %v8523_v24, %v2268_v59  ;;  %v5547_v24 = vld [vmem:[%s5617_s18 + $0xb4] ss:$68 sps:$4 sm:$0xff]  }
 0x205   : > { %4878 = vmatprep.subr.bf16.mxu1 %v5258_v17  ;;  %v2313_v12 = vsel %vm417_vm0, %v8524_v11, %v2259_v1  ;;  %v7541_v53 = vpop.permute.xlu1 %2192  ;;  %v7543_v23 = vpop.permute.xlu0 %2174  ;;  %v2330_v2 = vsel %vm2273_vm6, %v6913_v36, %v2329_v21  ;;  %v5241_v11 = vcombine.low %v430_v18, %v446_v54  ;;  %v5545_v18 = vld [vmem:[%s5617_s18 + $0xb0] ss:$68 sps:$4 sm:$0xff]  }
 0x206   : > { %4801 = vmatpush1.bf16.msra.mxu0 %v5539_v35  ;;  %4879 = vmatpush1.bf16.msra.mxu1 %v5257_v27  ;;  %v2314_v40 = vsel %vm2273_vm6, %v6884_v10, %v2313_v12  ;;  %v2250_v30 = vrot.slane %v7541_v53, 4  ;;  %v8418_v17 = vrot.slane %v7543_v23, 4  ;;  %v8525_v10 = vrot.slane %v6957_v28, 4 }
 0x207   : > { %4880 = vmatprep.subr.bf16.mxu1 %v5242_v43  ;;  %4802 = vmatprep.subr.bf16.mxu0 %v5544_v8  ;;  %v8526_v27 = vrot.slane %v6933_v50, 4  ;;  %v5448_v8 = vcombine.high %v2314_v40, %v2330_v2 }
 0x208   : > { %343 = vrot.lane.b32.xlu1 %v254_v47, %s5573_s19  ;;  %379 = vrot.lane.b32.xlu0 %v272_v42, %s5573_s19  ;;  %v2297_v36 = vsel %vm417_vm0, %v8525_v10, %v2250_v30  ;;  %v5550_v10 = vld [vmem:[%s5617_s18 + $0x2c] ss:$68 sps:$4 sm:$0xff]  }
 0x209   : > { %v2281_v35 = vsel %vm417_vm0, %v8526_v27, %v8418_v17  ;;  %v7565_v21 = vpop.permute.xlu1 %2230  ;;  %v7567_v54 = vpop.permute.xlu0 %2212  ;;  %v2298_v47 = vsel %vm2273_vm6, %v6957_v28, %v2297_v36  ;;  %v5447_v27 = vcombine.low %v2314_v40, %v2330_v2  ;;  %v5548_v40 = vld [vmem:[%s5617_s18 + $0x28] ss:$68 sps:$4 sm:$0xff]  }
 0x20a   : > { %4803 = vmatpush1.bf16.msra.mxu0 %v5542_v25  ;;  %4881 = vmatpush1.bf16.msra.mxu1 %v5241_v11  ;;  %v2282_v43 = vsel %vm2273_vm6, %v6933_v50, %v2281_v35  ;;  %v8417_v42 = vrot.slane %v7565_v21, 4  ;;  %v8416_v12 = vrot.slane %v7567_v54, 4 }
 0x20b   : > { %4804 = vmatprep.subr.bf16.mxu0 %v5448_v8  ;;  %4882 = vmatprep.subr.bf16.mxu1 %v5547_v24  ;;  %v5432_v25 = vcombine.high %v2282_v43, %v2298_v47  ;;  %v5431_v35 = vcombine.low %v2282_v43, %v2298_v47  ;;  %v8527_v8 = vrot.slane %v6998_v51, 4 }
 0x20c   : > { %2232 = vrot.lane.b32.xlu1 %v7241_v16, %s5578_s23  ;;  %2214 = vrot.lane.b32.xlu0 %v7244_v37, %s5578_s23  ;;  %v2331_v50 = vsel %vm417_vm0, %v2268_v59, %v8417_v42  ;;  %v2315_v28 = vsel %vm417_vm0, %v2259_v1, %v8416_v12 }
 0x20d   : > { %v7587_v11 = vpop.permute.xlu1 %1919  ;;  %v7589_v24 = vpop.permute.xlu0 %1901  ;;  %v2316_v2 = vsel %vm2273_vm6, %v7514_v20, %v2315_v28  ;;  %v2332_v59 = vsel %vm2273_vm6, %v7512_v5, %v2331_v50  ;;  %v2127_v50 = vld [vmem:[%s5617_s18 + $0x10c] sm:$0xf]  ;;  %v2118_v28 = vld [vmem:[%s5617_s18 + $0xc8] sm:$0xf] }
 0x20e   : > { %4805 = vmatpush2.bf16.msra.mxu0 %v5447_v27  ;;  %4883 = vmatpush1.bf16.msra.mxu1 %v5545_v18  ;;  %v1959_v36 = vrot.slane %v7587_v11, 4  ;;  %v1950_v1 = vrot.slane %v7589_v24, 4  ;;  %v8528_v18 = vrot.slane %v6979_v34, 4  ;;  %v5450_v27 = vcombine.high %v2316_v2, %v2332_v59 }
 0x20f   : > { %4806 = vmatprep.subr.bf16.mxu0 %v5432_v25  ;;  %4884 = vmatprep.subr.bf16.mxu1 %v5550_v10  ;;  %v5449_v17 = vcombine.low %v2316_v2, %v2332_v59 }
 0x210   : > { %2196 = vrot.lane.b32.xlu1 %v7294_v61, %s5578_s23  ;;  %2178 = vrot.lane.b32.xlu0 %v7297_v4, %s5578_s23  ;;  %v2020_v20 = vsel %vm417_vm0, %v8527_v8, %v1959_v36  ;;  %v2004_v5 = vsel %vm417_vm0, %v8528_v18, %v1950_v1 }
 0x211   : > { %v7610_v25 = vpop.permute.xlu1 %2194  ;;  %v7612_v43 = vpop.permute.xlu0 %2176  ;;  %v2005_v47 = vsel %vm1964_vm7, %v6979_v34, %v2004_v5  ;;  %v2021_v10 = vsel %vm1964_vm7, %v6998_v51, %v2020_v20  ;;  %v8529_v51 = vrot.slane %v7543_v23, 4 }
 0x212   : > { %4807 = vmatpush2.bf16.msra.mxu0 %v5431_v35  ;;  %4885 = vmatpush1.bf16.msra.mxu1 %v5548_v40  ;;  %v8426_v8 = vrot.slane %v7610_v25, 4  ;;  %v8425_v12 = vrot.slane %v7612_v43, 4  ;;  %v5415_v18 = vcombine.low %v2005_v47, %v2021_v10  ;;  %v5416_v42 = vcombine.high %v2005_v47, %v2021_v10  ;;  %v2100_v47 = vld [vmem:[%s5617_s18 + $0x40] sm:$0xf] }
 0x213   : > { %4886 = vmatprep.subr.bf16.mxu1 %v5450_v27 }
 0x214   : > { %2234 = vrot.lane.b32.xlu1 %v2127_v50, %s5578_s23  ;;  %2216 = vrot.lane.b32.xlu0 %v2118_v28, %s5578_s23  ;;  %v2299_v34 = vsel %vm417_vm0, %v2250_v30, %v8426_v8  ;;  %v2283_v40 = vsel %vm417_vm0, %v8529_v51, %v8425_v12  ;;  %v2109_v28 = vld [vmem:[%s5617_s18 + $0x84] sm:$0xf] }
 0x215   : > { %4808 = vmatprep.subr.bf16.mxu0 %v5416_v42  ;;  %v7632_v35 = vpop.permute.xlu1 %1883  ;;  %v7634_v2 = vpop.permute.xlu0 %1865  ;;  %v2284_v59 = vsel %vm2273_vm6, %v7543_v23, %v2283_v40  ;;  %v2300_v30 = vsel %vm2273_vm6, %v7541_v53, %v2299_v34  ;;  %v8531_v23 = vrot.slane %v7018_v49, 4 }
 0x216   : > { %4809 = vmatpush2.bf16.msra.mxu0 %v5415_v18  ;;  %4887 = vmatpush2.bf16.msra.mxu1 %v5449_v17  ;;  %v1941_v20 = vrot.slane %v7632_v35, 4  ;;  %v1932_v5 = vrot.slane %v7634_v2, 4  ;;  %v5433_v27 = vcombine.low %v2284_v59, %v2300_v30  ;;  %v5434_v42 = vcombine.high %v2284_v59, %v2300_v30 }
 0x217   : > { %v8530_v17 = vrot.slane %v7037_v19, 4 }
 0x218   : > { %1923 = vrot.lane.b32.xlu1 %v7241_v16, %s5579_s24  ;;  %1905 = vrot.lane.b32.xlu0 %v7244_v37, %s5579_s24  ;;  %v1972_v53 = vsel %vm417_vm0, %v8531_v23, %v1932_v5 }
 0x219   : > { %v1988_v50 = vsel %vm417_vm0, %v8530_v17, %v1941_v20  ;;  %4888 = vmatprep.subr.bf16.mxu1 %v5434_v42  ;;  %v7654_v10 = vpop.permute.xlu1 %1921  ;;  %v7656_v18 = vpop.permute.xlu0 %1903  ;;  %v1973_v34 = vsel %vm1964_vm7, %v7018_v49, %v1972_v53 }
 0x21a   : > { %4889 = vmatpush2.bf16.msra.mxu1 %v5433_v27  ;;  %v1989_v51 = vsel %vm1964_vm7, %v7037_v19, %v1988_v50  ;;  %v8422_v40 = vrot.slane %v7654_v10, 4  ;;  %v8419_v59 = vrot.slane %v7656_v18, 4 }
 0x21b   : > { %v5399_v30 = vcombine.low %v1973_v34, %v1989_v51  ;;  %v5400_v17 = vcombine.high %v1973_v34, %v1989_v51  ;;  %v1818_v51 = vld [vmem:[%s5617_s18 + $0x10c] sm:$0xf] }
 0x21c   : > { %2198 = vrot.lane.b32.xlu1 %v2109_v28, %s5578_s23  ;;  %2180 = vrot.lane.b32.xlu0 %v2100_v47, %s5578_s23  ;;  %v2022_v27 = vsel %vm417_vm0, %v1959_v36, %v8422_v40  ;;  %v2006_v49 = vsel %vm417_vm0, %v1950_v1, %v8419_v59  ;;  %v8532_v47 = vrot.slane %v7073_v6, 4 }
 0x21d   : > { %4810 = vmatprep.subr.bf16.mxu0 %v5400_v17  ;;  %v7672_v19 = vpop.permute.xlu1 %1610  ;;  %v7674_v42 = vpop.permute.xlu0 %1592  ;;  %v2007_v50 = vsel %vm1964_vm7, %v7589_v24, %v2006_v49  ;;  %v2023_v23 = vsel %vm1964_vm7, %v7587_v11, %v2022_v27  ;;  %v8533_v24 = vrot.slane %v7055_v15, 4 }
 0x21e   : > { %4811 = vmatpush2.bf16.msra.mxu0 %v5399_v30  ;;  %v1650_v36 = vrot.slane %v7672_v19, 4  ;;  %v1641_v53 = vrot.slane %v7674_v42, 4  ;;  %v5417_v28 = vcombine.low %v2007_v50, %v2023_v23  ;;  %v5418_v1 = vcombine.high %v2007_v50, %v2023_v23  ;;  %v1809_v30 = vld [vmem:[%s5617_s18 + $0xc8] sm:$0xf] }
 0x220   : > { %1887 = vrot.lane.b32.xlu1 %v7294_v61, %s5579_s24  ;;  %1869 = vrot.lane.b32.xlu0 %v7297_v4, %s5579_s24  ;;  %v1711_v34 = vsel %vm417_vm0, %v8532_v47, %v1650_v36  ;;  %v1695_v11 = vsel %vm417_vm0, %v8533_v24, %v1641_v53 }
 0x221   : > { %4890 = vmatprep.subr.bf16.mxu1 %v5418_v1  ;;  %v7694_v17 = vpop.permute.xlu1 %1885  ;;  %v7696_v27 = vpop.permute.xlu0 %1867  ;;  %v1696_v49 = vsel %vm1655_vm8, %v7055_v15, %v1695_v11  ;;  %v1712_v50 = vsel %vm1655_vm8, %v7073_v6, %v1711_v34 }
 0x222   : > { %4891 = vmatpush2.bf16.msra.mxu1 %v5417_v28  ;;  %v8421_v23 = vrot.slane %v7694_v17, 4  ;;  %v8420_v47 = vrot.slane %v7696_v27, 4  ;;  %v5383_v59 = vcombine.low %v1696_v49, %v1712_v50  ;;  %v5384_v24 = vcombine.high %v1696_v49, %v1712_v50  ;;  %v1800_v50 = vld [vmem:[%s5617_s18 + $0x84] sm:$0xf] }
 0x224   : > { %1925 = vrot.lane.b32.xlu1 %v1818_v51, %s5579_s24  ;;  %1907 = vrot.lane.b32.xlu0 %v1809_v30, %s5579_s24  ;;  %v1990_v28 = vsel %vm417_vm0, %v1941_v20, %v8421_v23  ;;  %v1974_v15 = vsel %vm417_vm0, %v1932_v5, %v8420_v47 }
 0x225   : > { %4812 = vmatprep.subr.bf16.mxu0 %v5384_v24  ;;  %v7712_v6 = vpop.permute.xlu1 %1574  ;;  %v7714_v1 = vpop.permute.xlu0 %1556  ;;  %v1975_v34 = vsel %vm1964_vm7, %v7634_v2, %v1974_v15  ;;  %v1991_v11 = vsel %vm1964_vm7, %v7632_v35, %v1990_v28  ;;  %v8535_v2 = vrot.slane %v7091_v33, 4  ;;  %v1791_v24 = vld [vmem:[%s5617_s18 + $0x40] sm:$0xf] }
 0x226   : > { %4813 = vmatpush2.bf16.msra.mxu0 %v5383_v59  ;;  %v1632_v20 = vrot.slane %v7712_v6, 4  ;;  %v1623_v51 = vrot.slane %v7714_v1, 4  ;;  %v5401_v30 = vcombine.low %v1975_v34, %v1991_v11  ;;  %v5402_v5 = vcombine.high %v1975_v34, %v1991_v11  ;;  %v7734_v28 = vpop.f32.mrf.mxu0 }
 0x227   : > { %v8534_v59 = vrot.slane %v7109_v57, 4 }
 0x228   : > { %1614 = vrot.lane.b32.xlu1 %v7241_v16, %s5580_s25  ;;  %1596 = vrot.lane.b32.xlu0 %v7244_v37, %s5580_s25  ;;  %v1663_v35 = vsel %vm417_vm0, %v8535_v2, %v1623_v51  ;;  %v7746_v40 = vpop.f32.mrf.mxu0 }
 0x229   : > { %v1679_v49 = vsel %vm417_vm0, %v8534_v59, %v1632_v20  ;;  %4892 = vmatprep.subr.bf16.mxu1 %v5402_v5  ;;  %v7736_v15 = vpop.permute.xlu1 %1612  ;;  %v7738_v34 = vpop.permute.xlu0 %1594  ;;  %v1664_v11 = vsel %vm1655_vm8, %v7091_v33, %v1663_v35 }
 0x22a   : > { %4893 = vmatpush2.bf16.msra.mxu1 %v5401_v30  ;;  %v1680_v59 = vsel %vm1655_vm8, %v7109_v57, %v1679_v49  ;;  %v8424_v47 = vrot.slane %v7736_v15, 4  ;;  %v8423_v2 = vrot.slane %v7738_v34, 4  ;;  %v4498_v57 = vpop.f32.mrf.mxu0 }
 0x22b   : > { %v5367_v5 = vcombine.low %v1664_v11, %v1680_v59  ;;  %v5368_v23 = vcombine.high %v1664_v11, %v1680_v59  ;;  %v1509_v57 = vld [vmem:[%s5617_s18 + $0x10c] sm:$0xf] }
 0x22c   : > { %1889 = vrot.lane.b32.xlu1 %v1800_v50, %s5579_s24  ;;  %1871 = vrot.lane.b32.xlu0 %v1791_v24, %s5579_s24  ;;  %v1713_v30 = vsel %vm417_vm0, %v1650_v36, %v8424_v47  ;;  %v1697_v33 = vsel %vm417_vm0, %v1641_v53, %v8423_v2  ;;  %v4499_v59 = vpop.f32.mrf.mxu0 }
 0x22d   : > { %4814 = vmatprep.subr.bf16.mxu0 %v5368_v23  ;;  %v7756_v49 = vpop.permute.xlu1 %1301  ;;  %v7758_v35 = vpop.permute.xlu0 %1283  ;;  %v1698_v50 = vsel %vm1655_vm8, %v7674_v42, %v1697_v33  ;;  %v1714_v24 = vsel %vm1655_vm8, %v7672_v19, %v1713_v30  ;;  %v8536_v42 = vrot.slane %v7145_v7, 4  ;;  %v8537_v30 = vrot.slane %v7127_v22, 4 }
 0x22e   : > { %4815 = vmatpush2.bf16.msra.mxu0 %v5367_v5  ;;  %v8428_v36 = vrot.slane %v7756_v49, 4  ;;  %v8427_v11 = vrot.slane %v7758_v35, 4  ;;  %v5385_v53 = vcombine.low %v1698_v50, %v1714_v24  ;;  %v5386_v23 = vcombine.high %v1698_v50, %v1714_v24  ;;  %v7770_v5 = vpop.f32.mrf.mxu1  ;;  %v1500_v50 = vld [vmem:[%s5617_s18 + $0xc8] sm:$0xf]  ;;  %v7784_v24 = vpop.f32.mrf.mxu0 }
 0x230   : > { %1578 = vrot.lane.b32.xlu1 %v7294_v61, %s5580_s25  ;;  %1560 = vrot.lane.b32.xlu0 %v7297_v4, %s5580_s25  ;;  %v1402_v19 = vsel %vm417_vm0, %v8536_v42, %v8428_v36  ;;  %v1386_v33 = vsel %vm417_vm0, %v8537_v30, %v8427_v11  ;;  %v7796_v11 = vpop.f32.mrf.mxu1  ;;  %v7798_v36 = vpop.f32.mrf.mxu0 }
 0x231   : > { %4894 = vmatprep.subr.bf16.mxu1 %v5386_v23  ;;  %v7786_v59 = vpop.permute.xlu1 %1576  ;;  %v7788_v2 = vpop.permute.xlu0 %1558  ;;  %v1387_v47 = vsel %vm1346_vm9, %v7127_v22, %v1386_v33  ;;  %v1403_v42 = vsel %vm1346_vm9, %v7145_v7, %v1402_v19  ;;  %8538 = vst [vmem:[#allocation11_spill] sm:$0xff] %v7798_v36 }
 0x232   : > { %4895 = vmatpush2.bf16.msra.mxu1 %v5385_v53  ;;  %v8430_v12 = vrot.slane %v7786_v59, 4  ;;  %v8429_v30 = vrot.slane %v7788_v2, 4  ;;  %v5351_v23 = vcombine.low %v1387_v47, %v1403_v42  ;;  %v5352_v8 = vcombine.high %v1387_v47, %v1403_v42  ;;  %v4580_v53 = vpop.f32.mrf.mxu1  ;;  %v4621_v19 = vpop.f32.mrf.mxu0 }
 0x234   : > { %1616 = vrot.lane.b32.xlu1 %v1509_v57, %s5580_s25  ;;  %1598 = vrot.lane.b32.xlu0 %v1500_v50, %s5580_s25  ;;  %v1681_v22 = vsel %vm417_vm0, %v1632_v20, %v8430_v12  ;;  %v1665_v7 = vsel %vm417_vm0, %v1623_v51, %v8429_v30  ;;  %v4581_v53 = vpop.f32.mrf.mxu1  ;;  %v4622_v19 = vpop.f32.mrf.mxu0  ;;  %v1482_v30 = vld [vmem:[%s5617_s18 + $0x40] sm:$0xf] }
 0x235   : > { %4816 = vmatprep.subr.bf16.mxu0 %v5352_v8  ;;  %v7808_v47 = vpop.permute.xlu1 %1265  ;;  %v7810_v33 = vpop.permute.xlu0 %1247  ;;  %v1666_v57 = vsel %vm1655_vm8, %v7714_v1, %v1665_v7  ;;  %v1682_v20 = vsel %vm1655_vm8, %v7712_v6, %v1681_v22  ;;  %v8540_v6 = vrot.slane %v7163_v38, 4  ;;  %v1491_v7 = vld [vmem:[%s5617_s18 + $0x84] sm:$0xf] }
 0x236   : > { %4817 = vmatpush2.bf16.msra.mxu0 %v5351_v23  ;;  %v1323_v50 = vrot.slane %v7808_v47, 4  ;;  %v1314_v51 = vrot.slane %v7810_v33, 4  ;;  %v5369_v8 = vcombine.low %v1666_v57, %v1682_v20  ;;  %v5370_v42 = vcombine.high %v1666_v57, %v1682_v20  ;;  %v7830_v57 = vpop.f32.mrf.mxu1 }
 0x237   : > { %v8539_v23 = vrot.slane %v7185_v29, 4  ;;  %8541 = vst [vmem:[#allocation13_spill] sm:$0xff] %v7830_v57 }
 0x238   : > { %1305 = vrot.lane.b32.xlu1 %v7241_v16, %s5581_s26  ;;  %1287 = vrot.lane.b32.xlu0 %v7244_v37, %s5581_s26  ;;  %v1354_v22 = vsel %vm417_vm0, %v8540_v6, %v1314_v51  ;;  %v7842_v12 = vpop.f32.mrf.mxu1 }
 0x239   : > { %v1370_v1 = vsel %vm417_vm0, %v8539_v23, %v1323_v50  ;;  %4896 = vmatprep.subr.bf16.mxu1 %v5370_v42  ;;  %v7832_v20 = vpop.permute.xlu1 %1303  ;;  %v7834_v53 = vpop.permute.xlu0 %1285  ;;  %v1355_v16 = vsel %vm1346_vm9, %v7163_v38, %v1354_v22  ;;  %8542 = vst [vmem:[#allocation12_spill] sm:$0xff] %v7842_v12 }
 0x23a   : > { %4897 = vmatpush2.bf16.msra.mxu1 %v5369_v8  ;;  %v1371_v37 = vsel %vm1346_vm9, %v7185_v29, %v1370_v1  ;;  %v8431_v19 = vrot.slane %v7832_v20, 4  ;;  %v8432_v23 = vrot.slane %v7834_v53, 4  ;;  %v8543_v8 = vrot.slane %v7756_v49, 4  ;;  %v4703_v22 = vpop.f32.mrf.mxu1 }
 0x23b   : > { %v5335_v42 = vcombine.low %v1355_v16, %v1371_v37  ;;  %v5336_v6 = vcombine.high %v1355_v16, %v1371_v37  ;;  %v8544_v29 = vrot.slane %v7758_v35, 4 }
 0x23c   : > { %1580 = vrot.lane.b32.xlu1 %v1491_v7, %s5580_s25  ;;  %1562 = vrot.lane.b32.xlu0 %v1482_v30, %s5580_s25  ;;  %v1404_v38 = vsel %vm417_vm0, %v8543_v8, %v8431_v19  ;;  %v4704_v22 = vpop.f32.mrf.mxu1 }
 0x23d   : > { %v1388_v1 = vsel %vm417_vm0, %v8544_v29, %v8432_v23  ;;  %4818 = vmatprep.subr.bf16.mxu0 %v5336_v6  ;;  %v7856_v16 = vpop.permute.xlu1 %2539  ;;  %v7858_v7 = vpop.permute.xlu0 %2521  ;;  %v1405_v37 = vsel %vm1346_vm9, %v7756_v49, %v1404_v38  ;;  %v1200_v38 = vld [vmem:[%s5617_s18 + $0x10c] sm:$0xf] }
 0x23e   : > { %4819 = vmatpush2.bf16.msra.mxu0 %v5335_v42  ;;  %v1389_v30 = vsel %vm1346_vm9, %v7758_v35, %v1388_v1  ;;  %v2578_v8 = vrot.slane %v7856_v16, 4  ;;  %v2569_v19 = vrot.slane %v7858_v7, 4  ;;  %v8545_v42 = vrot.slane %v7225_v63, 4 }
 0x23f   : > { %v5353_v29 = vcombine.low %v1389_v30, %v1405_v37  ;;  %v5354_v6 = vcombine.high %v1389_v30, %v1405_v37  ;;  %v8546_v1 = vrot.slane %v7204_v56, 4  ;;  %v1191_v30 = vld [vmem:[%s5617_s18 + $0xc8] sm:$0xf] }
 0x240   : > { %1269 = vrot.lane.b32.xlu1 %v7294_v61, %s5581_s26  ;;  %1251 = vrot.lane.b32.xlu0 %v7297_v4, %s5581_s26  ;;  %v2640_v35 = vsel %vm417_vm0, %v8545_v42, %v2578_v8 }
 0x241   : > { %v2624_v49 = vsel %vm417_vm0, %v8546_v1, %v2569_v19  ;;  %4898 = vmatprep.subr.bf16.mxu1 %v5354_v6  ;;  %4821 = vmatmul.mubr.bf16.vlgmr.msra.gmra.mxu0 %v6504_v26  ;;  %v7879_v37 = vpop.permute.xlu1 %1267  ;;  %v7881_v61 = vpop.permute.xlu0 %1249  ;;  %v2641_v22 = vsel %vm2582_vm2, %v7225_v63, %v2640_v35  ;;  %v2436_v63 = vld [vmem:[%s5617_s18 + $0x10c] sm:$0xf]  ;;  %v2427_v35 = vld [vmem:[%s5617_s18 + $0xc8] sm:$0xf] }
 0x242   : > { %4899 = vmatpush2.bf16.msra.mxu1 %v5353_v29  ;;  %v2625_v4 = vsel %vm2582_vm2, %v7204_v56, %v2624_v49  ;;  %4943 = vmatprep.mubr.bf16.mxu0 %v8454_v45  ;;  %v8434_v6 = vrot.slane %v7879_v37, 4  ;;  %v8433_v42 = vrot.slane %v7881_v61, 4 }
 0x243   : > { %v5481_v1 = vcombine.low %v2625_v4, %v2641_v22  ;;  %v5482_v23 = vcombine.high %v2625_v4, %v2641_v22 }
 0x244   : > { %1307 = vrot.lane.b32.xlu1 %v1200_v38, %s5581_s26  ;;  %1289 = vrot.lane.b32.xlu0 %v1191_v30, %s5581_s26  ;;  %v1372_v29 = vsel %vm417_vm0, %v1323_v50, %v8434_v6  ;;  %v1356_v56 = vsel %vm417_vm0, %v1314_v51, %v8433_v42  ;;  %v8547_v42 = vrot.slane %v7277_v62, 4  ;;  %v8548_v6 = vrot.slane %v7250_v31, 4 }
 0x245   : > { %4923 = vmatprep.subr.bf16.mxu0 %v5482_v23  ;;  %v7900_v49 = vpop.permute.xlu1 %2503  ;;  %v7902_v4 = vpop.permute.xlu0 %2485  ;;  %v1357_v38 = vsel %vm1346_vm9, %v7810_v33, %v1356_v56  ;;  %v1373_v50 = vsel %vm1346_vm9, %v7808_v47, %v1372_v29  ;;  %v1182_v47 = vld [vmem:[%s5617_s18 + $0x84] sm:$0xf]  ;;  %v1173_v29 = vld [vmem:[%s5617_s18 + $0x40] sm:$0xf] }
 0x246   : > { %4924 = vmatpush1.bf16.msra.mxu0 %v5481_v1  ;;  %v2560_v30 = vrot.slane %v7900_v49, 4  ;;  %v2551_v51 = vrot.slane %v7902_v4, 4  ;;  %v5337_v23 = vcombine.low %v1357_v38, %v1373_v50  ;;  %v5338_v22 = vcombine.high %v1357_v38, %v1373_v50 }
 0x248   : > { %2543 = vrot.lane.b32.xlu1 %v2436_v63, %s5574_s20  ;;  %2525 = vrot.lane.b32.xlu0 %v2427_v35, %s5574_s20  ;;  %v2608_v1 = vsel %vm417_vm0, %v8547_v42, %v2560_v30  ;;  %v2592_v33 = vsel %vm417_vm0, %v8548_v6, %v2551_v51 }
 0x249   : > { %4900 = vmatprep.subr.bf16.mxu1 %v5338_v22  ;;  %v7920_v56 = vpop.permute.xlu1 %2541  ;;  %v7922_v38 = vpop.permute.xlu0 %2523  ;;  %v2593_v63 = vsel %vm2582_vm2, %v7250_v31, %v2592_v33  ;;  %v2609_v42 = vsel %vm2582_vm2, %v7277_v62, %v2608_v1  ;;  %v2418_v62 = vld [vmem:[%s5617_s18 + $0x84] sm:$0xf]  ;;  %v2409_v1 = vld [vmem:[%s5617_s18 + $0x40] sm:$0xf] }
 0x24a   : > { %4901 = vmatpush2.bf16.msra.mxu1 %v5337_v23  ;;  %v8436_v35 = vrot.slane %v7920_v56, 4  ;;  %v8435_v6 = vrot.slane %v7922_v38, 4  ;;  %v5465_v50 = vcombine.low %v2593_v63, %v2609_v42  ;;  %v5466_v22 = vcombine.high %v2593_v63, %v2609_v42 }
 0x24c   : > { %1271 = vrot.lane.b32.xlu1 %v1182_v47, %s5581_s26  ;;  %1253 = vrot.lane.b32.xlu0 %v1173_v29, %s5581_s26  ;;  %v2642_v23 = vsel %vm417_vm0, %v2578_v8, %v8436_v35  ;;  %v2626_v31 = vsel %vm417_vm0, %v2569_v19, %v8435_v6  ;;  %v8550_v6 = vrot.slane %v7302_v9, 4 }
 0x24d   : > { %4925 = vmatprep.subr.bf16.mxu0 %v5466_v22  ;;  %4903 = vmatmul.mubr.bf16.vlgmr.msra.gmra.mxu1 %v6504_v26  ;;  %v997_v33 = vpop.permute.xlu1 %996  ;;  %v979_v12 = vpop.permute.xlu0 %978  ;;  %v2627_v47 = vsel %vm2582_vm2, %v7858_v7, %v2626_v31  ;;  %v2643_v29 = vsel %vm2582_vm2, %v7856_v16, %v2642_v23  ;;  %v8549_v22 = vrot.slane %v7324_v48, 4  ;;  %v3000_v16 = vld [vmem:[%s8305_s2] sm:$0xff]  ;;  %v7960_v23 = vld [vmem:[%s8304_s1 + $0x8] ss:$0 sps:$4 sm:$0xff]  }
 0x24e   : > { %4926 = vmatpush1.bf16.msra.mxu0 %v5465_v50  ;;  %5025 = vmatprep.mubr.bf16.mxu1 %v8454_v45  ;;  %v1034_v8 = vrot.slane %v997_v33, 4  ;;  %v1025_v63 = vrot.slane %v979_v12, 4  ;;  %v5483_v42 = vcombine.low %v2627_v47, %v2643_v29  ;;  %v5484_v19 = vcombine.high %v2627_v47, %v2643_v29 }
 0x250   : > { %2507 = vrot.lane.b32.xlu1 %v2418_v62, %s5574_s20  ;;  %2489 = vrot.lane.b32.xlu0 %v2409_v1, %s5574_s20  ;;  %v1097_v50 = vsel %vm417_vm0, %v8549_v22, %v1034_v8  ;;  %v1081_v7 = vsel %vm417_vm0, %v8550_v6, %v1025_v63 }
 0x251   : > { %5005 = vmatprep.subr.bf16.mxu1 %v5484_v19  ;;  %5492 = vmatmul.mubr.msk.bf16.vlgmr.msra.gmra.mxu0 %vm4456_vm4, %v7960_v23  ;;  %v7964_v31 = vpop.permute.xlu1 %2505  ;;  %v7966_v62 = vpop.permute.xlu0 %2487  ;;  %v1082_v6 = vsel %vm1037_vm3, %v7302_v9, %v1081_v7  ;;  %v1098_v1 = vsel %vm1037_vm3, %v7324_v48, %v1097_v50 }
 0x252   : > { %5006 = vmatpush1.bf16.msra.mxu1 %v5483_v42  ;;  %4984 = vmatprep.mubr.bf16.mxu0 %v8504_v14  ;;  %v8437_v47 = vrot.slane %v7964_v31, 4  ;;  %v8438_v29 = vrot.slane %v7966_v62, 4  ;;  %v5323_v19 = vcombine.low %v1082_v6, %v1098_v1  ;;  %v5324_v22 = vcombine.high %v1082_v6, %v1098_v1 }
 0x254   : > { %3003 = vperm.xlu0 %5515, %v3000_v16   ;;  %v2610_v35 = vsel %vm417_vm0, %v2560_v30, %v8437_v47  ;;  %v2594_v9 = vsel %vm417_vm0, %v2551_v51, %v8438_v29  ;;  %4952 = vmatprep.subr.bf16.mxu0 %v5324_v22  ;;  %v8551_v30 = vrot.slane %v7371_v13, 4  ;;  %v8552_v51 = vrot.slane %v7348_v3, 4 }
 0x255   : > { %v961_v42 = vpop.permute.xlu1 %960  ;;  %v943_v48 = vpop.permute.xlu0 %942  ;;  %4953 = vmatpush1.bf16.msra.mxu0 %v5323_v19  ;;  %v2595_v50 = vsel %vm2582_vm2, %v7902_v4, %v2594_v9  ;;  %v2611_v7 = vsel %vm2582_vm2, %v7900_v49, %v2610_v35 }
 0x256   : > { %v1016_v6 = vrot.slane %v961_v42, 4  ;;  %v1007_v16 = vrot.slane %v943_v48, 4  ;;  %v5467_v1 = vcombine.low %v2595_v50, %v2611_v7  ;;  %v5468_v57 = vcombine.high %v2595_v50, %v2611_v7 }
 0x258   : > { %v1065_v47 = vsel %vm417_vm0, %v8551_v30, %v1016_v6  ;;  %v1049_v22 = vsel %vm417_vm0, %v8552_v51, %v1007_v16  ;;  %5007 = vmatprep.subr.bf16.mxu1 %v5468_v57 }
 0x259   : > { %v999_v19 = vpop.permute.xlu1 %998  ;;  %v981_v29 = vpop.permute.xlu0 %980  ;;  %5008 = vmatpush1.bf16.msra.mxu1 %v5467_v1  ;;  %v1050_v4 = vsel %vm1037_vm3, %v7348_v3, %v1049_v22  ;;  %v1066_v49 = vsel %vm1037_vm3, %v7371_v13, %v1065_v47 }
 0x25a   : > { %v1035_v35 = vrot.slane %v999_v19, 4  ;;  %v1026_v9 = vrot.slane %v981_v29, 4  ;;  %v5307_v50 = vcombine.low %v1050_v4, %v1066_v49  ;;  %v5308_v7 = vcombine.high %v1050_v4, %v1066_v49 }
 0x25b   : > { %v8554_v19 = vrot.slane %v7391_v39, 4 }
 0x25c   : > { %v1099_v30 = vsel %vm417_vm0, %v1034_v8, %v1035_v35  ;;  %v1083_v36 = vsel %vm417_vm0, %v1025_v63, %v1026_v9  ;;  %4954 = vmatprep.subr.bf16.mxu0 %v5308_v7  ;;  %5493 = vmatmul.mubr.msk.bf16.vlgmr.msra.gmra.mxu1 %vm4456_vm4, %v7960_v23  ;;  %v8553_v8 = vrot.slane %v7415_v0, 4 }
 0x25d   : > { %v688_v57 = vpop.permute.xlu1 %687  ;;  %v670_v1 = vpop.permute.xlu0 %669  ;;  %4955 = vmatpush1.bf16.msra.mxu0 %v5307_v50  ;;  %v1084_v3 = vsel %vm1037_vm3, %v979_v12, %v1083_v36  ;;  %v1100_v51 = vsel %vm1037_vm3, %v997_v33, %v1099_v30  ;;  %5066 = vmatprep.mubr.bf16.mxu1 %v8504_v14 }
 0x25e   : > { %v725_v13 = vrot.slane %v688_v57, 4  ;;  %v716_v47 = vrot.slane %v670_v1, 4  ;;  %v5325_v29 = vcombine.low %v1084_v3, %v1100_v51  ;;  %v5326_v22 = vcombine.high %v1084_v3, %v1100_v51 }
 0x260   : > { %v788_v63 = vsel %vm417_vm0, %v8553_v8, %v725_v13  ;;  %v772_v4 = vsel %vm417_vm0, %v8554_v19, %v716_v47  ;;  %5034 = vmatprep.subr.bf16.mxu1 %v5326_v22 }
 0x261   : > { %v963_v49 = vpop.permute.xlu1 %962  ;;  %v945_v35 = vpop.permute.xlu0 %944  ;;  %5035 = vmatpush1.bf16.msra.mxu1 %v5325_v29  ;;  %v773_v12 = vsel %vm728_vm5, %v7391_v39, %v772_v4  ;;  %v789_v14 = vsel %vm728_vm5, %v7415_v0, %v788_v63  ;;  %v8555_v63 = vrot.slane %v7456_v44, 4 }
 0x262   : > { %v1017_v36 = vrot.slane %v963_v49, 4  ;;  %v1008_v33 = vrot.slane %v945_v35, 4  ;;  %v5291_v9 = vcombine.low %v773_v12, %v789_v14  ;;  %v5292_v50 = vcombine.high %v773_v12, %v789_v14 }
 0x264   : > { %v1067_v7 = vsel %vm417_vm0, %v1016_v6, %v1017_v36  ;;  %v1051_v30 = vsel %vm417_vm0, %v1007_v16, %v1008_v33  ;;  %4956 = vmatprep.subr.bf16.mxu0 %v5292_v50  ;;  %v8556_v6 = vrot.slane %v7439_v46, 4 }
 0x265   : > { %v652_v3 = vpop.permute.xlu1 %651  ;;  %v634_v51 = vpop.permute.xlu0 %633  ;;  %4957 = vmatpush1.bf16.msra.mxu0 %v5291_v9  ;;  %v1052_v29 = vsel %vm1037_vm3, %v943_v48, %v1051_v30  ;;  %v1068_v22 = vsel %vm1037_vm3, %v961_v42, %v1067_v7 }
 0x266   : > { %v707_v39 = vrot.slane %v652_v3, 4  ;;  %v698_v8 = vrot.slane %v634_v51, 4  ;;  %v5309_v19 = vcombine.low %v1052_v29, %v1068_v22  ;;  %v5310_v0 = vcombine.high %v1052_v29, %v1068_v22 }
 0x268   : > { %v756_v4 = vsel %vm417_vm0, %v8555_v63, %v707_v39  ;;  %v740_v16 = vsel %vm417_vm0, %v8556_v6, %v698_v8  ;;  %5036 = vmatprep.subr.bf16.mxu1 %v5310_v0  ;;  %v8557_v63 = vrot.slane %v7481_v52, 4  ;;  %v8559_v6 = vld [vmem:[#allocation4_spill] sm:$0xff] }
 0x269   : > { %v690_v49 = vpop.permute.xlu1 %689  ;;  %v672_v35 = vpop.permute.xlu0 %671  ;;  %5037 = vmatpush1.bf16.msra.mxu1 %v5309_v19  ;;  %v741_v48 = vsel %vm728_vm5, %v7439_v46, %v740_v16  ;;  %v757_v42 = vsel %vm728_vm5, %v7456_v44, %v756_v4  ;;  %v388_v16 = vrot.slane %v8559_v6, 4 }
 0x26a   : > { %v726_v12 = vrot.slane %v690_v49, 4  ;;  %v717_v14 = vrot.slane %v672_v35, 4  ;;  %v5275_v36 = vcombine.low %v741_v48, %v757_v42  ;;  %v5276_v33 = vcombine.high %v741_v48, %v757_v42 }
 0x26c   : > { %v790_v9 = vsel %vm417_vm0, %v725_v13, %v726_v12  ;;  %v774_v50 = vsel %vm417_vm0, %v716_v47, %v717_v14  ;;  %4958 = vmatprep.subr.bf16.mxu0 %v5276_v33  ;;  %v8558_v13 = vrot.slane %v7454_v60, 4 }
 0x26d   : > { %v378_v7 = vpop.permute.xlu1 %377  ;;  %v360_v30 = vpop.permute.xlu0 %359  ;;  %4959 = vmatpush1.bf16.msra.mxu0 %v5275_v36  ;;  %v775_v29 = vsel %vm728_vm5, %v670_v1, %v774_v50  ;;  %v791_v22 = vsel %vm728_vm5, %v688_v57, %v790_v9  ;;  %v8560_v9 = vrot.slane %v8514_v41, 4 }
 0x26e   : > { %v415_v46 = vrot.slane %v378_v7, 4  ;;  %v406_v19 = vrot.slane %v360_v30, 4  ;;  %v5293_v0 = vcombine.low %v775_v29, %v791_v22  ;;  %v5294_v44 = vcombine.high %v775_v29, %v791_v22 }
 0x26f   : > { %v431_v50 = vsel %vm417_vm0, %v8560_v9, %v388_v16 }
 0x270   : > { %v479_v4 = vsel %vm417_vm0, %v8557_v63, %v415_v46  ;;  %v463_v47 = vsel %vm417_vm0, %v8558_v13, %v406_v19  ;;  %5038 = vmatprep.subr.bf16.mxu1 %v5294_v44 }
 0x271   : > { %v654_v49 = vpop.permute.xlu1 %653  ;;  %5039 = vmatpush1.bf16.msra.mxu1 %v5293_v0  ;;  %v464_v57 = vsel %vm419_vm1, %v7454_v60, %v463_v47  ;;  %v480_v1 = vsel %vm419_vm1, %v7481_v52, %v479_v4 }
 0x272   : > { %v636_v35 = vpop.permute.xlu0 %635  ;;  %v708_v48 = vrot.slane %v654_v49, 4  ;;  %v5259_v12 = vcombine.low %v464_v57, %v480_v1  ;;  %v5260_v14 = vcombine.high %v464_v57, %v480_v1  ;;  %v432_v49 = vsel %vm419_vm1, %v8514_v41, %v431_v50  ;;  %v5551_v50 = vld [vmem:[%s5617_s18 + $0xb8] ss:$68 sps:$4 sm:$0xff]  }
 0x273   : > { %v699_v42 = vrot.slane %v636_v35, 4 }
 0x274   : > { %v758_v36 = vsel %vm417_vm0, %v707_v39, %v708_v48  ;;  %4960 = vmatprep.subr.bf16.mxu0 %v5260_v14  ;;  %v8561_v39 = vld [vmem:[#allocation6_spill] sm:$0xff] }
 0x275   : > { %v742_v33 = vsel %vm417_vm0, %v698_v8, %v699_v42  ;;  %v362_v29 = vpop.permute.xlu1 %361  ;;  %4961 = vmatpush1.bf16.msra.mxu0 %v5259_v12  ;;  %v759_v52 = vsel %vm728_vm5, %v652_v3, %v758_v36  ;;  %v389_v13 = vrot.slane %v8561_v39, 4  ;;  %v8562_v8 = vrot.slane %v7479_v58, 4  ;;  %v5553_v14 = vld [vmem:[%s5617_s18 + $0xbc] ss:$68 sps:$4 sm:$0xff]  }
 0x276   : > { %v342_v22 = vpop.permute.xlu0 %341  ;;  %v743_v60 = vsel %vm728_vm5, %v634_v51, %v742_v33  ;;  %v407_v0 = vrot.slane %v362_v29, 4 }
 0x277   : > { %v397_v44 = vrot.slane %v342_v22, 4  ;;  %v5277_v63 = vcombine.low %v743_v60, %v759_v52  ;;  %v5278_v4 = vcombine.high %v743_v60, %v759_v52  ;;  %v433_v36 = vsel %vm417_vm0, %v388_v16, %v389_v13 }
 0x278   : > { %v465_v35 = vsel %vm417_vm0, %v406_v19, %v407_v0 }
 0x279   : > { %v447_v47 = vsel %vm417_vm0, %v8562_v8, %v397_v44  ;;  %5040 = vmatprep.subr.bf16.mxu1 %v5278_v4  ;;  %v466_v29 = vsel %vm419_vm1, %v360_v30, %v465_v35  ;;  %v8563_v4 = vrot.slane %v7565_v21, 4  ;;  %v8564_v30 = vrot.slane %v7567_v54, 4 }
 0x27a   : > { %v344_v51 = vpop.permute.xlu1 %343  ;;  %v380_v3 = vpop.permute.xlu0 %379  ;;  %5041 = vmatpush1.bf16.msra.mxu1 %v5277_v63  ;;  %v448_v57 = vsel %vm419_vm1, %v7479_v58, %v447_v47  ;;  %v5554_v47 = vld [vmem:[%s5617_s18 + $0x30] ss:$68 sps:$4 sm:$0xff]  }
 0x27b   : > { %v398_v1 = vrot.slane %v344_v51, 4  ;;  %v416_v48 = vrot.slane %v380_v3, 4  ;;  %v5243_v42 = vcombine.low %v432_v49, %v448_v57  ;;  %v5244_v12 = vcombine.high %v432_v49, %v448_v57  ;;  %v5559_v3 = vld [vmem:[%s5617_s18 + $0xc4] ss:$68 sps:$4 sm:$0xff]  }
 0x27d   : > { %v449_v33 = vsel %vm417_vm0, %v397_v44, %v398_v1  ;;  %v481_v41 = vsel %vm417_vm0, %v415_v46, %v416_v48  ;;  %4962 = vmatprep.subr.bf16.mxu0 %v5244_v12  ;;  %v5556_v44 = vld [vmem:[%s5617_s18 + $0x34] ss:$68 sps:$4 sm:$0xff]   ;;  %v434_v46 = vsel %vm419_vm1, %v8559_v6, %v433_v36  ;;  %v8565_v1 = vrot.slane %v7610_v25, 4  ;;  %v5557_v36 = vld [vmem:[%s5617_s18 + $0xc0] ss:$68 sps:$4 sm:$0xff]  }
 0x27e   : > { %v2233_v19 = vpop.permute.xlu1 %2232  ;;  %v2215_v9 = vpop.permute.xlu0 %2214  ;;  %4963 = vmatpush1.bf16.msra.mxu0 %v5243_v42  ;;  %v482_v58 = vsel %vm419_vm1, %v378_v7, %v481_v41  ;;  %v450_v60 = vsel %vm419_vm1, %v342_v22, %v449_v33  ;;  %v8566_v42 = vrot.slane %v7612_v43, 4 }
 0x27f   : > { %v2270_v52 = vrot.slane %v2233_v19, 4  ;;  %v2261_v0 = vrot.slane %v2215_v9, 4  ;;  %4964 = vmatprep.subr.bf16.mxu0 %v5553_v14  ;;  %v5261_v16 = vcombine.low %v466_v29, %v482_v58  ;;  %v5262_v63 = vcombine.high %v466_v29, %v482_v58  ;;  %v5562_v58 = vld [vmem:[%s5617_s18 + $0x3c] ss:$68 sps:$4 sm:$0xff]  }
 0x280   : > { %v5246_v22 = vcombine.high %v434_v46, %v450_v60  ;;  %v5245_v57 = vcombine.low %v434_v46, %v450_v60 }
 0x281   : > { %v2333_v39 = vsel %vm417_vm0, %v8563_v4, %v2270_v52  ;;  %v2317_v7 = vsel %vm417_vm0, %v8564_v30, %v2261_v0  ;;  %5042 = vmatprep.subr.bf16.mxu1 %v5262_v63 }
 0x282   : > { %v8074_v13 = vpop.permute.xlu1 %2196  ;;  %v8076_v8 = vpop.permute.xlu0 %2178  ;;  %4965 = vmatpush1.bf16.msra.mxu0 %v5551_v50  ;;  %5043 = vmatpush1.bf16.msra.mxu1 %v5261_v16  ;;  %v2318_v6 = vsel %vm2273_vm6, %v7567_v54, %v2317_v7  ;;  %v2334_v49 = vsel %vm2273_vm6, %v7565_v21, %v2333_v39 }
 0x283   : > { %v2252_v35 = vrot.slane %v8074_v13, 4  ;;  %v2243_v51 = vrot.slane %v8076_v8, 4  ;;  %5044 = vmatprep.subr.bf16.mxu1 %v5246_v22  ;;  %4966 = vmatprep.subr.bf16.mxu0 %v5556_v44  ;;  %v5452_v12 = vcombine.high %v2318_v6, %v2334_v49  ;;  %v5451_v60 = vcombine.low %v2318_v6, %v2334_v49 }
 0x284   : > { %v8568_v49 = vrot.slane %v7656_v18, 4 }
 0x285   : > { %v2301_v48 = vsel %vm417_vm0, %v8565_v1, %v2252_v35  ;;  %v2285_v54 = vsel %vm417_vm0, %v8566_v42, %v2243_v51 }
 0x286   : > { %v2235_v14 = vpop.permute.xlu1 %2234  ;;  %v2217_v21 = vpop.permute.xlu0 %2216  ;;  %4967 = vmatpush1.bf16.msra.mxu0 %v5554_v47  ;;  %5045 = vmatpush1.bf16.msra.mxu1 %v5245_v57  ;;  %v2286_v33 = vsel %vm2273_vm6, %v7612_v43, %v2285_v54  ;;  %v2302_v41 = vsel %vm2273_vm6, %v7610_v25, %v2301_v48  ;;  %v5560_v25 = vld [vmem:[%s5617_s18 + $0x38] ss:$68 sps:$4 sm:$0xff]   ;;  %v8567_v47 = vrot.slane %v7654_v10, 4 }
 0x287   : > { %v2271_v50 = vrot.slane %v2235_v14, 4  ;;  %v2262_v29 = vrot.slane %v2217_v21, 4  ;;  %4968 = vmatprep.subr.bf16.mxu0 %v5452_v12  ;;  %5046 = vmatprep.subr.bf16.mxu1 %v5559_v3  ;;  %v5436_v44 = vcombine.high %v2286_v33, %v2302_v41  ;;  %v5435_v22 = vcombine.low %v2286_v33, %v2302_v41 }
 0x288   : > { %v8100_v46 = vpop.f32.mrf.mxu0 }
 0x289   : > { %v2335_v16 = vsel %vm417_vm0, %v2270_v52, %v2271_v50  ;;  %v2319_v63 = vsel %vm417_vm0, %v2261_v0, %v2262_v29 }
 0x28a   : > { %v8102_v4 = vpop.permute.xlu1 %1923  ;;  %v8104_v43 = vpop.permute.xlu0 %1905  ;;  %4969 = vmatpush2.bf16.msra.mxu0 %v5451_v60  ;;  %5047 = vmatpush1.bf16.msra.mxu1 %v5557_v36  ;;  %v2320_v39 = vsel %vm2273_vm6, %v2215_v9, %v2319_v63  ;;  %v2336_v30 = vsel %vm2273_vm6, %v2233_v19, %v2335_v16 }
 0x28b   : > { %v1961_v7 = vrot.slane %v8102_v4, 4  ;;  %v1952_v52 = vrot.slane %v8104_v43, 4  ;;  %4970 = vmatprep.subr.bf16.mxu0 %v5436_v44  ;;  %5048 = vmatprep.subr.bf16.mxu1 %v5562_v58  ;;  %v8111_v0 = vpop.f32.mrf.mxu0  ;;  %v5454_v9 = vcombine.high %v2320_v39, %v2336_v30  ;;  %v5453_v33 = vcombine.low %v2320_v39, %v2336_v30 }
 0x28d   : > { %v2024_v6 = vsel %vm417_vm0, %v8567_v47, %v1961_v7  ;;  %v2008_v3 = vsel %vm417_vm0, %v8568_v49, %v1952_v52  ;;  %v4662_v57 = vpop.f32.mrf.mxu0 }
 0x28e   : > { %v2199_v19 = vpop.permute.xlu1 %2198  ;;  %v2181_v1 = vpop.permute.xlu0 %2180  ;;  %4971 = vmatpush2.bf16.msra.mxu0 %v5435_v22  ;;  %5049 = vmatpush1.bf16.msra.mxu1 %v5560_v25  ;;  %v2009_v48 = vsel %vm1964_vm7, %v7656_v18, %v2008_v3  ;;  %v2025_v42 = vsel %vm1964_vm7, %v7654_v10, %v2024_v6  ;;  %v8569_v25 = vrot.slane %v7694_v17, 4 }
 0x28f   : > { %v2253_v54 = vrot.slane %v2199_v19, 4  ;;  %v2244_v12 = vrot.slane %v2181_v1, 4  ;;  %5050 = vmatprep.subr.bf16.mxu1 %v5454_v9  ;;  %v5419_v14 = vcombine.low %v2009_v48, %v2025_v42  ;;  %v5420_v21 = vcombine.high %v2009_v48, %v2025_v42  ;;  %v4663_v36 = vpop.f32.mrf.mxu0 }
 0x291   : > { %v2303_v41 = vsel %vm417_vm0, %v2252_v35, %v2253_v54  ;;  %v2287_v50 = vsel %vm417_vm0, %v2243_v51, %v2244_v12  ;;  %4972 = vmatprep.subr.bf16.mxu0 %v5420_v21  ;;  %v8570_v51 = vrot.slane %v7696_v27, 4 }
 0x292   : > { %v1888_v29 = vpop.permute.xlu1 %1887  ;;  %v1870_v58 = vpop.permute.xlu0 %1869  ;;  %4973 = vmatpush2.bf16.msra.mxu0 %v5419_v14  ;;  %5051 = vmatpush2.bf16.msra.mxu1 %v5453_v33  ;;  %v2288_v18 = vsel %vm2273_vm6, %v8076_v8, %v2287_v50  ;;  %v2304_v10 = vsel %vm2273_vm6, %v8074_v13, %v2303_v41  ;;  %v8571_v41 = vrot.slane %v7736_v15, 4 }
 0x293   : > { %v1943_v60 = vrot.slane %v1888_v29, 4  ;;  %v1934_v16 = vrot.slane %v1870_v58, 4  ;;  %v5437_v63 = vcombine.low %v2288_v18, %v2304_v10  ;;  %v5438_v44 = vcombine.high %v2288_v18, %v2304_v10 }
 0x294   : > { %v8135_v30 = vpop.f32.mrf.mxu1  ;;  %v8572_v18 = vrot.slane %v7738_v34, 4 }
 0x295   : > { %v1992_v35 = vsel %vm417_vm0, %v8569_v25, %v1943_v60  ;;  %v1976_v39 = vsel %vm417_vm0, %v8570_v51, %v1934_v16  ;;  %5052 = vmatprep.subr.bf16.mxu1 %v5438_v44 }
 0x296   : > { %v1926_v22 = vpop.permute.xlu1 %1925  ;;  %v1908_v8 = vpop.permute.xlu0 %1907  ;;  %5053 = vmatpush2.bf16.msra.mxu1 %v5437_v63  ;;  %v1977_v13 = vsel %vm1964_vm7, %v7696_v27, %v1976_v39  ;;  %v1993_v47 = vsel %vm1964_vm7, %v7694_v17, %v1992_v35 }
 0x297   : > { %v1962_v6 = vrot.slane %v1926_v22, 4  ;;  %v1953_v49 = vrot.slane %v1908_v8, 4  ;;  %v5403_v3 = vcombine.low %v1977_v13, %v1993_v47  ;;  %v5404_v9 = vcombine.high %v1977_v13, %v1993_v47  ;;  %v8141_v57 = vpop.f32.mrf.mxu1 }
 0x298   : > { %v8145_v48 = vpop.f32.mrf.mxu0 }
 0x299   : > { %v2026_v19 = vsel %vm417_vm0, %v1961_v7, %v1962_v6  ;;  %v2010_v1 = vsel %vm417_vm0, %v1952_v52, %v1953_v49  ;;  %4974 = vmatprep.subr.bf16.mxu0 %v5404_v9  ;;  %v4744_v42 = vpop.f32.mrf.mxu1 }
 0x29a   : > { %v1615_v54 = vpop.permute.xlu1 %1614  ;;  %v1597_v12 = vpop.permute.xlu0 %1596  ;;  %4975 = vmatpush2.bf16.msra.mxu0 %v5403_v3  ;;  %v2011_v17 = vsel %vm1964_vm7, %v8104_v43, %v2010_v1  ;;  %v2027_v27 = vsel %vm1964_vm7, %v8102_v4, %v2026_v19  ;;  %v8573_v42 = vrot.slane %v7786_v59, 4 }
 0x29b   : > { %v1652_v14 = vrot.slane %v1615_v54, 4  ;;  %v1643_v21 = vrot.slane %v1597_v12, 4  ;;  %v5421_v36 = vcombine.low %v2011_v17, %v2027_v27  ;;  %v5422_v33 = vcombine.high %v2011_v17, %v2027_v27  ;;  %v8151_v7 = vpop.f32.mrf.mxu0  ;;  %v4745_v52 = vpop.f32.mrf.mxu1 }
 0x29d   : > { %v1715_v50 = vsel %vm417_vm0, %v8571_v41, %v1652_v14  ;;  %v1699_v10 = vsel %vm417_vm0, %v8572_v18, %v1643_v21  ;;  %5054 = vmatprep.subr.bf16.mxu1 %v5422_v33  ;;  %v4785_v43 = vpop.f32.mrf.mxu0 }
 0x29e   : > { %v1890_v63 = vpop.permute.xlu1 %1889  ;;  %v1872_v44 = vpop.permute.xlu0 %1871  ;;  %5055 = vmatpush2.bf16.msra.mxu1 %v5421_v36  ;;  %v1700_v4 = vsel %vm1655_vm8, %v7738_v34, %v1699_v10  ;;  %v1716_v25 = vsel %vm1655_vm8, %v7736_v15, %v1715_v50 }
 0x29f   : > { %v1944_v35 = vrot.slane %v1890_v63, 4  ;;  %v1935_v51 = vrot.slane %v1872_v44, 4  ;;  %v5387_v39 = vcombine.low %v1700_v4, %v1716_v25  ;;  %v5388_v22 = vcombine.high %v1700_v4, %v1716_v25  ;;  %v4786_v8 = vpop.f32.mrf.mxu0 }
 0x2a1   : > { %v1994_v13 = vsel %vm417_vm0, %v1943_v60, %v1944_v35  ;;  %v1978_v47 = vsel %vm417_vm0, %v1934_v16, %v1935_v51  ;;  %4976 = vmatprep.subr.bf16.mxu0 %v5388_v22  ;;  %v8574_v60 = vrot.slane %v7788_v2, 4 }
 0x2a2   : > { %v1579_v6 = vpop.permute.xlu1 %1578  ;;  %v1561_v49 = vpop.permute.xlu0 %1560  ;;  %4977 = vmatpush2.bf16.msra.mxu0 %v5387_v39  ;;  %v1979_v3 = vsel %vm1964_vm7, %v1870_v58, %v1978_v47  ;;  %v1995_v34 = vsel %vm1964_vm7, %v1888_v29, %v1994_v13  ;;  %v8575_v13 = vrot.slane %v7832_v20, 4 }
 0x2a3   : > { %v1634_v9 = vrot.slane %v1579_v6, 4  ;;  %v1625_v19 = vrot.slane %v1561_v49, 4  ;;  %v5405_v15 = vcombine.low %v1979_v3, %v1995_v34  ;;  %v5406_v1 = vcombine.high %v1979_v3, %v1995_v34 }
 0x2a4   : > { %v8173_v27 = vpop.f32.mrf.mxu1 }
 0x2a5   : > { %v1683_v17 = vsel %vm417_vm0, %v8573_v42, %v1634_v9  ;;  %v1667_v16 = vsel %vm417_vm0, %v8574_v60, %v1625_v19  ;;  %5056 = vmatprep.subr.bf16.mxu1 %v5406_v1 }
 0x2a6   : > { %v1617_v36 = vpop.permute.xlu1 %1616  ;;  %v1599_v33 = vpop.permute.xlu0 %1598  ;;  %5057 = vmatpush2.bf16.msra.mxu1 %v5405_v15  ;;  %v1668_v29 = vsel %vm1655_vm8, %v7788_v2, %v1667_v16  ;;  %v1684_v58 = vsel %vm1655_vm8, %v7786_v59, %v1683_v17 }
 0x2a7   : > { %v1653_v52 = vrot.slane %v1617_v36, 4  ;;  %v1644_v41 = vrot.slane %v1599_v33, 4  ;;  %v5371_v50 = vcombine.low %v1668_v29, %v1684_v58  ;;  %v5372_v18 = vcombine.high %v1668_v29, %v1684_v58  ;;  %v8179_v10 = vpop.f32.mrf.mxu1 }
 0x2a9   : > { %v1717_v43 = vsel %vm417_vm0, %v1652_v14, %v1653_v52  ;;  %v1701_v63 = vsel %vm417_vm0, %v1643_v21, %v1644_v41  ;;  %4978 = vmatprep.subr.bf16.mxu0 %v5372_v18  ;;  %v4867_v44 = vpop.f32.mrf.mxu1  ;;  %v8576_v21 = vrot.slane %v7834_v53, 4 }
 0x2aa   : > { %v1306_v4 = vpop.permute.xlu1 %1305  ;;  %v1288_v25 = vpop.permute.xlu0 %1287  ;;  %4979 = vmatpush2.bf16.msra.mxu0 %v5371_v50  ;;  %v1702_v2 = vsel %vm1655_vm8, %v1597_v12, %v1701_v63  ;;  %v1718_v35 = vsel %vm1655_vm8, %v1615_v54, %v1717_v43  ;;  %v8577_v50 = vrot.slane %v7879_v37, 4 }
 0x2ab   : > { %v1343_v59 = vrot.slane %v1306_v4, 4  ;;  %v1334_v51 = vrot.slane %v1288_v25, 4  ;;  %v5389_v39 = vcombine.low %v1702_v2, %v1718_v35  ;;  %v5390_v22 = vcombine.high %v1702_v2, %v1718_v35  ;;  %v4868_v8 = vpop.f32.mrf.mxu1 }
 0x2ad   : > { %v1406_v14 = vsel %vm417_vm0, %v8575_v13, %v1343_v59  ;;  %v1390_v47 = vsel %vm417_vm0, %v8576_v21, %v1334_v51  ;;  %5058 = vmatprep.subr.bf16.mxu1 %v5390_v22 }
 0x2ae   : > { %v1581_v3 = vpop.permute.xlu1 %1580  ;;  %v1563_v34 = vpop.permute.xlu0 %1562  ;;  %5059 = vmatpush2.bf16.msra.mxu1 %v5389_v39  ;;  %v1391_v54 = vsel %vm1346_vm9, %v7834_v53, %v1390_v47  ;;  %v1407_v12 = vsel %vm1346_vm9, %v7832_v20, %v1406_v14 }
 0x2af   : > { %v1635_v15 = vrot.slane %v1581_v3, 4  ;;  %v1626_v1 = vrot.slane %v1563_v34, 4  ;;  %v5355_v42 = vcombine.low %v1391_v54, %v1407_v12  ;;  %v5356_v17 = vcombine.high %v1391_v54, %v1407_v12 }
 0x2b0   : > { %v8579_v54 = vrot.slane %v7920_v56, 4 }
 0x2b1   : > { %v1685_v60 = vsel %vm417_vm0, %v1634_v9, %v1635_v15  ;;  %v1669_v16 = vsel %vm417_vm0, %v1625_v19, %v1626_v1  ;;  %4980 = vmatprep.subr.bf16.mxu0 %v5356_v17  ;;  %v8578_v9 = vrot.slane %v7881_v61, 4 }
 0x2b2   : > { %v1270_v36 = vpop.permute.xlu1 %1269  ;;  %v1252_v33 = vpop.permute.xlu0 %1251  ;;  %4981 = vmatpush2.bf16.msra.mxu0 %v5355_v42  ;;  %v1670_v29 = vsel %vm1655_vm8, %v1561_v49, %v1669_v16  ;;  %v1686_v58 = vsel %vm1655_vm8, %v1579_v6, %v1685_v60 }
 0x2b3   : > { %v1325_v53 = vrot.slane %v1270_v36, 4  ;;  %v1316_v52 = vrot.slane %v1252_v33, 4  ;;  %v5373_v41 = vcombine.low %v1670_v29, %v1686_v58  ;;  %v5374_v20 = vcombine.high %v1670_v29, %v1686_v58 }
 0x2b5   : > { %v1374_v18 = vsel %vm417_vm0, %v8577_v50, %v1325_v53  ;;  %v1358_v19 = vsel %vm417_vm0, %v8578_v9, %v1316_v52  ;;  %5060 = vmatprep.subr.bf16.mxu1 %v5374_v20 }
 0x2b6   : > { %v1308_v43 = vpop.permute.xlu1 %1307  ;;  %v1290_v63 = vpop.permute.xlu0 %1289  ;;  %5061 = vmatpush2.bf16.msra.mxu1 %v5373_v41  ;;  %v1359_v49 = vsel %vm1346_vm9, %v7881_v61, %v1358_v19  ;;  %v1375_v6 = vsel %vm1346_vm9, %v7879_v37, %v1374_v18  ;;  %v8581_v19 = vrot.slane %v7964_v31, 4 }
 0x2b7   : > { %v1344_v44 = vrot.slane %v1308_v43, 4  ;;  %v1335_v2 = vrot.slane %v1290_v63, 4  ;;  %v5339_v35 = vcombine.low %v1359_v49, %v1375_v6  ;;  %v5340_v39 = vcombine.high %v1359_v49, %v1375_v6 }
 0x2b9   : > { %v1408_v22 = vsel %vm417_vm0, %v1343_v59, %v1344_v44  ;;  %v1392_v8 = vsel %vm417_vm0, %v1334_v51, %v1335_v2  ;;  %4982 = vmatprep.subr.bf16.mxu0 %v5340_v39  ;;  %v8580_v59 = vrot.slane %v7922_v38, 4 }
 0x2ba   : > { %v2544_v13 = vpop.permute.xlu1 %2543  ;;  %v2526_v14 = vpop.permute.xlu0 %2525  ;;  %4983 = vmatpush2.bf16.msra.mxu0 %v5339_v35  ;;  %v1393_v21 = vsel %vm1346_vm9, %v1288_v25, %v1392_v8  ;;  %v1409_v47 = vsel %vm1346_vm9, %v1306_v4, %v1408_v22  ;;  %v8583_v35 = vld [vmem:[#allocation11_spill] sm:$0xff]  ;;  %v8584_v22 = vld [vmem:[#allocation13_spill] sm:$0xff] }
 0x2bb   : > { %v2580_v61 = vrot.slane %v2544_v13, 4  ;;  %v2571_v3 = vrot.slane %v2526_v14, 4  ;;  %v5357_v34 = vcombine.low %v1393_v21, %v1409_v47  ;;  %v5358_v37 = vcombine.high %v1393_v21, %v1409_v47 }
 0x2bd   : > { %v2644_v12 = vsel %vm417_vm0, %v8579_v54, %v2580_v61  ;;  %v2628_v51 = vsel %vm417_vm0, %v8580_v59, %v2571_v3  ;;  %4985 = vmatmul.mubr.bf16.vlgmr.msra.gmra.mxu0 %v6504_v26  ;;  %5062 = vmatprep.subr.bf16.mxu1 %v5358_v37 }
 0x2be   : > { %v1272_v15 = vpop.permute.xlu1 %1271  ;;  %v1254_v1 = vpop.permute.xlu0 %1253  ;;  %5063 = vmatpush2.bf16.msra.mxu1 %v5357_v34  ;;  %v2629_v4 = vsel %vm2582_vm2, %v7922_v38, %v2628_v51  ;;  %v2645_v25 = vsel %vm2582_vm2, %v7920_v56, %v2644_v12  ;;  %5107 = vmatprep.mubr.bf16.mxu0 %v8454_v45 }
 0x2bf   : > { %v1326_v42 = vrot.slane %v1272_v15, 4  ;;  %v1317_v17 = vrot.slane %v1254_v1, 4  ;;  %v5485_v60 = vcombine.low %v2629_v4, %v2645_v25  ;;  %v5486_v16 = vcombine.high %v2629_v4, %v2645_v25 }
 0x2c1   : > { %v1376_v29 = vsel %vm417_vm0, %v1325_v53, %v1326_v42  ;;  %v1360_v58 = vsel %vm417_vm0, %v1316_v52, %v1317_v17  ;;  %5087 = vmatprep.subr.bf16.mxu0 %v5486_v16  ;;  %v8582_v53 = vrot.slane %v7966_v62, 4 }
 0x2c2   : > { %v2508_v41 = vpop.permute.xlu1 %2507  ;;  %v2490_v20 = vpop.permute.xlu0 %2489  ;;  %5088 = vmatpush1.bf16.msra.mxu0 %v5485_v60  ;;  %v1361_v38 = vsel %vm1346_vm9, %v1252_v33, %v1360_v58  ;;  %v1377_v50 = vsel %vm1346_vm9, %v1270_v36, %v1376_v29 }
 0x2c3   : > { %v2562_v56 = vrot.slane %v2508_v41, 4  ;;  %v2553_v18 = vrot.slane %v2490_v20, 4  ;;  %v5341_v45 = vcombine.low %v1361_v38, %v1377_v50  ;;  %v5342_v9 = vcombine.high %v1361_v38, %v1377_v50 }
 0x2c5   : > { %v2612_v43 = vsel %vm417_vm0, %v8581_v19, %v2562_v56  ;;  %v2596_v52 = vsel %vm417_vm0, %v8582_v53, %v2553_v18  ;;  %5064 = vmatprep.subr.bf16.mxu1 %v5342_v9 }
 0x2c6   : > { %5065 = vmatpush2.bf16.msra.mxu1 %v5341_v45  ;;  %v2597_v33 = vsel %vm2582_vm2, %v7966_v62, %v2596_v52  ;;  %v2613_v36 = vsel %vm2582_vm2, %v7964_v31, %v2612_v43 }
 0x2c7   : > { %v5469_v63 = vcombine.low %v2597_v33, %v2613_v36  ;;  %v5470_v49 = vcombine.high %v2597_v33, %v2613_v36 }
 0x2c9   : > { %5067 = vmatmul.mubr.bf16.vlgmr.msra.gmra.mxu1 %v6504_v26  ;;  %5089 = vmatprep.subr.bf16.mxu0 %v5470_v49 }
 0x2ca   : > { %5090 = vmatpush1.bf16.msra.mxu0 %v5469_v63 }
 0x2cd   : > { %5494 = vmatmul.mubr.msk.bf16.vlgmr.msra.gmra.mxu0 %vm4456_vm4, %v7960_v23 }
 0x2cf   : > { %v8243_v6 = vpop.permute.xlu0 %3003 }
 0x2d0   : > { %v4495_v62 = vadd.f32 %v7734_v28, %v8243_v6  ;;  %v4497_v31 = vadd.f32 %v7746_v40, %v8243_v6  ;;  %v4577_v44 = vadd.f32 %v7770_v5, %v8243_v6  ;;  %v4579_v26 = vadd.f32 %v7796_v11, %v8243_v6 }
 0x2d1   : > { %v4659_v2 = vadd.f32 %v8100_v46, %v8243_v6  ;;  %v4661_v40 = vadd.f32 %v8111_v0, %v8243_v6  ;;  %v4741_v28 = vadd.f32 %v8135_v30, %v8243_v6  ;;  %v4743_v11 = vadd.f32 %v8141_v57, %v8243_v6  ;;  %v8585_v0 = vld [vmem:[#allocation12_spill] sm:$0xff] }
 0x2d2   : > { %v4536_v5 = vadd.f32 %v7408_v32, %v4495_v62  ;;  %v4538_v23 = vadd.f32 %v7428_v55, %v4497_v31  ;;  %v4618_v46 = vadd.f32 %v7784_v24, %v4577_v44  ;;  %v4620_v39 = vadd.f32 %v8583_v35, %v4579_v26 }
 0x2d3   : > { %v4700_v8 = vadd.f32 %v8584_v22, %v4659_v2  ;;  %v4702_v13 = vadd.f32 %v8585_v0, %v4661_v40  ;;  %v4782_v14 = vadd.f32 %v8145_v48, %v4741_v28  ;;  %v4784_v30 = vadd.f32 %v8151_v7, %v4743_v11 }
 0x2d4   : > { %5116 = vst [vmem:[%s8258_s15] sm:$0xff] %v4536_v5  ;;  %5117 = vst [vmem:[%s8258_s15 + $0x8] sm:$0xff] %v4538_v23 }
 0x2d5   : > { %5118 = vst [vmem:[%s8258_s15 + $0x10] sm:$0xff] %v4618_v46  ;;  %5119 = vst [vmem:[%s8258_s15 + $0x18] sm:$0xff] %v4620_v39 }
 0x2d6   : > { %5120 = vst [vmem:[%s8258_s15 + $0x20] sm:$0xff] %v4700_v8  ;;  %5121 = vst [vmem:[%s8258_s15 + $0x28] sm:$0xff] %v4702_v13 }
 0x2d7   : > { %5122 = vst [vmem:[%s8258_s15 + $0x30] sm:$0xff] %v4782_v14  ;;  %5123 = vst [vmem:[%s8258_s15 + $0x38] sm:$0xff] %v4784_v30 }
 0x301   : > { %v4822_v55 = vpop.f32.mrf.mxu0 }
 0x302   : > { %v4823_v32 = vadd.f32 %v4822_v55, %v8243_v6 }
 0x303   : > { %v4824_v24 = vpop.f32.mrf.mxu0 }
 0x304   : > { %v4864_v57 = vadd.f32 %v8173_v27, %v4823_v32  ;;  %v4825_v48 = vadd.f32 %v4824_v24, %v8243_v6 }
 0x305   : > { %v4826_v21 = vpop.f32.mrf.mxu0 }
 0x306   : > { %5124 = vst [vmem:[%s8258_s15 + $0x40] sm:$0xff] %v4864_v57  ;;  %v4866_v7 = vadd.f32 %v8179_v10, %v4825_v48 }
 0x307   : > { %v4827_v47 = vpop.f32.mrf.mxu0 }
 0x308   : > { %5125 = vst [vmem:[%s8258_s15 + $0x48] sm:$0xff] %v4866_v7 }
 0x30d   : > { %v4904_v61 = vpop.f32.mrf.mxu1 }
 0x30e   : > { %v4905_v3 = vadd.f32 %v4904_v61, %v8243_v6 }
 0x30f   : > { %v4906_v34 = vpop.f32.mrf.mxu1 }
 0x310   : > { %v4907_v37 = vadd.f32 %v4906_v34, %v8243_v6 }
 0x311   : > { %v4945_v54 = vpop.f32.mrf.mxu0  ;;  %v4908_v12 = vpop.f32.mrf.mxu1 }
 0x312   : > { %v4946_v59 = vadd.f32 %v4945_v54, %v4905_v3 }
 0x313   : > { %v4947_v27 = vpop.f32.mrf.mxu0  ;;  %v4909_v51 = vpop.f32.mrf.mxu1 }
 0x314   : > { %5126 = vst [vmem:[%s8258_s15 + $0x50] sm:$0xff] %v4946_v59  ;;  %v4948_v15 = vadd.f32 %v4947_v27, %v4907_v37 }
 0x315   : > { %v4949_v1 = vpop.f32.mrf.mxu0 }
 0x316   : > { %5127 = vst [vmem:[%s8258_s15 + $0x58] sm:$0xff] %v4948_v15 }
 0x317   : > { %v4950_v10 = vpop.f32.mrf.mxu0 }
 0x31c   : > { %v5027_v4 = vpop.f32.mrf.mxu1 }
 0x31e   : > { %v5029_v25 = vpop.f32.mrf.mxu1 }
 0x320   : > { %v5031_v42 = vpop.f32.mrf.mxu1 }
 0x322   : > { %v5032_v17 = vpop.f32.mrf.mxu1 }
 0x37d   : > { %v4986_v60 = vpop.f32.mrf.mxu0 }
 0x37e   : > { %v4987_v16 = vadd.f32 %v4986_v60, %v8243_v6 }
 0x37f   : > { %v4988_v29 = vpop.f32.mrf.mxu0 }
 0x380   : > { %v5028_v58 = vadd.f32 %v5027_v4, %v4987_v16  ;;  %v4989_v41 = vadd.f32 %v4988_v29, %v8243_v6 }
 0x381   : > { %v4990_v20 = vpop.f32.mrf.mxu0 }
 0x382   : > { %5128 = vst [vmem:[%s8258_s15 + $0x60] sm:$0xff] %v5028_v58  ;;  %v5030_v38 = vadd.f32 %v5029_v25, %v4989_v41 }
 0x383   : > { %v4991_v50 = vpop.f32.mrf.mxu0 }
 0x384   : > { %5129 = vst [vmem:[%s8258_s15 + $0x68] sm:$0xff] %v5030_v38 }
 0x389   : > { %v5068_v56 = vpop.f32.mrf.mxu1 }
 0x38a   : > { %v5069_v18 = vadd.f32 %v5068_v56, %v8243_v6 }
 0x38b   : > { %v5070_v45 = vpop.f32.mrf.mxu1 }
 0x38c   : > { %v5071_v9 = vadd.f32 %v5070_v45, %v8243_v6 }
 0x38d   : > { %v5072_v19 = vpop.f32.mrf.mxu1  ;;  %v5109_v43 = vpop.f32.mrf.mxu0 }
 0x38e   : > { %v5110_v53 = vadd.f32 %v5109_v43, %v5069_v18 }
 0x38f   : > { %v5073_v52 = vpop.f32.mrf.mxu1  ;;  %v5111_v33 = vpop.f32.mrf.mxu0 }
 0x390   : > { %5130 = vst [vmem:[%s8258_s15 + $0x70] sm:$0xff] %v5110_v53  ;;  %v5112_v36 = vadd.f32 %v5111_v33, %v5071_v9 }
 0x391   : > { %v5113_v63 = vpop.f32.mrf.mxu0 }
 0x392   : > { %5131 = vst [vmem:[%s8258_s15 + $0x78] sm:$0xff] %v5112_v36 }
 0x393   : > { %v5114_v49 = vpop.f32.mrf.mxu0 }
 0x394 PF: > { %s13_s12 = sadd.s32 1, %s5571_s12  }
 0x395   : > { %p10_p5 = scmp.ge.s32.totalorder %s13_s12, 5  }
 0x397   :  { %12 = sbr.rel (!%p10_p5) target bundleno = 1 (0x1), region = 62 }

// kernel: similarity_reg_net_forward.11
= control target key start
LH: loop header
LB: loop body
LE: loop exit
PB: predicated region body
PF: predicated region fallthrough
CT: control target
= control target key end

     0   :  { %s2971_s12 = smov 0   ;;  %s4029_s0 = inlined_call_operand.vmem [shape: bf16[3,16,2176], index: 0, kind: input, shape index: {}]   ;;  %s4030_s1 = inlined_call_operand.vmem [shape: bf16[8,144], index: 1, kind: input, shape index: {}]   ;;  %s4031_s2 = inlined_call_operand.vmem [shape: f32[8,1], index: 2, kind: input, shape index: {}]   ;;  %s4032_s3 = inlined_call_operand.vmem [shape: f32[8,6144], index: 3, kind: output, shape index: {}]  }
   0x1 LB: > { %s2977_s13 = sadd.s32 4294967295, %s2940_s12   ;;  %p2731_p0 = scmp.ge.s32.totalorder %s2940_s12, 1  ;;  %s2940_s12 = sphi %s2971_s12, %s13_s12  }
   0x2   : > { %p137_p1 = scmp.lt.s32.totalorder %s2940_s12, 4 }
   0x4   : > { %p138_p2 = pnand %p2731_p0, %p137_p1 }
   0x5   : > { %p161_p3 = scmp.lt.s32.totalorder (!%p138_p2), %s2977_s13, 2  ;;  %s2942_s19 = smov (!%p138_p2), 91  }
   0x6   : > { %141 = sbr.rel (%p138_p2) target bundleno = 626 (0x272), region = 32  ;;  %s2943_s20 = smov (!%p138_p2), 92  }
   0x7   : > { %s2944_s21 = smov (!%p138_p2), 108   ;;  %s2945_s22 = smov (!%p138_p2), 109  }
   0x8   : > { %s2946_s23 = smov (!%p138_p2), 110   ;;  %s2947_s24 = smov (!%p138_p2), 126  }
   0x9   : > { %s2948_s25 = smov (!%p138_p2), 127   ;;  %s2949_s26 = smov (!%p138_p2), 90  }
   0xa   : > { %s2733_s4 = sshll.u32 (!%p138_p2), %s2977_s13, 4 }
   0xb   : > { %s162_s14 = scalar_select %p161_p3, %s2977_s13, 2  ;;  %v3082_v6 = vld [vmem:[%s4030_s1] sm:$0xff]  ;;  %vm2323_vm0 = vcmask 130048   ;;  %vm295_vm1 = vcmask 1043456   ;;  %vm1227_vm2 = vcmask 744448   ;;  %vm1072_vm3 = vcmask 752640  }
   0xc   : > { %v3089_v7 = vcombine.high %v3082_v6, %v3082_v6  ;;  %vm917_vm4 = vcmask 883712   ;;  %vm762_vm5 = vcmask 891904   ;;  %vm607_vm6 = vcmask 900096   ;;  %p167_p4 = scmp.lt.s32.totalorder %s2733_s4, 47 }
   0xd   : > { %s2891_s15 = smul.u32 136, %s162_s14  ;;  %vm452_vm7 = vcmask 1031168   ;;  %vm297_vm8 = vcmask 1039360   ;;  %vm1382_vm9 = vcmask 736256  }
   0xe   : > { %2881 = vmatprep.mubr.msk.bf16.mxu0 %vm2323_vm0, %v3089_v7  ;;  %2882 = vmatprep.mubr.msk.bf16.mxu1 %vm2323_vm0, %v3089_v7  ;;  %s4034_s4 = smov (!%p167_p4, %s2733_s4), 47 }
   0xf   : > { %s2986_s18 = scalar_lea.vmem %s4029_s0, %s2891_s15  ;;  %s2734_s5 = sshll.u32 %s4034_s4, 3 }
  0x10   : > { %v1138_v0 = vld [vmem:[%s2986_s18 + $0x10] sm:$0xff]  ;;  %v2990_v1 = vld [vmem:[%s2986_s18] sm:$0xff]  ;;  %v2999_v3 = vld [vmem:[%s2986_s18 + $0x8] sm:$0xff]  ;;  %s4008_s8 = scalar_lea.vmem %s4032_s3, %s2734_s5 }
  0x11   : > { %1176 = vrot.lane.b32.xlu1 %v1138_v0, %s2942_s19  ;;  %1172 = vrot.lane.b32.xlu0 %v2990_v1, %s2942_s19  ;;  %v2996_v2 = vld [vmem:[%s2986_s18 + $0x44] sm:$0xff]  ;;  %v1147_v4 = vld [vmem:[%s2986_s18 + $0x54] sm:$0xff] }
  0x12   : > { %v3003_v5 = vld [vmem:[%s2986_s18 + $0x4c] sm:$0xff]  ;;  %v3092_v8 = vld [vmem:[%s2986_s18 + $0x20] sm:$0xff]  ;;  %v3095_v9 = vld [vmem:[%s2986_s18 + $0x18] sm:$0xff] }
  0x13   : > { %v3106_v10 = vld [vmem:[%s2986_s18 + $0x64] sm:$0xff]  ;;  %v3109_v11 = vld [vmem:[%s2986_s18 + $0x5c] sm:$0xff] }
  0x15   : > { %1190 = vrot.lane.b32.xlu1 %v2996_v2, %s2942_s19  ;;  %1174 = vrot.lane.b32.xlu0 %v2999_v3, %s2942_s19 }
  0x19   : > { %1194 = vrot.lane.b32.xlu1 %v1147_v4, %s2942_s19  ;;  %1192 = vrot.lane.b32.xlu0 %v3003_v5, %s2942_s19 }
  0x1d   : > { %1019 = vrot.lane.b32.xlu1 %v2999_v3, %s2943_s20  ;;  %1017 = vrot.lane.b32.xlu0 %v2990_v1, %s2943_s20 }
  0x21   : > { %1035 = vrot.lane.b32.xlu1 %v2996_v2, %s2943_s20  ;;  %1021 = vrot.lane.b32.xlu0 %v1138_v0, %s2943_s20 }
  0x25   : > { %1039 = vrot.lane.b32.xlu1 %v1147_v4, %s2943_s20  ;;  %1037 = vrot.lane.b32.xlu0 %v3003_v5, %s2943_s20 }
  0x29   : > { %864 = vrot.lane.b32.xlu1 %v2999_v3, %s2944_s21  ;;  %862 = vrot.lane.b32.xlu0 %v2990_v1, %s2944_s21 }
  0x2d   : > { %880 = vrot.lane.b32.xlu1 %v2996_v2, %s2944_s21  ;;  %866 = vrot.lane.b32.xlu0 %v1138_v0, %s2944_s21 }
  0x31   : > { %884 = vrot.lane.b32.xlu1 %v1147_v4, %s2944_s21  ;;  %882 = vrot.lane.b32.xlu0 %v3003_v5, %s2944_s21 }
  0x35   : > { %709 = vrot.lane.b32.xlu1 %v2999_v3, %s2945_s22  ;;  %707 = vrot.lane.b32.xlu0 %v2990_v1, %s2945_s22 }
  0x39   : > { %725 = vrot.lane.b32.xlu1 %v2996_v2, %s2945_s22  ;;  %711 = vrot.lane.b32.xlu0 %v1138_v0, %s2945_s22 }
  0x3d   : > { %729 = vrot.lane.b32.xlu1 %v1147_v4, %s2945_s22  ;;  %727 = vrot.lane.b32.xlu0 %v3003_v5, %s2945_s22 }
  0x41   : > { %554 = vrot.lane.b32.xlu1 %v2999_v3, %s2946_s23  ;;  %552 = vrot.lane.b32.xlu0 %v2990_v1, %s2946_s23 }
  0x45   : > { %570 = vrot.lane.b32.xlu1 %v2996_v2, %s2946_s23  ;;  %556 = vrot.lane.b32.xlu0 %v1138_v0, %s2946_s23 }
  0x49   : > { %574 = vrot.lane.b32.xlu1 %v1147_v4, %s2946_s23  ;;  %572 = vrot.lane.b32.xlu0 %v3003_v5, %s2946_s23 }
  0x4d   : > { %399 = vrot.lane.b32.xlu1 %v2999_v3, %s2947_s24  ;;  %397 = vrot.lane.b32.xlu0 %v2990_v1, %s2947_s24 }
  0x51   : > { %415 = vrot.lane.b32.xlu1 %v2996_v2, %s2947_s24  ;;  %401 = vrot.lane.b32.xlu0 %v1138_v0, %s2947_s24 }
  0x55   : > { %419 = vrot.lane.b32.xlu1 %v1147_v4, %s2947_s24  ;;  %417 = vrot.lane.b32.xlu0 %v3003_v5, %s2947_s24 }
  0x59   : > { %243 = vrot.lane.b32.xlu1 %v2999_v3, %s2948_s25  ;;  %241 = vrot.lane.b32.xlu0 %v2990_v1, %s2948_s25 }
  0x5d   : > { %259 = vrot.lane.b32.xlu1 %v2996_v2, %s2948_s25  ;;  %245 = vrot.lane.b32.xlu0 %v1138_v0, %s2948_s25 }
  0x61   : > { %263 = vrot.lane.b32.xlu1 %v1147_v4, %s2948_s25  ;;  %261 = vrot.lane.b32.xlu0 %v3003_v5, %s2948_s25 }
  0x65   : > { %1329 = vrot.lane.b32.xlu1 %v2999_v3, %s2949_s26  ;;  %1327 = vrot.lane.b32.xlu0 %v2990_v1, %s2949_s26 }
  0x69   : > { %1345 = vrot.lane.b32.xlu1 %v2996_v2, %s2949_s26  ;;  %1331 = vrot.lane.b32.xlu0 %v1138_v0, %s2949_s26 }
  0x6d   : > { %1349 = vrot.lane.b32.xlu1 %v1147_v4, %s2949_s26  ;;  %1347 = vrot.lane.b32.xlu0 %v3003_v5, %s2949_s26 }
  0x71   : > { %1180 = vrot.lane.b32.xlu1 %v3092_v8, %s2942_s19  ;;  %1178 = vrot.lane.b32.xlu0 %v3095_v9, %s2942_s19 }
  0x75   : > { %1198 = vrot.lane.b32.xlu1 %v3106_v10, %s2942_s19  ;;  %1196 = vrot.lane.b32.xlu0 %v3109_v11, %s2942_s19 }
  0x79   : > { %1025 = vrot.lane.b32.xlu1 %v3092_v8, %s2943_s20  ;;  %1023 = vrot.lane.b32.xlu0 %v3095_v9, %s2943_s20 }
  0x7d   : > { %1043 = vrot.lane.b32.xlu1 %v3106_v10, %s2943_s20  ;;  %1041 = vrot.lane.b32.xlu0 %v3109_v11, %s2943_s20 }
  0x81   : > { %870 = vrot.lane.b32.xlu1 %v3092_v8, %s2944_s21  ;;  %868 = vrot.lane.b32.xlu0 %v3095_v9, %s2944_s21 }
  0x83   : > { %v3127_v12 = vpop.permute.xlu1 %1176  ;;  %v1173_v13 = vpop.permute.xlu0 %1172 }
  0x84   : > { %v1210_v17 = vrot.slane %v3127_v12, 4  ;;  %v1208_v18 = vrot.slane %v1173_v13, 4 }
  0x85   : > { %888 = vrot.lane.b32.xlu1 %v3106_v10, %s2944_s21  ;;  %886 = vrot.lane.b32.xlu0 %v3109_v11, %s2944_s21 }
  0x87   : > { %v1191_v14 = vpop.permute.xlu1 %1190  ;;  %v1175_v15 = vpop.permute.xlu0 %1174 }
  0x88   : > { %v1209_v16 = vrot.slane %v1175_v15, 4  ;;  %v1217_v19 = vrot.slane %v1191_v14, 4 }
  0x89   : > { %715 = vrot.lane.b32.xlu1 %v3092_v8, %s2945_s22  ;;  %713 = vrot.lane.b32.xlu0 %v3095_v9, %s2945_s22 }
  0x8a   : > { %v1226_v24 = vsel %vm295_vm1, %v1208_v18, %v1209_v16  ;;  %v1229_v25 = vsel %vm295_vm1, %v1209_v16, %v1210_v17 }
  0x8b   : > { %v3138_v20 = vpop.permute.xlu1 %1194  ;;  %v1193_v21 = vpop.permute.xlu0 %1192  ;;  %v1228_v30 = vsel %vm1227_vm2, %v1173_v13, %v1226_v24  ;;  %v1230_v32 = vsel %vm1227_vm2, %v1175_v15, %v1229_v25 }
  0x8c   : > { %v1219_v22 = vrot.slane %v3138_v20, 4  ;;  %v1218_v23 = vrot.slane %v1193_v21, 4 }
  0x8d   : > { %733 = vrot.lane.b32.xlu1 %v3106_v10, %s2945_s22  ;;  %731 = vrot.lane.b32.xlu0 %v3109_v11, %s2945_s22 }
  0x8e   : > { %v1243_v26 = vsel %vm295_vm1, %v1217_v19, %v1218_v23  ;;  %v1245_v27 = vsel %vm295_vm1, %v1218_v23, %v1219_v22 }
  0x8f   : > { %v1020_v28 = vpop.permute.xlu1 %1019  ;;  %v1018_v29 = vpop.permute.xlu0 %1017  ;;  %v1244_v31 = vsel %vm1227_vm2, %v1191_v14, %v1243_v26  ;;  %v1246_v33 = vsel %vm1227_vm2, %v1193_v21, %v1245_v27 }
  0x90   : > { %v2850_v34 = vcombine.high %v1228_v30, %v1244_v31  ;;  %v2852_v35 = vcombine.high %v1230_v32, %v1246_v33  ;;  %v2849_v36 = vcombine.low %v1228_v30, %v1244_v31  ;;  %v2851_v37 = vcombine.low %v1230_v32, %v1246_v33 }
  0x91   : > { %560 = vrot.lane.b32.xlu1 %v3092_v8, %s2946_s23  ;;  %558 = vrot.lane.b32.xlu0 %v3095_v9, %s2946_s23  ;;  %v1054_v38 = vrot.slane %v1020_v28, 4  ;;  %v1053_v39 = vrot.slane %v1018_v29, 4 }
  0x92   : > { %2327 = vmatprep.subr.bf16.mxu0 %v2850_v34  ;;  %2368 = vmatprep.subr.bf16.mxu1 %v2852_v35 }
  0x93   : > { %2328 = vmatpush1.bf16.msra.mxu0 %v2849_v36  ;;  %2369 = vmatpush1.bf16.msra.mxu1 %v2851_v37  ;;  %v1036_v40 = vpop.permute.xlu1 %1035  ;;  %v3161_v41 = vpop.permute.xlu0 %1021  ;;  %v1071_v43 = vsel %vm295_vm1, %v1053_v39, %v1054_v38 }
  0x94   : > { %v1055_v42 = vrot.slane %v3161_v41, 4  ;;  %v1062_v46 = vrot.slane %v1036_v40, 4  ;;  %v1073_v52 = vsel %vm1072_vm3, %v1018_v29, %v1071_v43 }
  0x95   : > { %578 = vrot.lane.b32.xlu1 %v3106_v10, %s2946_s23  ;;  %576 = vrot.lane.b32.xlu0 %v3109_v11, %s2946_s23 }
  0x96   : > { %v1074_v49 = vsel %vm295_vm1, %v1054_v38, %v1055_v42 }
  0x97   : > { %v3169_v44 = vpop.permute.xlu1 %1039  ;;  %v1038_v45 = vpop.permute.xlu0 %1037  ;;  %v1075_v57 = vsel %vm1072_vm3, %v1020_v28, %v1074_v49 }
  0x98   : > { %v1064_v47 = vrot.slane %v3169_v44, 4  ;;  %v1063_v48 = vrot.slane %v1038_v45, 4 }
  0x99   : > { %405 = vrot.lane.b32.xlu1 %v3092_v8, %s2947_s24  ;;  %403 = vrot.lane.b32.xlu0 %v3095_v9, %s2947_s24 }
  0x9a   : > { %v1090_v50 = vsel %vm295_vm1, %v1063_v48, %v1064_v47  ;;  %v1088_v51 = vsel %vm295_vm1, %v1062_v46, %v1063_v48 }
  0x9b   : > { %v1091_v53 = vsel %vm1072_vm3, %v1038_v45, %v1090_v50  ;;  %v865_v54 = vpop.permute.xlu1 %864  ;;  %v863_v55 = vpop.permute.xlu0 %862  ;;  %v1089_v56 = vsel %vm1072_vm3, %v1036_v40, %v1088_v51  ;;  %v3249_v51 = vld [vmem:[%s2986_s18 + $0x74] sm:$0xff] }
  0x9c   : > { %v2834_v58 = vcombine.high %v1073_v52, %v1089_v56  ;;  %v2836_v59 = vcombine.high %v1075_v57, %v1091_v53  ;;  %v2833_v60 = vcombine.low %v1073_v52, %v1089_v56  ;;  %v2835_v61 = vcombine.low %v1075_v57, %v1091_v53  ;;  %v3252_v52 = vld [vmem:[%s2986_s18 + $0x6c] sm:$0xff] }
  0x9d   : > { %423 = vrot.lane.b32.xlu1 %v3106_v10, %s2947_s24  ;;  %421 = vrot.lane.b32.xlu0 %v3109_v11, %s2947_s24  ;;  %v899_v62 = vrot.slane %v865_v54, 4  ;;  %v898_v63 = vrot.slane %v863_v55, 4 }
  0x9e   : > { %2329 = vmatprep.subr.bf16.mxu0 %v2834_v58  ;;  %2370 = vmatprep.subr.bf16.mxu1 %v2836_v59 }
  0x9f   : > { %2330 = vmatpush1.bf16.msra.mxu0 %v2833_v60  ;;  %2371 = vmatpush1.bf16.msra.mxu1 %v2835_v61  ;;  %v881_v0 = vpop.permute.xlu1 %880  ;;  %v3191_v4 = vpop.permute.xlu0 %866  ;;  %v916_v14 = vsel %vm295_vm1, %v898_v63, %v899_v62 }
  0xa0   : > { %v900_v13 = vrot.slane %v3191_v4, 4  ;;  %v907_v18 = vrot.slane %v881_v0, 4  ;;  %v918_v26 = vsel %vm917_vm4, %v863_v55, %v916_v14 }
  0xa1   : > { %249 = vrot.lane.b32.xlu1 %v3092_v8, %s2948_s25  ;;  %247 = vrot.lane.b32.xlu0 %v3095_v9, %s2948_s25 }
  0xa2   : > { %v919_v23 = vsel %vm295_vm1, %v899_v62, %v900_v13 }
  0xa3   : > { %v3199_v15 = vpop.permute.xlu1 %884  ;;  %v883_v16 = vpop.permute.xlu0 %882  ;;  %v920_v31 = vsel %vm917_vm4, %v865_v54, %v919_v23 }
  0xa4   : > { %v909_v19 = vrot.slane %v3199_v15, 4  ;;  %v908_v21 = vrot.slane %v883_v16, 4 }
  0xa5   : > { %267 = vrot.lane.b32.xlu1 %v3106_v10, %s2948_s25  ;;  %265 = vrot.lane.b32.xlu0 %v3109_v11, %s2948_s25 }
  0xa6   : > { %v935_v24 = vsel %vm295_vm1, %v908_v21, %v909_v19  ;;  %v933_v25 = vsel %vm295_vm1, %v907_v18, %v908_v21 }
  0xa7   : > { %v936_v27 = vsel %vm917_vm4, %v883_v16, %v935_v24  ;;  %v710_v28 = vpop.permute.xlu1 %709  ;;  %v708_v29 = vpop.permute.xlu0 %707  ;;  %v934_v30 = vsel %vm917_vm4, %v881_v0, %v933_v25 }
  0xa8   : > { %v2818_v32 = vcombine.high %v918_v26, %v934_v30  ;;  %v2820_v33 = vcombine.high %v920_v31, %v936_v27  ;;  %v2817_v34 = vcombine.low %v918_v26, %v934_v30  ;;  %v2819_v35 = vcombine.low %v920_v31, %v936_v27 }
  0xa9   : > { %1335 = vrot.lane.b32.xlu1 %v3092_v8, %s2949_s26  ;;  %1333 = vrot.lane.b32.xlu0 %v3095_v9, %s2949_s26  ;;  %v744_v36 = vrot.slane %v710_v28, 4  ;;  %v743_v37 = vrot.slane %v708_v29, 4  ;;  %v3229_v8 = vld [vmem:[%s2986_s18 + $0x30] sm:$0xff]  ;;  %v3232_v9 = vld [vmem:[%s2986_s18 + $0x28] sm:$0xff] }
  0xaa   : > { %2331 = vmatprep.subr.bf16.mxu0 %v2818_v32  ;;  %2372 = vmatprep.subr.bf16.mxu1 %v2820_v33 }
  0xab   : > { %2332 = vmatpush1.bf16.msra.mxu0 %v2817_v34  ;;  %2373 = vmatpush1.bf16.msra.mxu1 %v2819_v35  ;;  %v726_v38 = vpop.permute.xlu1 %725  ;;  %v3221_v39 = vpop.permute.xlu0 %711  ;;  %v761_v43 = vsel %vm295_vm1, %v743_v37, %v744_v36 }
  0xac   : > { %v745_v40 = vrot.slane %v3221_v39, 4  ;;  %v752_v48 = vrot.slane %v726_v38, 4  ;;  %v763_v54 = vsel %vm762_vm5, %v708_v29, %v761_v43 }
  0xad   : > { %1353 = vrot.lane.b32.xlu1 %v3106_v10, %s2949_s26  ;;  %1351 = vrot.lane.b32.xlu0 %v3109_v11, %s2949_s26 }
  0xae   : > { %v764_v10 = vsel %vm295_vm1, %v744_v36, %v745_v40 }
  0xaf   : > { %v3235_v45 = vpop.permute.xlu1 %729  ;;  %v728_v46 = vpop.permute.xlu0 %727  ;;  %v765_v59 = vsel %vm762_vm5, %v710_v28, %v764_v10 }
  0xb0   : > { %v754_v49 = vrot.slane %v3235_v45, 4  ;;  %v753_v50 = vrot.slane %v728_v46, 4 }
  0xb1   : > { %1184 = vrot.lane.b32.xlu1 %v3229_v8, %s2942_s19  ;;  %1182 = vrot.lane.b32.xlu0 %v3232_v9, %s2942_s19 }
  0xb2   : > { %v780_v11 = vsel %vm295_vm1, %v753_v50, %v754_v49  ;;  %v778_v53 = vsel %vm295_vm1, %v752_v48, %v753_v50 }
  0xb3   : > { %v781_v55 = vsel %vm762_vm5, %v728_v46, %v780_v11  ;;  %v555_v56 = vpop.permute.xlu1 %554  ;;  %v553_v57 = vpop.permute.xlu0 %552  ;;  %v779_v58 = vsel %vm762_vm5, %v726_v38, %v778_v53 }
  0xb4   : > { %v2802_v60 = vcombine.high %v763_v54, %v779_v58  ;;  %v2804_v61 = vcombine.high %v765_v59, %v781_v55  ;;  %v2801_v62 = vcombine.low %v763_v54, %v779_v58  ;;  %v2803_v63 = vcombine.low %v765_v59, %v781_v55 }
  0xb5   : > { %1202 = vrot.lane.b32.xlu1 %v3249_v51, %s2942_s19  ;;  %1200 = vrot.lane.b32.xlu0 %v3252_v52, %s2942_s19  ;;  %v589_v0 = vrot.slane %v555_v56, 4  ;;  %v588_v14 = vrot.slane %v553_v57, 4 }
  0xb6   : > { %2333 = vmatprep.subr.bf16.mxu0 %v2802_v60  ;;  %2374 = vmatprep.subr.bf16.mxu1 %v2804_v61 }
  0xb7   : > { %2334 = vmatpush1.bf16.msra.mxu0 %v2801_v62  ;;  %2375 = vmatpush1.bf16.msra.mxu1 %v2803_v63  ;;  %v571_v16 = vpop.permute.xlu1 %570  ;;  %v3263_v18 = vpop.permute.xlu0 %556  ;;  %v606_v23 = vsel %vm295_vm1, %v588_v14, %v589_v0 }
  0xb8   : > { %v590_v21 = vrot.slane %v3263_v18, 4  ;;  %v597_v26 = vrot.slane %v571_v16, 4  ;;  %v608_v32 = vsel %vm607_vm6, %v553_v57, %v606_v23 }
  0xb9   : > { %1029 = vrot.lane.b32.xlu1 %v3229_v8, %s2943_s20  ;;  %1027 = vrot.lane.b32.xlu0 %v3232_v9, %s2943_s20 }
  0xba   : > { %v609_v29 = vsel %vm295_vm1, %v589_v0, %v590_v21 }
  0xbb   : > { %v3271_v24 = vpop.permute.xlu1 %574  ;;  %v573_v25 = vpop.permute.xlu0 %572  ;;  %v610_v37 = vsel %vm607_vm6, %v555_v56, %v609_v29 }
  0xbc   : > { %v599_v27 = vrot.slane %v3271_v24, 4  ;;  %v598_v28 = vrot.slane %v573_v25, 4 }
  0xbd   : > { %1047 = vrot.lane.b32.xlu1 %v3249_v51, %s2943_s20  ;;  %1045 = vrot.lane.b32.xlu0 %v3252_v52, %s2943_s20 }
  0xbe   : > { %v625_v30 = vsel %vm295_vm1, %v598_v28, %v599_v27  ;;  %v623_v31 = vsel %vm295_vm1, %v597_v26, %v598_v28 }
  0xbf   : > { %v626_v33 = vsel %vm607_vm6, %v573_v25, %v625_v30  ;;  %v400_v34 = vpop.permute.xlu1 %399  ;;  %v398_v35 = vpop.permute.xlu0 %397  ;;  %v624_v36 = vsel %vm607_vm6, %v571_v16, %v623_v31 }
  0xc0   : > { %v2786_v38 = vcombine.high %v608_v32, %v624_v36  ;;  %v2788_v43 = vcombine.high %v610_v37, %v626_v33  ;;  %v2785_v46 = vcombine.low %v608_v32, %v624_v36  ;;  %v2787_v48 = vcombine.low %v610_v37, %v626_v33 }
  0xc1   : > { %874 = vrot.lane.b32.xlu1 %v3229_v8, %s2944_s21  ;;  %872 = vrot.lane.b32.xlu0 %v3232_v9, %s2944_s21  ;;  %v434_v50 = vrot.slane %v400_v34, 4  ;;  %v433_v10 = vrot.slane %v398_v35, 4 }
  0xc2   : > { %2335 = vmatprep.subr.bf16.mxu0 %v2786_v38  ;;  %2376 = vmatprep.subr.bf16.mxu1 %v2788_v43 }
  0xc3   : > { %2336 = vmatpush1.bf16.msra.mxu0 %v2785_v46  ;;  %2377 = vmatpush1.bf16.msra.mxu1 %v2787_v48  ;;  %v416_v11 = vpop.permute.xlu1 %415  ;;  %v3293_v53 = vpop.permute.xlu0 %401  ;;  %v451_v55 = vsel %vm295_vm1, %v433_v10, %v434_v50 }
  0xc4   : > { %v435_v54 = vrot.slane %v3293_v53, 4  ;;  %v442_v58 = vrot.slane %v416_v11, 4  ;;  %v453_v0 = vsel %vm452_vm7, %v398_v35, %v451_v55 }
  0xc5   : > { %892 = vrot.lane.b32.xlu1 %v3249_v51, %s2944_s21  ;;  %890 = vrot.lane.b32.xlu0 %v3252_v52, %s2944_s21 }
  0xc6   : > { %v454_v61 = vsel %vm295_vm1, %v434_v50, %v435_v54 }
  0xc7   : > { %v3301_v56 = vpop.permute.xlu1 %419  ;;  %v418_v57 = vpop.permute.xlu0 %417  ;;  %v455_v26 = vsel %vm452_vm7, %v400_v34, %v454_v61 }
  0xc8   : > { %v444_v59 = vrot.slane %v3301_v56, 4  ;;  %v443_v60 = vrot.slane %v418_v57, 4 }
  0xc9   : > { %719 = vrot.lane.b32.xlu1 %v3229_v8, %s2945_s22  ;;  %717 = vrot.lane.b32.xlu0 %v3232_v9, %s2945_s22 }
  0xca   : > { %v470_v62 = vsel %vm295_vm1, %v443_v60, %v444_v59  ;;  %v468_v63 = vsel %vm295_vm1, %v442_v58, %v443_v60 }
  0xcb   : > { %v471_v14 = vsel %vm452_vm7, %v418_v57, %v470_v62  ;;  %v244_v16 = vpop.permute.xlu1 %243  ;;  %v242_v23 = vpop.permute.xlu0 %241  ;;  %v469_v25 = vsel %vm452_vm7, %v416_v11, %v468_v63 }
  0xcc   : > { %v2770_v28 = vcombine.high %v453_v0, %v469_v25  ;;  %v2772_v29 = vcombine.high %v455_v26, %v471_v14  ;;  %v2769_v30 = vcombine.low %v453_v0, %v469_v25  ;;  %v2771_v31 = vcombine.low %v455_v26, %v471_v14 }
  0xcd   : > { %737 = vrot.lane.b32.xlu1 %v3249_v51, %s2945_s22  ;;  %735 = vrot.lane.b32.xlu0 %v3252_v52, %s2945_s22  ;;  %v278_v32 = vrot.slane %v244_v16, 4  ;;  %v277_v33 = vrot.slane %v242_v23, 4  ;;  %v2738_v25 = vcombine.high %v2990_v1, %v2996_v2  ;;  %v2740_v26 = vcombine.high %v2999_v3, %v3003_v5 }
  0xce   : > { %2337 = vmatprep.subr.bf16.mxu0 %v2770_v28  ;;  %2378 = vmatprep.subr.bf16.mxu1 %v2772_v29 }
  0xcf   : > { %2338 = vmatpush1.bf16.msra.mxu0 %v2769_v30  ;;  %2379 = vmatpush1.bf16.msra.mxu1 %v2771_v31  ;;  %v260_v35 = vpop.permute.xlu1 %259  ;;  %v3323_v36 = vpop.permute.xlu0 %245  ;;  %v296_v37 = vsel %vm295_vm1, %v277_v33, %v278_v32  ;;  %v2739_v33 = vcombine.low %v2999_v3, %v3003_v5 }
  0xd0   : > { %v279_v34 = vrot.slane %v3323_v36, 4  ;;  %v286_v46 = vrot.slane %v260_v35, 4  ;;  %v298_v57 = vsel %vm297_vm8, %v242_v23, %v296_v37 }
  0xd1   : > { %564 = vrot.lane.b32.xlu1 %v3229_v8, %s2946_s23  ;;  %562 = vrot.lane.b32.xlu0 %v3232_v9, %s2946_s23 }
  0xd2   : > { %v299_v10 = vsel %vm295_vm1, %v278_v32, %v279_v34  ;;  %v2737_v32 = vcombine.low %v2990_v1, %v2996_v2 }
  0xd3   : > { %v3331_v38 = vpop.permute.xlu1 %263  ;;  %v262_v43 = vpop.permute.xlu0 %261  ;;  %v300_v63 = vsel %vm297_vm8, %v244_v16, %v299_v10 }
  0xd4   : > { %v288_v48 = vrot.slane %v3331_v38, 4  ;;  %v287_v50 = vrot.slane %v262_v43, 4 }
  0xd5   : > { %582 = vrot.lane.b32.xlu1 %v3249_v51, %s2946_s23  ;;  %580 = vrot.lane.b32.xlu0 %v3252_v52, %s2946_s23 }
  0xd6   : > { %v315_v11 = vsel %vm295_vm1, %v287_v50, %v288_v48  ;;  %v313_v55 = vsel %vm295_vm1, %v286_v46, %v287_v50 }
  0xd7   : > { %v316_v58 = vsel %vm297_vm8, %v262_v43, %v315_v11  ;;  %v1330_v60 = vpop.permute.xlu1 %1329  ;;  %v1328_v61 = vpop.permute.xlu0 %1327  ;;  %v314_v62 = vsel %vm297_vm8, %v260_v35, %v313_v55 }
  0xd8   : > { %v2754_v0 = vcombine.high %v298_v57, %v314_v62  ;;  %v2756_v14 = vcombine.high %v300_v63, %v316_v58  ;;  %v2753_v23 = vcombine.low %v298_v57, %v314_v62  ;;  %v2755_v28 = vcombine.low %v300_v63, %v316_v58 }
  0xd9   : > { %409 = vrot.lane.b32.xlu1 %v3229_v8, %s2947_s24  ;;  %407 = vrot.lane.b32.xlu0 %v3232_v9, %s2947_s24  ;;  %v1364_v29 = vrot.slane %v1330_v60, 4  ;;  %v1363_v16 = vrot.slane %v1328_v61, 4 }
  0xda   : > { %2339 = vmatprep.subr.bf16.mxu0 %v2754_v0  ;;  %2380 = vmatprep.subr.bf16.mxu1 %v2756_v14 }
  0xdb   : > { %v1346_v30 = vpop.permute.xlu1 %1345  ;;  %2340 = vmatpush1.bf16.msra.mxu0 %v2753_v23  ;;  %2381 = vmatpush1.bf16.msra.mxu1 %v2755_v28  ;;  %v3357_v31 = vpop.permute.xlu0 %1331  ;;  %v1381_v37 = vsel %vm295_vm1, %v1363_v16, %v1364_v29  ;;  %v3396_v28 = vcombine.low %v3082_v6, %v3082_v6 }
  0xdc   : > { %v1365_v35 = vrot.slane %v3357_v31, 4  ;;  %2341 = vmatprep.subr.bf16.mxu0 %v2738_v25  ;;  %2382 = vmatprep.subr.bf16.mxu1 %v2740_v26  ;;  %v1372_v1 = vrot.slane %v1346_v30, 4  ;;  %v1383_v11 = vsel %vm1382_vm9, %v1328_v61, %v1381_v37 }
  0xdd   : > { %427 = vrot.lane.b32.xlu1 %v3249_v51, %s2947_s24  ;;  %425 = vrot.lane.b32.xlu0 %v3252_v52, %s2947_s24 }
  0xde   : > { %v1384_v5 = vsel %vm295_vm1, %v1364_v29, %v1365_v35 }
  0xdf   : > { %v3369_v43 = vpop.permute.xlu1 %1349  ;;  %v1348_v46 = vpop.permute.xlu0 %1347  ;;  %2342 = vmatpush1.bf16.msra.mxu0 %v2737_v32  ;;  %2383 = vmatpush1.bf16.msra.mxu1 %v2739_v33  ;;  %v1385_v63 = vsel %vm1382_vm9, %v1330_v60, %v1384_v5 }
  0xe0   : > { %v1374_v2 = vrot.slane %v3369_v43, 4  ;;  %v1373_v3 = vrot.slane %v1348_v46, 4 }
  0xe1   : > { %253 = vrot.lane.b32.xlu1 %v3229_v8, %s2948_s25  ;;  %251 = vrot.lane.b32.xlu0 %v3232_v9, %s2948_s25 }
  0xe2   : > { %v1400_v50 = vsel %vm295_vm1, %v1373_v3, %v1374_v2  ;;  %v1398_v10 = vsel %vm295_vm1, %v1372_v1, %v1373_v3 }
  0xe3   : > { %v1401_v55 = vsel %vm1382_vm9, %v1348_v46, %v1400_v50  ;;  %v3385_v57 = vpop.permute.xlu1 %1180  ;;  %v1179_v58 = vpop.permute.xlu0 %1178  ;;  %v1399_v62 = vsel %vm1382_vm9, %v1346_v30, %v1398_v10 }
  0xe4   : > { %v1212_v0 = vrot.slane %v3385_v57, 4  ;;  %v1211_v14 = vrot.slane %v1179_v58, 4  ;;  %v2866_v25 = vcombine.high %v1383_v11, %v1399_v62  ;;  %v2868_v26 = vcombine.high %v1385_v63, %v1401_v55 }
  0xe5   : > { %271 = vrot.lane.b32.xlu1 %v3249_v51, %s2948_s25  ;;  %269 = vrot.lane.b32.xlu0 %v3252_v52, %s2948_s25  ;;  %v2865_v61 = vcombine.low %v1383_v11, %v1399_v62  ;;  %v2867_v23 = vcombine.low %v1385_v63, %v1401_v55  ;;  %v3438_v55 = vld [vmem:[%s2986_s18 + $0x38] sm:$0xff] }
  0xe6   : > { %2357 = vmatprep.subr.bf16.mxu0 %v2866_v25  ;;  %2398 = vmatprep.subr.bf16.mxu1 %v2868_v26  ;;  %v1233_v60 = vsel %vm295_vm1, %v1211_v14, %v1212_v0  ;;  %v1231_v30 = vsel %vm295_vm1, %v1210_v17, %v1211_v14  ;;  %v1153_v26 = vld [vmem:[%s2986_s18 + $0x84] sm:$0xf] }
  0xe7   : > { %v3401_v29 = vpop.permute.xlu1 %1198  ;;  %v1197_v16 = vpop.permute.xlu0 %1196  ;;  %2358 = vmatpush2.bf16.msra.mxu0 %v2865_v61  ;;  %2399 = vmatpush2.bf16.msra.mxu1 %v2867_v23  ;;  %v1234_v6 = vsel %vm1227_vm2, %v1179_v58, %v1233_v60  ;;  %v1232_v1 = vsel %vm1227_vm2, %v3127_v12, %v1231_v30  ;;  %v3460_v61 = vld [vmem:[%s2986_s18 + $0x7c] sm:$0xff] }
  0xe8   : > { %v1221_v32 = vrot.slane %v3401_v29, 4  ;;  %v1220_v33 = vrot.slane %v1197_v16, 4 }
  0xe9   : > { %1339 = vrot.lane.b32.xlu1 %v3229_v8, %s2949_s26  ;;  %1337 = vrot.lane.b32.xlu0 %v3232_v9, %s2949_s26 }
  0xea   : > { %v1247_v37 = vsel %vm295_vm1, %v1219_v22, %v1220_v33  ;;  %v1249_v46 = vsel %vm295_vm1, %v1220_v33, %v1221_v32  ;;  %2360 = vmatmul.mubr.bf16.vlgmr.msra.gmra.mxu0 %v3396_v28  ;;  %2401 = vmatmul.mubr.bf16.vlgmr.msra.gmra.mxu1 %v3396_v28 }
  0xeb   : > { %v1250_v17 = vsel %vm1227_vm2, %v1197_v16, %v1249_v46  ;;  %v3421_v8 = vpop.permute.xlu1 %1025  ;;  %v1024_v9 = vpop.permute.xlu0 %1023  ;;  %v1248_v22 = vsel %vm1227_vm2, %v3138_v20, %v1247_v37  ;;  %2883 = vmatprep.mubr.msk.bf16.mxu0 %vm2323_vm0, %v3089_v7  ;;  %2884 = vmatprep.mubr.msk.bf16.mxu1 %vm2323_vm0, %v3089_v7  ;;  %v1144_v20 = vld [vmem:[%s2986_s18 + $0x40] sm:$0xf] }
  0xec   : > { %v2855_v3 = vcombine.low %v1234_v6, %v1250_v17  ;;  %v2856_v5 = vcombine.high %v1234_v6, %v1250_v17  ;;  %v1057_v50 = vrot.slane %v3421_v8, 4  ;;  %v1056_v10 = vrot.slane %v1024_v9, 4 }
  0xed   : > { %1357 = vrot.lane.b32.xlu1 %v3249_v51, %s2949_s26  ;;  %1355 = vrot.lane.b32.xlu0 %v3252_v52, %s2949_s26  ;;  %v2853_v12 = vcombine.low %v1232_v1, %v1248_v22  ;;  %v2854_v11 = vcombine.high %v1232_v1, %v1248_v22  ;;  %v989_v22 = vld [vmem:[%s2986_s18 + $0x40] sm:$0xf] }
  0xee   : > { %2450 = vmatprep.subr.bf16.mxu1 %v2856_v5  ;;  %v1076_v51 = vsel %vm295_vm1, %v1055_v42, %v1056_v10  ;;  %v1078_v52 = vsel %vm295_vm1, %v1056_v10, %v1057_v50 }
  0xef   : > { %2409 = vmatprep.subr.bf16.mxu0 %v2854_v11  ;;  %v3440_v58 = vpop.permute.xlu1 %1043  ;;  %v1042_v62 = vpop.permute.xlu0 %1041  ;;  %2451 = vmatpush1.bf16.msra.mxu1 %v2855_v3  ;;  %v1079_v23 = vsel %vm1072_vm3, %v1024_v9, %v1078_v52  ;;  %v1077_v33 = vsel %vm1072_vm3, %v3161_v41, %v1076_v51 }
  0xf0   : > { %v1066_v63 = vrot.slane %v3440_v58, 4  ;;  %v1065_v14 = vrot.slane %v1042_v62, 4  ;;  %2410 = vmatpush1.bf16.msra.mxu0 %v2853_v12 }
  0xf1   : > { %1188 = vrot.lane.b32.xlu1 %v1144_v20, %s2942_s19  ;;  %1186 = vrot.lane.b32.xlu0 %v3438_v55, %s2942_s19  ;;  %v998_v20 = vld [vmem:[%s2986_s18 + $0x84] sm:$0xf] }
  0xf2   : > { %v1092_v25 = vsel %vm295_vm1, %v1064_v47, %v1065_v14  ;;  %v1094_v42 = vsel %vm295_vm1, %v1065_v14, %v1066_v63 }
  0xf3   : > { %v1095_v60 = vsel %vm1072_vm3, %v1042_v62, %v1094_v42  ;;  %v3464_v16 = vpop.permute.xlu1 %870  ;;  %v869_v30 = vpop.permute.xlu0 %868  ;;  %v1093_v47 = vsel %vm1072_vm3, %v3169_v44, %v1092_v25 }
  0xf4   : > { %v2839_v6 = vcombine.low %v1079_v23, %v1095_v60  ;;  %v2840_v37 = vcombine.high %v1079_v23, %v1095_v60  ;;  %v902_v46 = vrot.slane %v3464_v16, 4  ;;  %v901_v17 = vrot.slane %v869_v30, 4 }
  0xf5   : > { %1206 = vrot.lane.b32.xlu1 %v1153_v26, %s2942_s19  ;;  %1204 = vrot.lane.b32.xlu0 %v3460_v61, %s2942_s19  ;;  %v2837_v9 = vcombine.low %v1077_v33, %v1093_v47  ;;  %v2838_v1 = vcombine.high %v1077_v33, %v1093_v47  ;;  %v834_v47 = vld [vmem:[%s2986_s18 + $0x40] sm:$0xf] }
  0xf6   : > { %2452 = vmatprep.subr.bf16.mxu1 %v2840_v37  ;;  %v921_v44 = vsel %vm295_vm1, %v900_v13, %v901_v17  ;;  %v923_v5 = vsel %vm295_vm1, %v901_v17, %v902_v46 }
  0xf7   : > { %2411 = vmatprep.subr.bf16.mxu0 %v2838_v1  ;;  %v3475_v41 = vpop.permute.xlu1 %888  ;;  %v887_v3 = vpop.permute.xlu0 %886  ;;  %2453 = vmatpush1.bf16.msra.mxu1 %v2839_v6  ;;  %v924_v62 = vsel %vm917_vm4, %v869_v30, %v923_v5  ;;  %v922_v25 = vsel %vm917_vm4, %v3191_v4, %v921_v44 }
  0xf8   : > { %v911_v10 = vrot.slane %v3475_v41, 4  ;;  %v910_v12 = vrot.slane %v887_v3, 4  ;;  %2412 = vmatpush1.bf16.msra.mxu0 %v2837_v9 }
  0xf9   : > { %1033 = vrot.lane.b32.xlu1 %v989_v22, %s2943_s20  ;;  %1031 = vrot.lane.b32.xlu0 %v3438_v55, %s2943_s20 }
  0xfa   : > { %v937_v11 = vsel %vm295_vm1, %v909_v19, %v910_v12  ;;  %v939_v13 = vsel %vm295_vm1, %v910_v12, %v911_v10 }
  0xfb   : > { %v940_v51 = vsel %vm917_vm4, %v887_v3, %v939_v13  ;;  %v3496_v52 = vpop.permute.xlu1 %715  ;;  %v714_v14 = vpop.permute.xlu0 %713  ;;  %v938_v42 = vsel %vm917_vm4, %v3199_v15, %v937_v11 }
  0xfc   : > { %v2823_v19 = vcombine.low %v924_v62, %v940_v51  ;;  %v2824_v26 = vcombine.high %v924_v62, %v940_v51  ;;  %v747_v23 = vrot.slane %v3496_v52, 4  ;;  %v746_v60 = vrot.slane %v714_v14, 4 }
  0xfd   : > { %1051 = vrot.lane.b32.xlu1 %v998_v20, %s2943_s20  ;;  %1049 = vrot.lane.b32.xlu0 %v3460_v61, %s2943_s20  ;;  %v2821_v30 = vcombine.low %v922_v25, %v938_v42  ;;  %v2822_v33 = vcombine.high %v922_v25, %v938_v42 }
  0xfe   : > { %2454 = vmatprep.subr.bf16.mxu1 %v2824_v26  ;;  %v768_v4 = vsel %vm295_vm1, %v746_v60, %v747_v23  ;;  %v766_v37 = vsel %vm295_vm1, %v745_v40, %v746_v60  ;;  %v843_v40 = vld [vmem:[%s2986_s18 + $0x84] sm:$0xf] }
  0xff   : > { %2413 = vmatprep.subr.bf16.mxu0 %v2822_v33  ;;  %v3510_v15 = vpop.permute.xlu1 %733  ;;  %v732_v6 = vpop.permute.xlu0 %731  ;;  %2455 = vmatpush1.bf16.msra.mxu1 %v2823_v19  ;;  %v769_v1 = vsel %vm762_vm5, %v714_v14, %v768_v4  ;;  %v767_v11 = vsel %vm762_vm5, %v3221_v39, %v766_v37  ;;  %v2950_v14 = vmov 0   ;;  %v679_v39 = vld [vmem:[%s2986_s18 + $0x40] sm:$0xf]  ;;  %v688_v4 = vld [vmem:[%s2986_s18 + $0x84] sm:$0xf] }
 0x100   : > { %v756_v17 = vrot.slane %v3510_v15, 4  ;;  %v755_v9 = vrot.slane %v732_v6, 4  ;;  %2414 = vmatpush1.bf16.msra.mxu0 %v2821_v30  ;;  %2909 = vset.pattern.permute.xlu0 %v2950_v14 }
 0x101   : > { %878 = vrot.lane.b32.xlu1 %v834_v47, %s2944_s21  ;;  %876 = vrot.lane.b32.xlu0 %v3438_v55, %s2944_s21 }
 0x102   : > { %v782_v22 = vsel %vm295_vm1, %v754_v49, %v755_v9  ;;  %v784_v3 = vsel %vm295_vm1, %v755_v9, %v756_v17 }
 0x103   : > { %v785_v44 = vsel %vm762_vm5, %v732_v6, %v784_v3  ;;  %v3528_v5 = vpop.permute.xlu1 %560  ;;  %v559_v12 = vpop.permute.xlu0 %558  ;;  %v783_v13 = vsel %vm762_vm5, %v3235_v45, %v782_v22 }
 0x104   : > { %v2807_v20 = vcombine.low %v769_v1, %v785_v44  ;;  %v2808_v62 = vcombine.high %v769_v1, %v785_v44  ;;  %v592_v49 = vrot.slane %v3528_v5, 4  ;;  %v591_v51 = vrot.slane %v559_v12, 4 }
 0x105   : > { %896 = vrot.lane.b32.xlu1 %v843_v40, %s2944_s21  ;;  %894 = vrot.lane.b32.xlu0 %v3460_v61, %s2944_s21  ;;  %v2805_v25 = vcombine.low %v767_v11, %v783_v13  ;;  %v2806_v42 = vcombine.high %v767_v11, %v783_v13 }
 0x106   : > { %2456 = vmatprep.subr.bf16.mxu1 %v2808_v62  ;;  %v611_v26 = vsel %vm295_vm1, %v590_v21, %v591_v51  ;;  %v613_v60 = vsel %vm295_vm1, %v591_v51, %v592_v49 }
 0x107   : > { %2415 = vmatprep.subr.bf16.mxu0 %v2806_v42  ;;  %v3539_v19 = vpop.permute.xlu1 %578  ;;  %v577_v45 = vpop.permute.xlu0 %576  ;;  %2457 = vmatpush1.bf16.msra.mxu1 %v2807_v20  ;;  %v614_v6 = vsel %vm607_vm6, %v559_v12, %v613_v60  ;;  %v612_v22 = vsel %vm607_vm6, %v3263_v18, %v611_v26  ;;  %v524_v20 = vld [vmem:[%s2986_s18 + $0x40] sm:$0xf] }
 0x108   : > { %v601_v30 = vrot.slane %v3539_v19, 4  ;;  %v600_v33 = vrot.slane %v577_v45, 4  ;;  %2416 = vmatpush1.bf16.msra.mxu0 %v2805_v25 }
 0x109   : > { %723 = vrot.lane.b32.xlu1 %v679_v39, %s2945_s22  ;;  %721 = vrot.lane.b32.xlu0 %v3438_v55, %s2945_s22  ;;  %v533_v39 = vld [vmem:[%s2986_s18 + $0x84] sm:$0xf] }
 0x10a   : > { %v627_v47 = vsel %vm295_vm1, %v599_v27, %v600_v33  ;;  %v629_v21 = vsel %vm295_vm1, %v600_v33, %v601_v30 }
 0x10b   : > { %v630_v37 = vsel %vm607_vm6, %v577_v45, %v629_v21  ;;  %v3560_v9 = vpop.permute.xlu1 %405  ;;  %v404_v1 = vpop.permute.xlu0 %403  ;;  %v628_v3 = vsel %vm607_vm6, %v3271_v24, %v627_v47 }
 0x10c   : > { %v2791_v27 = vcombine.low %v614_v6, %v630_v37  ;;  %v2792_v40 = vcombine.high %v614_v6, %v630_v37  ;;  %v437_v44 = vrot.slane %v3560_v9, 4  ;;  %v436_v11 = vrot.slane %v404_v1, 4 }
 0x10d   : > { %741 = vrot.lane.b32.xlu1 %v688_v4, %s2945_s22  ;;  %739 = vrot.lane.b32.xlu0 %v3460_v61, %s2945_s22  ;;  %v2789_v12 = vcombine.low %v612_v22, %v628_v3  ;;  %v2790_v13 = vcombine.high %v612_v22, %v628_v3  ;;  %v369_v3 = vld [vmem:[%s2986_s18 + $0x40] sm:$0xf] }
 0x10e   : > { %2458 = vmatprep.subr.bf16.mxu1 %v2792_v40  ;;  %v456_v24 = vsel %vm295_vm1, %v435_v54, %v436_v11  ;;  %v458_v51 = vsel %vm295_vm1, %v436_v11, %v437_v44 }
 0x10f   : > { %2417 = vmatprep.subr.bf16.mxu0 %v2790_v13  ;;  %v3571_v18 = vpop.permute.xlu1 %423  ;;  %v422_v62 = vpop.permute.xlu0 %421  ;;  %2459 = vmatpush1.bf16.msra.mxu1 %v2791_v27  ;;  %v459_v45 = vsel %vm452_vm7, %v404_v1, %v458_v51  ;;  %v457_v47 = vsel %vm452_vm7, %v3293_v53, %v456_v24 }
 0x110   : > { %v446_v14 = vrot.slane %v3571_v18, 4  ;;  %v445_v25 = vrot.slane %v422_v62, 4  ;;  %2418 = vmatpush1.bf16.msra.mxu0 %v2789_v12 }
 0x111   : > { %568 = vrot.lane.b32.xlu1 %v524_v20, %s2946_s23  ;;  %566 = vrot.lane.b32.xlu0 %v3438_v55, %s2946_s23  ;;  %v378_v20 = vld [vmem:[%s2986_s18 + $0x84] sm:$0xf] }
 0x112   : > { %v472_v42 = vsel %vm295_vm1, %v444_v59, %v445_v25  ;;  %v474_v54 = vsel %vm295_vm1, %v445_v25, %v446_v14 }
 0x113   : > { %v475_v26 = vsel %vm452_vm7, %v422_v62, %v474_v54  ;;  %v3592_v60 = vpop.permute.xlu1 %249  ;;  %v248_v33 = vpop.permute.xlu0 %247  ;;  %v473_v21 = vsel %vm452_vm7, %v3301_v56, %v472_v42 }
 0x114   : > { %v2775_v59 = vcombine.low %v459_v45, %v475_v26  ;;  %v2776_v4 = vcombine.high %v459_v45, %v475_v26  ;;  %v281_v6 = vrot.slane %v3592_v60, 4  ;;  %v280_v37 = vrot.slane %v248_v33, 4 }
 0x115   : > { %586 = vrot.lane.b32.xlu1 %v533_v39, %s2946_s23  ;;  %584 = vrot.lane.b32.xlu0 %v3460_v61, %s2946_s23  ;;  %v2773_v1 = vcombine.low %v457_v47, %v473_v21  ;;  %v2774_v22 = vcombine.high %v457_v47, %v473_v21 }
 0x116   : > { %2460 = vmatprep.subr.bf16.mxu1 %v2776_v4  ;;  %v301_v56 = vsel %vm295_vm1, %v279_v34, %v280_v37  ;;  %v303_v40 = vsel %vm295_vm1, %v280_v37, %v281_v6  ;;  %v2919_v37 = vld [vmem:[%s2986_s18 + $0x18] ss:$68 sps:$4 sm:$0xff]  }
 0x117   : > { %2419 = vmatprep.subr.bf16.mxu0 %v2774_v22  ;;  %v3603_v53 = vpop.permute.xlu1 %267  ;;  %v266_v27 = vpop.permute.xlu0 %265  ;;  %2461 = vmatpush1.bf16.msra.mxu1 %v2775_v59  ;;  %v304_v62 = vsel %vm297_vm8, %v248_v33, %v303_v40  ;;  %v302_v42 = vsel %vm297_vm8, %v3323_v36, %v301_v56  ;;  %v2921_v33 = vld [vmem:[%s2986_s18 + $0x1c] ss:$68 sps:$4 sm:$0xff]   ;;  %v2918_v59 = vld [vmem:[%s2986_s18 + $0x14] ss:$68 sps:$4 sm:$0xff]  }
 0x118   : > { %v290_v11 = vrot.slane %v3603_v53, 4  ;;  %v289_v12 = vrot.slane %v266_v27, 4  ;;  %2420 = vmatpush1.bf16.msra.mxu0 %v2773_v1  ;;  %v213_v36 = vld [vmem:[%s2986_s18 + $0x40] sm:$0xf]  ;;  %v2916_v56 = vld [vmem:[%s2986_s18 + $0x10] ss:$68 sps:$4 sm:$0xff]  }
 0x119   : > { %413 = vrot.lane.b32.xlu1 %v369_v3, %s2947_s24  ;;  %411 = vrot.lane.b32.xlu0 %v3438_v55, %s2947_s24 }
 0x11a   : > { %v317_v13 = vsel %vm295_vm1, %v288_v48, %v289_v12  ;;  %v319_v34 = vsel %vm295_vm1, %v289_v12, %v290_v11  ;;  %v222_v12 = vld [vmem:[%s2986_s18 + $0x84] sm:$0xf] }
 0x11b   : > { %v320_v24 = vsel %vm297_vm8, %v266_v27, %v319_v34  ;;  %v3624_v51 = vpop.permute.xlu1 %1335  ;;  %v1334_v25 = vpop.permute.xlu0 %1333  ;;  %v318_v48 = vsel %vm297_vm8, %v3331_v38, %v317_v13 }
 0x11c   : > { %v2759_v54 = vcombine.low %v304_v62, %v320_v24  ;;  %v2760_v39 = vcombine.high %v304_v62, %v320_v24  ;;  %v1367_v45 = vrot.slane %v3624_v51, 4  ;;  %v1366_v26 = vrot.slane %v1334_v25, 4 }
 0x11d   : > { %431 = vrot.lane.b32.xlu1 %v378_v20, %s2947_s24  ;;  %429 = vrot.lane.b32.xlu0 %v3460_v61, %s2947_s24  ;;  %v2757_v47 = vcombine.low %v302_v42, %v318_v48  ;;  %v2758_v21 = vcombine.high %v302_v42, %v318_v48 }
 0x11e   : > { %2462 = vmatprep.subr.bf16.mxu1 %v2760_v39  ;;  %v1386_v1 = vsel %vm295_vm1, %v1365_v35, %v1366_v26  ;;  %v1388_v22 = vsel %vm295_vm1, %v1366_v26, %v1367_v45 }
 0x11f   : > { %2421 = vmatprep.subr.bf16.mxu0 %v2758_v21  ;;  %v3637_v38 = vpop.permute.xlu1 %1353  ;;  %v1352_v4 = vpop.permute.xlu0 %1351  ;;  %2463 = vmatpush1.bf16.msra.mxu1 %v2759_v54  ;;  %v1389_v13 = vsel %vm1382_vm9, %v1334_v25, %v1388_v22  ;;  %v1387_v24 = vsel %vm1382_vm9, %v3357_v31, %v1386_v1 }
 0x120   : > { %v1376_v3 = vrot.slane %v3637_v38, 4  ;;  %v1375_v27 = vrot.slane %v1352_v4, 4  ;;  %2422 = vmatpush1.bf16.msra.mxu0 %v2757_v47  ;;  %2464 = vmatprep.subr.bf16.mxu1 %v2921_v33  ;;  %v1299_v33 = vld [vmem:[%s2986_s18 + $0x40] sm:$0xf] }
 0x121   : > { %257 = vrot.lane.b32.xlu1 %v213_v36, %s2948_s25  ;;  %255 = vrot.lane.b32.xlu0 %v3438_v55, %s2948_s25 }
 0x122   : > { %v1402_v40 = vsel %vm295_vm1, %v1374_v2, %v1375_v27  ;;  %v1404_v35 = vsel %vm295_vm1, %v1375_v27, %v1376_v3  ;;  %2423 = vmatprep.subr.bf16.mxu0 %v2918_v59 }
 0x123   : > { %v1405_v34 = vsel %vm1382_vm9, %v1352_v4, %v1404_v35  ;;  %v3660_v20 = vpop.permute.xlu1 %1184  ;;  %v1183_v62 = vpop.permute.xlu0 %1182  ;;  %2465 = vmatpush1.bf16.msra.mxu1 %v2919_v37  ;;  %v1403_v2 = vsel %vm1382_vm9, %v3369_v43, %v1402_v40 }
 0x124   : > { %v2871_v42 = vcombine.low %v1389_v13, %v1405_v34  ;;  %v2872_v48 = vcombine.high %v1389_v13, %v1405_v34  ;;  %v1214_v54 = vrot.slane %v3660_v20, 4  ;;  %v1213_v39 = vrot.slane %v1183_v62, 4  ;;  %2424 = vmatpush1.bf16.msra.mxu0 %v2916_v56  ;;  %v1591_v34 = vld [vmem:[%s4031_s2] sm:$0xff] }
 0x125   : > { %275 = vrot.lane.b32.xlu1 %v222_v12, %s2948_s25  ;;  %273 = vrot.lane.b32.xlu0 %v3460_v61, %s2948_s25  ;;  %v2869_v25 = vcombine.low %v1387_v24, %v1403_v2  ;;  %v2870_v26 = vcombine.high %v1387_v24, %v1403_v2 }
 0x126   : > { %2480 = vmatprep.subr.bf16.mxu1 %v2872_v48  ;;  %v1237_v31 = vsel %vm295_vm1, %v1213_v39, %v1214_v54  ;;  %v1235_v21 = vsel %vm295_vm1, %v1212_v0, %v1213_v39  ;;  %v1308_v0 = vld [vmem:[%s2986_s18 + $0x84] sm:$0xf] }
 0x127   : > { %2439 = vmatprep.subr.bf16.mxu0 %v2870_v26  ;;  %v3674_v43 = vpop.permute.xlu1 %1202  ;;  %v1201_v47 = vpop.permute.xlu0 %1200  ;;  %2481 = vmatpush2.bf16.msra.mxu1 %v2871_v42  ;;  %v1238_v4 = vsel %vm1227_vm2, %v1183_v62, %v1237_v31 }
 0x128   : > { %v1223_v36 = vrot.slane %v3674_v43, 4  ;;  %v1222_v59 = vrot.slane %v1201_v47, 4  ;;  %2440 = vmatpush2.bf16.msra.mxu0 %v2869_v25 }
 0x129   : > { %1343 = vrot.lane.b32.xlu1 %v1299_v33, %s2949_s26  ;;  %1341 = vrot.lane.b32.xlu0 %v3438_v55, %s2949_s26  ;;  %v1236_v55 = vsel %vm1227_vm2, %v3385_v57, %v1235_v21 }
 0x12a   : > { %v1251_v37 = vsel %vm295_vm1, %v1221_v32, %v1222_v59  ;;  %v1253_v1 = vsel %vm295_vm1, %v1222_v59, %v1223_v36  ;;  %2483 = vmatmul.mubr.bf16.vlgmr.msra.gmra.mxu1 %v3396_v28 }
 0x12b   : > { %v1254_v22 = vsel %vm1227_vm2, %v1201_v47, %v1253_v1  ;;  %v3693_v27 = vpop.permute.xlu1 %1029  ;;  %v1028_v56 = vpop.permute.xlu0 %1027  ;;  %v1252_v40 = vsel %vm1227_vm2, %v3401_v29, %v1251_v37  ;;  %2442 = vmatmul.mubr.bf16.vlgmr.msra.gmra.mxu0 %v3396_v28  ;;  %2886 = vmatprep.mubr.msk.bf16.mxu1 %vm2323_vm0, %v3089_v7 }
 0x12c   : > { %v2859_v32 = vcombine.low %v1238_v4, %v1254_v22  ;;  %v2860_v35 = vcombine.high %v1238_v4, %v1254_v22  ;;  %v1059_v12 = vrot.slane %v3693_v27, 4  ;;  %v1058_v13 = vrot.slane %v1028_v56, 4  ;;  %2885 = vmatprep.mubr.msk.bf16.mxu0 %vm2323_vm0, %v3089_v7 }
 0x12d   : > { %1361 = vrot.lane.b32.xlu1 %v1308_v0, %s2949_s26  ;;  %1359 = vrot.lane.b32.xlu0 %v3460_v61, %s2949_s26  ;;  %v2857_v57 = vcombine.low %v1236_v55, %v1252_v40  ;;  %v2858_v29 = vcombine.high %v1236_v55, %v1252_v40 }
 0x12e   : > { %2532 = vmatprep.subr.bf16.mxu1 %v2860_v35  ;;  %v1080_v2 = vsel %vm295_vm1, %v1057_v50, %v1058_v13  ;;  %v1082_v61 = vsel %vm295_vm1, %v1058_v13, %v1059_v12 }
 0x12f   : > { %2491 = vmatprep.subr.bf16.mxu0 %v2858_v29  ;;  %v3711_v62 = vpop.permute.xlu1 %1047  ;;  %v1046_v24 = vpop.permute.xlu0 %1045  ;;  %2533 = vmatpush1.bf16.msra.mxu1 %v2859_v32  ;;  %v1083_v26 = vsel %vm1072_vm3, %v1028_v56, %v1082_v61  ;;  %v1081_v47 = vsel %vm1072_vm3, %v3421_v8, %v1080_v2 }
 0x130   : > { %v1068_v42 = vrot.slane %v3711_v62, 4  ;;  %v1067_v48 = vrot.slane %v1046_v24, 4  ;;  %2492 = vmatpush1.bf16.msra.mxu0 %v2857_v57 }
 0x131   : > { %1594 = vperm.xlu0 %2909, %v1591_v34  }
 0x132   : > { %v1096_v39 = vsel %vm295_vm1, %v1066_v63, %v1067_v48  ;;  %v1098_v25 = vsel %vm295_vm1, %v1067_v48, %v1068_v42 }
 0x133   : > { %v1099_v50 = vsel %vm1072_vm3, %v1046_v24, %v1098_v25  ;;  %v3728_v33 = vpop.permute.xlu1 %874  ;;  %v873_v31 = vpop.permute.xlu0 %872  ;;  %v1097_v21 = vsel %vm1072_vm3, %v3440_v58, %v1096_v39 }
 0x134   : > { %v2843_v59 = vcombine.low %v1083_v26, %v1099_v50  ;;  %v2844_v4 = vcombine.high %v1083_v26, %v1099_v50  ;;  %v904_v63 = vrot.slane %v3728_v33, 4  ;;  %v903_v37 = vrot.slane %v873_v31, 4 }
 0x135   : > { %v2841_v1 = vcombine.low %v1081_v47, %v1097_v21  ;;  %v2842_v0 = vcombine.high %v1081_v47, %v1097_v21 }
 0x136   : > { %2534 = vmatprep.subr.bf16.mxu1 %v2844_v4  ;;  %v925_v8 = vsel %vm295_vm1, %v902_v46, %v903_v37  ;;  %v927_v58 = vsel %vm295_vm1, %v903_v37, %v904_v63 }
 0x137   : > { %2493 = vmatprep.subr.bf16.mxu0 %v2842_v0  ;;  %v3735_v22 = vpop.permute.xlu1 %892  ;;  %v891_v56 = vpop.permute.xlu0 %890  ;;  %2535 = vmatpush1.bf16.msra.mxu1 %v2843_v59  ;;  %v928_v13 = vsel %vm917_vm4, %v873_v31, %v927_v58  ;;  %v926_v34 = vsel %vm917_vm4, %v3464_v16, %v925_v8 }
 0x138   : > { %v913_v55 = vrot.slane %v3735_v22, 4  ;;  %v912_v40 = vrot.slane %v891_v56, 4  ;;  %2494 = vmatpush1.bf16.msra.mxu0 %v2841_v1 }
 0x13a   : > { %v941_v32 = vsel %vm295_vm1, %v911_v10, %v912_v40  ;;  %v943_v35 = vsel %vm295_vm1, %v912_v40, %v913_v55 }
 0x13b   : > { %v944_v46 = vsel %vm917_vm4, %v891_v56, %v943_v35  ;;  %v3752_v57 = vpop.permute.xlu1 %719  ;;  %v718_v29 = vpop.permute.xlu0 %717  ;;  %v942_v24 = vsel %vm917_vm4, %v3475_v41, %v941_v32 }
 0x13c   : > { %v2827_v2 = vcombine.low %v928_v13, %v944_v46  ;;  %v2828_v61 = vcombine.high %v928_v13, %v944_v46  ;;  %v749_v10 = vrot.slane %v3752_v57, 4  ;;  %v748_v48 = vrot.slane %v718_v29, 4 }
 0x13d   : > { %v2825_v39 = vcombine.low %v926_v34, %v942_v24  ;;  %v2826_v25 = vcombine.high %v926_v34, %v942_v24 }
 0x13e   : > { %2536 = vmatprep.subr.bf16.mxu1 %v2828_v61  ;;  %v770_v16 = vsel %vm295_vm1, %v747_v23, %v748_v48  ;;  %v772_v41 = vsel %vm295_vm1, %v748_v48, %v749_v10 }
 0x13f   : > { %2495 = vmatprep.subr.bf16.mxu0 %v2826_v25  ;;  %v3759_v26 = vpop.permute.xlu1 %737  ;;  %v736_v50 = vpop.permute.xlu0 %735  ;;  %2537 = vmatpush1.bf16.msra.mxu1 %v2827_v2  ;;  %v773_v4 = vsel %vm762_vm5, %v718_v29, %v772_v41  ;;  %v771_v0 = vsel %vm762_vm5, %v3496_v52, %v770_v16 }
 0x140   : > { %v758_v31 = vrot.slane %v3759_v26, 4  ;;  %v757_v47 = vrot.slane %v736_v50, 4  ;;  %2496 = vmatpush1.bf16.msra.mxu0 %v2825_v39 }
 0x142   : > { %v786_v21 = vsel %vm295_vm1, %v756_v17, %v757_v47  ;;  %v788_v59 = vsel %vm295_vm1, %v757_v47, %v758_v31 }
 0x143   : > { %v789_v23 = vsel %vm762_vm5, %v736_v50, %v788_v59  ;;  %v3776_v37 = vpop.permute.xlu1 %564  ;;  %v563_v1 = vpop.permute.xlu0 %562  ;;  %v787_v56 = vsel %vm762_vm5, %v3510_v15, %v786_v21 }
 0x144   : > { %v2811_v8 = vcombine.low %v773_v4, %v789_v23  ;;  %v2812_v58 = vcombine.high %v773_v4, %v789_v23  ;;  %v594_v17 = vrot.slane %v3776_v37, 4  ;;  %v593_v40 = vrot.slane %v563_v1, 4 }
 0x145   : > { %v2809_v32 = vcombine.low %v771_v0, %v787_v56  ;;  %v2810_v35 = vcombine.high %v771_v0, %v787_v56 }
 0x146   : > { %2538 = vmatprep.subr.bf16.mxu1 %v2812_v58  ;;  %v615_v52 = vsel %vm295_vm1, %v592_v49, %v593_v40  ;;  %v617_v15 = vsel %vm295_vm1, %v593_v40, %v594_v17 }
 0x147   : > { %2497 = vmatprep.subr.bf16.mxu0 %v2810_v35  ;;  %v3783_v13 = vpop.permute.xlu1 %582  ;;  %v581_v46 = vpop.permute.xlu0 %580  ;;  %2539 = vmatpush1.bf16.msra.mxu1 %v2811_v8  ;;  %v618_v61 = vsel %vm607_vm6, %v563_v1, %v617_v15  ;;  %v616_v25 = vsel %vm607_vm6, %v3528_v5, %v615_v52 }
 0x148   : > { %v603_v29 = vrot.slane %v3783_v13, 4  ;;  %v602_v34 = vrot.slane %v581_v46, 4  ;;  %2498 = vmatpush1.bf16.msra.mxu0 %v2809_v32 }
 0x14a   : > { %v631_v24 = vsel %vm295_vm1, %v601_v30, %v602_v34  ;;  %v633_v2 = vsel %vm295_vm1, %v602_v34, %v603_v29 }
 0x14b   : > { %v634_v49 = vsel %vm607_vm6, %v581_v46, %v633_v2  ;;  %v3800_v48 = vpop.permute.xlu1 %409  ;;  %v408_v39 = vpop.permute.xlu0 %407  ;;  %v632_v50 = vsel %vm607_vm6, %v3539_v19, %v631_v24 }
 0x14c   : > { %v2795_v16 = vcombine.low %v618_v61, %v634_v49  ;;  %v2796_v41 = vcombine.high %v618_v61, %v634_v49  ;;  %v439_v30 = vrot.slane %v3800_v48, 4  ;;  %v438_v47 = vrot.slane %v408_v39, 4 }
 0x14d   : > { %v2793_v21 = vcombine.low %v616_v25, %v632_v50  ;;  %v2794_v59 = vcombine.high %v616_v25, %v632_v50 }
 0x14e   : > { %2540 = vmatprep.subr.bf16.mxu1 %v2796_v41  ;;  %v460_v5 = vsel %vm295_vm1, %v437_v44, %v438_v47  ;;  %v462_v19 = vsel %vm295_vm1, %v438_v47, %v439_v30 }
 0x14f   : > { %2499 = vmatprep.subr.bf16.mxu0 %v2794_v59  ;;  %v3807_v4 = vpop.permute.xlu1 %427  ;;  %v426_v23 = vpop.permute.xlu0 %425  ;;  %2541 = vmatpush1.bf16.msra.mxu1 %v2795_v16  ;;  %v463_v58 = vsel %vm452_vm7, %v408_v39, %v462_v19  ;;  %v461_v35 = vsel %vm452_vm7, %v3560_v9, %v460_v5 }
 0x150   : > { %v448_v1 = vrot.slane %v3807_v4, 4  ;;  %v447_v0 = vrot.slane %v426_v23, 4  ;;  %2500 = vmatpush1.bf16.msra.mxu0 %v2793_v21 }
 0x152   : > { %v476_v56 = vsel %vm295_vm1, %v446_v14, %v447_v0  ;;  %v478_v8 = vsel %vm295_vm1, %v447_v0, %v448_v1 }
 0x153   : > { %v479_v44 = vsel %vm452_vm7, %v426_v23, %v478_v8  ;;  %v3824_v40 = vpop.permute.xlu1 %253  ;;  %v252_v32 = vpop.permute.xlu0 %251  ;;  %v477_v46 = vsel %vm452_vm7, %v3571_v18, %v476_v56  ;;  %v2927_v56 = vld [vmem:[%s2986_s18 + $0x2c] ss:$68 sps:$4 sm:$0xff]  }
 0x154   : > { %v2779_v52 = vcombine.low %v463_v58, %v479_v44  ;;  %v2780_v15 = vcombine.high %v463_v58, %v479_v44  ;;  %v283_v14 = vrot.slane %v3824_v40, 4  ;;  %v282_v34 = vrot.slane %v252_v32, 4  ;;  %v2924_v44 = vld [vmem:[%s2986_s18 + $0x24] ss:$68 sps:$4 sm:$0xff]  }
 0x155   : > { %v2777_v24 = vcombine.low %v461_v35, %v477_v46  ;;  %v2778_v2 = vcombine.high %v461_v35, %v477_v46 }
 0x156   : > { %2542 = vmatprep.subr.bf16.mxu1 %v2780_v15  ;;  %v305_v9 = vsel %vm295_vm1, %v281_v6, %v282_v34  ;;  %v307_v18 = vsel %vm295_vm1, %v282_v34, %v283_v14  ;;  %v2922_v34 = vld [vmem:[%s2986_s18 + $0x20] ss:$68 sps:$4 sm:$0xff]  }
 0x157   : > { %2501 = vmatprep.subr.bf16.mxu0 %v2778_v2  ;;  %v3831_v61 = vpop.permute.xlu1 %271  ;;  %v270_v49 = vpop.permute.xlu0 %269  ;;  %2543 = vmatpush1.bf16.msra.mxu1 %v2779_v52  ;;  %v308_v6 = vsel %vm297_vm8, %v252_v32, %v307_v18  ;;  %v306_v59 = vsel %vm297_vm8, %v3592_v60, %v305_v9  ;;  %v2925_v60 = vld [vmem:[%s2986_s18 + $0x28] ss:$68 sps:$4 sm:$0xff]  }
 0x158   : > { %v292_v39 = vrot.slane %v3831_v61, 4  ;;  %v291_v25 = vrot.slane %v270_v49, 4  ;;  %2502 = vmatpush1.bf16.msra.mxu0 %v2777_v24 }
 0x15a   : > { %v321_v50 = vsel %vm295_vm1, %v290_v11, %v291_v25  ;;  %v323_v16 = vsel %vm295_vm1, %v291_v25, %v292_v39 }
 0x15b   : > { %v324_v41 = vsel %vm297_vm8, %v270_v49, %v323_v16  ;;  %v3848_v47 = vpop.permute.xlu1 %1339  ;;  %v1338_v21 = vpop.permute.xlu0 %1337  ;;  %v322_v23 = vsel %vm297_vm8, %v3603_v53, %v321_v50 }
 0x15c   : > { %v2763_v5 = vcombine.low %v308_v6, %v324_v41  ;;  %v2764_v11 = vcombine.high %v308_v6, %v324_v41  ;;  %v1369_v19 = vrot.slane %v3848_v47, 4  ;;  %v1368_v0 = vrot.slane %v1338_v21, 4 }
 0x15d   : > { %v2761_v8 = vcombine.low %v306_v59, %v322_v23  ;;  %v2762_v58 = vcombine.high %v306_v59, %v322_v23 }
 0x15e   : > { %2544 = vmatprep.subr.bf16.mxu1 %v2764_v11  ;;  %v1390_v53 = vsel %vm295_vm1, %v1367_v45, %v1368_v0  ;;  %v1392_v46 = vsel %vm295_vm1, %v1368_v0, %v1369_v19 }
 0x15f   : > { %2503 = vmatprep.subr.bf16.mxu0 %v2762_v58  ;;  %v3857_v32 = vpop.permute.xlu1 %1357  ;;  %v1356_v35 = vpop.permute.xlu0 %1355  ;;  %2545 = vmatpush1.bf16.msra.mxu1 %v2763_v5  ;;  %v1393_v45 = vsel %vm1382_vm9, %v1338_v21, %v1392_v46  ;;  %v1391_v25 = vsel %vm1382_vm9, %v3624_v51, %v1390_v53 }
 0x160   : > { %v1378_v52 = vrot.slane %v3857_v32, 4  ;;  %v1377_v15 = vrot.slane %v1356_v35, 4  ;;  %2504 = vmatpush1.bf16.msra.mxu0 %v2761_v8  ;;  %2546 = vmatprep.subr.bf16.mxu1 %v2927_v56 }
 0x161   : > { %2505 = vmatprep.subr.bf16.mxu0 %v2924_v44 }
 0x162   : > { %v1406_v24 = vsel %vm295_vm1, %v1376_v3, %v1377_v15  ;;  %v1408_v2 = vsel %vm295_vm1, %v1377_v15, %v1378_v52 }
 0x163   : > { %v1409_v49 = vsel %vm1382_vm9, %v1356_v35, %v1408_v2  ;;  %v1189_v9 = vpop.permute.xlu1 %1188  ;;  %v1187_v18 = vpop.permute.xlu0 %1186  ;;  %2547 = vmatpush1.bf16.msra.mxu1 %v2925_v60  ;;  %v1407_v50 = vsel %vm1382_vm9, %v3637_v38, %v1406_v24 }
 0x164   : > { %v2875_v16 = vcombine.low %v1393_v45, %v1409_v49  ;;  %v2876_v6 = vcombine.high %v1393_v45, %v1409_v49  ;;  %v1216_v3 = vrot.slane %v1189_v9, 4  ;;  %v1215_v41 = vrot.slane %v1187_v18, 4  ;;  %2506 = vmatpush1.bf16.msra.mxu0 %v2922_v34 }
 0x165   : > { %v2873_v59 = vcombine.low %v1391_v25, %v1407_v50  ;;  %v2874_v23 = vcombine.high %v1391_v25, %v1407_v50 }
 0x166   : > { %2562 = vmatprep.subr.bf16.mxu1 %v2876_v6  ;;  %v1241_v21 = vsel %vm295_vm1, %v1215_v41, %v1216_v3  ;;  %v1239_v51 = vsel %vm295_vm1, %v1214_v54, %v1215_v41 }
 0x167   : > { %2521 = vmatprep.subr.bf16.mxu0 %v2874_v23  ;;  %v1207_v5 = vpop.permute.xlu1 %1206  ;;  %v1205_v11 = vpop.permute.xlu0 %1204  ;;  %2563 = vmatpush2.bf16.msra.mxu1 %v2875_v16  ;;  %v1242_v56 = vsel %vm1227_vm2, %v1187_v18, %v1241_v21  ;;  %v1240_v54 = vsel %vm1227_vm2, %v3660_v20, %v1239_v51 }
 0x168   : > { %v1225_v0 = vrot.slane %v1207_v5, 4  ;;  %v1224_v38 = vrot.slane %v1205_v11, 4  ;;  %2522 = vmatpush2.bf16.msra.mxu0 %v2873_v59 }
 0x16a   : > { %v1255_v8 = vsel %vm295_vm1, %v1223_v36, %v1224_v38  ;;  %v1257_v58 = vsel %vm295_vm1, %v1224_v38, %v1225_v0  ;;  %2565 = vmatmul.mubr.bf16.vlgmr.msra.gmra.mxu1 %v3396_v28 }
 0x16b   : > { %v1258_v44 = vsel %vm1227_vm2, %v1205_v11, %v1257_v58  ;;  %v1034_v35 = vpop.permute.xlu1 %1033  ;;  %v1032_v60 = vpop.permute.xlu0 %1031  ;;  %v1256_v53 = vsel %vm1227_vm2, %v3674_v43, %v1255_v8  ;;  %2524 = vmatmul.mubr.bf16.vlgmr.msra.gmra.mxu0 %v3396_v28  ;;  %2888 = vmatprep.mubr.msk.bf16.mxu1 %vm2323_vm0, %v3089_v7 }
 0x16c   : > { %v2863_v36 = vcombine.low %v1242_v56, %v1258_v44  ;;  %v2864_v46 = vcombine.high %v1242_v56, %v1258_v44  ;;  %v1061_v15 = vrot.slane %v1034_v35, 4  ;;  %v1060_v34 = vrot.slane %v1032_v60, 4  ;;  %2887 = vmatprep.mubr.msk.bf16.mxu0 %vm2323_vm0, %v3089_v7 }
 0x16d   : > { %v2861_v24 = vcombine.low %v1240_v54, %v1256_v53  ;;  %v2862_v2 = vcombine.high %v1240_v54, %v1256_v53 }
 0x16e   : > { %2614 = vmatprep.subr.bf16.mxu1 %v2864_v46  ;;  %v1084_v43 = vsel %vm295_vm1, %v1059_v12, %v1060_v34  ;;  %v1086_v49 = vsel %vm295_vm1, %v1060_v34, %v1061_v15 }
 0x16f   : > { %2573 = vmatprep.subr.bf16.mxu0 %v2862_v2  ;;  %v1052_v20 = vpop.permute.xlu1 %1051  ;;  %v1050_v45 = vpop.permute.xlu0 %1049  ;;  %2615 = vmatpush1.bf16.msra.mxu1 %v2863_v36  ;;  %v1087_v50 = vsel %vm1072_vm3, %v1032_v60, %v1086_v49  ;;  %v1085_v12 = vsel %vm1072_vm3, %v3693_v27, %v1084_v43 }
 0x170   : > { %v1070_v9 = vrot.slane %v1052_v20, 4  ;;  %v1069_v18 = vrot.slane %v1050_v45, 4  ;;  %2574 = vmatpush1.bf16.msra.mxu0 %v2861_v24 }
 0x172   : > { %v1100_v7 = vsel %vm295_vm1, %v1068_v42, %v1069_v18  ;;  %v1102_v25 = vsel %vm295_vm1, %v1069_v18, %v1070_v9 }
 0x173   : > { %v1103_v16 = vsel %vm1072_vm3, %v1050_v45, %v1102_v25  ;;  %v879_v6 = vpop.permute.xlu1 %878  ;;  %v877_v3 = vpop.permute.xlu0 %876  ;;  %v1101_v41 = vsel %vm1072_vm3, %v3711_v62, %v1100_v7 }
 0x174   : > { %v2847_v59 = vcombine.low %v1087_v50, %v1103_v16  ;;  %v2848_v23 = vcombine.high %v1087_v50, %v1103_v16  ;;  %v906_v21 = vrot.slane %v879_v6, 4  ;;  %v905_v5 = vrot.slane %v877_v3, 4 }
 0x175   : > { %v2845_v11 = vcombine.low %v1085_v12, %v1101_v41  ;;  %v2846_v42 = vcombine.high %v1085_v12, %v1101_v41 }
 0x176   : > { %2616 = vmatprep.subr.bf16.mxu1 %v2848_v23  ;;  %v929_v38 = vsel %vm295_vm1, %v904_v63, %v905_v5  ;;  %v931_v27 = vsel %vm295_vm1, %v905_v5, %v906_v21 }
 0x177   : > { %2575 = vmatprep.subr.bf16.mxu0 %v2846_v42  ;;  %v897_v51 = vpop.permute.xlu1 %896  ;;  %v895_v0 = vpop.permute.xlu0 %894  ;;  %2617 = vmatpush1.bf16.msra.mxu1 %v2847_v59  ;;  %v932_v44 = vsel %vm917_vm4, %v877_v3, %v931_v27  ;;  %v930_v63 = vsel %vm917_vm4, %v3728_v33, %v929_v38 }
 0x178   : > { %v915_v56 = vrot.slane %v897_v51, 4  ;;  %v914_v8 = vrot.slane %v895_v0, 4  ;;  %2576 = vmatpush1.bf16.msra.mxu0 %v2845_v11 }
 0x17a   : > { %v945_v62 = vsel %vm295_vm1, %v913_v55, %v914_v8  ;;  %v947_v58 = vsel %vm295_vm1, %v914_v8, %v915_v56 }
 0x17b   : > { %v948_v35 = vsel %vm917_vm4, %v895_v0, %v947_v58  ;;  %v724_v60 = vpop.permute.xlu1 %723  ;;  %v722_v54 = vpop.permute.xlu0 %721  ;;  %v946_v53 = vsel %vm917_vm4, %v3735_v22, %v945_v62 }
 0x17c   : > { %v2831_v36 = vcombine.low %v932_v44, %v948_v35  ;;  %v2832_v46 = vcombine.high %v932_v44, %v948_v35  ;;  %v751_v15 = vrot.slane %v724_v60, 4  ;;  %v750_v34 = vrot.slane %v722_v54, 4 }
 0x17d   : > { %v2829_v24 = vcombine.low %v930_v63, %v946_v53  ;;  %v2830_v55 = vcombine.high %v930_v63, %v946_v53 }
 0x17e   : > { %2618 = vmatprep.subr.bf16.mxu1 %v2832_v46  ;;  %v774_v45 = vsel %vm295_vm1, %v749_v10, %v750_v34  ;;  %v776_v33 = vsel %vm295_vm1, %v750_v34, %v751_v15 }
 0x17f   : > { %2577 = vmatprep.subr.bf16.mxu0 %v2830_v55  ;;  %v742_v2 = vpop.permute.xlu1 %741  ;;  %v740_v20 = vpop.permute.xlu0 %739  ;;  %2619 = vmatpush1.bf16.msra.mxu1 %v2831_v36  ;;  %v777_v18 = vsel %vm762_vm5, %v722_v54, %v776_v33  ;;  %v775_v10 = vsel %vm762_vm5, %v3752_v57, %v774_v45 }
 0x180   : > { %v760_v43 = vrot.slane %v742_v2, 4  ;;  %v759_v49 = vrot.slane %v740_v20, 4  ;;  %2578 = vmatpush1.bf16.msra.mxu0 %v2829_v24 }
 0x182   : > { %v790_v22 = vsel %vm295_vm1, %v758_v31, %v759_v49  ;;  %v792_v9 = vsel %vm295_vm1, %v759_v49, %v760_v43 }
 0x183   : > { %v793_v7 = vsel %vm762_vm5, %v740_v20, %v792_v9  ;;  %v569_v25 = vpop.permute.xlu1 %568  ;;  %v567_v50 = vpop.permute.xlu0 %566  ;;  %v791_v16 = vsel %vm762_vm5, %v3759_v26, %v790_v22 }
 0x184   : > { %v2815_v6 = vcombine.low %v777_v18, %v793_v7  ;;  %v2816_v3 = vcombine.high %v777_v18, %v793_v7  ;;  %v596_v12 = vrot.slane %v569_v25, 4  ;;  %v595_v41 = vrot.slane %v567_v50, 4 }
 0x185   : > { %v2813_v59 = vcombine.low %v775_v10, %v791_v16  ;;  %v2814_v31 = vcombine.high %v775_v10, %v791_v16 }
 0x186   : > { %2620 = vmatprep.subr.bf16.mxu1 %v2816_v3  ;;  %v619_v5 = vsel %vm295_vm1, %v594_v17, %v595_v41  ;;  %v621_v57 = vsel %vm295_vm1, %v595_v41, %v596_v12 }
 0x187   : > { %2579 = vmatprep.subr.bf16.mxu0 %v2814_v31  ;;  %v587_v23 = vpop.permute.xlu1 %586  ;;  %v585_v21 = vpop.permute.xlu0 %584  ;;  %2621 = vmatpush1.bf16.msra.mxu1 %v2815_v6  ;;  %v622_v0 = vsel %vm607_vm6, %v567_v50, %v621_v57  ;;  %v620_v17 = vsel %vm607_vm6, %v3776_v37, %v619_v5 }
 0x188   : > { %v605_v11 = vrot.slane %v587_v23, 4  ;;  %v604_v42 = vrot.slane %v585_v21, 4  ;;  %2580 = vmatpush1.bf16.msra.mxu0 %v2813_v59 }
 0x18a   : > { %v635_v26 = vsel %vm295_vm1, %v603_v29, %v604_v42  ;;  %v637_v51 = vsel %vm295_vm1, %v604_v42, %v605_v11  ;;  %v2930_v11 = vld [vmem:[%s2986_s18 + $0x34] ss:$68 sps:$4 sm:$0xff]  }
 0x18b   : > { %v638_v38 = vsel %vm607_vm6, %v585_v21, %v637_v51  ;;  %v414_v27 = vpop.permute.xlu1 %413  ;;  %v412_v56 = vpop.permute.xlu0 %411  ;;  %v636_v8 = vsel %vm607_vm6, %v3783_v13, %v635_v26  ;;  %v2933_v21 = vld [vmem:[%s2986_s18 + $0x3c] ss:$68 sps:$4 sm:$0xff]  }
 0x18c   : > { %v2799_v62 = vcombine.low %v622_v0, %v638_v38  ;;  %v2800_v58 = vcombine.high %v622_v0, %v638_v38  ;;  %v441_v44 = vrot.slane %v414_v27, 4  ;;  %v440_v35 = vrot.slane %v412_v56, 4  ;;  %v2931_v51 = vld [vmem:[%s2986_s18 + $0x38] ss:$68 sps:$4 sm:$0xff]   ;;  %v2928_v27 = vld [vmem:[%s2986_s18 + $0x30] ss:$68 sps:$4 sm:$0xff]  }
 0x18d   : > { %v2797_v60 = vcombine.low %v620_v17, %v636_v8  ;;  %v2798_v29 = vcombine.high %v620_v17, %v636_v8 }
 0x18e   : > { %2622 = vmatprep.subr.bf16.mxu1 %v2800_v58  ;;  %v464_v53 = vsel %vm295_vm1, %v439_v30, %v440_v35  ;;  %v466_v37 = vsel %vm295_vm1, %v440_v35, %v441_v44 }
 0x18f   : > { %2581 = vmatprep.subr.bf16.mxu0 %v2798_v29  ;;  %v432_v54 = vpop.permute.xlu1 %431  ;;  %v430_v63 = vpop.permute.xlu0 %429  ;;  %2623 = vmatpush1.bf16.msra.mxu1 %v2799_v62  ;;  %v467_v34 = vsel %vm452_vm7, %v412_v56, %v466_v37  ;;  %v465_v30 = vsel %vm452_vm7, %v3800_v48, %v464_v53 }
 0x190   : > { %v450_v36 = vrot.slane %v432_v54, 4  ;;  %v449_v46 = vrot.slane %v430_v63, 4  ;;  %2582 = vmatpush1.bf16.msra.mxu0 %v2797_v60 }
 0x192   : > { %v480_v13 = vsel %vm295_vm1, %v448_v1, %v449_v46  ;;  %v482_v15 = vsel %vm295_vm1, %v449_v46, %v450_v36 }
 0x193   : > { %v483_v24 = vsel %vm452_vm7, %v430_v63, %v482_v15  ;;  %v258_v55 = vpop.permute.xlu1 %257  ;;  %v256_v2 = vpop.permute.xlu0 %255  ;;  %v481_v20 = vsel %vm452_vm7, %v3807_v4, %v480_v13 }
 0x194   : > { %v2783_v45 = vcombine.low %v467_v34, %v483_v24  ;;  %v2784_v33 = vcombine.high %v467_v34, %v483_v24  ;;  %v285_v43 = vrot.slane %v258_v55, 4  ;;  %v284_v49 = vrot.slane %v256_v2, 4 }
 0x195   : > { %v2781_v22 = vcombine.low %v465_v30, %v481_v20  ;;  %v2782_v1 = vcombine.high %v465_v30, %v481_v20 }
 0x196   : > { %2624 = vmatprep.subr.bf16.mxu1 %v2784_v33  ;;  %v309_v7 = vsel %vm295_vm1, %v283_v14, %v284_v49  ;;  %v311_v48 = vsel %vm295_vm1, %v284_v49, %v285_v43 }
 0x197   : > { %2583 = vmatprep.subr.bf16.mxu0 %v2782_v1  ;;  %v276_v9 = vpop.permute.xlu1 %275  ;;  %v274_v18 = vpop.permute.xlu0 %273  ;;  %2625 = vmatpush1.bf16.msra.mxu1 %v2783_v45  ;;  %v312_v16 = vsel %vm297_vm8, %v256_v2, %v311_v48  ;;  %v310_v14 = vsel %vm297_vm8, %v3824_v40, %v309_v7 }
 0x198   : > { %v294_v25 = vrot.slane %v276_v9, 4  ;;  %v293_v4 = vrot.slane %v274_v18, 4  ;;  %2584 = vmatpush1.bf16.msra.mxu0 %v2781_v22 }
 0x19a   : > { %v325_v50 = vsel %vm295_vm1, %v292_v39, %v293_v4  ;;  %v327_v10 = vsel %vm295_vm1, %v293_v4, %v294_v25 }
 0x19b   : > { %v328_v6 = vsel %vm297_vm8, %v274_v18, %v327_v10  ;;  %v1344_v3 = vpop.permute.xlu1 %1343  ;;  %v1342_v12 = vpop.permute.xlu0 %1341  ;;  %v326_v41 = vsel %vm297_vm8, %v3831_v61, %v325_v50 }
 0x19c   : > { %v2767_v59 = vcombine.low %v312_v16, %v328_v6  ;;  %v2768_v31 = vcombine.high %v312_v16, %v328_v6  ;;  %v1371_v23 = vrot.slane %v1344_v3, 4  ;;  %v1370_v39 = vrot.slane %v1342_v12, 4 }
 0x19d   : > { %v2765_v5 = vcombine.low %v310_v14, %v326_v41  ;;  %v2766_v57 = vcombine.high %v310_v14, %v326_v41 }
 0x19e   : > { %2626 = vmatprep.subr.bf16.mxu1 %v2768_v31  ;;  %v1394_v40 = vsel %vm295_vm1, %v1369_v19, %v1370_v39  ;;  %v1396_v61 = vsel %vm295_vm1, %v1370_v39, %v1371_v23 }
 0x19f   : > { %2585 = vmatprep.subr.bf16.mxu0 %v2766_v57  ;;  %v1362_v42 = vpop.permute.xlu1 %1361  ;;  %v1360_v26 = vpop.permute.xlu0 %1359  ;;  %2627 = vmatpush1.bf16.msra.mxu1 %v2767_v59  ;;  %v1397_v8 = vsel %vm1382_vm9, %v1342_v12, %v1396_v61  ;;  %v1395_v19 = vsel %vm1382_vm9, %v3848_v47, %v1394_v40 }
 0x1a0   : > { %v1380_v0 = vrot.slane %v1362_v42, 4  ;;  %v1379_v38 = vrot.slane %v1360_v26, 4  ;;  %2586 = vmatpush1.bf16.msra.mxu0 %v2765_v5  ;;  %2628 = vmatprep.subr.bf16.mxu1 %v2933_v21 }
 0x1a1   : > { %2587 = vmatprep.subr.bf16.mxu0 %v2930_v11 }
 0x1a2   : > { %v1410_v56 = vsel %vm295_vm1, %v1378_v52, %v1379_v38  ;;  %v1412_v17 = vsel %vm295_vm1, %v1379_v38, %v1380_v0 }
 0x1a3   : > { %v1413_v62 = vsel %vm1382_vm9, %v1360_v26, %v1412_v17  ;;  %2629 = vmatpush1.bf16.msra.mxu1 %v2931_v51  ;;  %v1411_v58 = vsel %vm1382_vm9, %v3857_v32, %v1410_v56 }
 0x1a4   : > { %v2879_v44 = vcombine.low %v1397_v8, %v1413_v62  ;;  %v2880_v35 = vcombine.high %v1397_v8, %v1413_v62  ;;  %2588 = vmatpush1.bf16.msra.mxu0 %v2928_v27  ;;  %v2877_v60 = vcombine.low %v1395_v19, %v1411_v58  ;;  %v2878_v29 = vcombine.high %v1395_v19, %v1411_v58 }
 0x1a6   : > { %2603 = vmatprep.subr.bf16.mxu0 %v2878_v29  ;;  %2644 = vmatprep.subr.bf16.mxu1 %v2880_v35 }
 0x1a7   : > { %2645 = vmatpush2.bf16.msra.mxu1 %v2879_v44 }
 0x1a8   : > { %2604 = vmatpush2.bf16.msra.mxu0 %v2877_v60 }
 0x1aa   : > { %2647 = vmatmul.mubr.bf16.vlgmr.msra.gmra.mxu1 %v3396_v28  ;;  %v2361_v52 = vpop.f32.mrf.mxu0  ;;  %v2402_v54 = vpop.f32.mrf.mxu1 }
 0x1ab   : > { %2606 = vmatmul.mubr.bf16.vlgmr.msra.gmra.mxu0 %v3396_v28 }
 0x1ac   : > { %v2363_v47 = vpop.f32.mrf.mxu0  ;;  %v2404_v63 = vpop.f32.mrf.mxu1 }
 0x1ad   : > { %v1595_v32 = vpop.permute.xlu0 %1594 }
 0x1ae   : > { %v2365_v53 = vpop.f32.mrf.mxu0  ;;  %v2406_v37 = vpop.f32.mrf.mxu1  ;;  %v2362_v36 = vadd.f32 %v2361_v52, %v1595_v32  ;;  %v2364_v46 = vadd.f32 %v2363_v47, %v1595_v32  ;;  %v2403_v13 = vadd.f32 %v2402_v54, %v1595_v32  ;;  %v2405_v28 = vadd.f32 %v2404_v63, %v1595_v32 }
 0x1b0   : > { %2655 = vst [vmem:[%s4008_s8] sm:$0xff] %v2362_v36  ;;  %2656 = vst [vmem:[%s4008_s8 + $0x8] sm:$0xff] %v2364_v46  ;;  %v2366_v15 = vpop.f32.mrf.mxu0  ;;  %v2407_v34 = vpop.f32.mrf.mxu1 }
 0x1b1   : > { %2657 = vst [vmem:[%s4008_s8 + $0x10] sm:$0xff] %v2403_v13  ;;  %2658 = vst [vmem:[%s4008_s8 + $0x18] sm:$0xff] %v2405_v28 }
 0x1ea   : > { %v2484_v24 = vpop.f32.mrf.mxu1 }
 0x1eb   : > { %v2443_v55 = vpop.f32.mrf.mxu0  ;;  %v2485_v2 = vadd.f32 %v2484_v24, %v1595_v32 }
 0x1ec   : > { %v2444_v30 = vadd.f32 %v2443_v55, %v1595_v32  ;;  %v2486_v20 = vpop.f32.mrf.mxu1 }
 0x1ed   : > { %2661 = vst [vmem:[%s4008_s8 + $0x30] sm:$0xff] %v2485_v2  ;;  %v2445_v45 = vpop.f32.mrf.mxu0  ;;  %v2487_v33 = vadd.f32 %v2486_v20, %v1595_v32 }
 0x1ee   : > { %2659 = vst [vmem:[%s4008_s8 + $0x20] sm:$0xff] %v2444_v30  ;;  %v2446_v43 = vadd.f32 %v2445_v45, %v1595_v32  ;;  %v2488_v49 = vpop.f32.mrf.mxu1 }
 0x1ef   : > { %2662 = vst [vmem:[%s4008_s8 + $0x38] sm:$0xff] %v2487_v33  ;;  %v2447_v22 = vpop.f32.mrf.mxu0 }
 0x1f0   : > { %2660 = vst [vmem:[%s4008_s8 + $0x28] sm:$0xff] %v2446_v43  ;;  %v2489_v1 = vpop.f32.mrf.mxu1 }
 0x1f1   : > { %v2448_v9 = vpop.f32.mrf.mxu0 }
 0x22a   : > { %v2566_v18 = vpop.f32.mrf.mxu1 }
 0x22b   : > { %v2525_v7 = vpop.f32.mrf.mxu0  ;;  %v2567_v48 = vadd.f32 %v2566_v18, %v1595_v32 }
 0x22c   : > { %v2526_v25 = vadd.f32 %v2525_v7, %v1595_v32  ;;  %v2568_v4 = vpop.f32.mrf.mxu1 }
 0x22d   : > { %2665 = vst [vmem:[%s4008_s8 + $0x50] sm:$0xff] %v2567_v48  ;;  %v2527_v50 = vpop.f32.mrf.mxu0  ;;  %v2569_v10 = vadd.f32 %v2568_v4, %v1595_v32 }
 0x22e   : > { %2663 = vst [vmem:[%s4008_s8 + $0x40] sm:$0xff] %v2526_v25  ;;  %v2528_v16 = vadd.f32 %v2527_v50, %v1595_v32  ;;  %v2570_v6 = vpop.f32.mrf.mxu1 }
 0x22f   : > { %2666 = vst [vmem:[%s4008_s8 + $0x58] sm:$0xff] %v2569_v10  ;;  %v2529_v3 = vpop.f32.mrf.mxu0 }
 0x230   : > { %2664 = vst [vmem:[%s4008_s8 + $0x48] sm:$0xff] %v2528_v16  ;;  %v2571_v12 = vpop.f32.mrf.mxu1 }
 0x231   : > { %v2530_v14 = vpop.f32.mrf.mxu0 }
 0x26a   : > { %v2648_v41 = vpop.f32.mrf.mxu1 }
 0x26b   : > { %v2607_v59 = vpop.f32.mrf.mxu0  ;;  %v2649_v31 = vadd.f32 %v2648_v41, %v1595_v32 }
 0x26c   : > { %v2608_v23 = vadd.f32 %v2607_v59, %v1595_v32  ;;  %v2650_v39 = vpop.f32.mrf.mxu1 }
 0x26d   : > { %2669 = vst [vmem:[%s4008_s8 + $0x70] sm:$0xff] %v2649_v31  ;;  %v2609_v21 = vpop.f32.mrf.mxu0  ;;  %v2651_v5 = vadd.f32 %v2650_v39, %v1595_v32 }
 0x26e   : > { %2667 = vst [vmem:[%s4008_s8 + $0x60] sm:$0xff] %v2608_v23  ;;  %v2610_v57 = vadd.f32 %v2609_v21, %v1595_v32  ;;  %v2652_v11 = vpop.f32.mrf.mxu1 }
 0x26f   : > { %2670 = vst [vmem:[%s4008_s8 + $0x78] sm:$0xff] %v2651_v5  ;;  %v2611_v42 = vpop.f32.mrf.mxu0 }
 0x270   : > { %2668 = vst [vmem:[%s4008_s8 + $0x68] sm:$0xff] %v2610_v57  ;;  %v2653_v26 = vpop.f32.mrf.mxu1 }
 0x271   : > { %v2612_v51 = vpop.f32.mrf.mxu0 }
 0x272 PF: > { %s13_s12 = sadd.s32 1, %s2940_s12  }
 0x273   : > { %p10_p5 = scmp.ge.s32.totalorder %s13_s12, 5  }
 0x275   :  { %12 = sbr.rel (!%p10_p5) target bundleno = 1 (0x1), region = 62 }

</bundles_post_ra>
